<compile_context>
chip_gen: v7x
topology: tpu7x:2x2x1
jax: 0.10.0
libtpu: 0.0.40
codegen_flags: <defaults>
</compile_context>

<pallas_src>
import functools

import numpy as np
import jax
import jax.numpy as jnp
from jax.experimental import pallas as pl
from jax.experimental.pallas import tpu as pltpu

BN_EPS = 1e-5


def _round_up(x, m):
    return ((x + m - 1) // m) * m


def _fold_bn(bn):
    scale = bn['gamma'] / jnp.sqrt(bn['var'] + BN_EPS)
    bias = bn['beta'] - bn['mean'] * scale
    return scale.astype(jnp.float32), bias.astype(jnp.float32)


def _bottleneck_kernel(x_ref, w1_ref, s1_ref, b1_ref, w2_ref, s2_ref, b2_ref,
                       w3_ref, s3_ref, b3_ref, o_ref, hbuf_ref, lhs2_ref, *,
                       d_per_item):
    """One batch-block per grid step; matmul rows are (batch, depth) pairs.

    x_ref   : (M, H*W*Cin) f32, M = B_BLK * D
    w1_ref  : (H*W*Cin, rowp)  bf16  conv1 scattered into padded-(h,w) layout
    s1/b1   : (1, rowp)        f32   folded BN1 (zero on the halo / lane pad)
    w2_ref  : (3*rowp, c2p)    bf16  conv2: (kh,kw) banded, kd stacked on K
    s2/b2   : (1, c2p)         f32   folded BN2 tiled over H*W (+ lane pad)
    w3_ref  : (c2p, H*W*Cout)  bf16  conv3 block-diagonal over H*W
    s3/b3   : (1, H*W*Cout)    f32   folded BN3 tiled over H*W
    o_ref   : (M, H*W*Cout)
    hbuf_ref: VMEM (M+16, rowp) f32  h1 with one zero sublane-tile halo per side
    lhs2_ref: VMEM (M, 3*rowp)  bf16 fused conv2 LHS (pre-shifted kd tap copies)
    """
    m = x_ref.shape[0]
    rowp = hbuf_ref.shape[1]
    cdt = lhs2_ref.dtype                     # MXU operand dtype (bf16)

    x = x_ref[...]                                            # (M, H*W*Cin) f32

    # conv1 (1x1x1) + bn1 + relu, emitted directly in the padded-(h,w) lane
    # layout (halo and lane-pad columns have zero weight/scale/bias -> stay 0).
    h1 = jnp.dot(x.astype(cdt), w1_ref[...], preferred_element_type=jnp.float32)
    h1 = jnp.maximum(h1 * s1_ref[...] + b1_ref[...], 0.0)     # (M, rowp) f32

    # Depth-halo scratch (f32 so the 32-bit sublane tiling keeps the +-1 row
    # reads cheap): rows [8:M+8] hold h1, one zero sublane-tile on each side.
    zero_tile = jnp.zeros((8, rowp), jnp.float32)
    hbuf_ref[0:8, :] = zero_tile
    hbuf_ref[m + 8:m + 16, :] = zero_tile
    hbuf_ref[8:m + 8, :] = h1

    # conv2 (3x3x3, pad=1): the 9 (kh,kw) taps live in the banded weight, the 3
    # kd taps become 128-aligned lane-blocks of one fused LHS -> a single MXU
    # matmul with K = 3*rowp (accumulation stays on the MXU, no per-tap adds).
    # Rows whose depth-neighbour falls outside their own sample are masked so
    # batch elements never bleed into each other inside the stacked M axis.
    d_idx = jax.lax.broadcasted_iota(jnp.int32, (m, 1), 0) % d_per_item
    has_up = d_idx != 0                        # depth-1 neighbour exists
    has_dn = d_idx != d_per_item - 1           # depth+1 neighbour exists
    lhs2_ref[:, 0:rowp] = jnp.where(has_up, hbuf_ref[7:m + 7, :], 0.0).astype(cdt)
    lhs2_ref[:, rowp:2 * rowp] = h1.astype(cdt)
    lhs2_ref[:, 2 * rowp:3 * rowp] = jnp.where(has_dn, hbuf_ref[9:m + 9, :], 0.0).astype(cdt)

    h2 = jnp.dot(lhs2_ref[...], w2_ref[...], preferred_element_type=jnp.float32)
    h2 = jnp.maximum(h2 * s2_ref[...] + b2_ref[...], 0.0)     # (M, c2p) f32

    # conv3 (1x1x1) + bn3 + identity residual + relu (elementwise kept in f32).
    h3 = jnp.dot(h2.astype(cdt), w3_ref[...], preferred_element_type=jnp.float32)
    h3 = h3 * s3_ref[...] + b3_ref[...]
    o_ref[...] = jnp.maximum(h3 + x, 0.0).astype(o_ref.dtype)


def prepare_bottleneck(params, H, W, Cin, compute_dtype=jnp.bfloat16):
    """Build the lane-dense block-structured weights / folded-BN operands ONCE
    per parameter set (hoisted out of the per-forward path).

    Weight matrices are emitted in `compute_dtype` (bf16 by default): halves the
    dominant weight HBM traffic and feeds the bf16 MXU; the structural zeros of
    the scatter/band layouts stay exact in bf16.  BN scale/bias remain f32.
    """
    P = params['w1'].shape[0]
    Cout = params['w3'].shape[0]
    Hp, Wp = H + 2, W + 2
    row_raw = Hp * Wp * P
    rowp = _round_up(row_raw, 128)      # lane-pad: unmasked stores, full MXU passes
    c2_raw = H * W * P
    c2p = _round_up(c2_raw, 128)
    c3 = H * W * Cout

    w1 = params['w1'].reshape(P, Cin).T                     # (Cin, P)
    w2 = jnp.transpose(params['w2'], (2, 3, 4, 1, 0))       # (kd, kh, kw, Pin, Pout)
    w3 = params['w3'].reshape(Cout, P).T                    # (P, Cout)

    s1, b1 = _fold_bn(params['bn1'])
    s2, b2 = _fold_bn(params['bn2'])
    s3, b3 = _fold_bn(params['bn3'])

    # conv1: scatter each (h, w) block of w1 into padded-row position (h+1, w+1).
    scat = np.zeros((H * W, Hp * Wp), np.float32)
    for h in range(H):
        for w in range(W):
            scat[h * W + w, (h + 1) * Wp + (w + 1)] = 1.0
    w1p = jnp.einsum('ab,ci->acbi', jnp.asarray(scat), w1).reshape(H * W * Cin, row_raw)
    w1p = jnp.pad(w1p, ((0, 0), (0, rowp - row_raw)))

    hw_mask = np.zeros((Hp, Wp, 1), np.float32)
    hw_mask[1:H + 1, 1:W + 1, :] = 1.0
    hw_mask = jnp.asarray(hw_mask)
    s1p = jnp.pad((hw_mask * s1[None, None, :]).reshape(1, row_raw),
                  ((0, 0), (0, rowp - row_raw)))
    b1p = jnp.pad((hw_mask * b1[None, None, :]).reshape(1, row_raw),
                  ((0, 0), (0, rowp - row_raw)))

    # conv2: band the (kh, kw) taps per kd, pad rows->rowp / cols->c2p, then
    # stack the 3 kd taps along K -> one fused (3*rowp, c2p) weight.
    band = np.zeros((Hp * Wp, H * W, 3, 3), np.float32)
    for h in range(H):
        for w in range(W):
            for kh in range(3):
                for kw in range(3):
                    band[(h + kh) * Wp + (w + kw), h * W + w, kh, kw] = 1.0
    w2b = jnp.einsum('abuv,kuvij->kaibj', jnp.asarray(band), w2).reshape(3, row_raw, c2_raw)
    w2b = jnp.pad(w2b, ((0, 0), (0, rowp - row_raw), (0, c2p - c2_raw)))
    w2f = w2b.reshape(3 * rowp, c2p)

    s2t = jnp.pad(jnp.tile(s2.reshape(1, P), (1, H * W)), ((0, 0), (0, c2p - c2_raw)))
    b2t = jnp.pad(jnp.tile(b2.reshape(1, P), (1, H * W)), ((0, 0), (0, c2p - c2_raw)))

    # conv3: block-diagonal over H*W positions; zero rows for the c2 lane pad.
    w3b = jnp.einsum('ab,ij->aibj', jnp.eye(H * W, dtype=jnp.float32), w3).reshape(c2_raw, c3)
    w3b = jnp.pad(w3b, ((0, c2p - c2_raw), (0, 0)))

    s3t = jnp.tile(s3.reshape(1, Cout), (1, H * W))
    b3t = jnp.tile(b3.reshape(1, Cout), (1, H * W))

    cdt = compute_dtype
    return (w1p.astype(cdt), s1p, b1p, w2f.astype(cdt), s2t, b2t,
            w3b.astype(cdt), s3t, b3t)


def _choose_batch_block(n, d, target_rows=256):
    """Batch elements stacked per grid step: target ~128-256 matmul rows (fills
    the 128/256-row MXU), keep rows sublane-friendly, and prefer >=2 grid steps
    so both v7x TensorCores get work under dimension_semantics=("parallel",)."""
    divisors = [b for b in range(1, n + 1) if n % b == 0]
    ok = [b for b in divisors if (b * d) % 8 == 0] or [n]
    within = [b for b in ok if b * d <= target_rows]
    b = max(within) if within else min(ok)
    if n // b < 2:
        smaller = [c for c in ok if c < b and n // c >= 2]
        if smaller:
            b = max(smaller)
    return b


def _vmem_budget_bytes():
    """Generation-aware VMEM cap: ~80% of physical VMEM (v7x 64MiB -> ~51MiB,
    v5e/v6e 128MiB -> ~102MiB), leaving headroom for Mosaic internal scratch."""
    cap = 128 << 20
    try:
        cap = int(pltpu.get_tpu_info().vmem_capacity_bytes)
    except Exception:
        pass
    return int(cap * 0.8)


def bottleneck_forward(x_ncdhw, ops):
    """ops = prepare_bottleneck(params, H, W, Cin), built once per param set."""
    N, Cin, D, H, W = x_ncdhw.shape
    w1p, s1p, b1p, w2f, s2t, b2t, w3b, s3t, b3t = ops
    rowp = w1p.shape[1]
    c2p = w2f.shape[1]
    c3 = w3b.shape[1]
    assert w1p.shape[0] == H * W * Cin, "operands were built for a different H/W/Cin"
    assert c3 == H * W * Cin, "identity residual requires inplanes == planes * 4"

    b_blk = _choose_batch_block(N, D)
    m = b_blk * D
    grid = (N // b_blk,)

    # TODO(synk): keep activations channels-last between layers to drop these
    # two full-tensor transposes.
    x2d = jnp.transpose(x_ncdhw, (0, 2, 3, 4, 1)).reshape(N * D, H * W * Cin)

    def launch(single_buffer_weights):
        wkw = {}
        if single_buffer_weights:
            # Grid-invariant weights: fetched once, no need for double buffers.
            wkw = dict(pipeline_mode=pl.Buffered(1))
        weight_specs = [pl.BlockSpec(a.shape, lambda g: (0, 0), **wkw) for a in ops]
        in_specs = [pl.BlockSpec((m, H * W * Cin), lambda g: (g, 0))] + weight_specs
        out_specs = pl.BlockSpec((m, c3), lambda g: (g, 0))

        # VMEM budget: weights (1x or 2x buffered) + double-buffered activation
        # blocks + scratch + headroom, capped per TPU generation.
        wmult = 1 if single_buffer_weights else 2
        weight_bytes = wmult * sum(int(np.prod(a.shape)) * a.dtype.itemsize for a in ops)
        act_bytes = 2 * (m * H * W * Cin + m * c3) * x2d.dtype.itemsize
        scratch_bytes = (m + 16) * rowp * 4 + m * 3 * rowp * w1p.dtype.itemsize
        vmem_limit = weight_bytes + act_bytes + scratch_bytes + (4 << 20)
        vmem_limit = min(max(vmem_limit, 16 << 20), _vmem_budget_bytes())

        kernel = functools.partial(_bottleneck_kernel, d_per_item=D)
        return pl.pallas_call(
            kernel,
            out_shape=jax.ShapeDtypeStruct((N * D, c3), x_ncdhw.dtype),
            grid_spec=pltpu.PrefetchScalarGridSpec(
                num_scalar_prefetch=0,
                grid=grid,
                in_specs=in_specs,
                out_specs=out_specs,
                scratch_shapes=[
                    pltpu.VMEM((m + 16, rowp), jnp.float32),   # h1 with depth halo
                    pltpu.VMEM((m, 3 * rowp), w1p.dtype),      # fused conv2 LHS
                ]),
            compiler_params=pltpu.CompilerParams(
                dimension_semantics=("parallel",),
                vmem_limit_bytes=int(vmem_limit)),
        )(x2d, *ops)

    try:
        y2d = launch(single_buffer_weights=True)
        y2d.block_until_ready()
    except Exception:
        # pl.Buffered(1) unavailable on this jax build: fall back to the default
        # double-buffered weight pipeline (costs only VMEM headroom).
        y2d = launch(single_buffer_weights=False)

    y = y2d.reshape(N, D, H, W, Cin)
    return jnp.transpose(y, (0, 4, 1, 2, 3))   # NDHWC -> NCDHW


def make_params(key, inplanes, planes, expansion=4):
    ks = jax.random.split(key, 6)

    def bn(k, c):
        kg, kb, km, kv = jax.random.split(k, 4)
        return dict(
            gamma=1.0 + 0.1 * jax.random.normal(kg, (c,), jnp.float32),
            beta=0.1 * jax.random.normal(kb, (c,), jnp.float32),
            mean=0.1 * jax.random.normal(km, (c,), jnp.float32),
            var=1.0 + 0.1 * jnp.abs(jax.random.normal(kv, (c,), jnp.float32)),
        )

    return dict(
        w1=0.1 * jax.random.normal(ks[0], (planes, inplanes, 1, 1, 1), jnp.float32),
        w2=0.1 * jax.random.normal(ks[1], (planes, planes, 3, 3, 3), jnp.float32),
        w3=0.1 * jax.random.normal(ks[2], (planes * expansion, planes, 1, 1, 1), jnp.float32),
        bn1=bn(ks[3], planes),
        bn2=bn(ks[4], planes),
        bn3=bn(ks[5], planes * expansion),
    )


def ref_forward(x, params):
    """Pure-JAX f32 reference (NCDHW), used only to verify the Pallas kernel."""
    def conv(z, w, pad):
        return jax.lax.conv_general_dilated(
            z, w, window_strides=(1, 1, 1), padding=[(pad, pad)] * 3,
            dimension_numbers=('NCDHW', 'OIDHW', 'NCDHW'))

    def bn(z, b):
        sh = (1, -1, 1, 1, 1)
        scale = b['gamma'] / jnp.sqrt(b['var'] + BN_EPS)
        bias = b['beta'] - b['mean'] * scale
        return z * scale.reshape(sh) + bias.reshape(sh)

    out = jax.nn.relu(bn(conv(x, params['w1'], 0), params['bn1']))
    out = jax.nn.relu(bn(conv(out, params['w2'], 1), params['bn2']))
    out = bn(conv(out, params['w3'], 0), params['bn3'])
    return jax.nn.relu(out + x)


if __name__ == "__main__":
    key = jax.random.PRNGKey(0)
    kx, kp = jax.random.split(key)

    planes = 4
    inplanes = planes * 4             # identity residual (downsample=None, stride=1)
    N, D, H, W = 8, 8, 8, 8           # batch 8 so the batch-blocked grid is exercised

    x = jax.random.normal(kx, (N, inplanes, D, H, W), jnp.float32)
    params = make_params(kp, inplanes, planes)

    ops = prepare_bottleneck(params, H, W, inplanes)   # hoisted: once per param set
    y = bottleneck_forward(x, ops)
    jax.block_until_ready(y)

    y_ref = ref_forward(x, params)
    max_err = float(jnp.max(jnp.abs(y - y_ref)))
    # bf16 MXU operands (f32 accumulation): tolerance relaxed vs the f32-only kernel.
    assert jnp.allclose(y, y_ref, atol=5e-3, rtol=5e-3), f"mismatch, max_err={max_err}"

    print("KERNEL_OK")
</pallas_src>

<mosaic_0001>
module attributes {stable_mosaic.version = 11 : i64} {
  func.func @_bottleneck_kernel(%arg0: i32, %arg1: memref<32x1024xf32, #tpu.memory_space<vmem>>, %arg2: memref<1024x512xbf16, #tpu.memory_space<vmem>>, %arg3: memref<1x512xf32, #tpu.memory_space<vmem>>, %arg4: memref<1x512xf32, #tpu.memory_space<vmem>>, %arg5: memref<1536x256xbf16, #tpu.memory_space<vmem>>, %arg6: memref<1x256xf32, #tpu.memory_space<vmem>>, %arg7: memref<1x256xf32, #tpu.memory_space<vmem>>, %arg8: memref<256x1024xbf16, #tpu.memory_space<vmem>>, %arg9: memref<1x1024xf32, #tpu.memory_space<vmem>>, %arg10: memref<1x1024xf32, #tpu.memory_space<vmem>>, %arg11: memref<32x1024xf32, #tpu.memory_space<vmem>>, %arg12: memref<48x512xf32, #tpu.memory_space<vmem>>, %arg13: memref<32x1536xbf16, #tpu.memory_space<vmem>>) attributes {dimension_semantics = [#tpu.dimension_semantics<parallel>], iteration_bounds = array<i64: 2>, scalar_prefetch = 0 : i64, scratch_operands = 2 : i64, tpu.core_type = #tpu.core_type<tc>, window_params = [{transform_indices = @transform_0, window_bounds = array<i64: 32, 1024>}, {pipeline_mode = #tpu.pipeline_mode<synchronous>, transform_indices = @transform_1, window_bounds = array<i64: 1024, 512>}, {pipeline_mode = #tpu.pipeline_mode<synchronous>, transform_indices = @transform_2, window_bounds = array<i64: 1, 512>}, {pipeline_mode = #tpu.pipeline_mode<synchronous>, transform_indices = @transform_3, window_bounds = array<i64: 1, 512>}, {pipeline_mode = #tpu.pipeline_mode<synchronous>, transform_indices = @transform_4, window_bounds = array<i64: 1536, 256>}, {pipeline_mode = #tpu.pipeline_mode<synchronous>, transform_indices = @transform_5, window_bounds = array<i64: 1, 256>}, {pipeline_mode = #tpu.pipeline_mode<synchronous>, transform_indices = @transform_6, window_bounds = array<i64: 1, 256>}, {pipeline_mode = #tpu.pipeline_mode<synchronous>, transform_indices = @transform_7, window_bounds = array<i64: 256, 1024>}, {pipeline_mode = #tpu.pipeline_mode<synchronous>, transform_indices = @transform_8, window_bounds = array<i64: 1, 1024>}, {pipeline_mode = #tpu.pipeline_mode<synchronous>, transform_indices = @transform_9, window_bounds = array<i64: 1, 1024>}, {transform_indices = @transform_10, window_bounds = array<i64: 32, 1024>}]} {
    %c0 = arith.constant 0 : index
    %c0_0 = arith.constant 0 : index
    %0 = vector.load %arg1[%c0, %c0_0] : memref<32x1024xf32, #tpu.memory_space<vmem>>, vector<32x1024xf32>
    %1 = arith.truncf %0 : vector<32x1024xf32> to vector<32x1024xbf16>
    %c0_1 = arith.constant 0 : index
    %c0_2 = arith.constant 0 : index
    %2 = vector.load %arg2[%c0_1, %c0_2] : memref<1024x512xbf16, #tpu.memory_space<vmem>>, vector<1024x512xbf16>
    %cst = arith.constant dense<0.000000e+00> : vector<32x512xf32>
    %3 = tpu.matmul %1, %2, %cst {dimension_numbers = #tpu.dot_dimension_numbers<[1], [0], [0], [1], [0, 0, 1, 1], [], []>} : vector<32x1024xbf16>, vector<1024x512xbf16>, vector<32x512xf32> -> vector<32x512xf32>
    %c0_3 = arith.constant 0 : index
    %c0_4 = arith.constant 0 : index
    %4 = vector.load %arg3[%c0_3, %c0_4] : memref<1x512xf32, #tpu.memory_space<vmem>>, vector<1x512xf32>
    %5 = vector.broadcast %4 : vector<1x512xf32> to vector<32x512xf32>
    %6 = arith.mulf %3, %5 : vector<32x512xf32>
    %c0_5 = arith.constant 0 : index
    %c0_6 = arith.constant 0 : index
    %7 = vector.load %arg4[%c0_5, %c0_6] : memref<1x512xf32, #tpu.memory_space<vmem>>, vector<1x512xf32>
    %8 = vector.broadcast %7 : vector<1x512xf32> to vector<32x512xf32>
    %9 = arith.addf %6, %8 : vector<32x512xf32>
    %cst_7 = arith.constant 0.000000e+00 : f32
    %10 = vector.broadcast %cst_7 : f32 to vector<32x512xf32>
    %11 = arith.maximumf %9, %10 : vector<32x512xf32>
    %cst_8 = arith.constant 0.000000e+00 : f32
    %12 = vector.broadcast %cst_8 : f32 to vector<8x512xf32>
    %c0_9 = arith.constant 0 : index
    %c0_10 = arith.constant 0 : index
    %13 = vector.load %arg12[%c0_9, %c0_10] : memref<48x512xf32, #tpu.memory_space<vmem>>, vector<8x512xf32>
    tpu.vector_store %arg12[%c0_9, %c0_10], %12 {strides = array<i32>} : memref<48x512xf32, #tpu.memory_space<vmem>>, vector<8x512xf32>,
    %c40 = arith.constant 40 : index
    %c0_11 = arith.constant 0 : index
    %14 = vector.load %arg12[%c40, %c0_11] : memref<48x512xf32, #tpu.memory_space<vmem>>, vector<8x512xf32>
    tpu.vector_store %arg12[%c40, %c0_11], %12 {strides = array<i32>} : memref<48x512xf32, #tpu.memory_space<vmem>>, vector<8x512xf32>,
    %c8 = arith.constant 8 : index
    %c0_12 = arith.constant 0 : index
    %15 = vector.load %arg12[%c8, %c0_12] : memref<48x512xf32, #tpu.memory_space<vmem>>, vector<32x512xf32>
    tpu.vector_store %arg12[%c8, %c0_12], %11 {strides = array<i32>} : memref<48x512xf32, #tpu.memory_space<vmem>>, vector<32x512xf32>,
    %16 = tpu.iota {dimensions = array<i32: 0>} : vector<32x1xi32>
    %c8_i32 = arith.constant 8 : i32
    %c0_i32 = arith.constant 0 : i32
    %17 = arith.cmpi eq, %c8_i32, %c0_i32 : i32
    %c1_i32 = arith.constant 1 : i32
    %18 = arith.select %17, %c1_i32, %c8_i32 : i32
    %19 = vector.broadcast %18 : i32 to vector<32x1xi32>
    %20 = arith.remsi %16, %19 : vector<32x1xi32>
    %c0_i32_13 = arith.constant 0 : i32
    %21 = vector.broadcast %c0_i32_13 : i32 to vector<32x1xi32>
    %22 = arith.cmpi ne, %20, %21 : vector<32x1xi32>
    %c0_i32_14 = arith.constant 0 : i32
    %23 = vector.broadcast %c0_i32_14 : i32 to vector<32x1xi32>
    %24 = arith.cmpi slt, %20, %23 : vector<32x1xi32>
    %c0_i32_15 = arith.constant 0 : i32
    %25 = arith.cmpi slt, %18, %c0_i32_15 : i32
    %26 = vector.broadcast %25 : i1 to vector<32x1xi1>
    %27 = vector.broadcast %26 : vector<32x1xi1> to vector<32x1xi1>
    %28 = arith.xori %24, %27 : vector<32x1xi1>
    %29 = arith.andi %28, %22 : vector<32x1xi1>
    %30 = vector.broadcast %18 : i32 to vector<32x1xi32>
    %31 = arith.addi %20, %30 : vector<32x1xi32>
    %32 = arith.select %29, %31, %20 : vector<32x1xi1>, vector<32x1xi32>
    %c0_i32_16 = arith.constant 0 : i32
    %33 = vector.broadcast %c0_i32_16 : i32 to vector<32x1xi32>
    %34 = arith.cmpi ne, %32, %33 : vector<32x1xi32>
    %c7_i32 = arith.constant 7 : i32
    %35 = vector.broadcast %c7_i32 : i32 to vector<32x1xi32>
    %36 = arith.cmpi ne, %32, %35 : vector<32x1xi32>
    %c7 = arith.constant 7 : index
    %c0_17 = arith.constant 0 : index
    %37 = vector.load %arg12[%c7, %c0_17] : memref<48x512xf32, #tpu.memory_space<vmem>>, vector<32x512xf32>
    %cst_18 = arith.constant 0.000000e+00 : f32
    %38 = vector.shape_cast %34 : vector<32x1xi1> to vector<32x1xi1>
    %39 = vector.broadcast %38 : vector<32x1xi1> to vector<32x512xi1>
    %40 = vector.broadcast %cst_18 : f32 to vector<32x512xf32>
    %41 = arith.select %39, %37, %40 : vector<32x512xi1>, vector<32x512xf32>
    %42 = arith.truncf %41 : vector<32x512xf32> to vector<32x512xbf16>
    %c0_19 = arith.constant 0 : index
    %c0_20 = arith.constant 0 : index
    %43 = vector.load %arg13[%c0_19, %c0_20] : memref<32x1536xbf16, #tpu.memory_space<vmem>>, vector<32x512xbf16>
    tpu.vector_store %arg13[%c0_19, %c0_20], %42 {strides = array<i32>} : memref<32x1536xbf16, #tpu.memory_space<vmem>>, vector<32x512xbf16>,
    %44 = arith.truncf %11 : vector<32x512xf32> to vector<32x512xbf16>
    %c0_21 = arith.constant 0 : index
    %c512 = arith.constant 512 : index
    %45 = vector.load %arg13[%c0_21, %c512] : memref<32x1536xbf16, #tpu.memory_space<vmem>>, vector<32x512xbf16>
    tpu.vector_store %arg13[%c0_21, %c512], %44 {strides = array<i32>} : memref<32x1536xbf16, #tpu.memory_space<vmem>>, vector<32x512xbf16>,
    %c9 = arith.constant 9 : index
    %c0_22 = arith.constant 0 : index
    %46 = vector.load %arg12[%c9, %c0_22] : memref<48x512xf32, #tpu.memory_space<vmem>>, vector<32x512xf32>
    %cst_23 = arith.constant 0.000000e+00 : f32
    %47 = vector.shape_cast %36 : vector<32x1xi1> to vector<32x1xi1>
    %48 = vector.broadcast %47 : vector<32x1xi1> to vector<32x512xi1>
    %49 = vector.broadcast %cst_23 : f32 to vector<32x512xf32>
    %50 = arith.select %48, %46, %49 : vector<32x512xi1>, vector<32x512xf32>
    %51 = arith.truncf %50 : vector<32x512xf32> to vector<32x512xbf16>
    %c0_24 = arith.constant 0 : index
    %c1024 = arith.constant 1024 : index
    %52 = vector.load %arg13[%c0_24, %c1024] : memref<32x1536xbf16, #tpu.memory_space<vmem>>, vector<32x512xbf16>
    tpu.vector_store %arg13[%c0_24, %c1024], %51 {strides = array<i32>} : memref<32x1536xbf16, #tpu.memory_space<vmem>>, vector<32x512xbf16>,
    %c0_25 = arith.constant 0 : index
    %c0_26 = arith.constant 0 : index
    %53 = vector.load %arg13[%c0_25, %c0_26] : memref<32x1536xbf16, #tpu.memory_space<vmem>>, vector<32x1536xbf16>
    %c0_27 = arith.constant 0 : index
    %c0_28 = arith.constant 0 : index
    %54 = vector.load %arg5[%c0_27, %c0_28] : memref<1536x256xbf16, #tpu.memory_space<vmem>>, vector<1536x256xbf16>
    %cst_29 = arith.constant dense<0.000000e+00> : vector<32x256xf32>
    %55 = tpu.matmul %53, %54, %cst_29 {dimension_numbers = #tpu.dot_dimension_numbers<[1], [0], [0], [1], [0, 0, 1, 1], [], []>} : vector<32x1536xbf16>, vector<1536x256xbf16>, vector<32x256xf32> -> vector<32x256xf32>
    %c0_30 = arith.constant 0 : index
    %c0_31 = arith.constant 0 : index
    %56 = vector.load %arg6[%c0_30, %c0_31] : memref<1x256xf32, #tpu.memory_space<vmem>>, vector<1x256xf32>
    %57 = vector.broadcast %56 : vector<1x256xf32> to vector<32x256xf32>
    %58 = arith.mulf %55, %57 : vector<32x256xf32>
    %c0_32 = arith.constant 0 : index
    %c0_33 = arith.constant 0 : index
    %59 = vector.load %arg7[%c0_32, %c0_33] : memref<1x256xf32, #tpu.memory_space<vmem>>, vector<1x256xf32>
    %60 = vector.broadcast %59 : vector<1x256xf32> to vector<32x256xf32>
    %61 = arith.addf %58, %60 : vector<32x256xf32>
    %cst_34 = arith.constant 0.000000e+00 : f32
    %62 = vector.broadcast %cst_34 : f32 to vector<32x256xf32>
    %63 = arith.maximumf %61, %62 : vector<32x256xf32>
    %64 = arith.truncf %63 : vector<32x256xf32> to vector<32x256xbf16>
    %c0_35 = arith.constant 0 : index
    %c0_36 = arith.constant 0 : index
    %65 = vector.load %arg8[%c0_35, %c0_36] : memref<256x1024xbf16, #tpu.memory_space<vmem>>, vector<256x1024xbf16>
    %cst_37 = arith.constant dense<0.000000e+00> : vector<32x1024xf32>
    %66 = tpu.matmul %64, %65, %cst_37 {dimension_numbers = #tpu.dot_dimension_numbers<[1], [0], [0], [1], [0, 0, 1, 1], [], []>} : vector<32x256xbf16>, vector<256x1024xbf16>, vector<32x1024xf32> -> vector<32x1024xf32>
    %c0_38 = arith.constant 0 : index
    %c0_39 = arith.constant 0 : index
    %67 = vector.load %arg9[%c0_38, %c0_39] : memref<1x1024xf32, #tpu.memory_space<vmem>>, vector<1x1024xf32>
    %68 = vector.broadcast %67 : vector<1x1024xf32> to vector<32x1024xf32>
    %69 = arith.mulf %66, %68 : vector<32x1024xf32>
    %c0_40 = arith.constant 0 : index
    %c0_41 = arith.constant 0 : index
    %70 = vector.load %arg10[%c0_40, %c0_41] : memref<1x1024xf32, #tpu.memory_space<vmem>>, vector<1x1024xf32>
    %71 = vector.broadcast %70 : vector<1x1024xf32> to vector<32x1024xf32>
    %72 = arith.addf %69, %71 : vector<32x1024xf32>
    %73 = arith.addf %72, %0 : vector<32x1024xf32>
    %cst_42 = arith.constant 0.000000e+00 : f32
    %74 = vector.broadcast %cst_42 : f32 to vector<32x1024xf32>
    %75 = arith.maximumf %73, %74 : vector<32x1024xf32>
    %c0_43 = arith.constant 0 : index
    %c0_44 = arith.constant 0 : index
    %76 = vector.load %arg11[%c0_43, %c0_44] : memref<32x1024xf32, #tpu.memory_space<vmem>>, vector<32x1024xf32>
    tpu.vector_store %arg11[%c0_43, %c0_44], %75 {strides = array<i32>} : memref<32x1024xf32, #tpu.memory_space<vmem>>, vector<32x1024xf32>,
    return
  }
  func.func @transform_0(%arg0: i32) -> (i32, i32) {
    %c0_i32 = arith.constant 0 : i32
    %c0_i32_0 = arith.constant 0 : i32
    return %arg0, %c0_i32 : i32, i32
  }
  func.func @transform_1(%arg0: i32) -> (i32, i32) {
    %c0_i32 = arith.constant 0 : i32
    %c0_i32_0 = arith.constant 0 : i32
    %c0_i32_1 = arith.constant 0 : i32
    return %c0_i32, %c0_i32_0 : i32, i32
  }
  func.func @transform_2(%arg0: i32) -> (i32, i32) {
    %c0_i32 = arith.constant 0 : i32
    %c0_i32_0 = arith.constant 0 : i32
    %c0_i32_1 = arith.constant 0 : i32
    return %c0_i32, %c0_i32_0 : i32, i32
  }
  func.func @transform_3(%arg0: i32) -> (i32, i32) {
    %c0_i32 = arith.constant 0 : i32
    %c0_i32_0 = arith.constant 0 : i32
    %c0_i32_1 = arith.constant 0 : i32
    return %c0_i32, %c0_i32_0 : i32, i32
  }
  func.func @transform_4(%arg0: i32) -> (i32, i32) {
    %c0_i32 = arith.constant 0 : i32
    %c0_i32_0 = arith.constant 0 : i32
    %c0_i32_1 = arith.constant 0 : i32
    return %c0_i32, %c0_i32_0 : i32, i32
  }
  func.func @transform_5(%arg0: i32) -> (i32, i32) {
    %c0_i32 = arith.constant 0 : i32
    %c0_i32_0 = arith.constant 0 : i32
    %c0_i32_1 = arith.constant 0 : i32
    return %c0_i32, %c0_i32_0 : i32, i32
  }
  func.func @transform_6(%arg0: i32) -> (i32, i32) {
    %c0_i32 = arith.constant 0 : i32
    %c0_i32_0 = arith.constant 0 : i32
    %c0_i32_1 = arith.constant 0 : i32
    return %c0_i32, %c0_i32_0 : i32, i32
  }
  func.func @transform_7(%arg0: i32) -> (i32, i32) {
    %c0_i32 = arith.constant 0 : i32
    %c0_i32_0 = arith.constant 0 : i32
    %c0_i32_1 = arith.constant 0 : i32
    return %c0_i32, %c0_i32_0 : i32, i32
  }
  func.func @transform_8(%arg0: i32) -> (i32, i32) {
    %c0_i32 = arith.constant 0 : i32
    %c0_i32_0 = arith.constant 0 : i32
    %c0_i32_1 = arith.constant 0 : i32
    return %c0_i32, %c0_i32_0 : i32, i32
  }
  func.func @transform_9(%arg0: i32) -> (i32, i32) {
    %c0_i32 = arith.constant 0 : i32
    %c0_i32_0 = arith.constant 0 : i32
    %c0_i32_1 = arith.constant 0 : i32
    return %c0_i32, %c0_i32_0 : i32, i32
  }
  func.func @transform_10(%arg0: i32) -> (i32, i32) {
    %c0_i32 = arith.constant 0 : i32
    %c0_i32_0 = arith.constant 0 : i32
    return %arg0, %c0_i32 : i32, i32
  }
}

module attributes {stable_mosaic.version = 11 : i64} {
  func.func @_bottleneck_kernel(%arg0: i32, %arg1: memref<32x1024xf32, #tpu.memory_space<vmem>>, %arg2: memref<1024x512xbf16, #tpu.memory_space<vmem>>, %arg3: memref<1x512xf32, #tpu.memory_space<vmem>>, %arg4: memref<1x512xf32, #tpu.memory_space<vmem>>, %arg5: memref<1536x256xbf16, #tpu.memory_space<vmem>>, %arg6: memref<1x256xf32, #tpu.memory_space<vmem>>, %arg7: memref<1x256xf32, #tpu.memory_space<vmem>>, %arg8: memref<256x1024xbf16, #tpu.memory_space<vmem>>, %arg9: memref<1x1024xf32, #tpu.memory_space<vmem>>, %arg10: memref<1x1024xf32, #tpu.memory_space<vmem>>, %arg11: memref<32x1024xf32, #tpu.memory_space<vmem>>, %arg12: memref<48x512xf32, #tpu.memory_space<vmem>>, %arg13: memref<32x1536xbf16, #tpu.memory_space<vmem>>) attributes {dimension_semantics = [#tpu.dimension_semantics<parallel>], iteration_bounds = array<i64: 2>, scalar_prefetch = 0 : i64, scratch_operands = 2 : i64, tpu.core_type = #tpu.core_type<tc>, window_params = [{transform_indices = @transform_0, window_bounds = array<i64: 32, 1024>}, {pipeline_mode = #tpu.pipeline_mode<synchronous>, transform_indices = @transform_1, window_bounds = array<i64: 1024, 512>}, {pipeline_mode = #tpu.pipeline_mode<synchronous>, transform_indices = @transform_2, window_bounds = array<i64: 1, 512>}, {pipeline_mode = #tpu.pipeline_mode<synchronous>, transform_indices = @transform_3, window_bounds = array<i64: 1, 512>}, {pipeline_mode = #tpu.pipeline_mode<synchronous>, transform_indices = @transform_4, window_bounds = array<i64: 1536, 256>}, {pipeline_mode = #tpu.pipeline_mode<synchronous>, transform_indices = @transform_5, window_bounds = array<i64: 1, 256>}, {pipeline_mode = #tpu.pipeline_mode<synchronous>, transform_indices = @transform_6, window_bounds = array<i64: 1, 256>}, {pipeline_mode = #tpu.pipeline_mode<synchronous>, transform_indices = @transform_7, window_bounds = array<i64: 256, 1024>}, {pipeline_mode = #tpu.pipeline_mode<synchronous>, transform_indices = @transform_8, window_bounds = array<i64: 1, 1024>}, {pipeline_mode = #tpu.pipeline_mode<synchronous>, transform_indices = @transform_9, window_bounds = array<i64: 1, 1024>}, {transform_indices = @transform_10, window_bounds = array<i64: 32, 1024>}]} {
    %c0 = arith.constant 0 : index
    %c0_0 = arith.constant 0 : index
    %0 = vector.load %arg1[%c0, %c0_0] : memref<32x1024xf32, #tpu.memory_space<vmem>>, vector<32x1024xf32>
    %1 = arith.truncf %0 : vector<32x1024xf32> to vector<32x1024xbf16>
    %c0_1 = arith.constant 0 : index
    %c0_2 = arith.constant 0 : index
    %2 = vector.load %arg2[%c0_1, %c0_2] : memref<1024x512xbf16, #tpu.memory_space<vmem>>, vector<1024x512xbf16>
    %cst = arith.constant dense<0.000000e+00> : vector<32x512xf32>
    %3 = tpu.matmul %1, %2, %cst {dimension_numbers = #tpu.dot_dimension_numbers<[1], [0], [0], [1], [0, 0, 1, 1], [], []>} : vector<32x1024xbf16>, vector<1024x512xbf16>, vector<32x512xf32> -> vector<32x512xf32>
    %c0_3 = arith.constant 0 : index
    %c0_4 = arith.constant 0 : index
    %4 = vector.load %arg3[%c0_3, %c0_4] : memref<1x512xf32, #tpu.memory_space<vmem>>, vector<1x512xf32>
    %5 = vector.broadcast %4 : vector<1x512xf32> to vector<32x512xf32>
    %6 = arith.mulf %3, %5 : vector<32x512xf32>
    %c0_5 = arith.constant 0 : index
    %c0_6 = arith.constant 0 : index
    %7 = vector.load %arg4[%c0_5, %c0_6] : memref<1x512xf32, #tpu.memory_space<vmem>>, vector<1x512xf32>
    %8 = vector.broadcast %7 : vector<1x512xf32> to vector<32x512xf32>
    %9 = arith.addf %6, %8 : vector<32x512xf32>
    %cst_7 = arith.constant 0.000000e+00 : f32
    %10 = vector.broadcast %cst_7 : f32 to vector<32x512xf32>
    %11 = arith.maximumf %9, %10 : vector<32x512xf32>
    %cst_8 = arith.constant 0.000000e+00 : f32
    %12 = vector.broadcast %cst_8 : f32 to vector<8x512xf32>
    %c0_9 = arith.constant 0 : index
    %c0_10 = arith.constant 0 : index
    %13 = vector.load %arg12[%c0_9, %c0_10] : memref<48x512xf32, #tpu.memory_space<vmem>>, vector<8x512xf32>
    tpu.vector_store %arg12[%c0_9, %c0_10], %12 {strides = array<i32>} : memref<48x512xf32, #tpu.memory_space<vmem>>, vector<8x512xf32>,
    %c40 = arith.constant 40 : index
    %c0_11 = arith.constant 0 : index
    %14 = vector.load %arg12[%c40, %c0_11] : memref<48x512xf32, #tpu.memory_space<vmem>>, vector<8x512xf32>
    tpu.vector_store %arg12[%c40, %c0_11], %12 {strides = array<i32>} : memref<48x512xf32, #tpu.memory_space<vmem>>, vector<8x512xf32>,
    %c8 = arith.constant 8 : index
    %c0_12 = arith.constant 0 : index
    %15 = vector.load %arg12[%c8, %c0_12] : memref<48x512xf32, #tpu.memory_space<vmem>>, vector<32x512xf32>
    tpu.vector_store %arg12[%c8, %c0_12], %11 {strides = array<i32>} : memref<48x512xf32, #tpu.memory_space<vmem>>, vector<32x512xf32>,
    %16 = tpu.iota {dimensions = array<i32: 0>} : vector<32x1xi32>
    %c8_i32 = arith.constant 8 : i32
    %c0_i32 = arith.constant 0 : i32
    %17 = arith.cmpi eq, %c8_i32, %c0_i32 : i32
    %c1_i32 = arith.constant 1 : i32
    %18 = arith.select %17, %c1_i32, %c8_i32 : i32
    %19 = vector.broadcast %18 : i32 to vector<32x1xi32>
    %20 = arith.remsi %16, %19 : vector<32x1xi32>
    %c0_i32_13 = arith.constant 0 : i32
    %21 = vector.broadcast %c0_i32_13 : i32 to vector<32x1xi32>
    %22 = arith.cmpi ne, %20, %21 : vector<32x1xi32>
    %c0_i32_14 = arith.constant 0 : i32
    %23 = vector.broadcast %c0_i32_14 : i32 to vector<32x1xi32>
    %24 = arith.cmpi slt, %20, %23 : vector<32x1xi32>
    %c0_i32_15 = arith.constant 0 : i32
    %25 = arith.cmpi slt, %18, %c0_i32_15 : i32
    %26 = vector.broadcast %25 : i1 to vector<32x1xi1>
    %27 = vector.broadcast %26 : vector<32x1xi1> to vector<32x1xi1>
    %28 = arith.xori %24, %27 : vector<32x1xi1>
    %29 = arith.andi %28, %22 : vector<32x1xi1>
    %30 = vector.broadcast %18 : i32 to vector<32x1xi32>
    %31 = arith.addi %20, %30 : vector<32x1xi32>
    %32 = arith.select %29, %31, %20 : vector<32x1xi1>, vector<32x1xi32>
    %c0_i32_16 = arith.constant 0 : i32
    %33 = vector.broadcast %c0_i32_16 : i32 to vector<32x1xi32>
    %34 = arith.cmpi ne, %32, %33 : vector<32x1xi32>
    %c7_i32 = arith.constant 7 : i32
    %35 = vector.broadcast %c7_i32 : i32 to vector<32x1xi32>
    %36 = arith.cmpi ne, %32, %35 : vector<32x1xi32>
    %c7 = arith.constant 7 : index
    %c0_17 = arith.constant 0 : index
    %37 = vector.load %arg12[%c7, %c0_17] : memref<48x512xf32, #tpu.memory_space<vmem>>, vector<32x512xf32>
    %cst_18 = arith.constant 0.000000e+00 : f32
    %38 = vector.shape_cast %34 : vector<32x1xi1> to vector<32x1xi1>
    %39 = vector.broadcast %38 : vector<32x1xi1> to vector<32x512xi1>
    %40 = vector.broadcast %cst_18 : f32 to vector<32x512xf32>
    %41 = arith.select %39, %37, %40 : vector<32x512xi1>, vector<32x512xf32>
    %42 = arith.truncf %41 : vector<32x512xf32> to vector<32x512xbf16>
    %c0_19 = arith.constant 0 : index
    %c0_20 = arith.constant 0 : index
    %43 = vector.load %arg13[%c0_19, %c0_20] : memref<32x1536xbf16, #tpu.memory_space<vmem>>, vector<32x512xbf16>
    tpu.vector_store %arg13[%c0_19, %c0_20], %42 {strides = array<i32>} : memref<32x1536xbf16, #tpu.memory_space<vmem>>, vector<32x512xbf16>,
    %44 = arith.truncf %11 : vector<32x512xf32> to vector<32x512xbf16>
    %c0_21 = arith.constant 0 : index
    %c512 = arith.constant 512 : index
    %45 = vector.load %arg13[%c0_21, %c512] : memref<32x1536xbf16, #tpu.memory_space<vmem>>, vector<32x512xbf16>
    tpu.vector_store %arg13[%c0_21, %c512], %44 {strides = array<i32>} : memref<32x1536xbf16, #tpu.memory_space<vmem>>, vector<32x512xbf16>,
    %c9 = arith.constant 9 : index
    %c0_22 = arith.constant 0 : index
    %46 = vector.load %arg12[%c9, %c0_22] : memref<48x512xf32, #tpu.memory_space<vmem>>, vector<32x512xf32>
    %cst_23 = arith.constant 0.000000e+00 : f32
    %47 = vector.shape_cast %36 : vector<32x1xi1> to vector<32x1xi1>
    %48 = vector.broadcast %47 : vector<32x1xi1> to vector<32x512xi1>
    %49 = vector.broadcast %cst_23 : f32 to vector<32x512xf32>
    %50 = arith.select %48, %46, %49 : vector<32x512xi1>, vector<32x512xf32>
    %51 = arith.truncf %50 : vector<32x512xf32> to vector<32x512xbf16>
    %c0_24 = arith.constant 0 : index
    %c1024 = arith.constant 1024 : index
    %52 = vector.load %arg13[%c0_24, %c1024] : memref<32x1536xbf16, #tpu.memory_space<vmem>>, vector<32x512xbf16>
    tpu.vector_store %arg13[%c0_24, %c1024], %51 {strides = array<i32>} : memref<32x1536xbf16, #tpu.memory_space<vmem>>, vector<32x512xbf16>,
    %c0_25 = arith.constant 0 : index
    %c0_26 = arith.constant 0 : index
    %53 = vector.load %arg13[%c0_25, %c0_26] : memref<32x1536xbf16, #tpu.memory_space<vmem>>, vector<32x1536xbf16>
    %c0_27 = arith.constant 0 : index
    %c0_28 = arith.constant 0 : index
    %54 = vector.load %arg5[%c0_27, %c0_28] : memref<1536x256xbf16, #tpu.memory_space<vmem>>, vector<1536x256xbf16>
    %cst_29 = arith.constant dense<0.000000e+00> : vector<32x256xf32>
    %55 = tpu.matmul %53, %54, %cst_29 {dimension_numbers = #tpu.dot_dimension_numbers<[1], [0], [0], [1], [0, 0, 1, 1], [], []>} : vector<32x1536xbf16>, vector<1536x256xbf16>, vector<32x256xf32> -> vector<32x256xf32>
    %c0_30 = arith.constant 0 : index
    %c0_31 = arith.constant 0 : index
    %56 = vector.load %arg6[%c0_30, %c0_31] : memref<1x256xf32, #tpu.memory_space<vmem>>, vector<1x256xf32>
    %57 = vector.broadcast %56 : vector<1x256xf32> to vector<32x256xf32>
    %58 = arith.mulf %55, %57 : vector<32x256xf32>
    %c0_32 = arith.constant 0 : index
    %c0_33 = arith.constant 0 : index
    %59 = vector.load %arg7[%c0_32, %c0_33] : memref<1x256xf32, #tpu.memory_space<vmem>>, vector<1x256xf32>
    %60 = vector.broadcast %59 : vector<1x256xf32> to vector<32x256xf32>
    %61 = arith.addf %58, %60 : vector<32x256xf32>
    %cst_34 = arith.constant 0.000000e+00 : f32
    %62 = vector.broadcast %cst_34 : f32 to vector<32x256xf32>
    %63 = arith.maximumf %61, %62 : vector<32x256xf32>
    %64 = arith.truncf %63 : vector<32x256xf32> to vector<32x256xbf16>
    %c0_35 = arith.constant 0 : index
    %c0_36 = arith.constant 0 : index
    %65 = vector.load %arg8[%c0_35, %c0_36] : memref<256x1024xbf16, #tpu.memory_space<vmem>>, vector<256x1024xbf16>
    %cst_37 = arith.constant dense<0.000000e+00> : vector<32x1024xf32>
    %66 = tpu.matmul %64, %65, %cst_37 {dimension_numbers = #tpu.dot_dimension_numbers<[1], [0], [0], [1], [0, 0, 1, 1], [], []>} : vector<32x256xbf16>, vector<256x1024xbf16>, vector<32x1024xf32> -> vector<32x1024xf32>
    %c0_38 = arith.constant 0 : index
    %c0_39 = arith.constant 0 : index
    %67 = vector.load %arg9[%c0_38, %c0_39] : memref<1x1024xf32, #tpu.memory_space<vmem>>, vector<1x1024xf32>
    %68 = vector.broadcast %67 : vector<1x1024xf32> to vector<32x1024xf32>
    %69 = arith.mulf %66, %68 : vector<32x1024xf32>
    %c0_40 = arith.constant 0 : index
    %c0_41 = arith.constant 0 : index
    %70 = vector.load %arg10[%c0_40, %c0_41] : memref<1x1024xf32, #tpu.memory_space<vmem>>, vector<1x1024xf32>
    %71 = vector.broadcast %70 : vector<1x1024xf32> to vector<32x1024xf32>
    %72 = arith.addf %69, %71 : vector<32x1024xf32>
    %73 = arith.addf %72, %0 : vector<32x1024xf32>
    %cst_42 = arith.constant 0.000000e+00 : f32
    %74 = vector.broadcast %cst_42 : f32 to vector<32x1024xf32>
    %75 = arith.maximumf %73, %74 : vector<32x1024xf32>
    %c0_43 = arith.constant 0 : index
    %c0_44 = arith.constant 0 : index
    %76 = vector.load %arg11[%c0_43, %c0_44] : memref<32x1024xf32, #tpu.memory_space<vmem>>, vector<32x1024xf32>
    tpu.vector_store %arg11[%c0_43, %c0_44], %75 {strides = array<i32>} : memref<32x1024xf32, #tpu.memory_space<vmem>>, vector<32x1024xf32>,
    return
  }
  func.func @transform_0(%arg0: i32) -> (i32, i32) {
    %c0_i32 = arith.constant 0 : i32
    %c0_i32_0 = arith.constant 0 : i32
    return %arg0, %c0_i32 : i32, i32
  }
  func.func @transform_1(%arg0: i32) -> (i32, i32) {
    %c0_i32 = arith.constant 0 : i32
    %c0_i32_0 = arith.constant 0 : i32
    %c0_i32_1 = arith.constant 0 : i32
    return %c0_i32, %c0_i32_0 : i32, i32
  }
  func.func @transform_2(%arg0: i32) -> (i32, i32) {
    %c0_i32 = arith.constant 0 : i32
    %c0_i32_0 = arith.constant 0 : i32
    %c0_i32_1 = arith.constant 0 : i32
    return %c0_i32, %c0_i32_0 : i32, i32
  }
  func.func @transform_3(%arg0: i32) -> (i32, i32) {
    %c0_i32 = arith.constant 0 : i32
    %c0_i32_0 = arith.constant 0 : i32
    %c0_i32_1 = arith.constant 0 : i32
    return %c0_i32, %c0_i32_0 : i32, i32
  }
  func.func @transform_4(%arg0: i32) -> (i32, i32) {
    %c0_i32 = arith.constant 0 : i32
    %c0_i32_0 = arith.constant 0 : i32
    %c0_i32_1 = arith.constant 0 : i32
    return %c0_i32, %c0_i32_0 : i32, i32
  }
  func.func @transform_5(%arg0: i32) -> (i32, i32) {
    %c0_i32 = arith.constant 0 : i32
    %c0_i32_0 = arith.constant 0 : i32
    %c0_i32_1 = arith.constant 0 : i32
    return %c0_i32, %c0_i32_0 : i32, i32
  }
  func.func @transform_6(%arg0: i32) -> (i32, i32) {
    %c0_i32 = arith.constant 0 : i32
    %c0_i32_0 = arith.constant 0 : i32
    %c0_i32_1 = arith.constant 0 : i32
    return %c0_i32, %c0_i32_0 : i32, i32
  }
  func.func @transform_7(%arg0: i32) -> (i32, i32) {
    %c0_i32 = arith.constant 0 : i32
    %c0_i32_0 = arith.constant 0 : i32
    %c0_i32_1 = arith.constant 0 : i32
    return %c0_i32, %c0_i32_0 : i32, i32
  }
  func.func @transform_8(%arg0: i32) -> (i32, i32) {
    %c0_i32 = arith.constant 0 : i32
    %c0_i32_0 = arith.constant 0 : i32
    %c0_i32_1 = arith.constant 0 : i32
    return %c0_i32, %c0_i32_0 : i32, i32
  }
  func.func @transform_9(%arg0: i32) -> (i32, i32) {
    %c0_i32 = arith.constant 0 : i32
    %c0_i32_0 = arith.constant 0 : i32
    %c0_i32_1 = arith.constant 0 : i32
    return %c0_i32, %c0_i32_0 : i32, i32
  }
  func.func @transform_10(%arg0: i32) -> (i32, i32) {
    %c0_i32 = arith.constant 0 : i32
    %c0_i32_0 = arith.constant 0 : i32
    return %arg0, %c0_i32 : i32, i32
  }
}

</mosaic_0001>

<bundles_post_ra>
// kernel: tpu_custom_call.1
= control target key start
LH: loop header
LB: loop body
LE: loop exit
PB: predicated region body
PF: predicated region fallthrough
CT: control target
= control target key end

     0   :  { %s8506_s0 = inlined_call_operand.hbm [shape: f32[64,1024], index: 0, kind: input, shape index: {}]   ;;  %s8507_s1 = inlined_call_operand.hbm [shape: bf16[1024,512], index: 1, kind: input, shape index: {}]   ;;  %s8508_s2 = inlined_call_operand.hbm [shape: f32[1,512], index: 2, kind: input, shape index: {}]   ;;  %s8509_s3 = inlined_call_operand.hbm [shape: f32[1,512], index: 3, kind: input, shape index: {}]   ;;  %s8510_s4 = inlined_call_operand.hbm [shape: bf16[1536,256], index: 4, kind: input, shape index: {}]   ;;  %s8511_s5 = inlined_call_operand.vmem [shape: f32[1,256], index: 5, kind: input, shape index: {}]   ;;  %s8512_s6 = inlined_call_operand.vmem [shape: f32[1,256], index: 6, kind: input, shape index: {}]   ;;  %s8513_s7 = inlined_call_operand.hbm [shape: bf16[256,1024], index: 7, kind: input, shape index: {}]   ;;  %s8514_s8 = inlined_call_operand.vmem [shape: f32[1,1024], index: 8, kind: input, shape index: {}]   ;;  %s8515_s9 = inlined_call_operand.vmem [shape: f32[1,1024], index: 9, kind: input, shape index: {}]   ;;  %s8516_s10 = inlined_call_operand.hbm [shape: f32[64,1024], index: 10, kind: output, shape index: {}]  }
   0x1   :  { %8521 = sst [smem:[#allocation21_spill]] %s8515_s9 }
   0x2   :  { %8522 = sst [smem:[#allocation22_spill]] %s8516_s10 }
   0x3   :  { %15 = vsyncpa [#allocation5], 0 }
   0x4   :  { %17 = vsyncpa [#allocation5 + $0x1], 0 }
   0x5   :  { %18 = vsyncpa [#allocation8], 0 }
   0x6   :  { %19 = vsyncpa [#allocation11], 0 }
   0x7   :  { %20 = vsyncpa [#allocation14], 0 }
   0x8   :  { %21 = vsyncpa [#allocation6], 0 }
   0x9   :  { %23 = vsyncpa [#allocation6 + $0x1], 0  ;;  %s7700_s13 = smov 0   ;;  %s7702_s14 = smov 0  }
   0xa   :  { %s7704_s15 = smov 0   ;;  %s7706_s16 = smov 0  }
   0xb LB: > { %s7627_s17 = smov [#allocation7]   ;;  %s7721_s19 = sadd.s32 4294967295, %s7625_s16   ;;  %s7625_s16 = sphi %s7706_s16, %s8556_s16   ;;  %s7621_s15 = sphi %s7704_s15, %s8555_s15   ;;  %s7617_s14 = sphi %s7702_s14, %s8554_s14   ;;  %s7613_s13 = sphi %s7700_s13, %s8553_s13  }
   0xc   : > { %s287_s18 = sshll.u32 %s7627_s17, 4  ;;  %p5824_p0 = scmp.ge.s32.totalorder %s7625_s16, 1  ;;  %s7726_s18 = int_to_ptr.vmem [resolvable:$true] %s287_s18 }
   0xd   : > { %p8518_p1 = scmp.eq.s32.totalorder %s7721_s19, 0  ;;  %p275_p2 = scmp.lt.s32.totalorder %s7625_s16, 3 }
   0xe   : > { %s7628_s21 = smov [#allocation10]   ;;  %s7629_s24 = smov [#allocation9]  }
   0xf   : > { %p7728_p3 = pnand %p5824_p0, %p275_p2  ;;  %s312_s22 = sshll.u32 %s7628_s21, 4  ;;  %s7741_s22 = int_to_ptr.vmem [resolvable:$true] %s312_s22 }
  0x10   : > { %s301_s25 = sshll.u32 %s7629_s24, 4  ;;  %s7377_s28 = scalar_lea.hbm %s8507_s1, 32768  ;;  %s7743_s25 = int_to_ptr.vmem [resolvable:$true] %s301_s25 }
  0x11   : > { %s8523_s20 = scalar_select %p7728_p3, 1, 0 }
  0x12   : > { %p6589_p5 = pneg %p7728_p3  ;;  %p7378_p7 = scmp.ne.s32.totalorder %s8507_s1, %s7377_s28 }
  0x13   : > { %p7384_p11 = scmp.lt.u32.totalorder %s7377_s28, %s8507_s1 }
  0x14   : > { %p7737_p6 = pnand %p6589_p5, %p8518_p1 }
  0x16   : > { %p7753_p8 = pneg %p7737_p6 }
  0x18   : > { %p7380_p9 = pnand %p7753_p8, %p7378_p7 }
  0x1a   : > { %p7381_p10 = pneg %p7380_p9 }
  0x1c   : > { %p7386_p12 = pnand %p7384_p11, %p7381_p10 }
  0x1e   : > { %7389 = shalt.err (!%p7386_p12)
}
  0x1f   : > { %s7390_s21 = scalar_lea.vmem %s7726_s18, 32768  ;;  %p7398_p5 = scmp.lt.s32.totalorder %s7726_s18, %s7726_s18 }
  0x20   : > { %p7391_p13 = scmp.ne.s32.totalorder %s7726_s18, %s7390_s21  ;;  %p7399_p4 = scmp.lt.s32.totalorder %s7390_s21, %s7390_s21 }
  0x22   : > { %p7393_p0 = pnand %p7391_p13, %p7753_p8  ;;  %p7400_p7 = por %p7399_p4, %p7398_p5 }
  0x24   : > { %p7394_p2 = pneg %p7393_p0 }
  0x26   : > { %p7401_p9 = pnand %p7400_p7, %p7394_p2 }
  0x28   : > { %7404 = shalt.err (!%p7401_p9)
}
  0x29   : > { %s7630_s24 = smov 256   ;;  %s7631_s26 = smov 16  }
  0x2a   : > { %6592 = dma.hbm_to_vmem [thread:$0]  (!%p7737_p6), %s8507_s1, 32768, %s7726_s18, [#allocation8], %s7630_s24, %s7630_s24, %s7631_s26  }
  0x2b   : > { %s7405_s12 = scalar_lea.hbm %s8509_s3, 64 }
  0x2c   : > { %p7406_p4 = scmp.ne.s32.totalorder %s8509_s3, %s7405_s12  ;;  %p7412_p12 = scmp.lt.u32.totalorder %s7405_s12, %s8509_s3 }
  0x2e   : > { %p7408_p10 = pnand %p7406_p4, %p7753_p8 }
  0x30   : > { %p7409_p11 = pneg %p7408_p10 }
  0x32   : > { %p7414_p13 = pnand %p7412_p12, %p7409_p11 }
  0x34   : > { %7417 = shalt.err (!%p7414_p13)
}
  0x35   : > { %s7418_s18 = scalar_lea.vmem %s7741_s22, 64  ;;  %p7426_p7 = scmp.lt.s32.totalorder %s7741_s22, %s7741_s22 }
  0x36   : > { %p7419_p0 = scmp.ne.s32.totalorder %s7741_s22, %s7418_s18  ;;  %p7427_p9 = scmp.lt.s32.totalorder %s7418_s18, %s7418_s18 }
  0x38   : > { %p7421_p2 = pnand %p7419_p0, %p7753_p8  ;;  %p7428_p4 = por %p7427_p9, %p7426_p7 }
  0x3a   : > { %p7422_p5 = pneg %p7421_p2 }
  0x3c   : > { %p7429_p10 = pnand %p7428_p4, %p7422_p5 }
  0x3e   : > { %7432 = shalt.err (!%p7429_p10)
}
  0x3f   : > { %6598 = dma.hbm_to_vmem [thread:$0]  (!%p7737_p6), %s8509_s3, 64, %s7741_s22, [#allocation11]  }
  0x40   : > { %s7433_s27 = scalar_lea.hbm %s8508_s2, 64 }
  0x41   : > { %p7434_p11 = scmp.ne.s32.totalorder %s8508_s2, %s7433_s27  ;;  %p7440_p0 = scmp.lt.u32.totalorder %s7433_s27, %s8508_s2 }
  0x43   : > { %p7436_p12 = pnand %p7434_p11, %p7753_p8 }
  0x45   : > { %p7437_p13 = pneg %p7436_p12 }
  0x47   : > { %p7442_p2 = pnand %p7440_p0, %p7437_p13 }
  0x49   : > { %7445 = shalt.err (!%p7442_p2)
}
  0x4a   : > { %s7446_s22 = scalar_lea.vmem %s7743_s25, 64  ;;  %p7454_p4 = scmp.lt.s32.totalorder %s7743_s25, %s7743_s25 }
  0x4b   : > { %p7447_p5 = scmp.ne.s32.totalorder %s7743_s25, %s7446_s22  ;;  %p7455_p10 = scmp.lt.s32.totalorder %s7446_s22, %s7446_s22 }
  0x4d   : > { %p7449_p7 = pnand %p7447_p5, %p7753_p8  ;;  %p7456_p11 = por %p7455_p10, %p7454_p4 }
  0x4f   : > { %p7450_p9 = pneg %p7449_p7 }
  0x51   : > { %p7457_p12 = pnand %p7456_p11, %p7450_p9 }
  0x53   : > { %7460 = shalt.err (!%p7457_p12)
}
  0x54   : > { %6595 = dma.hbm_to_vmem [thread:$0]  (!%p7737_p6), %s8508_s2, 64, %s7743_s25, [#allocation8]  }
  0x55   : > { %s7632_s18 = smov [#allocation12]   ;;  %s7461_s26 = scalar_lea.hbm %s8510_s4, 24576 }
  0x56   : > { %s322_s9 = sshll.u32 %s7632_s18, 4  ;;  %p7462_p13 = scmp.ne.s32.totalorder %s8510_s4, %s7461_s26  ;;  %s323_s9 = int_to_ptr.vmem [resolvable:$true] %s322_s9 }
  0x57   : > { %p7468_p5 = scmp.lt.u32.totalorder %s7461_s26, %s8510_s4 }
  0x58   : > { %p7464_p0 = pnand %p7462_p13, %p7753_p8 }
  0x5a   : > { %p7465_p2 = pneg %p7464_p0 }
  0x5c   : > { %p7470_p7 = pnand %p7468_p5, %p7465_p2 }
  0x5e   : > { %7473 = shalt.err (!%p7470_p7)
}
  0x5f   : > { %s7474_s25 = scalar_lea.vmem %s323_s9, 24576  ;;  %p7482_p11 = scmp.lt.s32.totalorder %s323_s9, %s323_s9 }
  0x60   : > { %p7475_p9 = scmp.ne.s32.totalorder %s323_s9, %s7474_s25  ;;  %p7483_p12 = scmp.lt.s32.totalorder %s7474_s25, %s7474_s25 }
  0x62   : > { %p7477_p4 = pnand %p7475_p9, %p7753_p8  ;;  %p7484_p1 = por %p7483_p12, %p7482_p11 }
  0x64   : > { %p7478_p10 = pneg %p7477_p4 }
  0x66   : > { %p7485_p3 = pnand %p7484_p1, %p7478_p10 }
  0x68   : > { %7488 = shalt.err (!%p7485_p3)
}
  0x69   : > { %s7633_s12 = smov 128   ;;  %s7634_s22 = smov 8  }
  0x6a   : > { %6601 = dma.hbm_to_vmem [thread:$0]  (!%p7737_p6), %s8510_s4, 24576, %s323_s9, [#allocation11], %s7633_s12, %s7633_s12, %s7634_s22  }
  0x6b   : > { %s7635_s18 = smov [#allocation13]   ;;  %s7489_s27 = scalar_lea.hbm %s8513_s7, 16384 }
  0x6c   : > { %s341_s10 = sshll.u32 %s7635_s18, 4  ;;  %p7490_p1 = scmp.ne.s32.totalorder %s8513_s7, %s7489_s27  ;;  %s342_s10 = int_to_ptr.vmem [resolvable:$true] %s341_s10 }
  0x6d   : > { %p7496_p0 = scmp.lt.u32.totalorder %s7489_s27, %s8513_s7 }
  0x6e   : > { %p7492_p3 = pnand %p7490_p1, %p7753_p8 }
  0x70   : > { %p7493_p13 = pneg %p7492_p3 }
  0x72   : > { %p7498_p2 = pnand %p7496_p0, %p7493_p13 }
  0x74   : > { %7501 = shalt.err (!%p7498_p2)
}
  0x75   : > { %s7502_s9 = scalar_lea.vmem %s342_s10, 16384  ;;  %p7510_p4 = scmp.lt.s32.totalorder %s342_s10, %s342_s10 }
  0x76   : > { %p7503_p5 = scmp.ne.s32.totalorder %s342_s10, %s7502_s9  ;;  %p7511_p10 = scmp.lt.s32.totalorder %s7502_s9, %s7502_s9 }
  0x78   : > { %p7505_p7 = pnand %p7503_p5, %p7753_p8  ;;  %p7512_p11 = por %p7511_p10, %p7510_p4 }
  0x7a   : > { %p7506_p9 = pneg %p7505_p7 }
  0x7c   : > { %p7513_p12 = pnand %p7512_p11, %p7506_p9 }
  0x7e   : > { %7516 = shalt.err (!%p7513_p12)
}
  0x7f   : > { %s7636_s12 = smov 512   ;;  %s7637_s11 = smov 32  }
  0x80   : > { %6604 = dma.hbm_to_vmem [thread:$0]  (!%p7737_p6), %s8513_s7, 16384, %s342_s10, [#allocation14], %s7636_s12, %s7636_s12, %s7637_s11  }
  0x81   : > { %s5823_s21 = sadd.s32 4294967294, %s7625_s16   ;;  %s7858_s18 = sadd.s32 1, %s7625_s16  }
  0x82   : > { %s36_s24 = sadd.s32 1, %s7621_s15  ;;  %s33_s26 = ssub.s32 %s7625_s16, %s7858_s18 }
  0x83   : > { %p43_p8 = scmp.ne.s32.totalorder %s7621_s15, %s7617_s14  ;;  %p34_p1 = scmp.eq.s32.totalorder %s33_s26, 0 }
  0x84   : > { %p44_p3 = scmp.eq.s32.totalorder %s7625_s16, 0  ;;  %p49_p13 = scmp.ne.s32.totalorder %s7617_s14, %s7613_s13 }
  0x85   : > { %p262_p0 = scmp.eq.s32.totalorder %s7721_s19, 1  ;;  %p8526_p5 = scmp.eq.s32.totalorder %s7721_s19, 0 }
  0x86   : > { %s7870_s27 = scalar_select %p34_p1, %s7621_s15, %s36_s24  }
  0x87   : > { %p45_p2 = por %p44_p3, %p43_p8  ;;  %p7874_p7 = por %p8526_p5, %p49_p13 }
  0x88   : > { %p7878_p6 = por %p262_p0, %p43_p8  ;;  %p268_p9 = scmp.eq.s32.totalorder %s5823_s21, 1 }
  0x89   : > { %p6618_p4 = scmp.lt.s32.totalorder %s7625_s16, 2  ;;  %s361_s28 = sand.u32 1, %s7621_s15  }
  0x8a   : > { %s8528_s10 = scalar_select %p7878_p6, 1, 0 }
  0x8b   : > { %p7884_p10 = por %p268_p9, %p49_p13  ;;  %s5831_s30 = sshll.u32 %s361_s28, 8 }
  0x8c   : > { %s6426_s25 = sshll.u32 %s7625_s16, 12  ;;  %s365_s22 = scalar_lea.vmem [#allocation4], %s5831_s30 }
  0x8d   : > { %s8529_s29 = scalar_select %p7884_p10, 1, 0 }
  0x8e   : > { %s7892_s11 = scalar_lea.hbm %s8506_s0, %s6426_s25  ;;  %s373_s17 = sshll.u32 %s365_s22, 4  ;;  %s7898_s17 = int_to_ptr.vmem [resolvable:$true] %s373_s17 }
  0x8f   : > { %p7894_p11 = pnand %p6618_p4, %p45_p2  ;;  %s7900_s24 = scalar_lea.sflag [#allocation5], %s361_s28 }
  0x90   : > { %s7517_s26 = scalar_lea.hbm %s7892_s11, 4096  ;;  %s7522_s9 = scalar_lea.hbm %s8506_s0, 8192 }
  0x91   : > { %p7518_p12 = scmp.ne.s32.totalorder %s7892_s11, %s7517_s26  ;;  %p7519_p8 = pneg %p7894_p11 }
  0x92   : > { %p7523_p13 = scmp.lt.u32.totalorder %s7892_s11, %s8506_s0  ;;  %p7524_p0 = scmp.lt.u32.totalorder %s7522_s9, %s7517_s26 }
  0x93   : > { %p7520_p1 = pnand %p7519_p8, %p7518_p12  ;;  %p7526_p5 = scmp.lt.u32.totalorder %s7517_s26, %s7892_s11 }
  0x94   : > { %p7525_p2 = por %p7524_p0, %p7523_p13 }
  0x95   : > { %p7521_p3 = pneg %p7520_p1 }
  0x96   : > { %p7527_p9 = por %p7526_p5, %p7525_p2 }
  0x98   : > { %p7528_p4 = pnand %p7527_p9, %p7521_p3 }
  0x9a   : > { %7531 = shalt.err (!%p7528_p4)
}
  0x9b   : > { %s7532_s28 = scalar_lea.vmem %s7898_s17, 4096  ;;  %s7638_s30 = smov [#allocation4]  }
  0x9c   : > { %p7533_p12 = scmp.ne.s32.totalorder %s7898_s17, %s7532_s28  ;;  %s7537_s25 = sshll.u32 %s7638_s30, 4  ;;  %s7538_s25 = int_to_ptr.vmem [resolvable:$false] %s7537_s25 }
  0x9d   : > { %s7539_s12 = scalar_lea.vmem %s7538_s25, 8192  ;;  %p7540_p6 = scmp.lt.s32.totalorder %s7898_s17, %s7538_s25 }
  0x9e   : > { %p7535_p1 = pnand %p7533_p12, %p7519_p8  ;;  %p7541_p13 = scmp.lt.s32.totalorder %s7539_s12, %s7532_s28 }
  0xa0   : > { %p7536_p10 = pneg %p7535_p1  ;;  %p7542_p0 = por %p7541_p13, %p7540_p6 }
  0xa2   : > { %p7543_p2 = pnand %p7542_p0, %p7536_p10 }
  0xa4   : > { %7546 = shalt.err (!%p7543_p2)
}
  0xa5   : > { %s7639_s26 = smov 1024   ;;  %s7640_s9 = smov 64  }
  0xa6   : > { %6608 = dma.hbm_to_vmem [thread:$0]  (!%p7894_p11), %s7892_s11, 4096, %s7898_s17, %s7900_s24, %s7639_s26, %s7639_s26, %s7640_s9  }
  0xa7   : > { %p8531_p8 = scmp.ne.s32.totalorder %s8523_s20, 0 }
  0xa8   : > { %s7931_s22 = sand.u32 (!%p8531_p8), 1, %s7617_s14  }
  0xa9   : > { %385 = sbr.rel (%p8531_p8) target bundleno = 1653 (0x675), region = 60  ;;  %s5836_s28 = sshll.u32 (!%p8531_p8), %s7931_s22, 8 }
  0xaa   : > { %s388_s30 = scalar_lea.sflag (!%p8531_p8), [#allocation5], %s7931_s22  ;;  %s7937_s25 = scalar_lea.vmem (!%p8531_p8), [#allocation4], %s5836_s28 }
  0xb0   : > { %7592 = dma.done.wait (%p7874_p7), %s388_s30, 4096  }
  0xb1   : > { %7594 = vsyncadd (%p7874_p7), %s388_s30, 4294963200  ;;  %p8532_p6 = scmp.eq.s32.totalorder %s7721_s19, 0 }
  0xb3   : > { %7596 = dma.done.wait (%p8532_p6), [#allocation8], 32832   ;;  %p8533_p10 = pmov %p8532_p6 }
  0xb4   : > { %p8534_p11 = pmov %p8532_p6 }
  0xb5   : > { %7598 = vsyncadd (%p8533_p10), [#allocation8], 4294934464 }
  0xb6   : > { %7600 = dma.done.wait (%p8534_p11), [#allocation11], 24640   ;;  %p8535_p3 = pmov %p8532_p6 }
  0xb8   : > { %7602 = vsyncadd (%p8535_p3), [#allocation11], 4294942656  ;;  %p8536_p5 = pmov %p8535_p3 }
  0xb9   : > { %p8537_p9 = pmov %p8535_p3 }
  0xba   : > { %7604 = dma.done.wait (%p8536_p5), [#allocation14], 16384  }
  0xbb   : > { %7606 = vsyncadd (%p8537_p9), [#allocation14], 4294950912  ;;  %v6673_v0 = vld [vmem:[#allocation7 + $0x4] ss:$16 sps:$4 sm:$0xff]   ;;  %v6677_v2 = vld [vmem:[#allocation7] ss:$16 sps:$4 sm:$0xff]  }
  0xbc   : > { %v6675_v1 = vld [vmem:[#allocation7 + $0x204] ss:$16 sps:$4 sm:$0xff]   ;;  %2034 = vmatprep.subr.bf16.mxu1 %v6673_v0  ;;  %v6678_v3 = vld [vmem:[#allocation7 + $0x200] ss:$16 sps:$4 sm:$0xff]   ;;  %v451_v46 = vld [vmem:[%s7937_s25 + $0x8] sm:$0xff]  ;;  %vm2683_vm0 = vcmask 1040384  }
  0xbd   : > { %2087 = vmatprep.subr.bf16.mxu0 %v6675_v1  ;;  %v6679_v4 = vld [vmem:[#allocation7 + $0x24] ss:$16 sps:$4 sm:$0xff]   ;;  %2035 = vmatpush1.bf16.msra.mxu1 %v6677_v2  ;;  %v6683_v6 = vld [vmem:[#allocation7 + $0x20] ss:$16 sps:$4 sm:$0xff]   ;;  %v459_v49 = vld [vmem:[%s7937_s25 + $0x48] sm:$0xff]  ;;  %vm2832_vm7 = vcmask 1046528  }
  0xbe   : > { %2088 = vmatpush1.bf16.msra.mxu0 %v6678_v3  ;;  %v6681_v5 = vld [vmem:[#allocation7 + $0x224] ss:$16 sps:$4 sm:$0xff]   ;;  %2036 = vmatprep.subr.bf16.mxu1 %v6679_v4  ;;  %v6684_v7 = vld [vmem:[#allocation7 + $0x220] ss:$16 sps:$4 sm:$0xff]   ;;  %v7957_v50 = vpack.c.bf16 %v459_v49, %v451_v46  ;;  %v453_v51 = vld [vmem:[%s7937_s25 + $0x18] sm:$0xff]  ;;  %s8548_s9 = sld [smem:[#allocation21_spill]] }
  0xbf   : > { %2089 = vmatprep.subr.bf16.mxu0 %v6681_v5  ;;  %v6685_v8 = vld [vmem:[#allocation7 + $0x44] ss:$16 sps:$4 sm:$0xff]   ;;  %v6689_v10 = vld [vmem:[#allocation7 + $0x40] ss:$16 sps:$4 sm:$0xff]   ;;  %v461_v52 = vld [vmem:[%s7937_s25 + $0x58] sm:$0xff]  ;;  %s8373_s30 = scalar_lea.vmem [#allocation15], %s5836_s28 }
  0xc0   : > { %v6687_v9 = vld [vmem:[#allocation7 + $0x244] ss:$16 sps:$4 sm:$0xff]   ;;  %v6690_v11 = vld [vmem:[#allocation7 + $0x240] ss:$16 sps:$4 sm:$0xff]   ;;  %v7961_v55 = vpack.c.bf16 %v461_v52, %v453_v51  ;;  %2066 = vmatprep.mubr.bf16.mxu1 %v7957_v50  ;;  %s6428_s28 = sshll.u32 %s7721_s19, 12  ;;  %s5702_s20 = sshll.u32 %s8373_s30, 4  ;;  %s8459_s20 = int_to_ptr.vmem [resolvable:$true] %s5702_s20 }
  0xc1   : > { %2037 = vmatpush1.bf16.msra.mxu1 %v6683_v6  ;;  %v6691_v12 = vld [vmem:[#allocation7 + $0x64] ss:$16 sps:$4 sm:$0xff]   ;;  %v6695_v14 = vld [vmem:[#allocation7 + $0x60] ss:$16 sps:$4 sm:$0xff]   ;;  %s8549_s17 = sld [smem:[#allocation22_spill]]  ;;  %s5688_s19 = scalar_lea.sflag [#allocation6], %s7931_s22 }
  0xc2   : > { %2090 = vmatpush1.bf16.msra.mxu0 %v6684_v7  ;;  %2038 = vmatprep.subr.bf16.mxu1 %v6685_v8  ;;  %v6693_v13 = vld [vmem:[#allocation7 + $0x264] ss:$16 sps:$4 sm:$0xff]   ;;  %v6696_v15 = vld [vmem:[#allocation7 + $0x260] ss:$16 sps:$4 sm:$0xff]   ;;  %s7547_s24 = scalar_lea.vmem %s8459_s20, 4096  ;;  %p8550_p4 = scmp.ne.s32.totalorder %s8528_s10, 0 }
  0xc3   : > { %2091 = vmatprep.subr.bf16.mxu0 %v6687_v9  ;;  %v6697_v16 = vld [vmem:[#allocation7 + $0x84] ss:$16 sps:$4 sm:$0xff]   ;;  %v6701_v18 = vld [vmem:[#allocation7 + $0x80] ss:$16 sps:$4 sm:$0xff]   ;;  %2119 = vmatprep.mubr.bf16.mxu0 %v7961_v55  ;;  %p7548_p7 = scmp.ne.s32.totalorder %s8459_s20, %s7547_s24 }
  0xc4   : > { %v6699_v17 = vld [vmem:[#allocation7 + $0x284] ss:$16 sps:$4 sm:$0xff]   ;;  %v6702_v19 = vld [vmem:[#allocation7 + $0x280] ss:$16 sps:$4 sm:$0xff]  }
  0xc5   : > { %2039 = vmatpush1.bf16.msra.mxu1 %v6689_v10  ;;  %v6703_v20 = vld [vmem:[#allocation7 + $0xa4] ss:$16 sps:$4 sm:$0xff]   ;;  %v6707_v22 = vld [vmem:[#allocation7 + $0xa0] ss:$16 sps:$4 sm:$0xff]   ;;  %p7549_p12 = pnand %p7548_p7, %p8550_p4 }
  0xc6   : > { %2092 = vmatpush1.bf16.msra.mxu0 %v6690_v11  ;;  %2040 = vmatprep.subr.bf16.mxu1 %v6691_v12  ;;  %v6705_v21 = vld [vmem:[#allocation7 + $0x2a4] ss:$16 sps:$4 sm:$0xff]   ;;  %v6708_v23 = vld [vmem:[#allocation7 + $0x2a0] ss:$16 sps:$4 sm:$0xff]   ;;  %v6774_v11 = vld [vmem:[#allocation7 + $0xc] ss:$16 sps:$4 sm:$0xff]  }
  0xc7   : > { %2093 = vmatprep.subr.bf16.mxu0 %v6693_v13  ;;  %v6709_v24 = vld [vmem:[#allocation7 + $0xc4] ss:$16 sps:$4 sm:$0xff]   ;;  %v6713_v26 = vld [vmem:[#allocation7 + $0xc0] ss:$16 sps:$4 sm:$0xff]   ;;  %s8457_s21 = scalar_lea.hbm %s8549_s17, %s6428_s28  ;;  %p7550_p1 = pneg %p7549_p12 }
  0xc8   : > { %v6711_v25 = vld [vmem:[#allocation7 + $0x2c4] ss:$16 sps:$4 sm:$0xff]   ;;  %v6714_v27 = vld [vmem:[#allocation7 + $0x2c0] ss:$16 sps:$4 sm:$0xff]  }
  0xc9   : > { %2041 = vmatpush1.bf16.msra.mxu1 %v6695_v14  ;;  %v6715_v28 = vld [vmem:[#allocation7 + $0xe4] ss:$16 sps:$4 sm:$0xff]   ;;  %v6719_v30 = vld [vmem:[#allocation7 + $0xe0] ss:$16 sps:$4 sm:$0xff]   ;;  %v6772_v14 = vld [vmem:[#allocation7 + $0x8] ss:$16 sps:$4 sm:$0xff]  }
  0xca   : > { %2094 = vmatpush1.bf16.msra.mxu0 %v6696_v15  ;;  %2042 = vmatprep.subr.bf16.mxu1 %v6697_v16  ;;  %v6717_v29 = vld [vmem:[#allocation7 + $0x2e4] ss:$16 sps:$4 sm:$0xff]   ;;  %v6720_v31 = vld [vmem:[#allocation7 + $0x2e0] ss:$16 sps:$4 sm:$0xff]  }
  0xcb   : > { %2095 = vmatprep.subr.bf16.mxu0 %v6699_v17  ;;  %v6721_v32 = vld [vmem:[#allocation7 + $0x104] ss:$16 sps:$4 sm:$0xff]   ;;  %v6725_v34 = vld [vmem:[#allocation7 + $0x100] ss:$16 sps:$4 sm:$0xff]   ;;  %v6780_v17 = vld [vmem:[#allocation7 + $0x2c] ss:$16 sps:$4 sm:$0xff]  }
  0xcc   : > { %v6723_v33 = vld [vmem:[#allocation7 + $0x304] ss:$16 sps:$4 sm:$0xff]   ;;  %v6726_v35 = vld [vmem:[#allocation7 + $0x300] ss:$16 sps:$4 sm:$0xff]  }
  0xcd   : > { %2043 = vmatpush1.bf16.msra.mxu1 %v6701_v18  ;;  %v6727_v36 = vld [vmem:[#allocation7 + $0x124] ss:$16 sps:$4 sm:$0xff]   ;;  %v6731_v38 = vld [vmem:[#allocation7 + $0x120] ss:$16 sps:$4 sm:$0xff]  }
  0xce   : > { %2096 = vmatpush1.bf16.msra.mxu0 %v6702_v19  ;;  %2044 = vmatprep.subr.bf16.mxu1 %v6703_v20  ;;  %v6729_v37 = vld [vmem:[#allocation7 + $0x324] ss:$16 sps:$4 sm:$0xff]   ;;  %v6732_v39 = vld [vmem:[#allocation7 + $0x320] ss:$16 sps:$4 sm:$0xff]   ;;  %v6778_v19 = vld [vmem:[#allocation7 + $0x28] ss:$16 sps:$4 sm:$0xff]  }
  0xcf   : > { %2097 = vmatprep.subr.bf16.mxu0 %v6705_v21  ;;  %v6733_v40 = vld [vmem:[#allocation7 + $0x144] ss:$16 sps:$4 sm:$0xff]   ;;  %v6737_v42 = vld [vmem:[#allocation7 + $0x140] ss:$16 sps:$4 sm:$0xff]   ;;  %v6786_v21 = vld [vmem:[#allocation7 + $0x4c] ss:$16 sps:$4 sm:$0xff]  }
  0xd0   : > { %v6735_v41 = vld [vmem:[#allocation7 + $0x344] ss:$16 sps:$4 sm:$0xff]   ;;  %v6738_v43 = vld [vmem:[#allocation7 + $0x340] ss:$16 sps:$4 sm:$0xff]  }
  0xd1   : > { %2045 = vmatpush1.bf16.msra.mxu1 %v6707_v22  ;;  %v6739_v44 = vld [vmem:[#allocation7 + $0x164] ss:$16 sps:$4 sm:$0xff]   ;;  %v6743_v47 = vld [vmem:[#allocation7 + $0x160] ss:$16 sps:$4 sm:$0xff]  }
  0xd2   : > { %2098 = vmatpush1.bf16.msra.mxu0 %v6708_v23  ;;  %2046 = vmatprep.subr.bf16.mxu1 %v6709_v24  ;;  %v6741_v45 = vld [vmem:[#allocation7 + $0x364] ss:$16 sps:$4 sm:$0xff]   ;;  %v6744_v48 = vld [vmem:[#allocation7 + $0x360] ss:$16 sps:$4 sm:$0xff]   ;;  %v6784_v23 = vld [vmem:[#allocation7 + $0x48] ss:$16 sps:$4 sm:$0xff]  }
  0xd3   : > { %2099 = vmatprep.subr.bf16.mxu0 %v6711_v25  ;;  %v6745_v53 = vld [vmem:[#allocation7 + $0x184] ss:$16 sps:$4 sm:$0xff]   ;;  %v6749_v56 = vld [vmem:[#allocation7 + $0x180] ss:$16 sps:$4 sm:$0xff]   ;;  %v6792_v25 = vld [vmem:[#allocation7 + $0x6c] ss:$16 sps:$4 sm:$0xff]  }
  0xd4   : > { %v6747_v54 = vld [vmem:[#allocation7 + $0x384] ss:$16 sps:$4 sm:$0xff]   ;;  %v6750_v57 = vld [vmem:[#allocation7 + $0x380] ss:$16 sps:$4 sm:$0xff]  }
  0xd5   : > { %2047 = vmatpush1.bf16.msra.mxu1 %v6713_v26  ;;  %v6751_v58 = vld [vmem:[#allocation7 + $0x1a4] ss:$16 sps:$4 sm:$0xff]   ;;  %v6755_v60 = vld [vmem:[#allocation7 + $0x1a0] ss:$16 sps:$4 sm:$0xff]  }
  0xd6   : > { %2100 = vmatpush1.bf16.msra.mxu0 %v6714_v27  ;;  %2048 = vmatprep.subr.bf16.mxu1 %v6715_v28  ;;  %v6753_v59 = vld [vmem:[#allocation7 + $0x3a4] ss:$16 sps:$4 sm:$0xff]   ;;  %v6756_v61 = vld [vmem:[#allocation7 + $0x3a0] ss:$16 sps:$4 sm:$0xff]   ;;  %v6790_v27 = vld [vmem:[#allocation7 + $0x68] ss:$16 sps:$4 sm:$0xff]  }
  0xd7   : > { %2101 = vmatprep.subr.bf16.mxu0 %v6717_v29  ;;  %v6757_v62 = vld [vmem:[#allocation7 + $0x1c4] ss:$16 sps:$4 sm:$0xff]   ;;  %v6761_v0 = vld [vmem:[#allocation7 + $0x1c0] ss:$16 sps:$4 sm:$0xff]   ;;  %v6798_v29 = vld [vmem:[#allocation7 + $0x8c] ss:$16 sps:$4 sm:$0xff]  }
  0xd8   : > { %v6759_v63 = vld [vmem:[#allocation7 + $0x3c4] ss:$16 sps:$4 sm:$0xff]   ;;  %v6762_v1 = vld [vmem:[#allocation7 + $0x3c0] ss:$16 sps:$4 sm:$0xff]  }
  0xd9   : > { %2049 = vmatpush1.bf16.msra.mxu1 %v6719_v30  ;;  %v6763_v2 = vld [vmem:[#allocation7 + $0x1e4] ss:$16 sps:$4 sm:$0xff]   ;;  %v6767_v4 = vld [vmem:[#allocation7 + $0x1e0] ss:$16 sps:$4 sm:$0xff]  }
  0xda   : > { %2102 = vmatpush1.bf16.msra.mxu0 %v6720_v31  ;;  %2050 = vmatprep.subr.bf16.mxu1 %v6721_v32  ;;  %v6765_v3 = vld [vmem:[#allocation7 + $0x3e4] ss:$16 sps:$4 sm:$0xff]   ;;  %v6768_v5 = vld [vmem:[#allocation7 + $0x3e0] ss:$16 sps:$4 sm:$0xff]   ;;  %v6796_v31 = vld [vmem:[#allocation7 + $0x88] ss:$16 sps:$4 sm:$0xff]  }
  0xdb   : > { %2103 = vmatprep.subr.bf16.mxu0 %v6723_v33  ;;  %v450_v6 = vld [vmem:[%s7937_s25] sm:$0xff]  ;;  %v452_v9 = vld [vmem:[%s7937_s25 + $0x10] sm:$0xff]  ;;  %v6804_v33 = vld [vmem:[#allocation7 + $0xac] ss:$16 sps:$4 sm:$0xff]  }
  0xdc   : > { %v458_v7 = vld [vmem:[%s7937_s25 + $0x40] sm:$0xff]  ;;  %v460_v10 = vld [vmem:[%s7937_s25 + $0x50] sm:$0xff] }
  0xdd   : > { %2051 = vmatpush1.bf16.msra.mxu1 %v6725_v34  ;;  %v6771_v8 = vld [vmem:[#allocation7 + $0x404] ss:$16 sps:$4 sm:$0xff]   ;;  %v7969_v12 = vpack.c.bf16 %v458_v7, %v450_v6  ;;  %v6769_v13 = vld [vmem:[#allocation7 + $0x400] ss:$16 sps:$4 sm:$0xff]   ;;  %v7971_v15 = vpack.c.bf16 %v460_v10, %v452_v9  ;;  %v6832_v7 = vld [vmem:[#allocation7 + $0x148] ss:$16 sps:$4 sm:$0xff]  }
  0xde   : > { %2104 = vmatpush1.bf16.msra.mxu0 %v6726_v35  ;;  %2052 = vmatprep.subr.bf16.mxu1 %v6727_v36  ;;  %v6777_v16 = vld [vmem:[#allocation7 + $0x424] ss:$16 sps:$4 sm:$0xff]   ;;  %v6775_v18 = vld [vmem:[#allocation7 + $0x420] ss:$16 sps:$4 sm:$0xff]   ;;  %v6802_v35 = vld [vmem:[#allocation7 + $0xa8] ss:$16 sps:$4 sm:$0xff]  }
  0xdf   : > { %2105 = vmatprep.subr.bf16.mxu0 %v6729_v37  ;;  %v6783_v20 = vld [vmem:[#allocation7 + $0x444] ss:$16 sps:$4 sm:$0xff]   ;;  %v6781_v22 = vld [vmem:[#allocation7 + $0x440] ss:$16 sps:$4 sm:$0xff]   ;;  %v467_v36 = vld [vmem:[%s7937_s25 + $0x88] sm:$0xff] }
  0xe0   : > { %v6789_v24 = vld [vmem:[#allocation7 + $0x464] ss:$16 sps:$4 sm:$0xff]   ;;  %v6787_v26 = vld [vmem:[#allocation7 + $0x460] ss:$16 sps:$4 sm:$0xff]   ;;  %v475_v37 = vld [vmem:[%s7937_s25 + $0xc8] sm:$0xff] }
  0xe1   : > { %2053 = vmatpush1.bf16.msra.mxu1 %v6731_v38  ;;  %v6795_v28 = vld [vmem:[#allocation7 + $0x484] ss:$16 sps:$4 sm:$0xff]   ;;  %v6793_v30 = vld [vmem:[#allocation7 + $0x480] ss:$16 sps:$4 sm:$0xff]   ;;  %v6840_v9 = vld [vmem:[#allocation7 + $0x16c] ss:$16 sps:$4 sm:$0xff]  }
  0xe2   : > { %2106 = vmatpush1.bf16.msra.mxu0 %v6732_v39  ;;  %2054 = vmatprep.subr.bf16.mxu1 %v6733_v40  ;;  %v6801_v32 = vld [vmem:[#allocation7 + $0x4a4] ss:$16 sps:$4 sm:$0xff]   ;;  %v6799_v34 = vld [vmem:[#allocation7 + $0x4a0] ss:$16 sps:$4 sm:$0xff]   ;;  %v7979_v40 = vpack.c.bf16 %v475_v37, %v467_v36 }
  0xe3   : > { %2107 = vmatprep.subr.bf16.mxu0 %v6735_v41  ;;  %v466_v38 = vld [vmem:[%s7937_s25 + $0x80] sm:$0xff]  ;;  %v468_v49 = vld [vmem:[%s7937_s25 + $0x90] sm:$0xff] }
  0xe4   : > { %v474_v39 = vld [vmem:[%s7937_s25 + $0xc0] sm:$0xff]  ;;  %v476_v51 = vld [vmem:[%s7937_s25 + $0xd0] sm:$0xff] }
  0xe5   : > { %2055 = vmatpush1.bf16.msra.mxu1 %v6737_v42  ;;  %v7981_v41 = vpack.c.bf16 %v474_v39, %v466_v38  ;;  %v469_v42 = vld [vmem:[%s7937_s25 + $0x98] sm:$0xff]  ;;  %v6813_v52 = vld [vmem:[#allocation7 + $0x4e4] ss:$16 sps:$4 sm:$0xff]   ;;  %v6829_v6 = vld [vmem:[#allocation7 + $0x540] ss:$16 sps:$4 sm:$0xff]  }
  0xe6   : > { %2108 = vmatpush1.bf16.msra.mxu0 %v6738_v43  ;;  %2056 = vmatprep.subr.bf16.mxu1 %v6739_v44  ;;  %v477_v43 = vld [vmem:[%s7937_s25 + $0xd8] sm:$0xff]  ;;  %v6807_v44 = vld [vmem:[#allocation7 + $0x4c4] ss:$16 sps:$4 sm:$0xff]   ;;  %v6835_v10 = vld [vmem:[#allocation7 + $0x560] ss:$16 sps:$4 sm:$0xff]  }
  0xe7   : > { %2109 = vmatprep.subr.bf16.mxu0 %v6741_v45  ;;  %v6810_v45 = vld [vmem:[#allocation7 + $0xcc] ss:$16 sps:$4 sm:$0xff]   ;;  %v7985_v46 = vpack.c.bf16 %v477_v43, %v469_v42  ;;  %v6873_v37 = vld [vmem:[#allocation7 + $0x624] ss:$16 sps:$4 sm:$0xff]   ;;  %v6871_v43 = vld [vmem:[#allocation7 + $0x620] ss:$16 sps:$4 sm:$0xff]  }
  0xe8   : > { %v6876_v38 = vld [vmem:[#allocation7 + $0x22c] ss:$16 sps:$4 sm:$0xff]  }
  0xe9   : > { %2057 = vmatpush1.bf16.msra.mxu1 %v6743_v47  ;;  %v6805_v47 = vld [vmem:[#allocation7 + $0x4c0] ss:$16 sps:$4 sm:$0xff]   ;;  %v471_v39 = vld [vmem:[%s7937_s25 + $0xa8] sm:$0xff] }
  0xea   : > { %2110 = vmatpush1.bf16.msra.mxu0 %v6744_v48  ;;  %2058 = vmatprep.subr.bf16.mxu1 %v6745_v53  ;;  %v6808_v48 = vld [vmem:[#allocation7 + $0xc8] ss:$16 sps:$4 sm:$0xff]   ;;  %v7992_v53 = vpack.c.bf16 %v476_v51, %v468_v49  ;;  %v478_v49 = vld [vmem:[%s7937_s25 + $0xe0] sm:$0xff]  ;;  %v6882_v51 = vld [vmem:[#allocation7 + $0x24c] ss:$16 sps:$4 sm:$0xff]  }
  0xeb   : > { %2111 = vmatprep.subr.bf16.mxu0 %v6747_v54  ;;  %v6816_v54 = vld [vmem:[#allocation7 + $0xec] ss:$16 sps:$4 sm:$0xff]  }
  0xec   : > { %v479_v42 = vld [vmem:[%s7937_s25 + $0xe8] sm:$0xff] }
  0xed   : > { %2059 = vmatpush1.bf16.msra.mxu1 %v6749_v56  ;;  %v455_v56 = vld [vmem:[%s7937_s25 + $0x28] sm:$0xff] }
  0xee   : > { %2112 = vmatpush1.bf16.msra.mxu0 %v6750_v57  ;;  %2060 = vmatprep.subr.bf16.mxu1 %v6751_v58  ;;  %v463_v57 = vld [vmem:[%s7937_s25 + $0x68] sm:$0xff]  ;;  %v6811_v58 = vld [vmem:[#allocation7 + $0x4e0] ss:$16 sps:$4 sm:$0xff]  }
  0xef   : > { %2113 = vmatprep.subr.bf16.mxu0 %v6753_v59  ;;  %v6814_v59 = vld [vmem:[#allocation7 + $0xe8] ss:$16 sps:$4 sm:$0xff]  }
  0xf1   : > { %2061 = vmatpush1.bf16.msra.mxu1 %v6755_v60  ;;  %v7998_v60 = vpack.c.bf16 %v463_v57, %v455_v56  ;;  %v457_v57 = vld [vmem:[%s7937_s25 + $0x38] sm:$0xff] }
  0xf2   : > { %2114 = vmatpush1.bf16.msra.mxu0 %v6756_v61  ;;  %2062 = vmatprep.subr.bf16.mxu1 %v6757_v62  ;;  %v6819_v61 = vld [vmem:[#allocation7 + $0x504] ss:$16 sps:$4 sm:$0xff]   ;;  %v6822_v62 = vld [vmem:[#allocation7 + $0x10c] ss:$16 sps:$4 sm:$0xff]  }
  0xf3   : > { %2115 = vmatprep.subr.bf16.mxu0 %v6759_v63  ;;  %v6817_v63 = vld [vmem:[#allocation7 + $0x500] ss:$16 sps:$4 sm:$0xff]  }
  0xf5   : > { %2063 = vmatpush1.bf16.msra.mxu1 %v6761_v0  ;;  %v6820_v0 = vld [vmem:[#allocation7 + $0x108] ss:$16 sps:$4 sm:$0xff]  }
  0xf6   : > { %2116 = vmatpush1.bf16.msra.mxu0 %v6762_v1  ;;  %2064 = vmatprep.subr.bf16.mxu1 %v6763_v2  ;;  %v6825_v1 = vld [vmem:[#allocation7 + $0x524] ss:$16 sps:$4 sm:$0xff]   ;;  %v6823_v2 = vld [vmem:[#allocation7 + $0x520] ss:$16 sps:$4 sm:$0xff]  }
  0xf7   : > { %2117 = vmatprep.subr.bf16.mxu0 %v6765_v3  ;;  %v6826_v3 = vld [vmem:[#allocation7 + $0x128] ss:$16 sps:$4 sm:$0xff]  }
  0xf9   : > { %2065 = vmatpush1.bf16.msra.mxu1 %v6767_v4  ;;  %v6831_v4 = vld [vmem:[#allocation7 + $0x544] ss:$16 sps:$4 sm:$0xff]  }
  0xfa   : > { %2118 = vmatpush1.bf16.msra.mxu0 %v6768_v5  ;;  %2246 = vmatprep.subr.bf16.mxu1 %v6774_v11  ;;  %v6834_v5 = vld [vmem:[#allocation7 + $0x14c] ss:$16 sps:$4 sm:$0xff]   ;;  %v6838_v11 = vld [vmem:[#allocation7 + $0x168] ss:$16 sps:$4 sm:$0xff]  }
  0xfb   : > { %2140 = vmatprep.subr.bf16.mxu0 %v6771_v8  ;;  %v6837_v8 = vld [vmem:[#allocation7 + $0x564] ss:$16 sps:$4 sm:$0xff]  }
  0xfc   : > { %2067 = vmatmul.mubr.bf16.vlgmr.msra.gmra.mrb[0].mxu1 %v7969_v12 }
  0xfd   : > { %2120 = vmatmul.mubr.bf16.vlgmr.msra.gmra.mrb[0].mxu0 %v7971_v15  ;;  %2247 = vmatpush1.bf16.msra.mxu1 %v6772_v14  ;;  %v6846_v14 = vld [vmem:[#allocation7 + $0x18c] ss:$16 sps:$4 sm:$0xff]  }
  0xfe   : > { %2141 = vmatpush1.bf16.msra.mxu0 %v6769_v13  ;;  %2248 = vmatprep.subr.bf16.mxu1 %v6780_v17  ;;  %v6843_v13 = vld [vmem:[#allocation7 + $0x584] ss:$16 sps:$4 sm:$0xff]   ;;  %v6844_v17 = vld [vmem:[#allocation7 + $0x188] ss:$16 sps:$4 sm:$0xff]  }
  0xff   : > { %2142 = vmatprep.subr.bf16.mxu0 %v6777_v16  ;;  %2076 = vmatprep.mubr.bf16.mxu1 %v7979_v40  ;;  %v6841_v16 = vld [vmem:[#allocation7 + $0x580] ss:$16 sps:$4 sm:$0xff]  }
 0x100   : > { %2129 = vmatprep.mubr.bf16.mxu0 %v7985_v46 }
 0x101   : > { %2249 = vmatpush1.bf16.msra.mxu1 %v6778_v19  ;;  %v6852_v19 = vld [vmem:[#allocation7 + $0x1ac] ss:$16 sps:$4 sm:$0xff]  }
 0x102   : > { %2143 = vmatpush1.bf16.msra.mxu0 %v6775_v18  ;;  %2250 = vmatprep.subr.bf16.mxu1 %v6786_v21  ;;  %v6849_v18 = vld [vmem:[#allocation7 + $0x5a4] ss:$16 sps:$4 sm:$0xff]   ;;  %v6850_v21 = vld [vmem:[#allocation7 + $0x1a8] ss:$16 sps:$4 sm:$0xff]  }
 0x103   : > { %2144 = vmatprep.subr.bf16.mxu0 %v6783_v20  ;;  %v6847_v20 = vld [vmem:[#allocation7 + $0x5a0] ss:$16 sps:$4 sm:$0xff]  }
 0x104   : > { %2077 = vmatmul.mubr.bf16.gmra.mrb[4].mxu1 %v7981_v41 }
 0x105   : > { %2251 = vmatpush1.bf16.msra.mxu1 %v6784_v23  ;;  %2130 = vmatmul.mubr.bf16.gmra.mrb[4].mxu0 %v7992_v53  ;;  %v6858_v23 = vld [vmem:[#allocation7 + $0x1cc] ss:$16 sps:$4 sm:$0xff]  }
 0x106   : > { %2145 = vmatpush1.bf16.msra.mxu0 %v6781_v22  ;;  %2252 = vmatprep.subr.bf16.mxu1 %v6792_v25  ;;  %v6855_v22 = vld [vmem:[#allocation7 + $0x5c4] ss:$16 sps:$4 sm:$0xff]   ;;  %v6856_v25 = vld [vmem:[#allocation7 + $0x1c8] ss:$16 sps:$4 sm:$0xff]  }
 0x107   : > { %2146 = vmatprep.subr.bf16.mxu0 %v6789_v24  ;;  %2278 = vmatprep.mubr.bf16.mxu1 %v7957_v50  ;;  %v6828_v50 = vld [vmem:[#allocation7 + $0x12c] ss:$16 sps:$4 sm:$0xff]   ;;  %v6853_v24 = vld [vmem:[#allocation7 + $0x5c0] ss:$16 sps:$4 sm:$0xff]  }
 0x108   : > { %2172 = vmatprep.mubr.bf16.mxu0 %v7998_v60 }
 0x109   : > { %2253 = vmatpush1.bf16.msra.mxu1 %v6790_v27  ;;  %v6864_v27 = vld [vmem:[#allocation7 + $0x1ec] ss:$16 sps:$4 sm:$0xff]  }
 0x10a   : > { %2147 = vmatpush1.bf16.msra.mxu0 %v6787_v26  ;;  %2254 = vmatprep.subr.bf16.mxu1 %v6798_v29  ;;  %v6861_v26 = vld [vmem:[#allocation7 + $0x5e4] ss:$16 sps:$4 sm:$0xff]   ;;  %v6862_v29 = vld [vmem:[#allocation7 + $0x1e8] ss:$16 sps:$4 sm:$0xff]  }
 0x10b   : > { %2148 = vmatprep.subr.bf16.mxu0 %v6795_v28  ;;  %v6859_v28 = vld [vmem:[#allocation7 + $0x5e0] ss:$16 sps:$4 sm:$0xff]  }
 0x10d   : > { %2255 = vmatpush1.bf16.msra.mxu1 %v6796_v31  ;;  %v454_v31 = vld [vmem:[%s7937_s25 + $0x20] sm:$0xff] }
 0x10e   : > { %2149 = vmatpush1.bf16.msra.mxu0 %v6793_v30  ;;  %2256 = vmatprep.subr.bf16.mxu1 %v6804_v33  ;;  %v6867_v30 = vld [vmem:[#allocation7 + $0x604] ss:$16 sps:$4 sm:$0xff]   ;;  %v6870_v33 = vld [vmem:[#allocation7 + $0x20c] ss:$16 sps:$4 sm:$0xff]  }
 0x10f   : > { %2150 = vmatprep.subr.bf16.mxu0 %v6801_v32  ;;  %v462_v32 = vld [vmem:[%s7937_s25 + $0x60] sm:$0xff] }
 0x110   : > { %v8003_v36 = vpack.c.bf16 %v462_v32, %v454_v31  ;;  %v6942_v31 = vld [vmem:[#allocation7 + $0x38c] ss:$16 sps:$4 sm:$0xff]   ;;  %v6937_v32 = vld [vmem:[#allocation7 + $0x780] ss:$16 sps:$4 sm:$0xff]  }
 0x111   : > { %2257 = vmatpush1.bf16.msra.mxu1 %v6802_v35  ;;  %v6868_v35 = vld [vmem:[#allocation7 + $0x208] ss:$16 sps:$4 sm:$0xff]  }
 0x112   : > { %2151 = vmatpush1.bf16.msra.mxu0 %v6799_v34  ;;  %2258 = vmatprep.subr.bf16.mxu1 %v6810_v45  ;;  %v6865_v34 = vld [vmem:[#allocation7 + $0x600] ss:$16 sps:$4 sm:$0xff]   ;;  %v8007_v45 = vpack.c.bf16 %v479_v42, %v471_v39  ;;  %v6951_v39 = vld [vmem:[#allocation7 + $0x7c4] ss:$16 sps:$4 sm:$0xff]   ;;  %v6954_v42 = vld [vmem:[#allocation7 + $0x3cc] ss:$16 sps:$4 sm:$0xff]  }
 0x113   : > { %2152 = vmatprep.subr.bf16.mxu0 %v6807_v44  ;;  %v6874_v44 = vld [vmem:[#allocation7 + $0x228] ss:$16 sps:$4 sm:$0xff]  }
 0x115   : > { %2259 = vmatpush1.bf16.msra.mxu1 %v6808_v48  ;;  %v470_v48 = vld [vmem:[%s7937_s25 + $0xa0] sm:$0xff] }
 0x116   : > { %2153 = vmatpush1.bf16.msra.mxu0 %v6805_v47  ;;  %2260 = vmatprep.subr.bf16.mxu1 %v6816_v54  ;;  %v6879_v47 = vld [vmem:[#allocation7 + $0x644] ss:$16 sps:$4 sm:$0xff]   ;;  %v6880_v54 = vld [vmem:[#allocation7 + $0x248] ss:$16 sps:$4 sm:$0xff]   ;;  %v8015_v56 = vpack.c.bf16 %v478_v49, %v470_v48  ;;  %v6960_v48 = vld [vmem:[#allocation7 + $0x3ec] ss:$16 sps:$4 sm:$0xff]  }
 0x117   : > { %2154 = vmatprep.subr.bf16.mxu0 %v6813_v52  ;;  %v6877_v52 = vld [vmem:[#allocation7 + $0x640] ss:$16 sps:$4 sm:$0xff]  }
 0x118   : > { %v6955_v49 = vld [vmem:[#allocation7 + $0x7e0] ss:$16 sps:$4 sm:$0xff]  }
 0x119   : > { %2261 = vmatpush1.bf16.msra.mxu1 %v6814_v59  ;;  %v6888_v59 = vld [vmem:[#allocation7 + $0x26c] ss:$16 sps:$4 sm:$0xff]  }
 0x11a   : > { %2155 = vmatpush1.bf16.msra.mxu0 %v6811_v58  ;;  %2262 = vmatprep.subr.bf16.mxu1 %v6822_v62  ;;  %v465_v58 = vld [vmem:[%s7937_s25 + $0x78] sm:$0xff] }
 0x11b   : > { %2156 = vmatprep.subr.bf16.mxu0 %v6819_v61  ;;  %v8019_v61 = vpack.c.bf16 %v465_v58, %v457_v57  ;;  %v6886_v62 = vld [vmem:[#allocation7 + $0x268] ss:$16 sps:$4 sm:$0xff]  }
 0x11c   : > { %v473_v57 = vld [vmem:[%s7937_s25 + $0xb8] sm:$0xff] }
 0x11d   : > { %2263 = vmatpush1.bf16.msra.mxu1 %v6820_v0  ;;  %v6894_v0 = vld [vmem:[#allocation7 + $0x28c] ss:$16 sps:$4 sm:$0xff]  }
 0x11e   : > { %2157 = vmatpush1.bf16.msra.mxu0 %v6817_v63  ;;  %2264 = vmatprep.subr.bf16.mxu1 %v6828_v50  ;;  %v6891_v63 = vld [vmem:[#allocation7 + $0x684] ss:$16 sps:$4 sm:$0xff]   ;;  %v6892_v50 = vld [vmem:[#allocation7 + $0x288] ss:$16 sps:$4 sm:$0xff]  }
 0x11f   : > { %2158 = vmatprep.subr.bf16.mxu0 %v6825_v1  ;;  %v6889_v1 = vld [vmem:[#allocation7 + $0x680] ss:$16 sps:$4 sm:$0xff]   ;;  %v481_v58 = vld [vmem:[%s7937_s25 + $0xf8] sm:$0xff] }
 0x121   : > { %2265 = vmatpush1.bf16.msra.mxu1 %v6826_v3  ;;  %v6895_v3 = vld [vmem:[#allocation7 + $0x6a0] ss:$16 sps:$4 sm:$0xff]  }
 0x122   : > { %2159 = vmatpush1.bf16.msra.mxu0 %v6823_v2  ;;  %2266 = vmatprep.subr.bf16.mxu1 %v6834_v5  ;;  %v6897_v2 = vld [vmem:[#allocation7 + $0x6a4] ss:$16 sps:$4 sm:$0xff]  }
 0x123   : > { %2160 = vmatprep.subr.bf16.mxu0 %v6831_v4  ;;  %v6898_v4 = vld [vmem:[#allocation7 + $0x2a8] ss:$16 sps:$4 sm:$0xff]   ;;  %v6903_v5 = vld [vmem:[#allocation7 + $0x6c4] ss:$16 sps:$4 sm:$0xff]  }
 0x125   : > { %2267 = vmatpush1.bf16.msra.mxu1 %v6832_v7  ;;  %v6901_v7 = vld [vmem:[#allocation7 + $0x6c0] ss:$16 sps:$4 sm:$0xff]  }
 0x126   : > { %2161 = vmatpush1.bf16.msra.mxu0 %v6829_v6  ;;  %2268 = vmatprep.subr.bf16.mxu1 %v6840_v9  ;;  %v6906_v6 = vld [vmem:[#allocation7 + $0x2cc] ss:$16 sps:$4 sm:$0xff]  }
 0x127   : > { %2162 = vmatprep.subr.bf16.mxu0 %v6837_v8  ;;  %v6904_v8 = vld [vmem:[#allocation7 + $0x2c8] ss:$16 sps:$4 sm:$0xff]   ;;  %v6912_v9 = vld [vmem:[#allocation7 + $0x2ec] ss:$16 sps:$4 sm:$0xff]  }
 0x129   : > { %2269 = vmatpush1.bf16.msra.mxu1 %v6838_v11  ;;  %v6910_v11 = vld [vmem:[#allocation7 + $0x2e8] ss:$16 sps:$4 sm:$0xff]  }
 0x12a   : > { %2163 = vmatpush1.bf16.msra.mxu0 %v6835_v10  ;;  %2270 = vmatprep.subr.bf16.mxu1 %v6846_v14  ;;  %v6907_v10 = vld [vmem:[#allocation7 + $0x6e0] ss:$16 sps:$4 sm:$0xff]   ;;  %v6918_v14 = vld [vmem:[#allocation7 + $0x30c] ss:$16 sps:$4 sm:$0xff]  }
 0x12b   : > { %2164 = vmatprep.subr.bf16.mxu0 %v6843_v13  ;;  %v6915_v13 = vld [vmem:[#allocation7 + $0x704] ss:$16 sps:$4 sm:$0xff]  }
 0x12d   : > { %2271 = vmatpush1.bf16.msra.mxu1 %v6844_v17  ;;  %v6916_v17 = vld [vmem:[#allocation7 + $0x308] ss:$16 sps:$4 sm:$0xff]  }
 0x12e   : > { %2165 = vmatpush1.bf16.msra.mxu0 %v6841_v16  ;;  %2272 = vmatprep.subr.bf16.mxu1 %v6852_v19  ;;  %v6913_v16 = vld [vmem:[#allocation7 + $0x700] ss:$16 sps:$4 sm:$0xff]   ;;  %v6924_v19 = vld [vmem:[#allocation7 + $0x32c] ss:$16 sps:$4 sm:$0xff]  }
 0x12f   : > { %2166 = vmatprep.subr.bf16.mxu0 %v6849_v18  ;;  %v6921_v18 = vld [vmem:[#allocation7 + $0x724] ss:$16 sps:$4 sm:$0xff]  }
 0x131   : > { %2273 = vmatpush1.bf16.msra.mxu1 %v6850_v21  ;;  %v6922_v21 = vld [vmem:[#allocation7 + $0x328] ss:$16 sps:$4 sm:$0xff]  }
 0x132   : > { %2167 = vmatpush1.bf16.msra.mxu0 %v6847_v20  ;;  %2274 = vmatprep.subr.bf16.mxu1 %v6858_v23  ;;  %v6919_v20 = vld [vmem:[#allocation7 + $0x720] ss:$16 sps:$4 sm:$0xff]   ;;  %v6930_v23 = vld [vmem:[#allocation7 + $0x34c] ss:$16 sps:$4 sm:$0xff]  }
 0x133   : > { %2168 = vmatprep.subr.bf16.mxu0 %v6855_v22  ;;  %v6927_v22 = vld [vmem:[#allocation7 + $0x744] ss:$16 sps:$4 sm:$0xff]  }
 0x135   : > { %2275 = vmatpush1.bf16.msra.mxu1 %v6856_v25  ;;  %v6928_v25 = vld [vmem:[#allocation7 + $0x348] ss:$16 sps:$4 sm:$0xff]  }
 0x136   : > { %2169 = vmatpush1.bf16.msra.mxu0 %v6853_v24  ;;  %2276 = vmatprep.subr.bf16.mxu1 %v6864_v27  ;;  %v6925_v24 = vld [vmem:[#allocation7 + $0x740] ss:$16 sps:$4 sm:$0xff]   ;;  %v6936_v27 = vld [vmem:[#allocation7 + $0x36c] ss:$16 sps:$4 sm:$0xff]  }
 0x137   : > { %2170 = vmatprep.subr.bf16.mxu0 %v6861_v26  ;;  %v6933_v26 = vld [vmem:[#allocation7 + $0x764] ss:$16 sps:$4 sm:$0xff]  }
 0x139   : > { %2277 = vmatpush1.bf16.msra.mxu1 %v6862_v29  ;;  %v6934_v29 = vld [vmem:[#allocation7 + $0x368] ss:$16 sps:$4 sm:$0xff]  }
 0x13a   : > { %2171 = vmatpush1.bf16.msra.mxu0 %v6859_v28  ;;  %2299 = vmatprep.subr.bf16.mxu1 %v6870_v33  ;;  %v6931_v28 = vld [vmem:[#allocation7 + $0x760] ss:$16 sps:$4 sm:$0xff]   ;;  %v6940_v33 = vld [vmem:[#allocation7 + $0x388] ss:$16 sps:$4 sm:$0xff]  }
 0x13b   : > { %2193 = vmatprep.subr.bf16.mxu0 %v6867_v30  ;;  %v6939_v30 = vld [vmem:[#allocation7 + $0x784] ss:$16 sps:$4 sm:$0xff]  }
 0x13c   : > { %2279 = vmatmul.mubr.bf16.vlgmr.msra.gmra.mrb[8].mxu1 %v7969_v12  ;;  %v6885_v12 = vld [vmem:[#allocation7 + $0x664] ss:$16 sps:$4 sm:$0xff]  }
 0x13d   : > { %2173 = vmatmul.mubr.bf16.vlgmr.msra.gmra.mrb[0].mxu0 %v8003_v36  ;;  %2300 = vmatpush1.bf16.msra.mxu1 %v6868_v35  ;;  %v6948_v35 = vld [vmem:[#allocation7 + $0x3ac] ss:$16 sps:$4 sm:$0xff]  }
 0x13e   : > { %2194 = vmatpush1.bf16.msra.mxu0 %v6865_v34  ;;  %2301 = vmatprep.subr.bf16.mxu1 %v6876_v38  ;;  %v6945_v34 = vld [vmem:[#allocation7 + $0x7a4] ss:$16 sps:$4 sm:$0xff]   ;;  %v6946_v38 = vld [vmem:[#allocation7 + $0x3a8] ss:$16 sps:$4 sm:$0xff]  }
 0x13f   : > { %2195 = vmatprep.subr.bf16.mxu0 %v6873_v37  ;;  %2182 = vmatprep.mubr.bf16.mxu0 %v8007_v45  ;;  %v6943_v37 = vld [vmem:[#allocation7 + $0x7a0] ss:$16 sps:$4 sm:$0xff]  }
 0x140   : > { %2288 = vmatprep.mubr.bf16.mxu1 %v7979_v40  ;;  %v6883_v40 = vld [vmem:[#allocation7 + $0x660] ss:$16 sps:$4 sm:$0xff]  }
 0x141   : > { %2302 = vmatpush1.bf16.msra.mxu1 %v6874_v44  ;;  %v6952_v44 = vld [vmem:[#allocation7 + $0x3c8] ss:$16 sps:$4 sm:$0xff]  }
 0x142   : > { %2196 = vmatpush1.bf16.msra.mxu0 %v6871_v43  ;;  %2303 = vmatprep.subr.bf16.mxu1 %v6882_v51  ;;  %v6949_v43 = vld [vmem:[#allocation7 + $0x7c0] ss:$16 sps:$4 sm:$0xff]   ;;  %v6958_v51 = vld [vmem:[#allocation7 + $0x3e8] ss:$16 sps:$4 sm:$0xff]  }
 0x143   : > { %2197 = vmatprep.subr.bf16.mxu0 %v6879_v47  ;;  %v6957_v47 = vld [vmem:[#allocation7 + $0x7e4] ss:$16 sps:$4 sm:$0xff]  }
 0x144   : > { %2289 = vmatmul.mubr.bf16.gmra.mrb[12].mxu1 %v7981_v41  ;;  %v6900_v41 = vld [vmem:[#allocation7 + $0x2ac] ss:$16 sps:$4 sm:$0xff]  }
 0x145   : > { %2183 = vmatmul.mubr.bf16.gmra.mrb[4].mxu0 %v8015_v56  ;;  %2304 = vmatpush1.bf16.msra.mxu1 %v6880_v54  ;;  %v464_v54 = vld [vmem:[%s7937_s25 + $0x70] sm:$0xff] }
 0x146   : > { %2198 = vmatpush1.bf16.msra.mxu0 %v6877_v52  ;;  %2305 = vmatprep.subr.bf16.mxu1 %v6888_v59  ;;  %v456_v52 = vld [vmem:[%s7937_s25 + $0x30] sm:$0xff]  ;;  %v6961_v59 = vld [vmem:[#allocation7 + $0x408] ss:$16 sps:$4 sm:$0xff]  }
 0x147   : > { %2199 = vmatprep.subr.bf16.mxu0 %v6885_v12  ;;  %2225 = vmatprep.mubr.bf16.mxu0 %v8019_v61  ;;  %v6963_v12 = vld [vmem:[#allocation7 + $0x40c] ss:$16 sps:$4 sm:$0xff]  }
 0x148   : > { %2331 = vmatprep.mubr.bf16.mxu1 %v7961_v55  ;;  %v6909_v55 = vld [vmem:[#allocation7 + $0x6e4] ss:$16 sps:$4 sm:$0xff]  }
 0x149   : > { %2306 = vmatpush1.bf16.msra.mxu1 %v6886_v62  ;;  %v6966_v62 = vld [vmem:[#allocation7 + $0x42c] ss:$16 sps:$4 sm:$0xff]  }
 0x14a   : > { %2200 = vmatpush1.bf16.msra.mxu0 %v6883_v40  ;;  %2307 = vmatprep.subr.bf16.mxu1 %v6894_v0  ;;  %v8029_v40 = vpack.c.bf16 %v464_v54, %v456_v52  ;;  %v6964_v0 = vld [vmem:[#allocation7 + $0x428] ss:$16 sps:$4 sm:$0xff]   ;;  %v7011_v54 = vld [vmem:[#allocation7 + $0x60c] ss:$16 sps:$4 sm:$0xff]  }
 0x14b   : > { %2201 = vmatprep.subr.bf16.mxu0 %v6891_v63  ;;  %v8031_v63 = vpack.c.bf16 %v481_v58, %v473_v57  ;;  %v7006_v52 = vld [vmem:[#allocation7 + $0x5e8] ss:$16 sps:$4 sm:$0xff]   ;;  %v7014_v57 = vld [vmem:[#allocation7 + $0x62c] ss:$16 sps:$4 sm:$0xff]  }
 0x14c   : > { %v7012_v58 = vld [vmem:[#allocation7 + $0x628] ss:$16 sps:$4 sm:$0xff]  }
 0x14d   : > { %2308 = vmatpush1.bf16.msra.mxu1 %v6892_v50  ;;  %v480_v50 = vld [vmem:[%s7937_s25 + $0xf0] sm:$0xff] }
 0x14e   : > { %2202 = vmatpush1.bf16.msra.mxu0 %v6889_v1  ;;  %2309 = vmatprep.subr.bf16.mxu1 %v6900_v41  ;;  %v472_v1 = vld [vmem:[%s7937_s25 + $0xb0] sm:$0xff]  ;;  %v6967_v41 = vld [vmem:[#allocation7 + $0x448] ss:$16 sps:$4 sm:$0xff]  }
 0x14f   : > { %2203 = vmatprep.subr.bf16.mxu0 %v6897_v2  ;;  %v6969_v2 = vld [vmem:[#allocation7 + $0x44c] ss:$16 sps:$4 sm:$0xff]  }
 0x151   : > { %2310 = vmatpush1.bf16.msra.mxu1 %v6898_v4  ;;  %v6972_v4 = vld [vmem:[#allocation7 + $0x46c] ss:$16 sps:$4 sm:$0xff]  }
 0x152   : > { %2204 = vmatpush1.bf16.msra.mxu0 %v6895_v3  ;;  %2311 = vmatprep.subr.bf16.mxu1 %v6906_v6  ;;  %v8039_v3 = vpack.c.bf16 %v480_v50, %v472_v1  ;;  %v7059_v6 = vld [vmem:[#allocation12 + $0x4] ss:$8 sps:$4 sm:$0xff]   ;;  %v7018_v1 = vld [vmem:[#allocation7 + $0x668] ss:$16 sps:$4 sm:$0xff]  }
 0x153   : > { %2205 = vmatprep.subr.bf16.mxu0 %v6903_v5  ;;  %v7057_v5 = vld [vmem:[#allocation12] ss:$8 sps:$4 sm:$0xff]   ;;  %v7023_v50 = vld [vmem:[#allocation7 + $0x68c] ss:$16 sps:$4 sm:$0xff]  }
 0x155   : > { %2312 = vmatpush1.bf16.msra.mxu1 %v6904_v8  ;;  %v6975_v8 = vld [vmem:[#allocation7 + $0x48c] ss:$16 sps:$4 sm:$0xff]  }
 0x156   : > { %2206 = vmatpush1.bf16.msra.mxu0 %v6901_v7  ;;  %2313 = vmatprep.subr.bf16.mxu1 %v6912_v9  ;;  %v7062_v7 = vld [vmem:[#allocation12 + $0x14] ss:$8 sps:$4 sm:$0xff]   ;;  %v6973_v9 = vld [vmem:[#allocation7 + $0x488] ss:$16 sps:$4 sm:$0xff]  }
 0x157   : > { %2207 = vmatprep.subr.bf16.mxu0 %v6909_v55  ;;  %v7065_v55 = vld [vmem:[#allocation12 + $0x24] ss:$8 sps:$4 sm:$0xff]  }
 0x159   : > { %2314 = vmatpush1.bf16.msra.mxu1 %v6910_v11  ;;  %v7063_v11 = vld [vmem:[#allocation12 + $0x20] ss:$8 sps:$4 sm:$0xff]  }
 0x15a   : > { %2208 = vmatpush1.bf16.msra.mxu0 %v6907_v10  ;;  %2315 = vmatprep.subr.bf16.mxu1 %v6918_v14  ;;  %v6978_v10 = vld [vmem:[#allocation7 + $0x4ac] ss:$16 sps:$4 sm:$0xff]  }
 0x15b   : > { %2209 = vmatprep.subr.bf16.mxu0 %v6915_v13  ;;  %v6976_v13 = vld [vmem:[#allocation7 + $0x4a8] ss:$16 sps:$4 sm:$0xff]   ;;  %v6981_v14 = vld [vmem:[#allocation7 + $0x4cc] ss:$16 sps:$4 sm:$0xff]  }
 0x15d   : > { %2316 = vmatpush1.bf16.msra.mxu1 %v6916_v17  ;;  %v6979_v17 = vld [vmem:[#allocation7 + $0x4c8] ss:$16 sps:$4 sm:$0xff]  }
 0x15e   : > { %2210 = vmatpush1.bf16.msra.mxu0 %v6913_v16  ;;  %2317 = vmatprep.subr.bf16.mxu1 %v6924_v19  ;;  %v7071_v16 = vld [vmem:[#allocation12 + $0x44] ss:$8 sps:$4 sm:$0xff]   ;;  %v7069_v19 = vld [vmem:[#allocation12 + $0x40] ss:$8 sps:$4 sm:$0xff]  }
 0x15f   : > { %2211 = vmatprep.subr.bf16.mxu0 %v6921_v18  ;;  %v6984_v18 = vld [vmem:[#allocation7 + $0x4ec] ss:$16 sps:$4 sm:$0xff]  }
 0x161   : > { %2318 = vmatpush1.bf16.msra.mxu1 %v6922_v21  ;;  %v6982_v21 = vld [vmem:[#allocation7 + $0x4e8] ss:$16 sps:$4 sm:$0xff]  }
 0x162   : > { %2212 = vmatpush1.bf16.msra.mxu0 %v6919_v20  ;;  %2319 = vmatprep.subr.bf16.mxu1 %v6930_v23  ;;  %v7074_v20 = vld [vmem:[#allocation12 + $0x54] ss:$8 sps:$4 sm:$0xff]   ;;  %v7072_v23 = vld [vmem:[#allocation12 + $0x50] ss:$8 sps:$4 sm:$0xff]  }
 0x163   : > { %2213 = vmatprep.subr.bf16.mxu0 %v6927_v22  ;;  %v6987_v22 = vld [vmem:[#allocation7 + $0x50c] ss:$16 sps:$4 sm:$0xff]  }
 0x165   : > { %2320 = vmatpush1.bf16.msra.mxu1 %v6928_v25  ;;  %v6985_v25 = vld [vmem:[#allocation7 + $0x508] ss:$16 sps:$4 sm:$0xff]  }
 0x166   : > { %2214 = vmatpush1.bf16.msra.mxu0 %v6925_v24  ;;  %2321 = vmatprep.subr.bf16.mxu1 %v6936_v27  ;;  %v7077_v24 = vld [vmem:[#allocation12 + $0x64] ss:$8 sps:$4 sm:$0xff]   ;;  %v7075_v27 = vld [vmem:[#allocation12 + $0x60] ss:$8 sps:$4 sm:$0xff]  }
 0x167   : > { %2215 = vmatprep.subr.bf16.mxu0 %v6933_v26  ;;  %v6990_v26 = vld [vmem:[#allocation7 + $0x52c] ss:$16 sps:$4 sm:$0xff]  }
 0x169   : > { %2322 = vmatpush1.bf16.msra.mxu1 %v6934_v29  ;;  %v6988_v29 = vld [vmem:[#allocation7 + $0x528] ss:$16 sps:$4 sm:$0xff]  }
 0x16a   : > { %2216 = vmatpush1.bf16.msra.mxu0 %v6931_v28  ;;  %2323 = vmatprep.subr.bf16.mxu1 %v6942_v31  ;;  %v7080_v28 = vld [vmem:[#allocation12 + $0x74] ss:$8 sps:$4 sm:$0xff]   ;;  %v7078_v31 = vld [vmem:[#allocation12 + $0x70] ss:$8 sps:$4 sm:$0xff]  }
 0x16b   : > { %2217 = vmatprep.subr.bf16.mxu0 %v6939_v30  ;;  %v6993_v30 = vld [vmem:[#allocation7 + $0x54c] ss:$16 sps:$4 sm:$0xff]  }
 0x16d   : > { %2324 = vmatpush1.bf16.msra.mxu1 %v6940_v33  ;;  %v6991_v33 = vld [vmem:[#allocation7 + $0x548] ss:$16 sps:$4 sm:$0xff]  }
 0x16e   : > { %2218 = vmatpush1.bf16.msra.mxu0 %v6937_v32  ;;  %2325 = vmatprep.subr.bf16.mxu1 %v6948_v35  ;;  %v7083_v32 = vld [vmem:[#allocation12 + $0x84] ss:$8 sps:$4 sm:$0xff]   ;;  %v7081_v35 = vld [vmem:[#allocation12 + $0x80] ss:$8 sps:$4 sm:$0xff]  }
 0x16f   : > { %2219 = vmatprep.subr.bf16.mxu0 %v6945_v34  ;;  %v6996_v34 = vld [vmem:[#allocation7 + $0x56c] ss:$16 sps:$4 sm:$0xff]  }
 0x171   : > { %2326 = vmatpush1.bf16.msra.mxu1 %v6946_v38  ;;  %v6994_v38 = vld [vmem:[#allocation7 + $0x568] ss:$16 sps:$4 sm:$0xff]  }
 0x172   : > { %2220 = vmatpush1.bf16.msra.mxu0 %v6943_v37  ;;  %2327 = vmatprep.subr.bf16.mxu1 %v6954_v42  ;;  %v7086_v37 = vld [vmem:[#allocation12 + $0x94] ss:$8 sps:$4 sm:$0xff]   ;;  %v7084_v42 = vld [vmem:[#allocation12 + $0x90] ss:$8 sps:$4 sm:$0xff]  }
 0x173   : > { %2221 = vmatprep.subr.bf16.mxu0 %v6951_v39  ;;  %v6999_v39 = vld [vmem:[#allocation7 + $0x58c] ss:$16 sps:$4 sm:$0xff]  }
 0x175   : > { %2328 = vmatpush1.bf16.msra.mxu1 %v6952_v44  ;;  %v7002_v44 = vld [vmem:[#allocation7 + $0x5ac] ss:$16 sps:$4 sm:$0xff]  }
 0x176   : > { %2222 = vmatpush1.bf16.msra.mxu0 %v6949_v43  ;;  %2329 = vmatprep.subr.bf16.mxu1 %v6960_v48  ;;  %v6997_v43 = vld [vmem:[#allocation7 + $0x588] ss:$16 sps:$4 sm:$0xff]   ;;  %v7005_v48 = vld [vmem:[#allocation7 + $0x5cc] ss:$16 sps:$4 sm:$0xff]  }
 0x177   : > { %2223 = vmatprep.subr.bf16.mxu0 %v6957_v47  ;;  %v7000_v47 = vld [vmem:[#allocation7 + $0x5a8] ss:$16 sps:$4 sm:$0xff]  }
 0x179   : > { %2330 = vmatpush1.bf16.msra.mxu1 %v6958_v51  ;;  %v7008_v51 = vld [vmem:[#allocation7 + $0x5ec] ss:$16 sps:$4 sm:$0xff]  }
 0x17a   : > { %2224 = vmatpush1.bf16.msra.mxu0 %v6955_v49  ;;  %2352 = vmatprep.subr.bf16.mxu1 %v6963_v12  ;;  %v7003_v49 = vld [vmem:[#allocation7 + $0x5c8] ss:$16 sps:$4 sm:$0xff]  }
 0x17b   : > { %4093 = vmatprep.subr.bf16.mxu0 %v7059_v6  ;;  %v7009_v12 = vld [vmem:[#allocation7 + $0x608] ss:$16 sps:$4 sm:$0xff]  }
 0x17c   : > { %2332 = vmatmul.mubr.bf16.vlgmr.msra.gmra.mrb[8].mxu1 %v7971_v15  ;;  %v6970_v15 = vld [vmem:[#allocation7 + $0x468] ss:$16 sps:$4 sm:$0xff]  }
 0x17d   : > { %2226 = vmatmul.mubr.bf16.vlgmr.msra.gmra.mrb[0].mxu0 %v8029_v40  ;;  %2353 = vmatpush1.bf16.msra.mxu1 %v6961_v59  ;;  %v7017_v59 = vld [vmem:[#allocation7 + $0x64c] ss:$16 sps:$4 sm:$0xff]   ;;  %v7024_v6 = vld [vmem:[#allocation7 + $0x6a8] ss:$16 sps:$4 sm:$0xff]  }
 0x17e   : > { %2235 = vmatprep.mubr.bf16.mxu0 %v8031_v63  ;;  %2354 = vmatprep.subr.bf16.mxu1 %v6966_v62  ;;  %v7015_v62 = vld [vmem:[#allocation7 + $0x648] ss:$16 sps:$4 sm:$0xff]  }
 0x17f   : > { %2341 = vmatprep.mubr.bf16.mxu1 %v7985_v46  ;;  %4094 = vmatpush1.bf16.msra.mxu0 %v7057_v5  ;;  %v7060_v46 = vld [vmem:[#allocation12 + $0x10] ss:$8 sps:$4 sm:$0xff]  }
 0x180   : > { %4095 = vmatprep.subr.bf16.mxu0 %v7062_v7  ;;  %v7090_v5 = vld [vmem:[#allocation12 + $0xb0] ss:$8 sps:$4 sm:$0xff]  }
 0x181   : > { %2355 = vmatpush1.bf16.msra.mxu1 %v6964_v0  ;;  %v7020_v0 = vld [vmem:[#allocation7 + $0x66c] ss:$16 sps:$4 sm:$0xff]  }
 0x182   : > { %2356 = vmatprep.subr.bf16.mxu1 %v6969_v2  ;;  %v7089_v2 = vld [vmem:[#allocation12 + $0xa4] ss:$8 sps:$4 sm:$0xff]  }
 0x183   : > { %4096 = vmatpush1.bf16.msra.mxu0 %v7060_v46 }
 0x184   : > { %2342 = vmatmul.mubr.bf16.gmra.mrb[12].mxu1 %v7992_v53  ;;  %v7068_v53 = vld [vmem:[#allocation12 + $0x34] ss:$8 sps:$4 sm:$0xff]   ;;  %4097 = vmatprep.subr.bf16.mxu0 %v7065_v55  ;;  %v7027_v55 = vld [vmem:[#allocation7 + $0x6c8] ss:$16 sps:$4 sm:$0xff]  }
 0x185   : > { %2236 = vmatmul.mubr.bf16.gmra.mrb[4].mxu0 %v8039_v3  ;;  %2357 = vmatpush1.bf16.msra.mxu1 %v6967_v41  ;;  %v7021_v41 = vld [vmem:[#allocation7 + $0x688] ss:$16 sps:$4 sm:$0xff]  }
 0x186   : > { %2384 = vmatprep.mubr.bf16.mxu1 %v7998_v60  ;;  %2358 = vmatprep.subr.bf16.mxu1 %v6972_v4  ;;  %v7066_v60 = vld [vmem:[#allocation12 + $0x30] ss:$8 sps:$4 sm:$0xff]   ;;  %v7092_v4 = vld [vmem:[#allocation12 + $0xb4] ss:$8 sps:$4 sm:$0xff]  }
 0x187   : > { %4098 = vmatpush1.bf16.msra.mxu0 %v7063_v11  ;;  %v7032_v11 = vld [vmem:[#allocation7 + $0x6ec] ss:$16 sps:$4 sm:$0xff]  }
 0x188   : > { %4099 = vmatprep.subr.bf16.mxu0 %v7068_v53  ;;  %v7098_v53 = vld [vmem:[#allocation12 + $0xd4] ss:$8 sps:$4 sm:$0xff]  }
 0x189   : > { %2359 = vmatpush1.bf16.msra.mxu1 %v6970_v15 }
 0x18a   : > { %2360 = vmatprep.subr.bf16.mxu1 %v6975_v8  ;;  %v7093_v8 = vld [vmem:[#allocation12 + $0xc0] ss:$8 sps:$4 sm:$0xff]  }
 0x18b   : > { %4100 = vmatpush1.bf16.msra.mxu0 %v7066_v60  ;;  %v7035_v60 = vld [vmem:[#allocation7 + $0x70c] ss:$16 sps:$4 sm:$0xff]  }
 0x18c   : > { %4101 = vmatprep.subr.bf16.mxu0 %v7071_v16  ;;  %v7101_v16 = vld [vmem:[#allocation12 + $0xe4] ss:$8 sps:$4 sm:$0xff]  }
 0x18d   : > { %2361 = vmatpush1.bf16.msra.mxu1 %v6973_v9  ;;  %v7641_v9 = vmov 0.0  }
 0x18e   : > { %2362 = vmatprep.subr.bf16.mxu1 %v6978_v10  ;;  %2551 = vst [vmem:[#allocation2 + $0x8] sm:$0xff] %v7641_v9  ;;  %2550 = vst [vmem:[#allocation2] sm:$0xff] %v7641_v9 }
 0x18f   : > { %4102 = vmatpush1.bf16.msra.mxu0 %v7069_v19  ;;  %2552 = vst [vmem:[#allocation2 + $0x10] sm:$0xff] %v7641_v9  ;;  %2553 = vst [vmem:[#allocation2 + $0x18] sm:$0xff] %v7641_v9  ;;  %v7038_v19 = vld [vmem:[#allocation7 + $0x72c] ss:$16 sps:$4 sm:$0xff]  }
 0x190   : > { %4103 = vmatprep.subr.bf16.mxu0 %v7074_v20  ;;  %2554 = vst [vmem:[#allocation2 + $0xa0] sm:$0xff] %v7641_v9  ;;  %2555 = vst [vmem:[#allocation2 + $0xa8] sm:$0xff] %v7641_v9  ;;  %v7104_v20 = vld [vmem:[#allocation12 + $0xf4] ss:$8 sps:$4 sm:$0xff]  }
 0x191   : > { %2363 = vmatpush1.bf16.msra.mxu1 %v6976_v13  ;;  %2556 = vst [vmem:[#allocation2 + $0xb0] sm:$0xff] %v7641_v9  ;;  %2557 = vst [vmem:[#allocation2 + $0xb8] sm:$0xff] %v7641_v9  ;;  %v7096_v13 = vld [vmem:[#allocation12 + $0xd0] ss:$8 sps:$4 sm:$0xff]  }
 0x192   : > { %2364 = vmatprep.subr.bf16.mxu1 %v6981_v14  ;;  %v7030_v14 = vld [vmem:[#allocation7 + $0x6e8] ss:$16 sps:$4 sm:$0xff]  }
 0x193   : > { %4104 = vmatpush1.bf16.msra.mxu0 %v7072_v23  ;;  %v7041_v23 = vld [vmem:[#allocation7 + $0x74c] ss:$16 sps:$4 sm:$0xff]  }
 0x194   : > { %4105 = vmatprep.subr.bf16.mxu0 %v7077_v24  ;;  %v7039_v24 = vld [vmem:[#allocation7 + $0x748] ss:$16 sps:$4 sm:$0xff]  }
 0x195   : > { %2365 = vmatpush1.bf16.msra.mxu1 %v6979_v17  ;;  %v7099_v17 = vld [vmem:[#allocation12 + $0xe0] ss:$8 sps:$4 sm:$0xff]  }
 0x196   : > { %2366 = vmatprep.subr.bf16.mxu1 %v6984_v18  ;;  %v7033_v18 = vld [vmem:[#allocation7 + $0x708] ss:$16 sps:$4 sm:$0xff]  }
 0x197   : > { %4106 = vmatpush1.bf16.msra.mxu0 %v7075_v27 }
 0x198   : > { %4107 = vmatprep.subr.bf16.mxu0 %v7080_v28  ;;  %v7042_v28 = vld [vmem:[#allocation7 + $0x768] ss:$16 sps:$4 sm:$0xff]  }
 0x199   : > { %2367 = vmatpush1.bf16.msra.mxu1 %v6982_v21  ;;  %v7102_v21 = vld [vmem:[#allocation12 + $0xf0] ss:$8 sps:$4 sm:$0xff]  }
 0x19a   : > { %2368 = vmatprep.subr.bf16.mxu1 %v6987_v22  ;;  %v7036_v22 = vld [vmem:[#allocation7 + $0x728] ss:$16 sps:$4 sm:$0xff]  }
 0x19b   : > { %4108 = vmatpush1.bf16.msra.mxu0 %v7078_v31 }
 0x19c   : > { %4109 = vmatprep.subr.bf16.mxu0 %v7083_v32  ;;  %v7045_v32 = vld [vmem:[#allocation7 + $0x788] ss:$16 sps:$4 sm:$0xff]  }
 0x19d   : > { %2369 = vmatpush1.bf16.msra.mxu1 %v6985_v25  ;;  %v7044_v25 = vld [vmem:[#allocation7 + $0x76c] ss:$16 sps:$4 sm:$0xff]  }
 0x19e   : > { %2370 = vmatprep.subr.bf16.mxu1 %v6990_v26 }
 0x19f   : > { %4110 = vmatpush1.bf16.msra.mxu0 %v7081_v35  ;;  %v7053_v35 = vld [vmem:[#allocation7 + $0x7cc] ss:$16 sps:$4 sm:$0xff]  }
 0x1a0   : > { %4111 = vmatprep.subr.bf16.mxu0 %v7086_v37  ;;  %v7051_v37 = vld [vmem:[#allocation7 + $0x7c8] ss:$16 sps:$4 sm:$0xff]  }
 0x1a1   : > { %2371 = vmatpush1.bf16.msra.mxu1 %v6988_v29 }
 0x1a2   : > { %2372 = vmatprep.subr.bf16.mxu1 %v6993_v30  ;;  %v7047_v30 = vld [vmem:[#allocation7 + $0x78c] ss:$16 sps:$4 sm:$0xff]  }
 0x1a3   : > { %4112 = vmatpush1.bf16.msra.mxu0 %v7084_v42  ;;  %v7054_v42 = vld [vmem:[#allocation7 + $0x7e8] ss:$16 sps:$4 sm:$0xff]  }
 0x1a4   : > { %4113 = vmatprep.subr.bf16.mxu0 %v7089_v2 }
 0x1a5   : > { %2373 = vmatpush1.bf16.msra.mxu1 %v6991_v33  ;;  %v7050_v33 = vld [vmem:[#allocation7 + $0x7ac] ss:$16 sps:$4 sm:$0xff]  }
 0x1a6   : > { %2374 = vmatprep.subr.bf16.mxu1 %v6996_v34  ;;  %v7048_v34 = vld [vmem:[#allocation7 + $0x7a8] ss:$16 sps:$4 sm:$0xff]  }
 0x1a9   : > { %2375 = vmatpush1.bf16.msra.mxu1 %v6994_v38  ;;  %v7107_v38 = vld [vmem:[#allocation12 + $0x104] ss:$8 sps:$4 sm:$0xff]  }
 0x1aa   : > { %2376 = vmatprep.subr.bf16.mxu1 %v6999_v39  ;;  %v7056_v39 = vld [vmem:[#allocation7 + $0x7ec] ss:$16 sps:$4 sm:$0xff]  }
 0x1ad   : > { %2377 = vmatpush1.bf16.msra.mxu1 %v6997_v43  ;;  %v2460_v43 = vlaneseq }
 0x1ae   : > { %2378 = vmatprep.subr.bf16.mxu1 %v7002_v44 }
 0x1af   : > { %v8067_v44 = vshrl.u32 %v2460_v43, 7 }
 0x1b1   : > { %2379 = vmatpush1.bf16.msra.mxu1 %v7000_v47  ;;  %v8070_v47 = vsub.s32 0, %v8067_v44 }
 0x1b2   : > { %2380 = vmatprep.subr.bf16.mxu1 %v7005_v48  ;;  %v8072_v48 = vld [vmem:[#allocation9] sm:$0xf] }
 0x1b5   : > { %2381 = vmatpush1.bf16.msra.mxu1 %v7003_v49  ;;  %v8075_v49 = vsub.s32 1, %v8067_v44 }
 0x1b6   : > { %2382 = vmatprep.subr.bf16.mxu1 %v7008_v51  ;;  %v8077_v51 = vld [vmem:[#allocation10] sm:$0xf] }
 0x1b9   : > { %2383 = vmatpush1.bf16.msra.mxu1 %v7006_v52 }
 0x1ba   : > { %2405 = vmatprep.subr.bf16.mxu1 %v7011_v54  ;;  %v2501_v54 = vrot.slane %v8077_v51, %v8070_v47 }
 0x1bc   : > { %2385 = vmatmul.mubr.bf16.vlgmr.msra.gmra.mrb[8].mxu1 %v8003_v36  ;;  %v7087_v36 = vld [vmem:[#allocation12 + $0xa0] ss:$8 sps:$4 sm:$0xff]  }
 0x1bd   : > { %2406 = vmatpush1.bf16.msra.mxu1 %v7009_v12  ;;  %2394 = vmatprep.mubr.bf16.mxu1 %v8007_v45  ;;  %v7026_v45 = vld [vmem:[#allocation7 + $0x6ac] ss:$16 sps:$4 sm:$0xff]  }
 0x1be   : > { %2407 = vmatprep.subr.bf16.mxu1 %v7014_v57  ;;  %4114 = vmatpush1.bf16.msra.mxu0 %v7087_v36 }
 0x1bf   : > { %4115 = vmatprep.subr.bf16.mxu0 %v7092_v4  ;;  %v2635_v4 = vld [vmem:[#allocation2] sm:$0x80] }
 0x1c1   : > { %2408 = vmatpush1.bf16.msra.mxu1 %v7012_v58  ;;  %v2505_v58 = vrot.slane %v8077_v51, %v8075_v49 }
 0x1c2   : > { %2409 = vmatprep.subr.bf16.mxu1 %v7017_v59  ;;  %4116 = vmatpush1.bf16.msra.mxu0 %v7090_v5 }
 0x1c4   : > { %2395 = vmatmul.mubr.bf16.gmra.mrb[12].mxu1 %v8015_v56  ;;  %v7029_v56 = vld [vmem:[#allocation7 + $0x6cc] ss:$16 sps:$4 sm:$0xff]  }
 0x1c5   : > { %2410 = vmatpush1.bf16.msra.mxu1 %v7015_v62  ;;  %2437 = vmatprep.mubr.bf16.mxu1 %v8019_v61  ;;  %v7095_v61 = vld [vmem:[#allocation12 + $0xc4] ss:$8 sps:$4 sm:$0xff]  }
 0x1c6   : > { %2411 = vmatprep.subr.bf16.mxu1 %v7020_v0  ;;  %4117 = vmatprep.subr.bf16.mxu0 %v7095_v61 }
 0x1c7   : > { %4118 = vmatpush1.bf16.msra.mxu0 %v7093_v8 }
 0x1c8   : > { %4119 = vmatprep.subr.bf16.mxu0 %v7098_v53 }
 0x1c9   : > { %2412 = vmatpush1.bf16.msra.mxu1 %v7018_v1 }
 0x1ca   : > { %2413 = vmatprep.subr.bf16.mxu1 %v7023_v50  ;;  %v8091_v50 = vadd.s32 8, %v8067_v44 }
 0x1cb   : > { %4120 = vmatpush1.bf16.msra.mxu0 %v7096_v13 }
 0x1cc   : > { %4121 = vmatprep.subr.bf16.mxu0 %v7101_v16  ;;  %v2590_v8 = vand.u32 7, %v8091_v50  ;;  %v4467_v50 = vld [vmem:[#allocation13 + $0x20] sm:$0xff] }
 0x1cd   : > { %2414 = vmatpush1.bf16.msra.mxu1 %v7021_v41 }
 0x1ce   : > { %2415 = vmatprep.subr.bf16.mxu1 %v7026_v45  ;;  %vm2628_vm2 = vcmp.ne.s32.totalorder %v2590_v8, 0  ;;  %vm2632_vm9 = vcmp.ne.s32.totalorder %v2590_v8, 7  ;;  %v4471_v8 = vld [vmem:[#allocation13 + $0x40] sm:$0xff] }
 0x1cf   : > { %v8048_v15 = vpop.f32.mrb[0].mxu1  ;;  %4122 = vmatpush1.bf16.msra.mxu0 %v7099_v17 }
 0x1d0   : > { %v8050_v7 = vpop.f32.mrb[1].mxu1  ;;  %4123 = vmatprep.subr.bf16.mxu0 %v7104_v20 }
 0x1d1   : > { %v8052_v46 = vpop.f32.mrb[2].mxu1  ;;  %2416 = vmatpush1.bf16.msra.mxu1 %v7024_v6 }
 0x1d2   : > { %v8054_v10 = vpop.f32.mrb[3].mxu1  ;;  %2417 = vmatprep.subr.bf16.mxu1 %v7029_v56  ;;  %v2583_v56 = vand.u32 7, %v8067_v44 }
 0x1d3   : > { %4124 = vmatpush1.bf16.msra.mxu0 %v7102_v21 }
 0x1d4   : > { %4146 = vmatprep.subr.bf16.mxu0 %v7107_v38  ;;  %vm8111_vm1 = vcmp.ne.s32.totalorder %v2583_v56, 0  ;;  %vm2631_vm8 = vcmp.ne.s32.totalorder %v2583_v56, 7  ;;  %v4463_v56 = vld [vmem:[#allocation13] sm:$0xff] }
 0x1d5   : > { %2418 = vmatpush1.bf16.msra.mxu1 %v7027_v55  ;;  %vm8133_vm3 = vmpackc.low %vm2628_vm2, %vm8111_vm1 }
 0x1d6   : > { %2419 = vmatprep.subr.bf16.mxu1 %v7032_v11  ;;  %v2684_v11 = vrot.slane %v2635_v4, 7  ;;  %v7113_v4 = vld [vmem:[#allocation12 + $0x124] ss:$8 sps:$4 sm:$0xff]   ;;  %vm8267_vm10 = vmpackc.low %vm2632_vm9, %vm2631_vm8 }
 0x1d7   : > { %v8056_v26 = vpop.f32.mrb[4].mxu1 }
 0x1d8   : > { %v8058_v27 = vpop.f32.mrb[5].mxu1 }
 0x1d9   : > { %2420 = vmatpush1.bf16.msra.mxu1 %v7030_v14  ;;  %v8060_v29 = vpop.f32.mrb[6].mxu1 }
 0x1da   : > { %2421 = vmatprep.subr.bf16.mxu1 %v7035_v60  ;;  %v8062_v31 = vpop.f32.mrb[7].mxu1 }
 0x1dd   : > { %2422 = vmatpush1.bf16.msra.mxu1 %v7033_v18 }
 0x1de   : > { %2423 = vmatprep.subr.bf16.mxu1 %v7038_v19  ;;  %v7182_v19 = vld [vmem:[#allocation12 + $0x294] ss:$8 sps:$4 sm:$0xff]  }
 0x1e1   : > { %2424 = vmatpush1.bf16.msra.mxu1 %v7036_v22 }
 0x1e2   : > { %2425 = vmatprep.subr.bf16.mxu1 %v7041_v23 }
 0x1e5   : > { %2426 = vmatpush1.bf16.msra.mxu1 %v7039_v24 }
 0x1e6   : > { %2427 = vmatprep.subr.bf16.mxu1 %v7044_v25 }
 0x1e9   : > { %2428 = vmatpush1.bf16.msra.mxu1 %v7042_v28 }
 0x1ea   : > { %2429 = vmatprep.subr.bf16.mxu1 %v7047_v30 }
 0x1ed   : > { %2430 = vmatpush1.bf16.msra.mxu1 %v7045_v32 }
 0x1ee   : > { %2431 = vmatprep.subr.bf16.mxu1 %v7050_v33 }
 0x1f1   : > { %2432 = vmatpush1.bf16.msra.mxu1 %v7048_v34 }
 0x1f2   : > { %2433 = vmatprep.subr.bf16.mxu1 %v7053_v35 }
 0x1f5   : > { %2434 = vmatpush1.bf16.msra.mxu1 %v7051_v37 }
 0x1f6   : > { %2435 = vmatprep.subr.bf16.mxu1 %v7056_v39 }
 0x1f9   : > { %2436 = vmatpush1.bf16.msra.mxu1 %v7054_v42 }
 0x1fc   : > { %2438 = vmatmul.mubr.bf16.vlgmr.msra.gmra.mrb[8].mxu1 %v8029_v40  ;;  %v2463_v40 = vrot.slane %v8072_v48, %v8070_v47 }
 0x1fd   : > { %2447 = vmatprep.mubr.bf16.mxu1 %v8031_v63  ;;  %v2467_v63 = vrot.slane %v8072_v48, %v8075_v49 }
 0x204   : > { %2448 = vmatmul.mubr.bf16.gmra.mrb[12].mxu1 %v8039_v3 }
 0x250   : > { %v2227_v52 = vpop.f32.mrb[0].mxu0 }
 0x251   : > { %v6477_v3 = vadd.f32 %v2227_v52, %v8048_v15  ;;  %v2229_v12 = vpop.f32.mrb[1].mxu0  ;;  %v2636_v15 = vld [vmem:[#allocation2 + $0x8] sm:$0x80]  ;;  %v7105_v52 = vld [vmem:[#allocation12 + $0x100] ss:$8 sps:$4 sm:$0xff]  }
 0x252   : > { %v6478_v57 = vadd.f32 %v2229_v12, %v8050_v7  ;;  %v2231_v59 = vpop.f32.mrb[2].mxu0  ;;  %v2687_v14 = vrot.slane %v2636_v15, 7 }
 0x253   : > { %v2480_v62 = vmul.f32 %v6477_v3, %v2463_v40  ;;  %v6479_v0 = vadd.f32 %v2231_v59, %v8052_v46  ;;  %v2233_v1 = vpop.f32.mrb[3].mxu0 }
 0x254   : > { %v2481_v2 = vmul.f32 %v6478_v57, %v2467_v63  ;;  %v6480_v36 = vadd.f32 %v2233_v1, %v8054_v10  ;;  %v7110_v57 = vld [vmem:[#allocation12 + $0x114] ss:$8 sps:$4 sm:$0xff]  }
 0x255   : > { %v2518_v41 = vadd.f32 %v2501_v54, %v2480_v62  ;;  %v2484_v45 = vmul.f32 %v6479_v0, %v2463_v40 }
 0x256   : > { %v2519_v5 = vadd.f32 %v2505_v58, %v2481_v2  ;;  %v2485_v6 = vmul.f32 %v6480_v36, %v2467_v63  ;;  %v7108_v36 = vld [vmem:[#allocation12 + $0x110] ss:$8 sps:$4 sm:$0xff]  }
 0x257   : > { %v8095_v61 = vmax.f32 %v2518_v41, 0.0  ;;  %v2522_v7 = vadd.f32 %v2501_v54, %v2484_v45 }
 0x258   : > { %v8098_v46 = vmax.f32 %v2519_v5, 0.0  ;;  %v2523_v55 = vadd.f32 %v2505_v58, %v2485_v6  ;;  %v2237_v9 = vpop.f32.mrb[4].mxu0 }
 0x259   : > { %2558 = vst [vmem:[#allocation2 + $0x20] sm:$0xff] %v8095_v61  ;;  %v8101_v10 = vmax.f32 %v2522_v7, 0.0  ;;  %v6481_v53 = vadd.f32 %v2237_v9, %v8056_v26  ;;  %v2239_v13 = vpop.f32.mrb[5].mxu0  ;;  %v2685_v60 = vrot.slane %v8095_v61, 7  ;;  %v7111_v7 = vld [vmem:[#allocation12 + $0x120] ss:$8 sps:$4 sm:$0xff]  }
 0x25a   : > { %2559 = vst [vmem:[#allocation2 + $0x28] sm:$0xff] %v8098_v46  ;;  %v8106_v16 = vmax.f32 %v2523_v55, 0.0  ;;  %v6482_v17 = vadd.f32 %v2239_v13, %v8058_v27  ;;  %v2241_v18 = vpop.f32.mrb[6].mxu0  ;;  %v2688_v20 = vrot.slane %v8098_v46, 7  ;;  %v7116_v55 = vld [vmem:[#allocation12 + $0x134] ss:$8 sps:$4 sm:$0xff]  }
 0x25b   : > { %2562 = vst [vmem:[#allocation2 + $0x40] sm:$0xff] %v8101_v10  ;;  %v2768_v21 = vpack.c.bf16 %v8101_v10, %v8095_v61  ;;  %v2488_v22 = vmul.f32 %v6481_v53, %v2463_v40  ;;  %v6483_v23 = vadd.f32 %v2241_v18, %v8060_v29  ;;  %v2243_v24 = vpop.f32.mrb[7].mxu0  ;;  %v2686_v28 = vsel %vm2683_vm0, %v2684_v11, %v2685_v60  ;;  %v7114_v13 = vld [vmem:[#allocation12 + $0x130] ss:$8 sps:$4 sm:$0xff]   ;;  %v7215_v61 = vld [vmem:[#allocation12 + $0x344] ss:$8 sps:$4 sm:$0xff]  }
 0x25c   : > { %2563 = vst [vmem:[#allocation2 + $0x48] sm:$0xff] %v8106_v16  ;;  %v2489_v25 = vmul.f32 %v6482_v17, %v2467_v63  ;;  %v6484_v26 = vadd.f32 %v2243_v24, %v8062_v31  ;;  %v2698_v27 = vrot.slane %v8106_v16, 7  ;;  %v2696_v33 = vrot.slane %v8101_v10, 7  ;;  %v7122_v24 = vld [vmem:[#allocation12 + $0x154] ss:$8 sps:$4 sm:$0xff]  }
 0x25d   : > { %v2526_v30 = vadd.f32 %v2501_v54, %v2488_v22  ;;  %v2492_v32 = vmul.f32 %v6483_v23, %v2463_v40  ;;  %v2769_v29 = vpack.c.bf16 %v8106_v16, %v8098_v46  ;;  %v2689_v37 = vsel %vm2683_vm0, %v2687_v14, %v2688_v20  ;;  %v7117_v23 = vld [vmem:[#allocation12 + $0x140] ss:$8 sps:$4 sm:$0xff]   ;;  %v7185_v46 = vld [vmem:[#allocation12 + $0x2a4] ss:$8 sps:$4 sm:$0xff]  }
 0x25e   : > { %v2527_v34 = vadd.f32 %v2505_v58, %v2489_v25  ;;  %v2493_v35 = vmul.f32 %v6484_v26, %v2467_v63  ;;  %v2699_v38 = vsel %vm2683_vm0, %v2688_v20, %v2698_v27  ;;  %v2697_v40 = vsel %vm2683_vm0, %v2685_v60, %v2696_v33  ;;  %v7119_v60 = vld [vmem:[#allocation12 + $0x144] ss:$8 sps:$4 sm:$0xff]   ;;  %v7120_v25 = vld [vmem:[#allocation12 + $0x150] ss:$8 sps:$4 sm:$0xff]   ;;  %v7183_v16 = vld [vmem:[#allocation12 + $0x2a0] ss:$8 sps:$4 sm:$0xff]  }
 0x25f   : > { %v2542_v39 = vmax.f32 %v2526_v30, 0.0  ;;  %v2530_v42 = vadd.f32 %v2501_v54, %v2492_v32  ;;  %v6430_v43 = vpack.c.bf16 %v2699_v38, %v2689_v37  ;;  %v6433_v63 = vpack.c.bf16 %v2697_v40, %v2686_v28  ;;  %v7125_v26 = vld [vmem:[#allocation12 + $0x164] ss:$8 sps:$4 sm:$0xff]   ;;  %v7128_v28 = vld [vmem:[#allocation12 + $0x174] ss:$8 sps:$4 sm:$0xff]  }
 0x260   : > { %v8138_v3 = vmax.f32 %v2527_v34, 0.0  ;;  %v2531_v12 = vadd.f32 %v2505_v58, %v2493_v35  ;;  %v8145_v54 = vadd.s32 16, %v8067_v44  ;;  %v8149_v58 = vadd.s32 24, %v8067_v44  ;;  %v7126_v30 = vld [vmem:[#allocation12 + $0x170] ss:$8 sps:$4 sm:$0xff]  }
 0x261   : > { %2566 = vst [vmem:[#allocation2 + $0x60] sm:$0xff] %v2542_v39  ;;  %v2546_v59 = vmax.f32 %v2530_v42, 0.0  ;;  %6431 = vmatprep.mubr.msk.bf16.mxu0 %vm8133_vm3, %v6430_v43  ;;  %v2704_v62 = vrot.slane %v2542_v39, 7  ;;  %v7131_v32 = vld [vmem:[#allocation12 + $0x184] ss:$8 sps:$4 sm:$0xff]  }
 0x262   : > { %v2547_v0 = vmax.f32 %v2531_v12, 0.0  ;;  %6434 = vmatmul.mubr.msk.bf16.vlgmr.msra.gmra.mrb[8].mxu0 %vm8133_vm3, %v6433_v63  ;;  %v2706_v1 = vrot.slane %v8138_v3, 7  ;;  %v2597_v6 = vand.u32 7, %v8145_v54  ;;  %v2604_v15 = vand.u32 7, %v8149_v58  ;;  %v7134_v34 = vld [vmem:[#allocation12 + $0x194] ss:$8 sps:$4 sm:$0xff]  }
 0x263   : > { %2570 = vst [vmem:[#allocation2 + $0x80] sm:$0xff] %v2546_v59  ;;  %v2705_v2 = vsel %vm2683_vm0, %v2696_v33, %v2704_v62  ;;  %4147 = vmatpush1.bf16.msra.mxu0 %v7105_v52  ;;  %v8152_v41 = vpack.c.bf16 %v2546_v59, %v2542_v39  ;;  %v7129_v33 = vld [vmem:[#allocation12 + $0x180] ss:$8 sps:$4 sm:$0xff]   ;;  %v7132_v35 = vld [vmem:[#allocation12 + $0x190] ss:$8 sps:$4 sm:$0xff]  }
 0x264   : > { %2571 = vst [vmem:[#allocation2 + $0x88] sm:$0xff] %v2547_v0  ;;  %v2707_v45 = vsel %vm2683_vm0, %v2698_v27, %v2706_v1  ;;  %4148 = vmatprep.subr.bf16.mxu0 %v7110_v57  ;;  %v8156_v5 = vpack.c.bf16 %v2547_v0, %v8138_v3  ;;  %vm2629_vm4 = vcmp.ne.s32.totalorder %v2597_v6, 0  ;;  %vm2630_vm5 = vcmp.ne.s32.totalorder %v2604_v15, 0  ;;  %v7123_v27 = vld [vmem:[#allocation12 + $0x160] ss:$8 sps:$4 sm:$0xff]  }
 0x265   : > { %vm8166_vm6 = vmpackc.low %vm2630_vm5, %vm2629_vm4  ;;  %v7137_v37 = vld [vmem:[#allocation12 + $0x1a4] ss:$8 sps:$4 sm:$0xff]   ;;  %v7135_v38 = vld [vmem:[#allocation12 + $0x1a0] ss:$8 sps:$4 sm:$0xff]   ;;  %vm2633_vm11 = vcmp.ne.s32.totalorder %v2597_v6, 7  ;;  %vm2634_vm12 = vcmp.ne.s32.totalorder %v2604_v15, 7 }
 0x266   : > { %v7140_v39 = vld [vmem:[#allocation12 + $0x1b4] ss:$8 sps:$4 sm:$0xff]   ;;  %v7138_v42 = vld [vmem:[#allocation12 + $0x1b0] ss:$8 sps:$4 sm:$0xff]   ;;  %v7143_v43 = vld [vmem:[#allocation12 + $0x1c4] ss:$8 sps:$4 sm:$0xff]  }
 0x267   : > { %4149 = vmatpush1.bf16.msra.mxu0 %v7108_v36  ;;  %v7141_v40 = vld [vmem:[#allocation12 + $0x1c0] ss:$8 sps:$4 sm:$0xff]   ;;  %v7146_v52 = vld [vmem:[#allocation12 + $0x1d4] ss:$8 sps:$4 sm:$0xff]   ;;  %v7144_v12 = vld [vmem:[#allocation12 + $0x1d0] ss:$8 sps:$4 sm:$0xff]  }
 0x268   : > { %4150 = vmatprep.subr.bf16.mxu0 %v7113_v4  ;;  %v7149_v63 = vld [vmem:[#allocation12 + $0x1e4] ss:$8 sps:$4 sm:$0xff]   ;;  %v7147_v57 = vld [vmem:[#allocation12 + $0x1e0] ss:$8 sps:$4 sm:$0xff]   ;;  %v7152_v59 = vld [vmem:[#allocation12 + $0x1f4] ss:$8 sps:$4 sm:$0xff]  }
 0x269   : > { %v7155_v0 = vld [vmem:[#allocation12 + $0x204] ss:$8 sps:$4 sm:$0xff]   ;;  %v7213_v10 = vld [vmem:[#allocation12 + $0x340] ss:$8 sps:$4 sm:$0xff]   ;;  %vm8284_vm13 = vmpackc.low %vm2634_vm12, %vm2633_vm11 }
 0x26a   : > { %v2651_v9 = vld [vmem:[#allocation2 + $0x80] sm:$0x7f]  ;;  %v4464_v54 = vld [vmem:[#allocation13 + $0x8] sm:$0xff] }
 0x26b   : > { %v2652_v11 = vld [vmem:[#allocation2 + $0x88] sm:$0x7f]  ;;  %v2712_v53 = vrot.slane %v2651_v9, 7  ;;  %4151 = vmatpush1.bf16.msra.mxu0 %v7111_v7  ;;  %v7302_v58 = vld [vmem:[#allocation12 + $0x514] ss:$8 sps:$4 sm:$0xff]  }
 0x26c   : > { %v2714_v14 = vrot.slane %v2652_v11, 7  ;;  %4152 = vmatprep.subr.bf16.mxu0 %v7116_v55 }
 0x26d   : > { %v2713_v17 = vsel %vm2683_vm0, %v2704_v62, %v2712_v53  ;;  %v7150_v62 = vld [vmem:[#allocation12 + $0x1f0] ss:$8 sps:$4 sm:$0xff]  }
 0x26e   : > { %v2715_v18 = vsel %vm2683_vm0, %v2706_v1, %v2714_v14  ;;  %v6439_v20 = vpack.c.bf16 %v2713_v17, %v2705_v2  ;;  %v8175_v1 = vsub.s32 2, %v8067_v44  ;;  %v8178_v2 = vsub.s32 3, %v8067_v44 }
 0x26f   : > { %v6436_v22 = vpack.c.bf16 %v2715_v18, %v2707_v45  ;;  %4153 = vmatpush1.bf16.msra.mxu0 %v7114_v13  ;;  %v2637_v18 = vld [vmem:[#allocation2 + $0x10] sm:$0x80] }
 0x270   : > { %4154 = vmatprep.subr.bf16.mxu0 %v7119_v60  ;;  %v2471_v36 = vrot.slane %v8072_v48, %v8175_v1  ;;  %v2475_v45 = vrot.slane %v8072_v48, %v8178_v2  ;;  %v2509_v4 = vrot.slane %v8077_v51, %v8175_v1  ;;  %v2513_v55 = vrot.slane %v8077_v51, %v8178_v2 }
 0x271   : > { %6437 = vmatprep.mubr.msk.bf16.mxu0 %vm8166_vm6, %v6436_v22 }
 0x272   : > { %6440 = vmatmul.mubr.msk.bf16.gmra.mrb[12].mxu0 %vm8166_vm6, %v6439_v20 }
 0x273   : > { %4155 = vmatpush1.bf16.msra.mxu0 %v7117_v23  ;;  %v2638_v23 = vld [vmem:[#allocation2 + $0x18] sm:$0x80] }
 0x274   : > { %4156 = vmatprep.subr.bf16.mxu0 %v7122_v24 }
 0x277   : > { %4157 = vmatpush1.bf16.msra.mxu0 %v7120_v25 }
 0x278   : > { %4158 = vmatprep.subr.bf16.mxu0 %v7125_v26 }
 0x27b   : > { %4159 = vmatpush1.bf16.msra.mxu0 %v7123_v27  ;;  %v2690_v27 = vrot.slane %v2637_v18, 7 }
 0x27c   : > { %4160 = vmatprep.subr.bf16.mxu0 %v7128_v28  ;;  %v2693_v28 = vrot.slane %v2638_v23, 7 }
 0x27f   : > { %4161 = vmatpush1.bf16.msra.mxu0 %v7126_v30 }
 0x280   : > { %4162 = vmatprep.subr.bf16.mxu0 %v7131_v32 }
 0x283   : > { %4163 = vmatpush1.bf16.msra.mxu0 %v7129_v33 }
 0x284   : > { %4164 = vmatprep.subr.bf16.mxu0 %v7134_v34 }
 0x287   : > { %4165 = vmatpush1.bf16.msra.mxu0 %v7132_v35 }
 0x288   : > { %4166 = vmatprep.subr.bf16.mxu0 %v7137_v37 }
 0x28b   : > { %4167 = vmatpush1.bf16.msra.mxu0 %v7135_v38 }
 0x28c   : > { %4168 = vmatprep.subr.bf16.mxu0 %v7140_v39 }
 0x28f   : > { %4169 = vmatpush1.bf16.msra.mxu0 %v7138_v42 }
 0x290   : > { %4170 = vmatprep.subr.bf16.mxu0 %v7143_v43 }
 0x293   : > { %4171 = vmatpush1.bf16.msra.mxu0 %v7141_v40 }
 0x294   : > { %4172 = vmatprep.subr.bf16.mxu0 %v7146_v52 }
 0x297   : > { %4173 = vmatpush1.bf16.msra.mxu0 %v7144_v12 }
 0x298   : > { %4174 = vmatprep.subr.bf16.mxu0 %v7149_v63 }
 0x29b   : > { %4175 = vmatpush1.bf16.msra.mxu0 %v7147_v57 }
 0x29c   : > { %4176 = vmatprep.subr.bf16.mxu0 %v7152_v59 }
 0x29f   : > { %4177 = vmatpush1.bf16.msra.mxu0 %v7150_v62 }
 0x2a0   : > { %4199 = vmatprep.subr.bf16.mxu0 %v7155_v0 }
 0x2cf   : > { %v2439_v7 = vpop.f32.mrb[8].mxu1 }
 0x2d0   : > { %v2482_v9 = vmul.f32 %v2471_v36, %v2439_v7  ;;  %v2441_v11 = vpop.f32.mrb[9].mxu1 }
 0x2d1   : > { %v2483_v53 = vmul.f32 %v2475_v45, %v2441_v11  ;;  %v2443_v13 = vpop.f32.mrb[10].mxu1 }
 0x2d2   : > { %v2520_v14 = vadd.f32 %v2509_v4, %v2482_v9  ;;  %v2486_v60 = vmul.f32 %v2471_v36, %v2443_v13  ;;  %v2445_v17 = vpop.f32.mrb[11].mxu1 }
 0x2d3   : > { %v2521_v20 = vadd.f32 %v2513_v55, %v2483_v53  ;;  %v2487_v22 = vmul.f32 %v2475_v45, %v2445_v17  ;;  %v7153_v17 = vld [vmem:[#allocation12 + $0x200] ss:$8 sps:$4 sm:$0xff]  }
 0x2d4   : > { %v8188_v24 = vmax.f32 %v2520_v14, 0.0  ;;  %v2524_v48 = vadd.f32 %v2509_v4, %v2486_v60 }
 0x2d5   : > { %v8190_v25 = vmax.f32 %v2521_v20, 0.0  ;;  %v2525_v26 = vadd.f32 %v2513_v55, %v2487_v22  ;;  %v7158_v22 = vld [vmem:[#allocation12 + $0x214] ss:$8 sps:$4 sm:$0xff]  }
 0x2d6   : > { %2560 = vst [vmem:[#allocation2 + $0x30] sm:$0xff] %v8188_v24  ;;  %v8193_v51 = vmax.f32 %v2524_v48, 0.0  ;;  %v2691_v30 = vrot.slane %v8188_v24, 7 }
 0x2d7   : > { %2561 = vst [vmem:[#allocation2 + $0x38] sm:$0xff] %v8190_v25  ;;  %v8197_v32 = vmax.f32 %v2525_v26, 0.0  ;;  %v2449_v33 = vpop.f32.mrb[12].mxu1  ;;  %v2694_v34 = vrot.slane %v8190_v25, 7 }
 0x2d8   : > { %2564 = vst [vmem:[#allocation2 + $0x50] sm:$0xff] %v8193_v51  ;;  %v2770_v35 = vpack.c.bf16 %v8193_v51, %v8188_v24  ;;  %v2490_v37 = vmul.f32 %v2471_v36, %v2449_v33  ;;  %v2451_v38 = vpop.f32.mrb[13].mxu1  ;;  %v2700_v39 = vrot.slane %v8193_v51, 7  ;;  %v2692_v52 = vsel %vm2683_vm0, %v2690_v27, %v2691_v30  ;;  %v7255_v51 = vld [vmem:[#allocation12 + $0x420] ss:$8 sps:$4 sm:$0xff]  }
 0x2d9   : > { %v2491_v42 = vmul.f32 %v2475_v45, %v2451_v38  ;;  %v2453_v43 = vpop.f32.mrb[14].mxu1  ;;  %v2702_v40 = vrot.slane %v8197_v32, 7  ;;  %v2771_v12 = vpack.c.bf16 %v8197_v32, %v8190_v25  ;;  %v2695_v62 = vsel %vm2683_vm0, %v2693_v28, %v2694_v34  ;;  %v7227_v25 = vld [vmem:[#allocation12 + $0x384] ss:$8 sps:$4 sm:$0xff]  }
 0x2da   : > { %v2528_v63 = vadd.f32 %v2509_v4, %v2490_v37  ;;  %v2494_v57 = vmul.f32 %v2471_v36, %v2453_v43  ;;  %v2455_v59 = vpop.f32.mrb[15].mxu1  ;;  %v2701_v0 = vsel %vm2683_vm0, %v2691_v30, %v2700_v39  ;;  %v7161_v37 = vld [vmem:[#allocation12 + $0x224] ss:$8 sps:$4 sm:$0xff]   ;;  %v7159_v43 = vld [vmem:[#allocation12 + $0x220] ss:$8 sps:$4 sm:$0xff]  }
 0x2db   : > { %v2529_v7 = vadd.f32 %v2513_v55, %v2491_v42  ;;  %v2495_v9 = vmul.f32 %v2475_v45, %v2455_v59  ;;  %v2703_v11 = vsel %vm2683_vm0, %v2694_v34, %v2702_v40  ;;  %v6445_v53 = vpack.c.bf16 %v2701_v0, %v2692_v52  ;;  %v7164_v52 = vld [vmem:[#allocation12 + $0x234] ss:$8 sps:$4 sm:$0xff]   ;;  %v7162_v59 = vld [vmem:[#allocation12 + $0x230] ss:$8 sps:$4 sm:$0xff]   ;;  %v7167_v0 = vld [vmem:[#allocation12 + $0x244] ss:$8 sps:$4 sm:$0xff]  }
 0x2dc   : > { %v2544_v13 = vmax.f32 %v2528_v63, 0.0  ;;  %v2532_v14 = vadd.f32 %v2509_v4, %v2494_v57  ;;  %v6442_v60 = vpack.c.bf16 %v2703_v11, %v2695_v62  ;;  %v2843_v45 = vrot.slane %v8197_v32, 1  ;;  %v7225_v32 = vld [vmem:[#allocation12 + $0x380] ss:$8 sps:$4 sm:$0xff]  }
 0x2dd   : > { %v8211_v18 = vmax.f32 %v2529_v7, 0.0  ;;  %v2533_v20 = vadd.f32 %v2513_v55, %v2495_v9  ;;  %v7156_v55 = vld [vmem:[#allocation12 + $0x210] ss:$8 sps:$4 sm:$0xff]  }
 0x2de   : > { %2568 = vst [vmem:[#allocation2 + $0x70] sm:$0xff] %v2544_v13  ;;  %v2548_v36 = vmax.f32 %v2532_v14, 0.0  ;;  %6443 = vmatprep.mubr.msk.bf16.mxu0 %vm8133_vm3, %v6442_v60  ;;  %v2708_v23 = vrot.slane %v2544_v13, 7  ;;  %v2787_v48 = vld [vmem:[#allocation2 + $0x38] sm:$0xfe] }
 0x2df   : > { %v2549_v26 = vmax.f32 %v2533_v20, 0.0  ;;  %6446 = vmatmul.mubr.msk.bf16.vlgmr.msra.gmra.mrb[8].mxu0 %vm8133_vm3, %v6445_v53  ;;  %v2710_v4 = vrot.slane %v8211_v18, 7  ;;  %v2842_v27 = vrot.slane %v2787_v48, 1  ;;  %v2851_v28 = vrot.slane %v8211_v18, 1  ;;  %v7170_v14 = vld [vmem:[#allocation12 + $0x254] ss:$8 sps:$4 sm:$0xff]  }
 0x2e0   : > { %2572 = vst [vmem:[#allocation2 + $0x90] sm:$0xff] %v2548_v36  ;;  %4200 = vmatpush1.bf16.msra.mxu0 %v7153_v17  ;;  %v2709_v30 = vsel %vm2683_vm0, %v2700_v39, %v2708_v23  ;;  %v8221_v33 = vpack.c.bf16 %v2548_v36, %v2544_v13  ;;  %v7165_v13 = vld [vmem:[#allocation12 + $0x240] ss:$8 sps:$4 sm:$0xff]   ;;  %v7168_v60 = vld [vmem:[#allocation12 + $0x250] ss:$8 sps:$4 sm:$0xff]  }
 0x2e1   : > { %2573 = vst [vmem:[#allocation2 + $0x98] sm:$0xff] %v2549_v26  ;;  %4201 = vmatprep.subr.bf16.mxu0 %v7158_v22  ;;  %v2711_v34 = vsel %vm2683_vm0, %v2702_v40, %v2710_v4  ;;  %v8225_v31 = vpack.c.bf16 %v2549_v26, %v8211_v18  ;;  %v8228_v38 = vsel %vm2832_vm7, %v2842_v27, %v2843_v45  ;;  %v7173_v17 = vld [vmem:[#allocation12 + $0x264] ss:$8 sps:$4 sm:$0xff]   ;;  %v7171_v20 = vld [vmem:[#allocation12 + $0x260] ss:$8 sps:$4 sm:$0xff]  }
 0x2e2   : > { %v8233_v42 = vsel %vm2832_vm7, %v2843_v45, %v2851_v28  ;;  %v7176_v22 = vld [vmem:[#allocation12 + $0x274] ss:$8 sps:$4 sm:$0xff]   ;;  %v7174_v36 = vld [vmem:[#allocation12 + $0x270] ss:$8 sps:$4 sm:$0xff]   ;;  %v7177_v48 = vld [vmem:[#allocation12 + $0x280] ss:$8 sps:$4 sm:$0xff]  }
 0x2e3   : > { %v6466_v39 = vpack.c.bf16 %v8233_v42, %v8228_v38  ;;  %v7180_v45 = vld [vmem:[#allocation12 + $0x290] ss:$8 sps:$4 sm:$0xff]   ;;  %v7189_v27 = vld [vmem:[#allocation12 + $0x2c0] ss:$8 sps:$4 sm:$0xff]   ;;  %v7323_v42 = vld [vmem:[#allocation12 + $0x584] ss:$8 sps:$4 sm:$0xff]  }
 0x2e4   : > { %4202 = vmatpush1.bf16.msra.mxu0 %v7156_v55  ;;  %v7186_v26 = vld [vmem:[#allocation12 + $0x2b0] ss:$8 sps:$4 sm:$0xff]   ;;  %v7194_v55 = vld [vmem:[#allocation12 + $0x2d4] ss:$8 sps:$4 sm:$0xff]  }
 0x2e5   : > { %4203 = vmatprep.subr.bf16.mxu0 %v7161_v37  ;;  %v7195_v37 = vld [vmem:[#allocation12 + $0x2e0] ss:$8 sps:$4 sm:$0xff]   ;;  %v7318_v38 = vld [vmem:[#allocation12 + $0x570] ss:$8 sps:$4 sm:$0xff]  }
 0x2e7   : > { %v2653_v40 = vld [vmem:[#allocation2 + $0x90] sm:$0x7f] }
 0x2e8   : > { %v2654_v63 = vld [vmem:[#allocation2 + $0x98] sm:$0x7f]  ;;  %v2716_v57 = vrot.slane %v2653_v40, 7  ;;  %4204 = vmatpush1.bf16.msra.mxu0 %v7159_v43  ;;  %v7203_v40 = vld [vmem:[#allocation12 + $0x304] ss:$8 sps:$4 sm:$0xff]  }
 0x2e9   : > { %v2718_v62 = vrot.slane %v2654_v63, 7  ;;  %4205 = vmatprep.subr.bf16.mxu0 %v7164_v52  ;;  %v7200_v43 = vld [vmem:[#allocation12 + $0x2f4] ss:$8 sps:$4 sm:$0xff]   ;;  %v7198_v52 = vld [vmem:[#allocation12 + $0x2f0] ss:$8 sps:$4 sm:$0xff]  }
 0x2ea   : > { %v2717_v7 = vsel %vm2683_vm0, %v2708_v23, %v2716_v57  ;;  %v7179_v23 = vld [vmem:[#allocation12 + $0x284] ss:$8 sps:$4 sm:$0xff]   ;;  %v7201_v63 = vld [vmem:[#allocation12 + $0x300] ss:$8 sps:$4 sm:$0xff]   ;;  %v7206_v57 = vld [vmem:[#allocation12 + $0x314] ss:$8 sps:$4 sm:$0xff]  }
 0x2eb   : > { %v2719_v9 = vsel %vm2683_vm0, %v2710_v4, %v2718_v62  ;;  %v6451_v11 = vpack.c.bf16 %v2717_v7, %v2709_v30  ;;  %v7191_v4 = vld [vmem:[#allocation12 + $0x2c4] ss:$8 sps:$4 sm:$0xff]   ;;  %v7192_v30 = vld [vmem:[#allocation12 + $0x2d0] ss:$8 sps:$4 sm:$0xff]   ;;  %v7212_v7 = vld [vmem:[#allocation12 + $0x334] ss:$8 sps:$4 sm:$0xff]  }
 0x2ec   : > { %v6448_v53 = vpack.c.bf16 %v2719_v9, %v2711_v34  ;;  %4206 = vmatpush1.bf16.msra.mxu0 %v7162_v59  ;;  %v7197_v34 = vld [vmem:[#allocation12 + $0x2e4] ss:$8 sps:$4 sm:$0xff]   ;;  %v7204_v59 = vld [vmem:[#allocation12 + $0x310] ss:$8 sps:$4 sm:$0xff]  }
 0x2ed   : > { %4207 = vmatprep.subr.bf16.mxu0 %v7167_v0  ;;  %v7209_v62 = vld [vmem:[#allocation12 + $0x324] ss:$8 sps:$4 sm:$0xff]   ;;  %v7207_v0 = vld [vmem:[#allocation12 + $0x320] ss:$8 sps:$4 sm:$0xff]   ;;  %v7210_v9 = vld [vmem:[#allocation12 + $0x330] ss:$8 sps:$4 sm:$0xff]  }
 0x2ee   : > { %6449 = vmatprep.mubr.msk.bf16.mxu0 %vm8166_vm6, %v6448_v53  ;;  %v7219_v53 = vld [vmem:[#allocation12 + $0x360] ss:$8 sps:$4 sm:$0xff]  }
 0x2ef   : > { %6452 = vmatmul.mubr.msk.bf16.gmra.mrb[12].mxu0 %vm8166_vm6, %v6451_v11  ;;  %v7221_v11 = vld [vmem:[#allocation12 + $0x364] ss:$8 sps:$4 sm:$0xff]  }
 0x2f0   : > { %4231 = vmatprep.mubr.bf16.mxu0 %v2769_v29  ;;  %4208 = vmatpush1.bf16.msra.mxu0 %v7165_v13  ;;  %v7188_v29 = vld [vmem:[#allocation12 + $0x2b4] ss:$8 sps:$4 sm:$0xff]   ;;  %v7222_v13 = vld [vmem:[#allocation12 + $0x370] ss:$8 sps:$4 sm:$0xff]  }
 0x2f1   : > { %4209 = vmatprep.subr.bf16.mxu0 %v7170_v14  ;;  %v7228_v14 = vld [vmem:[#allocation12 + $0x390] ss:$8 sps:$4 sm:$0xff]  }
 0x2f4   : > { %4210 = vmatpush1.bf16.msra.mxu0 %v7168_v60  ;;  %v7233_v60 = vld [vmem:[#allocation12 + $0x3a4] ss:$8 sps:$4 sm:$0xff]  }
 0x2f5   : > { %4211 = vmatprep.subr.bf16.mxu0 %v7173_v17  ;;  %v7231_v17 = vld [vmem:[#allocation12 + $0x3a0] ss:$8 sps:$4 sm:$0xff]  }
 0x2f8   : > { %4212 = vmatpush1.bf16.msra.mxu0 %v7171_v20  ;;  %v7236_v20 = vld [vmem:[#allocation12 + $0x3b4] ss:$8 sps:$4 sm:$0xff]  }
 0x2f9   : > { %4213 = vmatprep.subr.bf16.mxu0 %v7176_v22  ;;  %v7234_v22 = vld [vmem:[#allocation12 + $0x3b0] ss:$8 sps:$4 sm:$0xff]  }
 0x2fc   : > { %4214 = vmatpush1.bf16.msra.mxu0 %v7174_v36  ;;  %v7239_v36 = vld [vmem:[#allocation12 + $0x3c4] ss:$8 sps:$4 sm:$0xff]  }
 0x2fd   : > { %4215 = vmatprep.subr.bf16.mxu0 %v7179_v23  ;;  %v7237_v23 = vld [vmem:[#allocation12 + $0x3c0] ss:$8 sps:$4 sm:$0xff]  }
 0x300   : > { %4216 = vmatpush1.bf16.msra.mxu0 %v7177_v48  ;;  %v7242_v48 = vld [vmem:[#allocation12 + $0x3d4] ss:$8 sps:$4 sm:$0xff]  }
 0x301   : > { %4217 = vmatprep.subr.bf16.mxu0 %v7182_v19  ;;  %v7240_v19 = vld [vmem:[#allocation12 + $0x3d0] ss:$8 sps:$4 sm:$0xff]  }
 0x304   : > { %4218 = vmatpush1.bf16.msra.mxu0 %v7180_v45  ;;  %v7245_v45 = vld [vmem:[#allocation12 + $0x3e4] ss:$8 sps:$4 sm:$0xff]  }
 0x305   : > { %4219 = vmatprep.subr.bf16.mxu0 %v7185_v46  ;;  %v7243_v46 = vld [vmem:[#allocation12 + $0x3e0] ss:$8 sps:$4 sm:$0xff]  }
 0x308   : > { %4220 = vmatpush1.bf16.msra.mxu0 %v7183_v16  ;;  %v7248_v16 = vld [vmem:[#allocation12 + $0x3f4] ss:$8 sps:$4 sm:$0xff]  }
 0x309   : > { %4221 = vmatprep.subr.bf16.mxu0 %v7188_v29  ;;  %v7246_v29 = vld [vmem:[#allocation12 + $0x3f0] ss:$8 sps:$4 sm:$0xff]  }
 0x30c   : > { %4222 = vmatpush1.bf16.msra.mxu0 %v7186_v26  ;;  %v7251_v26 = vld [vmem:[#allocation12 + $0x404] ss:$8 sps:$4 sm:$0xff]  }
 0x30d   : > { %4223 = vmatprep.subr.bf16.mxu0 %v7191_v4  ;;  %v7249_v4 = vld [vmem:[#allocation12 + $0x400] ss:$8 sps:$4 sm:$0xff]  }
 0x310   : > { %4224 = vmatpush1.bf16.msra.mxu0 %v7189_v27  ;;  %v2789_v27 = vld [vmem:[#allocation2 + $0x48] sm:$0xff] }
 0x311   : > { %4225 = vmatprep.subr.bf16.mxu0 %v7194_v55  ;;  %v7254_v55 = vld [vmem:[#allocation12 + $0x414] ss:$8 sps:$4 sm:$0xff]  }
 0x314   : > { %4226 = vmatpush1.bf16.msra.mxu0 %v7192_v30  ;;  %v2785_v30 = vld [vmem:[#allocation2 + $0x28] sm:$0xfe] }
 0x315   : > { %4227 = vmatprep.subr.bf16.mxu0 %v7197_v34  ;;  %v2837_v34 = vrot.slane %v2789_v27, 1 }
 0x318   : > { %4228 = vmatpush1.bf16.msra.mxu0 %v7195_v37  ;;  %v7252_v37 = vld [vmem:[#allocation12 + $0x410] ss:$8 sps:$4 sm:$0xff]  }
 0x319   : > { %4229 = vmatprep.subr.bf16.mxu0 %v7200_v43  ;;  %v7257_v43 = vld [vmem:[#allocation12 + $0x424] ss:$8 sps:$4 sm:$0xff]  }
 0x31c   : > { %4230 = vmatpush1.bf16.msra.mxu0 %v7198_v52  ;;  %v2836_v52 = vrot.slane %v2785_v30, 1 }
 0x31d   : > { %4252 = vmatprep.subr.bf16.mxu0 %v7203_v40  ;;  %v2847_v40 = vrot.slane %v8138_v3, 1 }
 0x31f   : > { %4232 = vmatmul.mubr.bf16.vlgmr.msra.gmra.mrb[8].mxu0 %v2768_v21  ;;  %v7218_v21 = vld [vmem:[#allocation12 + $0x354] ss:$8 sps:$4 sm:$0xff]   ;;  %v2848_v24 = vsel %vm2832_vm7, %v2837_v34, %v2847_v40 }
 0x320   : > { %4241 = vmatprep.mubr.bf16.mxu0 %v8156_v5  ;;  %4253 = vmatpush1.bf16.msra.mxu0 %v7201_v63  ;;  %v7216_v5 = vld [vmem:[#allocation12 + $0x350] ss:$8 sps:$4 sm:$0xff]   ;;  %v2838_v63 = vsel %vm2832_vm7, %v2836_v52, %v2837_v34  ;;  %v7278_v34 = vld [vmem:[#allocation12 + $0x494] ss:$8 sps:$4 sm:$0xff]  }
 0x321   : > { %4254 = vmatprep.subr.bf16.mxu0 %v7206_v57  ;;  %v6454_v57 = vpack.c.bf16 %v2848_v24, %v2838_v63  ;;  %v7276_v63 = vld [vmem:[#allocation12 + $0x490] ss:$8 sps:$4 sm:$0xff]  }
 0x324   : > { %4255 = vmatpush1.bf16.msra.mxu0 %v7204_v59  ;;  %v7258_v59 = vld [vmem:[#allocation12 + $0x430] ss:$8 sps:$4 sm:$0xff]  }
 0x325   : > { %4256 = vmatprep.subr.bf16.mxu0 %v7209_v62  ;;  %v6291_v62 = vcombine.low %v4463_v56, %v4467_v50 }
 0x327   : > { %4242 = vmatmul.mubr.bf16.gmra.mrb[12].mxu0 %v8152_v41  ;;  %v7224_v41 = vld [vmem:[#allocation12 + $0x374] ss:$8 sps:$4 sm:$0xff]  }
 0x328   : > { %4257 = vmatpush1.bf16.msra.mxu0 %v7207_v0  ;;  %4284 = vmatprep.mubr.bf16.mxu0 %v2771_v12  ;;  %v7230_v12 = vld [vmem:[#allocation12 + $0x394] ss:$8 sps:$4 sm:$0xff]   ;;  %v6292_v0 = vcombine.high %v4463_v56, %v4467_v50  ;;  %v7279_v50 = vld [vmem:[#allocation12 + $0x4a0] ss:$8 sps:$4 sm:$0xff]  }
 0x329   : > { %4258 = vmatprep.subr.bf16.mxu0 %v7212_v7  ;;  %v4475_v7 = vld [vmem:[#allocation13 + $0x60] sm:$0xff] }
 0x32a   : > { %5231 = vmatprep.subr.bf16.mxu1 %v6292_v0  ;;  %v4539_v0 = vld [vmem:[#allocation13 + $0x260] sm:$0xff] }
 0x32b   : > { %5232 = vmatpush1.bf16.msra.mxu1 %v6291_v62  ;;  %v4535_v62 = vld [vmem:[#allocation13 + $0x240] sm:$0xff] }
 0x32c   : > { %4259 = vmatpush1.bf16.msra.mxu0 %v7210_v9  ;;  %v7263_v9 = vld [vmem:[#allocation12 + $0x444] ss:$8 sps:$4 sm:$0xff]  }
 0x32d   : > { %4260 = vmatprep.subr.bf16.mxu0 %v7215_v61  ;;  %v6300_v61 = vcombine.high %v4471_v8, %v4475_v7 }
 0x32f   : > { %5233 = vmatprep.subr.bf16.mxu1 %v6300_v61  ;;  %v6364_v61 = vcombine.high %v4535_v62, %v4539_v0 }
 0x330   : > { %4261 = vmatpush1.bf16.msra.mxu0 %v7213_v10  ;;  %v4479_v10 = vld [vmem:[#allocation13 + $0x80] sm:$0xff] }
 0x331   : > { %4262 = vmatprep.subr.bf16.mxu0 %v7218_v21  ;;  %v4483_v21 = vld [vmem:[#allocation13 + $0xa0] sm:$0xff] }
 0x334   : > { %4263 = vmatpush1.bf16.msra.mxu0 %v7216_v5  ;;  %v6299_v5 = vcombine.low %v4471_v8, %v4475_v7 }
 0x335   : > { %4264 = vmatprep.subr.bf16.mxu0 %v7221_v11  ;;  %v6308_v11 = vcombine.high %v4479_v10, %v4483_v21 }
 0x336   : > { %5234 = vmatpush1.bf16.msra.mxu1 %v6299_v5  ;;  %v4547_v5 = vld [vmem:[#allocation13 + $0x2a0] sm:$0xff] }
 0x337   : > { %5235 = vmatprep.subr.bf16.mxu1 %v6308_v11  ;;  %v7285_v11 = vld [vmem:[#allocation12 + $0x4c0] ss:$8 sps:$4 sm:$0xff]  }
 0x338   : > { %4265 = vmatpush1.bf16.msra.mxu0 %v7219_v53  ;;  %v7266_v53 = vld [vmem:[#allocation12 + $0x454] ss:$8 sps:$4 sm:$0xff]  }
 0x339   : > { %4266 = vmatprep.subr.bf16.mxu0 %v7224_v41  ;;  %v4487_v41 = vld [vmem:[#allocation13 + $0xc0] sm:$0xff] }
 0x33c   : > { %4267 = vmatpush1.bf16.msra.mxu0 %v7222_v13  ;;  %v4491_v13 = vld [vmem:[#allocation13 + $0xe0] sm:$0xff] }
 0x33d   : > { %4268 = vmatprep.subr.bf16.mxu0 %v7227_v25  ;;  %v6307_v25 = vcombine.low %v4479_v10, %v4483_v21  ;;  %v7287_v10 = vld [vmem:[#allocation12 + $0x4c4] ss:$8 sps:$4 sm:$0xff]  }
 0x33e   : > { %v4543_v21 = vld [vmem:[#allocation13 + $0x280] sm:$0xff] }
 0x33f   : > { %5236 = vmatpush1.bf16.msra.mxu1 %v6307_v25  ;;  %v4555_v25 = vld [vmem:[#allocation13 + $0x2e0] sm:$0xff] }
 0x340   : > { %4269 = vmatpush1.bf16.msra.mxu0 %v7225_v32  ;;  %v7264_v32 = vld [vmem:[#allocation12 + $0x450] ss:$8 sps:$4 sm:$0xff]  }
 0x341   : > { %4270 = vmatprep.subr.bf16.mxu0 %v7230_v12  ;;  %v6316_v12 = vcombine.high %v4487_v41, %v4491_v13 }
 0x343   : > { %5237 = vmatprep.subr.bf16.mxu1 %v6316_v12  ;;  %v7288_v12 = vld [vmem:[#allocation12 + $0x4d0] ss:$8 sps:$4 sm:$0xff]  }
 0x344   : > { %4271 = vmatpush1.bf16.msra.mxu0 %v7228_v14  ;;  %v7269_v14 = vld [vmem:[#allocation12 + $0x464] ss:$8 sps:$4 sm:$0xff]  }
 0x345   : > { %4272 = vmatprep.subr.bf16.mxu0 %v7233_v60  ;;  %v4495_v60 = vld [vmem:[#allocation13 + $0x100] sm:$0xff] }
 0x348   : > { %4273 = vmatpush1.bf16.msra.mxu0 %v7231_v17  ;;  %v4499_v17 = vld [vmem:[#allocation13 + $0x120] sm:$0xff] }
 0x349   : > { %4274 = vmatprep.subr.bf16.mxu0 %v7236_v20  ;;  %v6315_v20 = vcombine.low %v4487_v41, %v4491_v13  ;;  %v7290_v41 = vld [vmem:[#allocation12 + $0x4d4] ss:$8 sps:$4 sm:$0xff]   ;;  %v4551_v13 = vld [vmem:[#allocation13 + $0x2c0] sm:$0xff] }
 0x34b   : > { %5238 = vmatpush1.bf16.msra.mxu1 %v6315_v20  ;;  %v4563_v20 = vld [vmem:[#allocation13 + $0x320] sm:$0xff] }
 0x34c   : > { %4275 = vmatpush1.bf16.msra.mxu0 %v7234_v22  ;;  %v7267_v22 = vld [vmem:[#allocation12 + $0x460] ss:$8 sps:$4 sm:$0xff]  }
 0x34d   : > { %4276 = vmatprep.subr.bf16.mxu0 %v7239_v36  ;;  %v6324_v36 = vcombine.high %v4495_v60, %v4499_v17 }
 0x34f   : > { %5239 = vmatprep.subr.bf16.mxu1 %v6324_v36  ;;  %v6379_v36 = vcombine.low %v4551_v13, %v4555_v25 }
 0x350   : > { %4277 = vmatpush1.bf16.msra.mxu0 %v7237_v23  ;;  %v7272_v23 = vld [vmem:[#allocation12 + $0x474] ss:$8 sps:$4 sm:$0xff]  }
 0x351   : > { %4278 = vmatprep.subr.bf16.mxu0 %v7242_v48  ;;  %v4503_v48 = vld [vmem:[#allocation13 + $0x140] sm:$0xff] }
 0x354   : > { %4279 = vmatpush1.bf16.msra.mxu0 %v7240_v19  ;;  %v4507_v19 = vld [vmem:[#allocation13 + $0x160] sm:$0xff] }
 0x355   : > { %4280 = vmatprep.subr.bf16.mxu0 %v7245_v45  ;;  %v6323_v45 = vcombine.low %v4495_v60, %v4499_v17  ;;  %v6331_v27 = vcombine.low %v4503_v48, %v4507_v19  ;;  %v7293_v60 = vld [vmem:[#allocation12 + $0x4e4] ss:$8 sps:$4 sm:$0xff]  }
 0x356   : > { %v4559_v17 = vld [vmem:[#allocation13 + $0x300] sm:$0xff] }
 0x357   : > { %5240 = vmatpush1.bf16.msra.mxu1 %v6323_v45  ;;  %v6388_v45 = vcombine.high %v4559_v17, %v4563_v20 }
 0x358   : > { %4281 = vmatpush1.bf16.msra.mxu0 %v7243_v46  ;;  %v7270_v46 = vld [vmem:[#allocation12 + $0x470] ss:$8 sps:$4 sm:$0xff]  }
 0x359   : > { %4282 = vmatprep.subr.bf16.mxu0 %v7248_v16  ;;  %v6332_v16 = vcombine.high %v4503_v48, %v4507_v19  ;;  %v2797_v48 = vld [vmem:[#allocation2 + $0x88] sm:$0xff] }
 0x35a   : > { %v2801_v19 = vld [vmem:[#allocation2 + $0xa8] sm:$0x1] }
 0x35b   : > { %5241 = vmatprep.subr.bf16.mxu1 %v6332_v16  ;;  %v2788_v16 = vld [vmem:[#allocation2 + $0x40] sm:$0xff] }
 0x35c   : > { %4283 = vmatpush1.bf16.msra.mxu0 %v7246_v29  ;;  %v7275_v29 = vld [vmem:[#allocation12 + $0x484] ss:$8 sps:$4 sm:$0xff]   ;;  %5242 = vmatpush1.bf16.msra.mxu1 %v6331_v27  ;;  %v2863_v27 = vrot.slane %v2801_v19, 1  ;;  %v7339_v19 = vld [vmem:[#allocation12 + $0x5e0] ss:$8 sps:$4 sm:$0xff]  }
 0x35d   : > { %4305 = vmatprep.subr.bf16.mxu0 %v7251_v26  ;;  %v4511_v26 = vld [vmem:[#allocation13 + $0x180] sm:$0xff] }
 0x35f   : > { %4285 = vmatmul.mubr.bf16.vlgmr.msra.gmra.mrb[8].mxu0 %v2770_v35  ;;  %v4579_v35 = vld [vmem:[#allocation13 + $0x3a0] sm:$0xff] }
 0x360   : > { %4294 = vmatprep.mubr.bf16.mxu0 %v8225_v31  ;;  %4306 = vmatpush1.bf16.msra.mxu0 %v7249_v4  ;;  %v7260_v31 = vld [vmem:[#allocation12 + $0x434] ss:$8 sps:$4 sm:$0xff]   ;;  %v4515_v4 = vld [vmem:[#allocation13 + $0x1a0] sm:$0xff] }
 0x361   : > { %4307 = vmatprep.subr.bf16.mxu0 %v7254_v55  ;;  %v7273_v55 = vld [vmem:[#allocation12 + $0x480] ss:$8 sps:$4 sm:$0xff]   ;;  %v6340_v30 = vcombine.high %v4511_v26, %v4515_v4  ;;  %v6339_v52 = vcombine.low %v4511_v26, %v4515_v4  ;;  %v2784_v26 = vld [vmem:[#allocation2 + $0x20] sm:$0xfe]  ;;  %v2855_v4 = vrot.slane %v2797_v48, 1 }
 0x362   : > { %v2794_v48 = vld [vmem:[#allocation2 + $0x70] sm:$0xff] }
 0x363   : > { %5243 = vmatprep.subr.bf16.mxu1 %v6340_v30  ;;  %v7294_v30 = vld [vmem:[#allocation12 + $0x4f0] ss:$8 sps:$4 sm:$0xff]  }
 0x364   : > { %4308 = vmatpush1.bf16.msra.mxu0 %v7252_v37  ;;  %v4519_v37 = vld [vmem:[#allocation13 + $0x1c0] sm:$0xff]  ;;  %5244 = vmatpush1.bf16.msra.mxu1 %v6339_v52 }
 0x365   : > { %4309 = vmatprep.subr.bf16.mxu0 %v7257_v43  ;;  %v4523_v43 = vld [vmem:[#allocation13 + $0x1e0] sm:$0xff] }
 0x366   : > { %v6348_v24 = vcombine.high %v4519_v37, %v4523_v43  ;;  %v6347_v56 = vcombine.low %v4519_v37, %v4523_v43  ;;  %v7299_v37 = vld [vmem:[#allocation12 + $0x504] ss:$8 sps:$4 sm:$0xff]   ;;  %v2833_v43 = vrot.slane %v2784_v26, 1  ;;  %v2849_v26 = vrot.slane %v2794_v48, 1 }
 0x367   : > { %4295 = vmatmul.mubr.bf16.gmra.mrb[12].mxu0 %v8221_v33  ;;  %v7261_v33 = vld [vmem:[#allocation12 + $0x440] ss:$8 sps:$4 sm:$0xff]  }
 0x368   : > { %4310 = vmatpush1.bf16.msra.mxu0 %v7255_v51  ;;  %6455 = vmatprep.mubr.msk.bf16.mxu0 %vm8267_vm10, %v6454_v57  ;;  %v7281_v51 = vld [vmem:[#allocation12 + $0x4a4] ss:$8 sps:$4 sm:$0xff]  }
 0x369   : > { %4311 = vmatprep.subr.bf16.mxu0 %v7260_v31  ;;  %v4527_v31 = vld [vmem:[#allocation13 + $0x200] sm:$0xff]  ;;  %5245 = vmatprep.subr.bf16.mxu1 %v6348_v24  ;;  %v2864_v24 = vsel %vm2832_vm7, %v2855_v4, %v2863_v27 }
 0x36a   : > { %v4531_v57 = vld [vmem:[#allocation13 + $0x220] sm:$0xff]  ;;  %5246 = vmatpush1.bf16.msra.mxu1 %v6347_v56 }
 0x36b   : > { %v6356_v8 = vcombine.high %v4527_v31, %v4531_v57  ;;  %v6355_v7 = vcombine.low %v4527_v31, %v4531_v57  ;;  %v2800_v31 = vld [vmem:[#allocation2 + $0xa0] sm:$0x1]  ;;  %v7297_v56 = vld [vmem:[#allocation12 + $0x500] ss:$8 sps:$4 sm:$0xff]  }
 0x36c   : > { %4312 = vmatpush1.bf16.msra.mxu0 %v7258_v59  ;;  %v7284_v59 = vld [vmem:[#allocation12 + $0x4b4] ss:$8 sps:$4 sm:$0xff]   ;;  %v2861_v15 = vrot.slane %v2800_v31, 1 }
 0x36d   : > { %4313 = vmatprep.subr.bf16.mxu0 %v7263_v9  ;;  %v7282_v9 = vld [vmem:[#allocation12 + $0x4b0] ss:$8 sps:$4 sm:$0xff]   ;;  %5247 = vmatprep.subr.bf16.mxu1 %v6356_v8  ;;  %v7305_v8 = vld [vmem:[#allocation12 + $0x524] ss:$8 sps:$4 sm:$0xff]  }
 0x36e   : > { %5248 = vmatpush1.bf16.msra.mxu1 %v6355_v7 }
 0x36f   : > { %5249 = vmatprep.subr.bf16.mxu1 %v6364_v61  ;;  %v7306_v61 = vld [vmem:[#allocation12 + $0x530] ss:$8 sps:$4 sm:$0xff]  }
 0x370   : > { %4314 = vmatpush1.bf16.msra.mxu0 %v7261_v33  ;;  %v6363_v33 = vcombine.low %v4535_v62, %v4539_v0  ;;  %v7303_v0 = vld [vmem:[#allocation12 + $0x520] ss:$8 sps:$4 sm:$0xff]  }
 0x371   : > { %4315 = vmatprep.subr.bf16.mxu0 %v7266_v53  ;;  %v6372_v53 = vcombine.high %v4543_v21, %v4547_v5 }
 0x372   : > { %5250 = vmatpush1.bf16.msra.mxu1 %v6363_v33  ;;  %v7312_v33 = vld [vmem:[#allocation12 + $0x550] ss:$8 sps:$4 sm:$0xff]  }
 0x373   : > { %5251 = vmatprep.subr.bf16.mxu1 %v6372_v53  ;;  %v7315_v53 = vld [vmem:[#allocation12 + $0x560] ss:$8 sps:$4 sm:$0xff]  }
 0x374   : > { %4316 = vmatpush1.bf16.msra.mxu0 %v7264_v32  ;;  %v6371_v32 = vcombine.low %v4543_v21, %v4547_v5  ;;  %v7309_v21 = vld [vmem:[#allocation12 + $0x540] ss:$8 sps:$4 sm:$0xff]   ;;  %v7314_v5 = vld [vmem:[#allocation12 + $0x554] ss:$8 sps:$4 sm:$0xff]  }
 0x375   : > { %4317 = vmatprep.subr.bf16.mxu0 %v7269_v14  ;;  %v6380_v14 = vcombine.high %v4551_v13, %v4555_v25  ;;  %v7326_v13 = vld [vmem:[#allocation12 + $0x594] ss:$8 sps:$4 sm:$0xff]   ;;  %v7324_v25 = vld [vmem:[#allocation12 + $0x590] ss:$8 sps:$4 sm:$0xff]  }
 0x376   : > { %5252 = vmatpush1.bf16.msra.mxu1 %v6371_v32  ;;  %v7329_v32 = vld [vmem:[#allocation12 + $0x5a4] ss:$8 sps:$4 sm:$0xff]  }
 0x377   : > { %5253 = vmatprep.subr.bf16.mxu1 %v6380_v14  ;;  %v7332_v14 = vld [vmem:[#allocation12 + $0x5b4] ss:$8 sps:$4 sm:$0xff]  }
 0x378   : > { %4318 = vmatpush1.bf16.msra.mxu0 %v7267_v22  ;;  %v2792_v22 = vld [vmem:[#allocation2 + $0x60] sm:$0xff] }
 0x379   : > { %4319 = vmatprep.subr.bf16.mxu0 %v7272_v23  ;;  %v7291_v23 = vld [vmem:[#allocation12 + $0x4e0] ss:$8 sps:$4 sm:$0xff]  }
 0x37a   : > { %5254 = vmatpush1.bf16.msra.mxu1 %v6379_v36  ;;  %v7336_v36 = vld [vmem:[#allocation12 + $0x5d0] ss:$8 sps:$4 sm:$0xff]  }
 0x37b   : > { %5255 = vmatprep.subr.bf16.mxu1 %v6388_v45  ;;  %v2799_v45 = vld [vmem:[#allocation2 + $0x98] sm:$0xff] }
 0x37c   : > { %4320 = vmatpush1.bf16.msra.mxu0 %v7270_v46  ;;  %v7296_v46 = vld [vmem:[#allocation12 + $0x4f4] ss:$8 sps:$4 sm:$0xff]   ;;  %v2859_v27 = vrot.slane %v2799_v45, 1 }
 0x37d   : > { %4321 = vmatprep.subr.bf16.mxu0 %v7275_v29  ;;  %v2845_v29 = vrot.slane %v2792_v22, 1  ;;  %v7338_v22 = vld [vmem:[#allocation12 + $0x5d4] ss:$8 sps:$4 sm:$0xff]  }
 0x380   : > { %4322 = vmatpush1.bf16.msra.mxu0 %v7273_v55  ;;  %v6387_v55 = vcombine.low %v4559_v17, %v4563_v20  ;;  %v7335_v17 = vld [vmem:[#allocation12 + $0x5c4] ss:$8 sps:$4 sm:$0xff]   ;;  %v7333_v20 = vld [vmem:[#allocation12 + $0x5c0] ss:$8 sps:$4 sm:$0xff]  }
 0x381   : > { %4323 = vmatprep.subr.bf16.mxu0 %v7278_v34  ;;  %v2834_v34 = vrot.slane %v2788_v16, 1  ;;  %v7344_v16 = vld [vmem:[#allocation12 + $0x5f4] ss:$8 sps:$4 sm:$0xff]  }
 0x382   : > { %5256 = vmatpush1.bf16.msra.mxu1 %v6387_v55 }
 0x383   : > { %v2846_v52 = vsel %vm2832_vm7, %v2834_v34, %v2845_v29  ;;  %v2835_v57 = vsel %vm2832_vm7, %v2833_v43, %v2834_v34 }
 0x384   : > { %4324 = vmatpush1.bf16.msra.mxu0 %v7276_v63  ;;  %v2856_v63 = vsel %vm2832_vm7, %v2847_v40, %v2855_v4  ;;  %v7300_v40 = vld [vmem:[#allocation12 + $0x510] ss:$8 sps:$4 sm:$0xff]   ;;  %v2786_v4 = vld [vmem:[#allocation2 + $0x30] sm:$0xfe] }
 0x385   : > { %4325 = vmatprep.subr.bf16.mxu0 %v7281_v51  ;;  %v2796_v51 = vld [vmem:[#allocation2 + $0x80] sm:$0xff]  ;;  %v6460_v6 = vpack.c.bf16 %v2864_v24, %v2856_v63  ;;  %v2798_v24 = vld [vmem:[#allocation2 + $0x90] sm:$0xff] }
 0x386   : > { %v2853_v3 = vrot.slane %v2796_v51, 1  ;;  %v2802_v51 = vld [vmem:[#allocation2 + $0xb0] sm:$0x1] }
 0x388   : > { %4326 = vmatpush1.bf16.msra.mxu0 %v7279_v50  ;;  %v6457_v50 = vpack.c.bf16 %v2846_v52, %v2835_v57  ;;  %v2862_v62 = vsel %vm2832_vm7, %v2853_v3, %v2861_v15  ;;  %v2860_v52 = vsel %vm2832_vm7, %v2851_v28, %v2859_v27  ;;  %v4571_v15 = vld [vmem:[#allocation13 + $0x360] sm:$0xff] }
 0x389   : > { %4327 = vmatprep.subr.bf16.mxu0 %v7284_v59  ;;  %v2854_v59 = vsel %vm2832_vm7, %v2845_v29, %v2853_v3  ;;  %v2790_v29 = vld [vmem:[#allocation2 + $0x50] sm:$0xff]  ;;  %v4567_v3 = vld [vmem:[#allocation13 + $0x340] sm:$0xff] }
 0x38a   : > { %v6463_v7 = vpack.c.bf16 %v2862_v62, %v2854_v59  ;;  %v2840_v34 = vrot.slane %v2790_v29, 1  ;;  %v4575_v59 = vld [vmem:[#allocation13 + $0x380] sm:$0xff] }
 0x38b   : > { %v6404_v62 = vcombine.high %v4575_v59, %v4579_v35 }
 0x38c   : > { %4328 = vmatpush1.bf16.msra.mxu0 %v7282_v9  ;;  %v7308_v9 = vld [vmem:[#allocation12 + $0x534] ss:$8 sps:$4 sm:$0xff]   ;;  %v2850_v43 = vsel %vm2832_vm7, %v2840_v34, %v2849_v26 }
 0x38d   : > { %4329 = vmatprep.subr.bf16.mxu0 %v7287_v10  ;;  %v7311_v10 = vld [vmem:[#allocation12 + $0x544] ss:$8 sps:$4 sm:$0xff]  }
 0x390   : > { %4330 = vmatpush1.bf16.msra.mxu0 %v7285_v11  ;;  %v7317_v11 = vld [vmem:[#allocation12 + $0x564] ss:$8 sps:$4 sm:$0xff]  }
 0x391   : > { %4331 = vmatprep.subr.bf16.mxu0 %v7290_v41  ;;  %v7320_v41 = vld [vmem:[#allocation12 + $0x574] ss:$8 sps:$4 sm:$0xff]  }
 0x394   : > { %4332 = vmatpush1.bf16.msra.mxu0 %v7288_v12  ;;  %v7327_v12 = vld [vmem:[#allocation12 + $0x5a0] ss:$8 sps:$4 sm:$0xff]  }
 0x395   : > { %4333 = vmatprep.subr.bf16.mxu0 %v7293_v60  ;;  %v7330_v60 = vld [vmem:[#allocation12 + $0x5b0] ss:$8 sps:$4 sm:$0xff]  }
 0x398   : > { %4334 = vmatpush1.bf16.msra.mxu0 %v7291_v23  ;;  %v7341_v23 = vld [vmem:[#allocation12 + $0x5e4] ss:$8 sps:$4 sm:$0xff]  }
 0x399   : > { %4335 = vmatprep.subr.bf16.mxu0 %v7296_v46  ;;  %v2803_v46 = vld [vmem:[#allocation2 + $0xb8] sm:$0x1] }
 0x39a   : > { %v2867_v55 = vrot.slane %v2803_v46, 1 }
 0x39c   : > { %4336 = vmatpush1.bf16.msra.mxu0 %v7294_v30  ;;  %v7342_v30 = vld [vmem:[#allocation12 + $0x5f0] ss:$8 sps:$4 sm:$0xff]   ;;  %v2868_v63 = vsel %vm2832_vm7, %v2859_v27, %v2867_v55 }
 0x39d   : > { %4358 = vmatprep.subr.bf16.mxu0 %v7299_v37  ;;  %v2839_v37 = vrot.slane %v2786_v4, 1  ;;  %v4476_v4 = vld [vmem:[#allocation13 + $0x68] sm:$0xff] }
 0x39f   : > { %6458 = vmatmul.mubr.msk.bf16.vlgmr.msra.gmra.mrb[8].mxu0 %vm8267_vm10, %v6457_v50  ;;  %v2841_v31 = vsel %vm2832_vm7, %v2839_v37, %v2840_v34  ;;  %v2857_v50 = vrot.slane %v2798_v24, 1 }
 0x3a0   : > { %6461 = vmatprep.mubr.msk.bf16.mxu0 %vm8284_vm13, %v6460_v6  ;;  %4359 = vmatpush1.bf16.msra.mxu0 %v7297_v56  ;;  %v6469_v57 = vpack.c.bf16 %v2850_v43, %v2841_v31  ;;  %v6472_v56 = vpack.c.bf16 %v2868_v63, %v2860_v52 }
 0x3a1   : > { %4360 = vmatprep.subr.bf16.mxu0 %v7302_v58  ;;  %v2865_v58 = vrot.slane %v2802_v51, 1  ;;  %v2858_v18 = vsel %vm2832_vm7, %v2849_v26, %v2857_v50  ;;  %v4472_v26 = vld [vmem:[#allocation13 + $0x48] sm:$0xff] }
 0x3a2   : > { %v6302_v51 = vcombine.high %v4472_v26, %v4476_v4 }
 0x3a3   : > { %v2866_v28 = vsel %vm2832_vm7, %v2857_v50, %v2865_v58  ;;  %v4484_v50 = vld [vmem:[#allocation13 + $0xa8] sm:$0xff] }
 0x3a4   : > { %4361 = vmatpush1.bf16.msra.mxu0 %v7300_v40  ;;  %v6475_v6 = vpack.c.bf16 %v2866_v28, %v2858_v18  ;;  %v6396_v40 = vcombine.high %v4567_v3, %v4571_v15  ;;  %v6301_v28 = vcombine.low %v4472_v26, %v4476_v4  ;;  %v4556_v26 = vld [vmem:[#allocation13 + $0x2e8] sm:$0xff] }
 0x3a5   : > { %4362 = vmatprep.subr.bf16.mxu0 %v7305_v8  ;;  %v6395_v8 = vcombine.low %v4567_v3, %v4571_v15 }
 0x3a6   : > { %5257 = vmatprep.subr.bf16.mxu1 %v6396_v40 }
 0x3a7   : > { %6464 = vmatmul.mubr.msk.bf16.gmra.mrb[12].mxu0 %vm8284_vm13, %v6463_v7  ;;  %5258 = vmatpush1.bf16.msra.mxu1 %v6395_v8  ;;  %v4583_v7 = vld [vmem:[#allocation13 + $0x3c0] sm:$0xff] }
 0x3a8   : > { %4363 = vmatpush1.bf16.msra.mxu0 %v7303_v0  ;;  %6467 = vmatprep.mubr.msk.bf16.mxu0 %vm8267_vm10, %v6466_v39  ;;  %v7321_v39 = vld [vmem:[#allocation12 + $0x580] ss:$8 sps:$4 sm:$0xff]   ;;  %v6403_v0 = vcombine.low %v4575_v59, %v4579_v35 }
 0x3a9   : > { %4364 = vmatprep.subr.bf16.mxu0 %v7308_v9  ;;  %5259 = vmatprep.subr.bf16.mxu1 %v6404_v62  ;;  %v4587_v9 = vld [vmem:[#allocation13 + $0x3e0] sm:$0xff]  ;;  %v4488_v59 = vld [vmem:[#allocation13 + $0xc8] sm:$0xff] }
 0x3aa   : > { %v4492_v35 = vld [vmem:[#allocation13 + $0xe8] sm:$0xff] }
 0x3ab   : > { %5260 = vmatpush1.bf16.msra.mxu1 %v6403_v0 }
 0x3ac   : > { %4365 = vmatpush1.bf16.msra.mxu0 %v7306_v61  ;;  %v6412_v61 = vcombine.high %v4583_v7, %v4587_v9 }
 0x3ad   : > { %4366 = vmatprep.subr.bf16.mxu0 %v7311_v10  ;;  %v6411_v10 = vcombine.low %v4583_v7, %v4587_v9  ;;  %v6318_v9 = vcombine.high %v4488_v59, %v4492_v35 }
 0x3ae   : > { %5261 = vmatprep.subr.bf16.mxu1 %v6412_v61  ;;  %v4496_v61 = vld [vmem:[#allocation13 + $0x108] sm:$0xff] }
 0x3af   : > { %5262 = vmatpush1.bf16.msra.mxu1 %v6411_v10  ;;  %v4500_v10 = vld [vmem:[#allocation13 + $0x128] sm:$0xff] }
 0x3b0   : > { %4367 = vmatpush1.bf16.msra.mxu0 %v7309_v21  ;;  %v4468_v21 = vld [vmem:[#allocation13 + $0x28] sm:$0xff] }
 0x3b1   : > { %4368 = vmatprep.subr.bf16.mxu0 %v7314_v5  ;;  %v6294_v5 = vcombine.high %v4464_v54, %v4468_v21 }
 0x3b3   : > { %5284 = vmatprep.subr.bf16.mxu1 %v6294_v5  ;;  %v4504_v5 = vld [vmem:[#allocation13 + $0x148] sm:$0xff] }
 0x3b4   : > { %4369 = vmatpush1.bf16.msra.mxu0 %v7312_v33  ;;  %v6293_v33 = vcombine.low %v4464_v54, %v4468_v21  ;;  %v6317_v54 = vcombine.low %v4488_v59, %v4492_v35  ;;  %v6326_v21 = vcombine.high %v4496_v61, %v4500_v10  ;;  %v4473_v35 = vld [vmem:[#allocation13 + $0x50] sm:$0xff] }
 0x3b5   : > { %4370 = vmatprep.subr.bf16.mxu0 %v7317_v11  ;;  %v4411_v11 = vld [vmem:[%s8511_s5] sm:$0x3] }
 0x3b8   : > { %4371 = vmatpush1.bf16.msra.mxu0 %v7315_v53  ;;  %v4431_v53 = vld [vmem:[%s8512_s6] sm:$0x3] }
 0x3b9   : > { %4372 = vmatprep.subr.bf16.mxu0 %v7320_v41  ;;  %v4416_v41 = vrot.slane %v4411_v11, %v8070_v47 }
 0x3bc   : > { %4373 = vmatpush1.bf16.msra.mxu0 %v7318_v38  ;;  %v4420_v38 = vrot.slane %v4411_v11, %v8075_v49  ;;  %v6325_v11 = vcombine.low %v4496_v61, %v4500_v10  ;;  %v4481_v10 = vld [vmem:[#allocation13 + $0x90] sm:$0xff] }
 0x3bd   : > { %4374 = vmatprep.subr.bf16.mxu0 %v7323_v42  ;;  %v4436_v42 = vrot.slane %v4431_v53, %v8070_v47 }
 0x3c0   : > { %4375 = vmatpush1.bf16.msra.mxu0 %v7321_v39 }
 0x3c1   : > { %4376 = vmatprep.subr.bf16.mxu0 %v7326_v13  ;;  %v4440_v13 = vrot.slane %v4431_v53, %v8075_v49 }
 0x3c4   : > { %4377 = vmatpush1.bf16.msra.mxu0 %v7324_v25 }
 0x3c5   : > { %4378 = vmatprep.subr.bf16.mxu0 %v7329_v32 }
 0x3c8   : > { %4379 = vmatpush1.bf16.msra.mxu0 %v7327_v12 }
 0x3c9   : > { %4380 = vmatprep.subr.bf16.mxu0 %v7332_v14 }
 0x3cc   : > { %4381 = vmatpush1.bf16.msra.mxu0 %v7330_v60 }
 0x3cd   : > { %4382 = vmatprep.subr.bf16.mxu0 %v7335_v17 }
 0x3d0   : > { %4383 = vmatpush1.bf16.msra.mxu0 %v7333_v20 }
 0x3d1   : > { %4384 = vmatprep.subr.bf16.mxu0 %v7338_v22 }
 0x3d4   : > { %4385 = vmatpush1.bf16.msra.mxu0 %v7336_v36 }
 0x3d5   : > { %4386 = vmatprep.subr.bf16.mxu0 %v7341_v23 }
 0x3d8   : > { %4387 = vmatpush1.bf16.msra.mxu0 %v7339_v19 }
 0x3d9   : > { %4388 = vmatprep.subr.bf16.mxu0 %v7344_v16 }
 0x3dc   : > { %4389 = vmatpush1.bf16.msra.mxu0 %v7342_v30 }
 0x3df   : > { %6470 = vmatmul.mubr.msk.bf16.vlgmr.msra.gmra.mrb[8].mxu0 %vm8267_vm10, %v6469_v57 }
 0x3e0   : > { %6473 = vmatprep.mubr.msk.bf16.mxu0 %vm8284_vm13, %v6472_v56  ;;  %v4480_v56 = vld [vmem:[#allocation13 + $0x88] sm:$0xff] }
 0x3e1   : > { %v6310_v15 = vcombine.high %v4480_v56, %v4484_v50  ;;  %v6309_v7 = vcombine.low %v4480_v56, %v4484_v50  ;;  %v4580_v56 = vld [vmem:[#allocation13 + $0x3a8] sm:$0xff] }
 0x3e7   : > { %6476 = vmatmul.mubr.msk.bf16.gmra.mrb[12].mxu0 %vm8284_vm13, %v6475_v6 }
 0x4b2   : > { %v4392_v39 = vpop.f32.mrb[8].mxu0 }
 0x4b3   : > { %v4423_v25 = vmul.f32 %v4416_v41, %v4392_v39  ;;  %v4394_v32 = vpop.f32.mrb[9].mxu0 }
 0x4b4   : > { %v4424_v12 = vmul.f32 %v4420_v38, %v4394_v32  ;;  %v4396_v14 = vpop.f32.mrb[10].mxu0 }
 0x4b5   : > { %v4443_v60 = vadd.f32 %v4436_v42, %v4423_v25  ;;  %v4425_v17 = vmul.f32 %v4416_v41, %v4396_v14  ;;  %v4398_v20 = vpop.f32.mrb[11].mxu0  ;;  %v4524_v25 = vld [vmem:[#allocation13 + $0x1e8] sm:$0xff] }
 0x4b6   : > { %v4444_v22 = vadd.f32 %v4440_v13, %v4424_v12  ;;  %v4426_v36 = vmul.f32 %v4420_v38, %v4398_v20  ;;  %v4528_v14 = vld [vmem:[#allocation13 + $0x208] sm:$0xff] }
 0x4b7   : > { %v4445_v23 = vadd.f32 %v4436_v42, %v4425_v17  ;;  %v4451_v19 = vmax.f32 %v4443_v60, 0.0  ;;  %v4532_v60 = vld [vmem:[#allocation13 + $0x228] sm:$0xff] }
 0x4b8   : > { %v4446_v48 = vadd.f32 %v4440_v13, %v4426_v36  ;;  %v4452_v46 = vmax.f32 %v4444_v22, 0.0  ;;  %v6358_v20 = vcombine.high %v4528_v14, %v4532_v60  ;;  %v4536_v22 = vld [vmem:[#allocation13 + $0x248] sm:$0xff] }
 0x4b9   : > { %v4453_v45 = vmax.f32 %v4445_v23, 0.0  ;;  %v4540_v36 = vld [vmem:[#allocation13 + $0x268] sm:$0xff]  ;;  %v6357_v23 = vcombine.low %v4528_v14, %v4532_v60  ;;  %v4513_v60 = vld [vmem:[#allocation13 + $0x190] sm:$0xff] }
 0x4ba   : > { %v4454_v16 = vmax.f32 %v4446_v48, 0.0  ;;  %v4402_v29 = vpop.f32.mrb[12].mxu0  ;;  %v6366_v48 = vcombine.high %v4536_v22, %v4540_v36 }
 0x4bb   : > { %v8325_v27 = vpack.c.bf16 %v4453_v45, %v4451_v19  ;;  %v4427_v55 = vmul.f32 %v4416_v41, %v4402_v29  ;;  %v4404_v30 = vpop.f32.mrb[13].mxu0  ;;  %v4544_v19 = vld [vmem:[#allocation13 + $0x288] sm:$0xff] }
 0x4bc   : > { %v8327_v34 = vpack.c.bf16 %v4454_v16, %v4452_v46  ;;  %v4428_v37 = vmul.f32 %v4420_v38, %v4404_v30  ;;  %v4406_v43 = vpop.f32.mrb[14].mxu0  ;;  %v4548_v45 = vld [vmem:[#allocation13 + $0x2a8] sm:$0xff]  ;;  %v6365_v46 = vcombine.low %v4536_v22, %v4540_v36  ;;  %v4521_v36 = vld [vmem:[#allocation13 + $0x1d0] sm:$0xff] }
 0x4bd   : > { %v4447_v52 = vadd.f32 %v4436_v42, %v4427_v55  ;;  %v4429_v63 = vmul.f32 %v4416_v41, %v4406_v43  ;;  %v4408_v24 = vpop.f32.mrb[15].mxu0  ;;  %v4512_v41 = vld [vmem:[#allocation13 + $0x188] sm:$0xff]  ;;  %v6374_v16 = vcombine.high %v4544_v19, %v4548_v45  ;;  %v6373_v4 = vcombine.low %v4544_v19, %v4548_v45  ;;  %v4529_v45 = vld [vmem:[#allocation13 + $0x210] sm:$0xff] }
 0x4be   : > { %v4448_v31 = vadd.f32 %v4440_v13, %v4428_v37  ;;  %v4430_v57 = vmul.f32 %v4420_v38, %v4408_v24  ;;  %5263 = vmatprep.mubr.bf16.mxu1 %v8327_v34  ;;  %v4516_v38 = vld [vmem:[#allocation13 + $0x1a8] sm:$0xff] }
 0x4bf   : > { %v4449_v58 = vadd.f32 %v4436_v42, %v4429_v63  ;;  %5264 = vmatmul.mubr.bf16.vlgmr.msra.gmra.mrb[16].mxu1 %v8325_v27  ;;  %v4455_v6 = vmax.f32 %v4447_v52, 0.0  ;;  %v6342_v39 = vcombine.high %v4512_v41, %v4516_v38  ;;  %v6341_v32 = vcombine.low %v4512_v41, %v4516_v38  ;;  %v4552_v29 = vld [vmem:[#allocation13 + $0x2c8] sm:$0xff]  ;;  %v4497_v38 = vld [vmem:[#allocation13 + $0x110] sm:$0xff] }
 0x4c0   : > { %v4450_v18 = vadd.f32 %v4440_v13, %v4430_v57  ;;  %5285 = vmatpush1.bf16.msra.mxu1 %v6293_v33  ;;  %v4456_v40 = vmax.f32 %v4448_v31, 0.0  ;;  %v4508_v33 = vld [vmem:[#allocation13 + $0x168] sm:$0xff]  ;;  %v6382_v55 = vcombine.high %v4552_v29, %v4556_v26  ;;  %v6381_v43 = vcombine.low %v4552_v29, %v4556_v26  ;;  %v4537_v26 = vld [vmem:[#allocation13 + $0x250] sm:$0xff] }
 0x4c1   : > { %v4457_v3 = vmax.f32 %v4449_v58, 0.0  ;;  %5286 = vmatprep.subr.bf16.mxu1 %v6302_v51  ;;  %v6334_v53 = vcombine.high %v4504_v5, %v4508_v33  ;;  %v6333_v42 = vcombine.low %v4504_v5, %v4508_v33  ;;  %v4520_v13 = vld [vmem:[#allocation13 + $0x1c8] sm:$0xff]  ;;  %v4489_v33 = vld [vmem:[#allocation13 + $0xd0] sm:$0xff] }
 0x4c2   : > { %v4458_v8 = vmax.f32 %v4450_v18, 0.0  ;;  %v6350_v12 = vcombine.high %v4520_v13, %v4524_v25  ;;  %v6349_v17 = vcombine.low %v4520_v13, %v4524_v25  ;;  %v4560_v30 = vld [vmem:[#allocation13 + $0x308] sm:$0xff]  ;;  %v4505_v25 = vld [vmem:[#allocation13 + $0x150] sm:$0xff] }
 0x4c3   : > { %v8331_v62 = vpack.c.bf16 %v4457_v3, %v4455_v6  ;;  %v4564_v37 = vld [vmem:[#allocation13 + $0x328] sm:$0xff] }
 0x4c4   : > { %v8333_v0 = vpack.c.bf16 %v4458_v8, %v4456_v40  ;;  %5287 = vmatpush1.bf16.msra.mxu1 %v6301_v28  ;;  %v6390_v52 = vcombine.high %v4560_v30, %v4564_v37  ;;  %v4568_v63 = vld [vmem:[#allocation13 + $0x348] sm:$0xff]  ;;  %v6389_v51 = vcombine.low %v4560_v30, %v4564_v37  ;;  %v4469_v40 = vld [vmem:[#allocation13 + $0x30] sm:$0xff] }
 0x4c5   : > { %5288 = vmatprep.subr.bf16.mxu1 %v6310_v15  ;;  %v4572_v24 = vld [vmem:[#allocation13 + $0x368] sm:$0xff]  ;;  %v4465_v15 = vld [vmem:[#allocation13 + $0x10] sm:$0xff] }
 0x4c6   : > { %5273 = vmatprep.mubr.bf16.mxu1 %v8333_v0  ;;  %v6398_v31 = vcombine.high %v4568_v63, %v4572_v24  ;;  %v4576_v57 = vld [vmem:[#allocation13 + $0x388] sm:$0xff]  ;;  %v6397_v50 = vcombine.low %v4568_v63, %v4572_v24  ;;  %v6296_v59 = vcombine.high %v4465_v15, %v4469_v40  ;;  %v4545_v37 = vld [vmem:[#allocation13 + $0x290] sm:$0xff] }
 0x4c7   : > { %5274 = vmatmul.mubr.bf16.gmra.mrb[20].mxu1 %v8331_v62  ;;  %v6406_v58 = vcombine.high %v4576_v57, %v4580_v56  ;;  %v4584_v18 = vld [vmem:[#allocation13 + $0x3c8] sm:$0xff]  ;;  %v6405_v6 = vcombine.low %v4576_v57, %v4580_v56  ;;  %v4553_v24 = vld [vmem:[#allocation13 + $0x2d0] sm:$0xff] }
 0x4c8   : > { %5289 = vmatpush1.bf16.msra.mxu1 %v6309_v7  ;;  %5316 = vmatprep.mubr.bf16.mxu1 %v8327_v34  ;;  %v4588_v28 = vld [vmem:[#allocation13 + $0x3e8] sm:$0xff]  ;;  %v4477_v7 = vld [vmem:[#allocation13 + $0x70] sm:$0xff] }
 0x4c9   : > { %5290 = vmatprep.subr.bf16.mxu1 %v6318_v9  ;;  %v6414_v3 = vcombine.high %v4584_v18, %v4588_v28  ;;  %v6413_v8 = vcombine.low %v4584_v18, %v4588_v28  ;;  %v6295_v9 = vcombine.low %v4465_v15, %v4469_v40  ;;  %v6304_v61 = vcombine.high %v4473_v35, %v4477_v7  ;;  %v4561_v56 = vld [vmem:[#allocation13 + $0x310] sm:$0xff] }
 0x4ca   : > { %v4569_v28 = vld [vmem:[#allocation13 + $0x350] sm:$0xff] }
 0x4cb   : > { %v4577_v40 = vld [vmem:[#allocation13 + $0x390] sm:$0xff] }
 0x4cc   : > { %5291 = vmatpush1.bf16.msra.mxu1 %v6317_v54  ;;  %v4485_v54 = vld [vmem:[#allocation13 + $0xb0] sm:$0xff] }
 0x4cd   : > { %5292 = vmatprep.subr.bf16.mxu1 %v6326_v21  ;;  %v6303_v21 = vcombine.low %v4473_v35, %v4477_v7  ;;  %v6312_v5 = vcombine.high %v4481_v10, %v4485_v54  ;;  %v4585_v7 = vld [vmem:[#allocation13 + $0x3d0] sm:$0xff] }
 0x4d0   : > { %5293 = vmatpush1.bf16.msra.mxu1 %v6325_v11  ;;  %v4493_v11 = vld [vmem:[#allocation13 + $0xf0] sm:$0xff] }
 0x4d1   : > { %5294 = vmatprep.subr.bf16.mxu1 %v6334_v53  ;;  %v6311_v53 = vcombine.low %v4481_v10, %v4485_v54  ;;  %v6320_v41 = vcombine.high %v4489_v33, %v4493_v11  ;;  %v4466_v54 = vld [vmem:[#allocation13 + $0x18] sm:$0xff] }
 0x4d4   : > { %5295 = vmatpush1.bf16.msra.mxu1 %v6333_v42  ;;  %v4501_v42 = vld [vmem:[#allocation13 + $0x130] sm:$0xff] }
 0x4d5   : > { %5296 = vmatprep.subr.bf16.mxu1 %v6342_v39  ;;  %v6319_v39 = vcombine.low %v4489_v33, %v4493_v11  ;;  %v6328_v13 = vcombine.high %v4497_v38, %v4501_v42  ;;  %v4474_v11 = vld [vmem:[#allocation13 + $0x58] sm:$0xff] }
 0x4d8   : > { %5297 = vmatpush1.bf16.msra.mxu1 %v6341_v32  ;;  %v4509_v32 = vld [vmem:[#allocation13 + $0x170] sm:$0xff] }
 0x4d9   : > { %5298 = vmatprep.subr.bf16.mxu1 %v6350_v12  ;;  %v6327_v12 = vcombine.low %v4497_v38, %v4501_v42  ;;  %v6336_v14 = vcombine.high %v4505_v25, %v4509_v32  ;;  %v4482_v42 = vld [vmem:[#allocation13 + $0x98] sm:$0xff] }
 0x4dc   : > { %5299 = vmatpush1.bf16.msra.mxu1 %v6349_v17  ;;  %v4517_v17 = vld [vmem:[#allocation13 + $0x1b0] sm:$0xff] }
 0x4dd   : > { %5300 = vmatprep.subr.bf16.mxu1 %v6358_v20  ;;  %v6335_v20 = vcombine.low %v4505_v25, %v4509_v32  ;;  %v6344_v22 = vcombine.high %v4513_v60, %v4517_v17  ;;  %v4490_v32 = vld [vmem:[#allocation13 + $0xd8] sm:$0xff] }
 0x4e0   : > { %5301 = vmatpush1.bf16.msra.mxu1 %v6357_v23  ;;  %v4525_v23 = vld [vmem:[#allocation13 + $0x1f0] sm:$0xff] }
 0x4e1   : > { %5302 = vmatprep.subr.bf16.mxu1 %v6366_v48  ;;  %v6343_v48 = vcombine.low %v4513_v60, %v4517_v17  ;;  %v6352_v19 = vcombine.high %v4521_v36, %v4525_v23  ;;  %v4498_v17 = vld [vmem:[#allocation13 + $0x118] sm:$0xff] }
 0x4e4   : > { %5303 = vmatpush1.bf16.msra.mxu1 %v6365_v46  ;;  %v4533_v46 = vld [vmem:[#allocation13 + $0x230] sm:$0xff] }
 0x4e5   : > { %5304 = vmatprep.subr.bf16.mxu1 %v6374_v16  ;;  %v6351_v16 = vcombine.low %v4521_v36, %v4525_v23  ;;  %v6360_v29 = vcombine.high %v4529_v45, %v4533_v46  ;;  %v4506_v23 = vld [vmem:[#allocation13 + $0x158] sm:$0xff] }
 0x4e8   : > { %5305 = vmatpush1.bf16.msra.mxu1 %v6373_v4  ;;  %v4541_v4 = vld [vmem:[#allocation13 + $0x270] sm:$0xff] }
 0x4e9   : > { %5306 = vmatprep.subr.bf16.mxu1 %v6382_v55  ;;  %v6359_v55 = vcombine.low %v4529_v45, %v4533_v46  ;;  %v6368_v30 = vcombine.high %v4537_v26, %v4541_v4  ;;  %v4514_v46 = vld [vmem:[#allocation13 + $0x198] sm:$0xff] }
 0x4ec   : > { %5307 = vmatpush1.bf16.msra.mxu1 %v6381_v43  ;;  %v4549_v43 = vld [vmem:[#allocation13 + $0x2b0] sm:$0xff] }
 0x4ed   : > { %5308 = vmatprep.subr.bf16.mxu1 %v6390_v52  ;;  %v6367_v52 = vcombine.low %v4537_v26, %v4541_v4  ;;  %v6376_v63 = vcombine.high %v4545_v37, %v4549_v43  ;;  %v4522_v4 = vld [vmem:[#allocation13 + $0x1d8] sm:$0xff] }
 0x4f0   : > { %5309 = vmatpush1.bf16.msra.mxu1 %v6389_v51  ;;  %v4557_v51 = vld [vmem:[#allocation13 + $0x2f0] sm:$0xff] }
 0x4f1   : > { %5310 = vmatprep.subr.bf16.mxu1 %v6398_v31  ;;  %v6375_v31 = vcombine.low %v4545_v37, %v4549_v43  ;;  %v6384_v57 = vcombine.high %v4553_v24, %v4557_v51  ;;  %v4530_v37 = vld [vmem:[#allocation13 + $0x218] sm:$0xff] }
 0x4f2   : > { %v4534_v43 = vld [vmem:[#allocation13 + $0x238] sm:$0xff] }
 0x4f4   : > { %5311 = vmatpush1.bf16.msra.mxu1 %v6397_v50  ;;  %v4565_v50 = vld [vmem:[#allocation13 + $0x330] sm:$0xff] }
 0x4f5   : > { %5312 = vmatprep.subr.bf16.mxu1 %v6406_v58  ;;  %v6383_v58 = vcombine.low %v4553_v24, %v4557_v51  ;;  %v6392_v18 = vcombine.high %v4561_v56, %v4565_v50  ;;  %v4538_v24 = vld [vmem:[#allocation13 + $0x258] sm:$0xff] }
 0x4f6   : > { %v4542_v51 = vld [vmem:[#allocation13 + $0x278] sm:$0xff] }
 0x4f8   : > { %5313 = vmatpush1.bf16.msra.mxu1 %v6405_v6  ;;  %v4573_v6 = vld [vmem:[#allocation13 + $0x370] sm:$0xff] }
 0x4f9   : > { %5314 = vmatprep.subr.bf16.mxu1 %v6414_v3  ;;  %v6391_v3 = vcombine.low %v4561_v56, %v4565_v50  ;;  %v6400_v15 = vcombine.high %v4569_v28, %v4573_v6  ;;  %v4546_v56 = vld [vmem:[#allocation13 + $0x298] sm:$0xff] }
 0x4fa   : > { %v4550_v50 = vld [vmem:[#allocation13 + $0x2b8] sm:$0xff] }
 0x4fc   : > { %5315 = vmatpush1.bf16.msra.mxu1 %v6413_v8  ;;  %v4581_v8 = vld [vmem:[#allocation13 + $0x3b0] sm:$0xff] }
 0x4fd   : > { %5337 = vmatprep.subr.bf16.mxu1 %v6296_v59  ;;  %v6399_v59 = vcombine.low %v4569_v28, %v4573_v6  ;;  %v6408_v35 = vcombine.high %v4577_v40, %v4581_v8  ;;  %v4554_v28 = vld [vmem:[#allocation13 + $0x2d8] sm:$0xff] }
 0x4fe   : > { %v4558_v6 = vld [vmem:[#allocation13 + $0x2f8] sm:$0xff] }
 0x4ff   : > { %5317 = vmatmul.mubr.bf16.vlgmr.msra.gmra.mrb[24].mxu1 %v8325_v27 }
 0x500   : > { %5326 = vmatprep.mubr.bf16.mxu1 %v8333_v0  ;;  %5338 = vmatpush1.bf16.msra.mxu1 %v6295_v9  ;;  %v4589_v9 = vld [vmem:[#allocation13 + $0x3f0] sm:$0xff] }
 0x501   : > { %5339 = vmatprep.subr.bf16.mxu1 %v6304_v61  ;;  %v6407_v61 = vcombine.low %v4577_v40, %v4581_v8  ;;  %v6416_v10 = vcombine.high %v4585_v7, %v4589_v9  ;;  %v4562_v40 = vld [vmem:[#allocation13 + $0x318] sm:$0xff] }
 0x502   : > { %v4566_v8 = vld [vmem:[#allocation13 + $0x338] sm:$0xff] }
 0x504   : > { %5340 = vmatpush1.bf16.msra.mxu1 %v6303_v21  ;;  %v4470_v21 = vld [vmem:[#allocation13 + $0x38] sm:$0xff] }
 0x505   : > { %5341 = vmatprep.subr.bf16.mxu1 %v6312_v5  ;;  %v6415_v5 = vcombine.low %v4585_v7, %v4589_v9  ;;  %v6298_v33 = vcombine.high %v4466_v54, %v4470_v21  ;;  %v4570_v7 = vld [vmem:[#allocation13 + $0x358] sm:$0xff] }
 0x506   : > { %v4574_v9 = vld [vmem:[#allocation13 + $0x378] sm:$0xff] }
 0x507   : > { %5327 = vmatmul.mubr.bf16.gmra.mrb[28].mxu1 %v8331_v62 }
 0x508   : > { %5342 = vmatpush1.bf16.msra.mxu1 %v6311_v53  ;;  %5369 = vmatprep.mubr.bf16.mxu1 %v8327_v34  ;;  %v4478_v53 = vld [vmem:[#allocation13 + $0x78] sm:$0xff] }
 0x509   : > { %5343 = vmatprep.subr.bf16.mxu1 %v6320_v41  ;;  %v6297_v41 = vcombine.low %v4466_v54, %v4470_v21  ;;  %v6306_v38 = vcombine.high %v4474_v11, %v4478_v53  ;;  %v4578_v54 = vld [vmem:[#allocation13 + $0x398] sm:$0xff] }
 0x50a   : > { %v4582_v21 = vld [vmem:[#allocation13 + $0x3b8] sm:$0xff] }
 0x50c   : > { %5344 = vmatpush1.bf16.msra.mxu1 %v6319_v39  ;;  %v4486_v39 = vld [vmem:[#allocation13 + $0xb8] sm:$0xff] }
 0x50d   : > { %5345 = vmatprep.subr.bf16.mxu1 %v6328_v13  ;;  %v6305_v13 = vcombine.low %v4474_v11, %v4478_v53  ;;  %v6314_v25 = vcombine.high %v4482_v42, %v4486_v39  ;;  %v4586_v11 = vld [vmem:[#allocation13 + $0x3d8] sm:$0xff] }
 0x50e   : > { %v4590_v53 = vld [vmem:[#allocation13 + $0x3f8] sm:$0xff] }
 0x510   : > { %5346 = vmatpush1.bf16.msra.mxu1 %v6327_v12  ;;  %v4494_v12 = vld [vmem:[#allocation13 + $0xf8] sm:$0xff] }
 0x511   : > { %5347 = vmatprep.subr.bf16.mxu1 %v6336_v14  ;;  %v6313_v14 = vcombine.low %v4482_v42, %v4486_v39  ;;  %v6322_v60 = vcombine.high %v4490_v32, %v4494_v12  ;;  %v6417_v42 = vcombine.low %v4586_v11, %v4590_v53  ;;  %v8352_v39 = vld [vmem:[%s8514_s8] sm:$0xff] }
 0x514   : > { %5348 = vmatpush1.bf16.msra.mxu1 %v6335_v20  ;;  %v4502_v20 = vld [vmem:[#allocation13 + $0x138] sm:$0xff] }
 0x515   : > { %5349 = vmatprep.subr.bf16.mxu1 %v6344_v22  ;;  %v6321_v22 = vcombine.low %v4490_v32, %v4494_v12  ;;  %v6330_v36 = vcombine.high %v4498_v17, %v4502_v20 }
 0x518   : > { %5350 = vmatpush1.bf16.msra.mxu1 %v6343_v48  ;;  %v4510_v48 = vld [vmem:[#allocation13 + $0x178] sm:$0xff] }
 0x519   : > { %5351 = vmatprep.subr.bf16.mxu1 %v6352_v19  ;;  %v6329_v19 = vcombine.low %v4498_v17, %v4502_v20  ;;  %v6338_v45 = vcombine.high %v4506_v23, %v4510_v48 }
 0x51c   : > { %5352 = vmatpush1.bf16.msra.mxu1 %v6351_v16  ;;  %v4518_v16 = vld [vmem:[#allocation13 + $0x1b8] sm:$0xff] }
 0x51d   : > { %5353 = vmatprep.subr.bf16.mxu1 %v6360_v29  ;;  %v6337_v29 = vcombine.low %v4506_v23, %v4510_v48  ;;  %v6346_v26 = vcombine.high %v4514_v46, %v4518_v16 }
 0x520   : > { %5354 = vmatpush1.bf16.msra.mxu1 %v6359_v55  ;;  %v4526_v55 = vld [vmem:[#allocation13 + $0x1f8] sm:$0xff] }
 0x521   : > { %5355 = vmatprep.subr.bf16.mxu1 %v6368_v30  ;;  %v6345_v30 = vcombine.low %v4514_v46, %v4518_v16 }
 0x524   : > { %5356 = vmatpush1.bf16.msra.mxu1 %v6367_v52  ;;  %v6353_v52 = vcombine.low %v4522_v4, %v4526_v55 }
 0x525   : > { %5357 = vmatprep.subr.bf16.mxu1 %v6376_v63  ;;  %v6362_v63 = vcombine.high %v4530_v37, %v4534_v43 }
 0x528   : > { %5358 = vmatpush1.bf16.msra.mxu1 %v6375_v31  ;;  %v6361_v31 = vcombine.low %v4530_v37, %v4534_v43 }
 0x529   : > { %5359 = vmatprep.subr.bf16.mxu1 %v6384_v57  ;;  %v6370_v57 = vcombine.high %v4538_v24, %v4542_v51 }
 0x52c   : > { %5360 = vmatpush1.bf16.msra.mxu1 %v6383_v58  ;;  %v6369_v58 = vcombine.low %v4538_v24, %v4542_v51 }
 0x52d   : > { %5361 = vmatprep.subr.bf16.mxu1 %v6392_v18  ;;  %v6378_v18 = vcombine.high %v4546_v56, %v4550_v50 }
 0x530   : > { %5362 = vmatpush1.bf16.msra.mxu1 %v6391_v3  ;;  %v6377_v3 = vcombine.low %v4546_v56, %v4550_v50 }
 0x531   : > { %5363 = vmatprep.subr.bf16.mxu1 %v6400_v15  ;;  %v6386_v15 = vcombine.high %v4554_v28, %v4558_v6 }
 0x534   : > { %5364 = vmatpush1.bf16.msra.mxu1 %v6399_v59  ;;  %v6385_v59 = vcombine.low %v4554_v28, %v4558_v6  ;;  %v7349_v28 = vld [vmem:[%s7937_s25 + $0x80] sm:$0xff] }
 0x535   : > { %5365 = vmatprep.subr.bf16.mxu1 %v6408_v35  ;;  %v6394_v35 = vcombine.high %v4562_v40, %v4566_v8 }
 0x538   : > { %5366 = vmatpush1.bf16.msra.mxu1 %v6407_v61  ;;  %v6393_v61 = vcombine.low %v4562_v40, %v4566_v8 }
 0x539   : > { %5367 = vmatprep.subr.bf16.mxu1 %v6416_v10  ;;  %v6402_v10 = vcombine.high %v4570_v7, %v4574_v9 }
 0x53c   : > { %5368 = vmatpush1.bf16.msra.mxu1 %v6415_v5  ;;  %v6401_v5 = vcombine.low %v4570_v7, %v4574_v9 }
 0x53d   : > { %5390 = vmatprep.subr.bf16.mxu1 %v6298_v33  ;;  %v6410_v33 = vcombine.high %v4578_v54, %v4582_v21 }
 0x53f   : > { %5370 = vmatmul.mubr.bf16.vlgmr.msra.gmra.mrb[32].mxu1 %v8325_v27 }
 0x540   : > { %5379 = vmatprep.mubr.bf16.mxu1 %v8333_v0  ;;  %5391 = vmatpush1.bf16.msra.mxu1 %v6297_v41  ;;  %v6409_v41 = vcombine.low %v4578_v54, %v4582_v21 }
 0x541   : > { %5392 = vmatprep.subr.bf16.mxu1 %v6306_v38  ;;  %v6418_v38 = vcombine.high %v4586_v11, %v4590_v53 }
 0x544   : > { %5393 = vmatpush1.bf16.msra.mxu1 %v6305_v13  ;;  %v8357_v13 = vld [vmem:[%s8548_s9] sm:$0xff] }
 0x545   : > { %5394 = vmatprep.subr.bf16.mxu1 %v6314_v25  ;;  %v5448_v25 = vrot.slane %v8352_v39, %v8070_v47  ;;  %v5526_v32 = vrot.slane %v8357_v13, %v8075_v49  ;;  %v5530_v11 = vrot.slane %v8357_v13, %v8175_v1 }
 0x547   : > { %5380 = vmatmul.mubr.bf16.gmra.mrb[36].mxu1 %v8331_v62 }
 0x548   : > { %5395 = vmatpush1.bf16.msra.mxu1 %v6313_v14  ;;  %5422 = vmatprep.mubr.bf16.mxu1 %v8327_v34  ;;  %v6354_v34 = vcombine.high %v4522_v4, %v4526_v55 }
 0x549   : > { %5396 = vmatprep.subr.bf16.mxu1 %v6322_v60 }
 0x54c   : > { %5397 = vmatpush1.bf16.msra.mxu1 %v6321_v22 }
 0x54d   : > { %5398 = vmatprep.subr.bf16.mxu1 %v6330_v36 }
 0x550   : > { %5399 = vmatpush1.bf16.msra.mxu1 %v6329_v19  ;;  %v7345_v19 = vld [vmem:[%s7937_s25] sm:$0xff] }
 0x551   : > { %5400 = vmatprep.subr.bf16.mxu1 %v6338_v45 }
 0x554   : > { %5401 = vmatpush1.bf16.msra.mxu1 %v6337_v29 }
 0x555   : > { %5402 = vmatprep.subr.bf16.mxu1 %v6346_v26 }
 0x558   : > { %5403 = vmatpush1.bf16.msra.mxu1 %v6345_v30  ;;  %v7348_v30 = vld [vmem:[%s7937_s25 + $0x48] sm:$0xff] }
 0x559   : > { %5404 = vmatprep.subr.bf16.mxu1 %v6354_v34 }
 0x55c   : > { %5405 = vmatpush1.bf16.msra.mxu1 %v6353_v52 }
 0x55d   : > { %5406 = vmatprep.subr.bf16.mxu1 %v6362_v63 }
 0x560   : > { %5407 = vmatpush1.bf16.msra.mxu1 %v6361_v31 }
 0x561   : > { %5408 = vmatprep.subr.bf16.mxu1 %v6370_v57 }
 0x564   : > { %5409 = vmatpush1.bf16.msra.mxu1 %v6369_v58 }
 0x565   : > { %5410 = vmatprep.subr.bf16.mxu1 %v6378_v18 }
 0x568   : > { %5411 = vmatpush1.bf16.msra.mxu1 %v6377_v3 }
 0x569   : > { %5412 = vmatprep.subr.bf16.mxu1 %v6386_v15  ;;  %v7350_v15 = vld [vmem:[%s7937_s25 + $0x88] sm:$0xff] }
 0x56c   : > { %5413 = vmatpush1.bf16.msra.mxu1 %v6385_v59 }
 0x56d   : > { %5414 = vmatprep.subr.bf16.mxu1 %v6394_v35  ;;  %v7351_v35 = vld [vmem:[%s7937_s25 + $0xc0] sm:$0xff] }
 0x570   : > { %5415 = vmatpush1.bf16.msra.mxu1 %v6393_v61  ;;  %v7352_v61 = vld [vmem:[%s7937_s25 + $0xc8] sm:$0xff] }
 0x571   : > { %5416 = vmatprep.subr.bf16.mxu1 %v6402_v10 }
 0x574   : > { %5417 = vmatpush1.bf16.msra.mxu1 %v6401_v5  ;;  %v5456_v5 = vrot.slane %v8352_v39, %v8175_v1 }
 0x575   : > { %5418 = vmatprep.subr.bf16.mxu1 %v6410_v33  ;;  %v5460_v33 = vrot.slane %v8352_v39, %v8178_v2 }
 0x578   : > { %5419 = vmatpush1.bf16.msra.mxu1 %v6409_v41  ;;  %v5534_v41 = vrot.slane %v8357_v13, %v8178_v2 }
 0x579   : > { %5420 = vmatprep.subr.bf16.mxu1 %v6418_v38 }
 0x57c   : > { %5421 = vmatpush1.bf16.msra.mxu1 %v6417_v42 }
 0x57f   : > { %5423 = vmatmul.mubr.bf16.vlgmr.msra.gmra.mrb[40].mxu1 %v8325_v27  ;;  %v5452_v27 = vrot.slane %v8352_v39, %v8075_v49  ;;  %v7347_v49 = vld [vmem:[%s7937_s25 + $0x40] sm:$0xff] }
 0x580   : > { %5432 = vmatprep.mubr.bf16.mxu1 %v8333_v0 }
 0x587   : > { %5433 = vmatmul.mubr.bf16.gmra.mrb[44].mxu1 %v8331_v62  ;;  %v5522_v62 = vrot.slane %v8357_v13, %v8070_v47  ;;  %v7346_v47 = vld [vmem:[%s7937_s25 + $0x8] sm:$0xff] }
 0x592   : > { %v5265_v0 = vpop.f32.mrb[16].mxu1 }
 0x593   : > { %v5485_v12 = vmul.f32 %v5448_v25, %v5265_v0  ;;  %v5267_v14 = vpop.f32.mrb[17].mxu1 }
 0x594   : > { %v5486_v60 = vmul.f32 %v5452_v27, %v5267_v14  ;;  %v5269_v17 = vpop.f32.mrb[18].mxu1 }
 0x595   : > { %v5559_v20 = vadd.f32 %v5522_v62, %v5485_v12  ;;  %v5493_v22 = vmul.f32 %v5448_v25, %v5269_v17  ;;  %v5271_v36 = vpop.f32.mrb[19].mxu1 }
 0x596   : > { %v5560_v23 = vadd.f32 %v5526_v32, %v5486_v60  ;;  %v5494_v48 = vmul.f32 %v5452_v27, %v5271_v36  ;;  %v7353_v60 = vld [vmem:[%s7937_s25 + $0x10] sm:$0xff] }
 0x597   : > { %v5591_v45 = vadd.f32 %v7345_v19, %v5559_v20  ;;  %v5567_v46 = vadd.f32 %v5522_v62, %v5493_v22  ;;  %v7354_v20 = vld [vmem:[%s7937_s25 + $0x18] sm:$0xff] }
 0x598   : > { %v5592_v16 = vadd.f32 %v7346_v47, %v5560_v23  ;;  %v5568_v29 = vadd.f32 %v5526_v32, %v5494_v48  ;;  %v7355_v23 = vld [vmem:[%s7937_s25 + $0x50] sm:$0xff] }
 0x599   : > { %v5623_v26 = vmax.f32 %v5591_v45, 0.0  ;;  %v5599_v4 = vadd.f32 %v7347_v49, %v5567_v46  ;;  %v7356_v45 = vld [vmem:[%s7937_s25 + $0x58] sm:$0xff] }
 0x59a   : > { %v5624_v55 = vmax.f32 %v5592_v16, 0.0  ;;  %v5600_v34 = vadd.f32 %v7348_v30, %v5568_v29  ;;  %v5275_v37 = vpop.f32.mrb[20].mxu1 }
 0x59b   : > { %5655 = vst [vmem:[%s8373_s30] sm:$0xff] %v5623_v26  ;;  %v5631_v43 = vmax.f32 %v5599_v4, 0.0  ;;  %v5501_v52 = vmul.f32 %v5448_v25, %v5275_v37  ;;  %v5277_v63 = vpop.f32.mrb[21].mxu1 }
 0x59c   : > { %5656 = vst [vmem:[%s8373_s30 + $0x8] sm:$0xff] %v5624_v55  ;;  %v5632_v24 = vmax.f32 %v5600_v34, 0.0  ;;  %v5502_v51 = vmul.f32 %v5452_v27, %v5277_v63  ;;  %v5279_v31 = vpop.f32.mrb[22].mxu1  ;;  %v7357_v63 = vld [vmem:[%s7937_s25 + $0x90] sm:$0xff] }
 0x59d   : > { %5663 = vst [vmem:[%s8373_s30 + $0x40] sm:$0xff] %v5631_v43  ;;  %v5575_v57 = vadd.f32 %v5522_v62, %v5501_v52  ;;  %v5509_v56 = vmul.f32 %v5448_v25, %v5279_v31  ;;  %v5281_v50 = vpop.f32.mrb[23].mxu1  ;;  %v7358_v31 = vld [vmem:[%s7937_s25 + $0x98] sm:$0xff] }
 0x59e   : > { %5664 = vst [vmem:[%s8373_s30 + $0x48] sm:$0xff] %v5632_v24  ;;  %v5576_v58 = vadd.f32 %v5526_v32, %v5502_v51  ;;  %v5510_v18 = vmul.f32 %v5452_v27, %v5281_v50 }
 0x59f   : > { %v5607_v6 = vadd.f32 %v7349_v28, %v5575_v57  ;;  %v5583_v3 = vadd.f32 %v5522_v62, %v5509_v56 }
 0x5a0   : > { %v5608_v40 = vadd.f32 %v7350_v15, %v5576_v58  ;;  %v5584_v8 = vadd.f32 %v5526_v32, %v5510_v18  ;;  %v7359_v58 = vld [vmem:[%s7937_s25 + $0xd0] sm:$0xff] }
 0x5a1   : > { %v5639_v59 = vmax.f32 %v5607_v6, 0.0  ;;  %v5615_v7 = vadd.f32 %v7351_v35, %v5583_v3  ;;  %v7360_v6 = vld [vmem:[%s7937_s25 + $0xd8] sm:$0xff] }
 0x5a2   : > { %v5640_v9 = vmax.f32 %v5608_v40, 0.0  ;;  %v5616_v10 = vadd.f32 %v7352_v61, %v5584_v8  ;;  %v5463_v8 = vsub.s32 4, %v8067_v44 }
 0x5a3   : > { %5671 = vst [vmem:[%s8373_s30 + $0x80] sm:$0xff] %v5639_v59  ;;  %v5647_v54 = vmax.f32 %v5615_v7, 0.0  ;;  %v5467_v59 = vsub.s32 5, %v8067_v44 }
 0x5a4   : > { %5672 = vst [vmem:[%s8373_s30 + $0x88] sm:$0xff] %v5640_v9  ;;  %v5648_v21 = vmax.f32 %v5616_v10, 0.0  ;;  %v5464_v35 = vrot.slane %v8352_v39, %v5463_v8  ;;  %v5538_v9 = vrot.slane %v8357_v13, %v5463_v8 }
 0x5a5   : > { %5679 = vst [vmem:[%s8373_s30 + $0xc0] sm:$0xff] %v5647_v54  ;;  %v5468_v7 = vrot.slane %v8352_v39, %v5467_v59  ;;  %v5542_v10 = vrot.slane %v8357_v13, %v5467_v59 }
 0x5a6   : > { %5680 = vst [vmem:[%s8373_s30 + $0xc8] sm:$0xff] %v5648_v21 }
 0x5d2   : > { %v5318_v53 = vpop.f32.mrb[24].mxu1 }
 0x5d3   : > { %v5487_v38 = vmul.f32 %v5456_v5, %v5318_v53  ;;  %v5320_v42 = vpop.f32.mrb[25].mxu1 }
 0x5d4   : > { %v5488_v25 = vmul.f32 %v5460_v33, %v5320_v42  ;;  %v5322_v27 = vpop.f32.mrb[26].mxu1 }
 0x5d5   : > { %v5561_v62 = vadd.f32 %v5530_v11, %v5487_v38  ;;  %v5495_v0 = vmul.f32 %v5456_v5, %v5322_v27  ;;  %v5324_v32 = vpop.f32.mrb[27].mxu1 }
 0x5d6   : > { %v5562_v12 = vadd.f32 %v5534_v41, %v5488_v25  ;;  %v5496_v14 = vmul.f32 %v5460_v33, %v5324_v32  ;;  %v7361_v25 = vld [vmem:[%s7937_s25 + $0x20] sm:$0xff] }
 0x5d7   : > { %v5593_v17 = vadd.f32 %v7353_v60, %v5561_v62  ;;  %v5569_v1 = vadd.f32 %v5530_v11, %v5495_v0  ;;  %v7362_v0 = vld [vmem:[%s7937_s25 + $0x28] sm:$0xff]  ;;  %v7363_v60 = vld [vmem:[%s7937_s25 + $0x60] sm:$0xff] }
 0x5d8   : > { %v5594_v22 = vadd.f32 %v7354_v20, %v5562_v12  ;;  %v5570_v36 = vadd.f32 %v5534_v41, %v5496_v14  ;;  %v7364_v20 = vld [vmem:[%s7937_s25 + $0x68] sm:$0xff] }
 0x5d9   : > { %v5625_v2 = vmax.f32 %v5593_v17, 0.0  ;;  %v5601_v48 = vadd.f32 %v7355_v23, %v5569_v1 }
 0x5da   : > { %v5626_v19 = vmax.f32 %v5594_v22, 0.0  ;;  %v5602_v46 = vadd.f32 %v7356_v45, %v5570_v36  ;;  %v5328_v47 = vpop.f32.mrb[28].mxu1 }
 0x5db   : > { %5657 = vst [vmem:[%s8373_s30 + $0x10] sm:$0xff] %v5625_v2  ;;  %v5633_v16 = vmax.f32 %v5601_v48, 0.0  ;;  %v5503_v29 = vmul.f32 %v5456_v5, %v5328_v47  ;;  %v5330_v26 = vpop.f32.mrb[29].mxu1 }
 0x5dc   : > { %5658 = vst [vmem:[%s8373_s30 + $0x18] sm:$0xff] %v5626_v19  ;;  %v5634_v49 = vmax.f32 %v5602_v46, 0.0  ;;  %v5504_v4 = vmul.f32 %v5460_v33, %v5330_v26  ;;  %v5332_v55 = vpop.f32.mrb[30].mxu1 }
 0x5dd   : > { %5665 = vst [vmem:[%s8373_s30 + $0x50] sm:$0xff] %v5633_v16  ;;  %v5577_v30 = vadd.f32 %v5530_v11, %v5503_v29  ;;  %v5511_v34 = vmul.f32 %v5456_v5, %v5332_v55  ;;  %v5334_v37 = vpop.f32.mrb[31].mxu1 }
 0x5de   : > { %5666 = vst [vmem:[%s8373_s30 + $0x58] sm:$0xff] %v5634_v49  ;;  %v5578_v43 = vadd.f32 %v5534_v41, %v5504_v4  ;;  %v5512_v52 = vmul.f32 %v5460_v33, %v5334_v37  ;;  %v7365_v4 = vld [vmem:[%s7937_s25 + $0xa0] sm:$0xff] }
 0x5df   : > { %v5609_v24 = vadd.f32 %v7357_v63, %v5577_v30  ;;  %v5585_v51 = vadd.f32 %v5530_v11, %v5511_v34  ;;  %v7366_v34 = vld [vmem:[%s7937_s25 + $0xa8] sm:$0xff]  ;;  %v7367_v63 = vld [vmem:[%s7937_s25 + $0xe0] sm:$0xff] }
 0x5e0   : > { %v5610_v57 = vadd.f32 %v7358_v31, %v5578_v43  ;;  %v5586_v56 = vadd.f32 %v5534_v41, %v5512_v52  ;;  %v7368_v31 = vld [vmem:[%s7937_s25 + $0xe8] sm:$0xff] }
 0x5e1   : > { %v5641_v50 = vmax.f32 %v5609_v24, 0.0  ;;  %v5617_v18 = vadd.f32 %v7359_v58, %v5585_v51  ;;  %v5471_v58 = vsub.s32 6, %v8067_v44 }
 0x5e2   : > { %v5642_v28 = vmax.f32 %v5610_v57, 0.0  ;;  %v5618_v3 = vadd.f32 %v7360_v6, %v5586_v56 }
 0x5e3   : > { %5673 = vst [vmem:[%s8373_s30 + $0x90] sm:$0xff] %v5641_v50  ;;  %v5649_v15 = vmax.f32 %v5617_v18, 0.0  ;;  %v5475_v18 = vsub.s32 7, %v8067_v44 }
 0x5e4   : > { %5674 = vst [vmem:[%s8373_s30 + $0x98] sm:$0xff] %v5642_v28  ;;  %v5650_v40 = vmax.f32 %v5618_v3, 0.0  ;;  %v5472_v28 = vrot.slane %v8352_v39, %v5471_v58  ;;  %v5546_v3 = vrot.slane %v8357_v13, %v5471_v58 }
 0x5e5   : > { %5681 = vst [vmem:[%s8373_s30 + $0xd0] sm:$0xff] %v5649_v15  ;;  %v5476_v6 = vrot.slane %v8352_v39, %v5475_v18 }
 0x5e6   : > { %5682 = vst [vmem:[%s8373_s30 + $0xd8] sm:$0xff] %v5650_v40  ;;  %v5550_v40 = vrot.slane %v8357_v13, %v5475_v18 }
 0x612   : > { %v5371_v61 = vpop.f32.mrb[32].mxu1 }
 0x613   : > { %v5489_v54 = vmul.f32 %v5464_v35, %v5371_v61  ;;  %v5373_v21 = vpop.f32.mrb[33].mxu1 }
 0x614   : > { %v5490_v5 = vmul.f32 %v5468_v7, %v5373_v21  ;;  %v5375_v33 = vpop.f32.mrb[34].mxu1  ;;  %v7369_v21 = vld [vmem:[%s7937_s25 + $0x30] sm:$0xff] }
 0x615   : > { %v5563_v11 = vadd.f32 %v5538_v9, %v5489_v54  ;;  %v5497_v53 = vmul.f32 %v5464_v35, %v5375_v33  ;;  %v5377_v41 = vpop.f32.mrb[35].mxu1  ;;  %v7370_v33 = vld [vmem:[%s7937_s25 + $0x38] sm:$0xff] }
 0x616   : > { %v5564_v38 = vadd.f32 %v5542_v10, %v5490_v5  ;;  %v5498_v42 = vmul.f32 %v5468_v7, %v5377_v41  ;;  %v7371_v41 = vld [vmem:[%s7937_s25 + $0x70] sm:$0xff] }
 0x617   : > { %v5595_v27 = vadd.f32 %v7361_v25, %v5563_v11  ;;  %v5571_v62 = vadd.f32 %v5538_v9, %v5497_v53  ;;  %v7372_v25 = vld [vmem:[%s7937_s25 + $0x78] sm:$0xff] }
 0x618   : > { %v5596_v32 = vadd.f32 %v7362_v0, %v5564_v38  ;;  %v5572_v12 = vadd.f32 %v5542_v10, %v5498_v42 }
 0x619   : > { %v5627_v14 = vmax.f32 %v5595_v27, 0.0  ;;  %v5603_v17 = vadd.f32 %v7363_v60, %v5571_v62 }
 0x61a   : > { %v5628_v1 = vmax.f32 %v5596_v32, 0.0  ;;  %v5604_v22 = vadd.f32 %v7364_v20, %v5572_v12  ;;  %v5381_v36 = vpop.f32.mrb[36].mxu1 }
 0x61b   : > { %5659 = vst [vmem:[%s8373_s30 + $0x20] sm:$0xff] %v5627_v14  ;;  %v5635_v2 = vmax.f32 %v5603_v17, 0.0  ;;  %v5505_v23 = vmul.f32 %v5464_v35, %v5381_v36  ;;  %v5383_v48 = vpop.f32.mrb[37].mxu1 }
 0x61c   : > { %5660 = vst [vmem:[%s8373_s30 + $0x28] sm:$0xff] %v5628_v1  ;;  %v5636_v19 = vmax.f32 %v5604_v22, 0.0  ;;  %v5506_v45 = vmul.f32 %v5468_v7, %v5383_v48  ;;  %v5385_v46 = vpop.f32.mrb[38].mxu1 }
 0x61d   : > { %5667 = vst [vmem:[%s8373_s30 + $0x60] sm:$0xff] %v5635_v2  ;;  %v5579_v47 = vadd.f32 %v5538_v9, %v5505_v23  ;;  %v5513_v16 = vmul.f32 %v5464_v35, %v5385_v46  ;;  %v5387_v29 = vpop.f32.mrb[39].mxu1  ;;  %v7373_v23 = vld [vmem:[%s7937_s25 + $0xb0] sm:$0xff] }
 0x61e   : > { %5668 = vst [vmem:[%s8373_s30 + $0x68] sm:$0xff] %v5636_v19  ;;  %v5580_v26 = vadd.f32 %v5542_v10, %v5506_v45  ;;  %v5514_v49 = vmul.f32 %v5468_v7, %v5387_v29  ;;  %v7374_v45 = vld [vmem:[%s7937_s25 + $0xb8] sm:$0xff]  ;;  %v7375_v29 = vld [vmem:[%s7937_s25 + $0xf0] sm:$0xff] }
 0x61f   : > { %v5611_v55 = vadd.f32 %v7365_v4, %v5579_v47  ;;  %v5587_v30 = vadd.f32 %v5538_v9, %v5513_v16  ;;  %v7376_v4 = vld [vmem:[%s7937_s25 + $0xf8] sm:$0xff]  ;;  %s7642_s25 = smov [#allocation15]  }
 0x620   : > { %v5612_v37 = vadd.f32 %v7366_v34, %v5580_v26  ;;  %v5588_v43 = vadd.f32 %v5542_v10, %v5514_v49  ;;  %s7551_s12 = sshll.u32 %s7642_s25, 4  ;;  %s7552_s12 = int_to_ptr.vmem [resolvable:$false] %s7551_s12 }
 0x621   : > { %v5643_v52 = vmax.f32 %v5611_v55, 0.0  ;;  %v5619_v24 = vadd.f32 %v7367_v63, %v5587_v30  ;;  %s7553_s26 = scalar_lea.vmem %s7552_s12, 8192  ;;  %p7554_p13 = scmp.lt.s32.totalorder %s8459_s20, %s7552_s12 }
 0x622   : > { %v5644_v51 = vmax.f32 %v5612_v37, 0.0  ;;  %v5620_v57 = vadd.f32 %v7368_v31, %v5588_v43  ;;  %p7555_p0 = scmp.lt.s32.totalorder %s7553_s26, %s7547_s24 }
 0x623   : > { %5675 = vst [vmem:[%s8373_s30 + $0xa0] sm:$0xff] %v5643_v52  ;;  %v5651_v56 = vmax.f32 %v5619_v24, 0.0 }
 0x624   : > { %5676 = vst [vmem:[%s8373_s30 + $0xa8] sm:$0xff] %v5644_v51  ;;  %v5652_v50 = vmax.f32 %v5620_v57, 0.0  ;;  %p7556_p2 = por %p7555_p0, %p7554_p13 }
 0x625   : > { %5683 = vst [vmem:[%s8373_s30 + $0xe0] sm:$0xff] %v5651_v56 }
 0x626   : > { %5684 = vst [vmem:[%s8373_s30 + $0xe8] sm:$0xff] %v5652_v50  ;;  %p7557_p8 = pnand %p7556_p2, %p7550_p1 }
 0x652   : > { %v5424_v15 = vpop.f32.mrb[40].mxu1 }
 0x653   : > { %v5491_v8 = vmul.f32 %v5472_v28, %v5424_v15  ;;  %v5426_v59 = vpop.f32.mrb[41].mxu1 }
 0x654   : > { %v5492_v35 = vmul.f32 %v5476_v6, %v5426_v59  ;;  %v5428_v7 = vpop.f32.mrb[42].mxu1 }
 0x655   : > { %v5565_v9 = vadd.f32 %v5546_v3, %v5491_v8  ;;  %v5499_v61 = vmul.f32 %v5472_v28, %v5428_v7  ;;  %v5430_v10 = vpop.f32.mrb[43].mxu1 }
 0x656   : > { %v5566_v44 = vadd.f32 %v5550_v40, %v5492_v35  ;;  %v5500_v54 = vmul.f32 %v5476_v6, %v5430_v10 }
 0x657   : > { %v5597_v39 = vadd.f32 %v7369_v21, %v5565_v9  ;;  %v5573_v5 = vadd.f32 %v5546_v3, %v5499_v61 }
 0x658   : > { %v5598_v11 = vadd.f32 %v7370_v33, %v5566_v44  ;;  %v5574_v53 = vadd.f32 %v5550_v40, %v5500_v54 }
 0x659   : > { %v5629_v13 = vmax.f32 %v5597_v39, 0.0  ;;  %v5605_v38 = vadd.f32 %v7371_v41, %v5573_v5 }
 0x65a   : > { %v5630_v42 = vmax.f32 %v5598_v11, 0.0  ;;  %v5606_v27 = vadd.f32 %v7372_v25, %v5574_v53  ;;  %v5434_v62 = vpop.f32.mrb[44].mxu1 }
 0x65b   : > { %5661 = vst [vmem:[%s8373_s30 + $0x30] sm:$0xff] %v5629_v13  ;;  %v5637_v0 = vmax.f32 %v5605_v38, 0.0  ;;  %v5507_v32 = vmul.f32 %v5472_v28, %v5434_v62  ;;  %v5436_v12 = vpop.f32.mrb[45].mxu1 }
 0x65c   : > { %5662 = vst [vmem:[%s8373_s30 + $0x38] sm:$0xff] %v5630_v42  ;;  %v5638_v14 = vmax.f32 %v5606_v27, 0.0  ;;  %v5508_v60 = vmul.f32 %v5476_v6, %v5436_v12  ;;  %v5438_v17 = vpop.f32.mrb[46].mxu1 }
 0x65d   : > { %5669 = vst [vmem:[%s8373_s30 + $0x70] sm:$0xff] %v5637_v0  ;;  %v5581_v1 = vadd.f32 %v5546_v3, %v5507_v32  ;;  %v5515_v20 = vmul.f32 %v5472_v28, %v5438_v17  ;;  %v5440_v22 = vpop.f32.mrb[47].mxu1 }
 0x65e   : > { %5670 = vst [vmem:[%s8373_s30 + $0x78] sm:$0xff] %v5638_v14  ;;  %v5582_v36 = vadd.f32 %v5550_v40, %v5508_v60  ;;  %v5516_v2 = vmul.f32 %v5476_v6, %v5440_v22 }
 0x65f   : > { %v5613_v48 = vadd.f32 %v7373_v23, %v5581_v1  ;;  %v5589_v19 = vadd.f32 %v5546_v3, %v5515_v20 }
 0x660   : > { %v5614_v46 = vadd.f32 %v7374_v45, %v5582_v36  ;;  %v5590_v47 = vadd.f32 %v5550_v40, %v5516_v2 }
 0x661   : > { %v5645_v16 = vmax.f32 %v5613_v48, 0.0  ;;  %v5621_v26 = vadd.f32 %v7375_v29, %v5589_v19 }
 0x662   : > { %v5646_v49 = vmax.f32 %v5614_v46, 0.0  ;;  %v5622_v55 = vadd.f32 %v7376_v4, %v5590_v47 }
 0x663   : > { %5677 = vst [vmem:[%s8373_s30 + $0xb0] sm:$0xff] %v5645_v16  ;;  %v5653_v30 = vmax.f32 %v5621_v26, 0.0 }
 0x664   : > { %5678 = vst [vmem:[%s8373_s30 + $0xb8] sm:$0xff] %v5646_v49  ;;  %v5654_v34 = vmax.f32 %v5622_v55, 0.0 }
 0x665   : > { %5685 = vst [vmem:[%s8373_s30 + $0xf0] sm:$0xff] %v5653_v30 }
 0x666   : > { %5686 = vst [vmem:[%s8373_s30 + $0xf8] sm:$0xff] %v5654_v34 }
 0x667   : > { %7560 = shalt.err (!%p7557_p8)
}
 0x668   : > { %s7561_s9 = scalar_lea.hbm %s8457_s21, 4096  ;;  %s7565_s23 = scalar_lea.hbm %s8549_s17, 8192 }
 0x669   : > { %p7562_p6 = scmp.ne.s32.totalorder %s8457_s21, %s7561_s9  ;;  %p7566_p3 = scmp.lt.u32.totalorder %s8457_s21, %s8549_s17 }
 0x66a   : > { %p7567_p5 = scmp.lt.u32.totalorder %s7565_s23, %s7561_s9  ;;  %p7569_p7 = scmp.lt.u32.totalorder %s7561_s9, %s8457_s21 }
 0x66b   : > { %p7563_p10 = pnand %p7562_p6, %p8550_p4 }
 0x66c   : > { %p7568_p9 = por %p7567_p5, %p7566_p3 }
 0x66d   : > { %p7564_p11 = pneg %p7563_p10 }
 0x66e   : > { %p7570_p12 = por %p7569_p7, %p7568_p9 }
 0x670   : > { %p7571_p1 = pnand %p7570_p12, %p7564_p11 }
 0x672   : > { %7574 = shalt.err (!%p7571_p1)
}
 0x673   : > { %s7643_s24 = smov 1024   ;;  %s7644_s12 = smov 64  }
 0x674   : > { %6587 = dma.vmem_to_hbm [thread:$0]  (%p8550_p4), %s8459_s20, 4096, %s8457_s21, %s5688_s19, %s7643_s24, %s7643_s24, %s7644_s12  }
 0x675 PF: > { %s5717_s26 = sand.u32 1, %s7613_s13   ;;  %p8551_p13 = scmp.ne.s32.totalorder %s8529_s29, 0 }
 0x676   : > { %p8552_p0 = scmp.ge.s32.totalorder %s7625_s16, 2  ;;  %s5718_s9 = scalar_lea.sflag [#allocation6], %s5717_s26 }
 0x678   : > { %p6610_p2 = pnand %p8552_p0, %p8551_p13 }
 0x67a   : > { %7608 = dma.done.wait (!%p6610_p2), %s5718_s9, 4096  }
 0x67b   : > { %7610 = vsyncadd (!%p6610_p2), %s5718_s9, 4294963200  ;;  %p26_p8 = scmp.ge.s32.totalorder %s7858_s18, 4   ;;  %s8553_s13 = smov %s7617_s14 }
 0x67c   : > { %s8554_s14 = smov %s7621_s15  ;;  %s8555_s15 = smov %s7870_s27 }
 0x67d   : > { %s8556_s16 = smov %s7858_s18  ;;  %28 = sbr.rel (!%p26_p8) target bundleno = 11 (0xb), region = 125 }
 0x684   :  { %5723 = vsyncpa [#allocation5], 1 }
 0x685   :  { %5725 = vsyncpa [#allocation5 + $0x1], 1 }
 0x686   :  { %5726 = vsyncpa [#allocation8], 1 }
 0x687   :  { %5727 = vsyncpa [#allocation11], 1 }
 0x688   :  { %5728 = vsyncpa [#allocation14], 1 }
 0x689   :  { %5729 = vsyncpa [#allocation6], 1 }
 0x68a   :  { %5731 = vsyncpa [#allocation6 + $0x1], 1 }

// kernel: tpu_custom_call.1
= control target key start
LH: loop header
LB: loop body
LE: loop exit
PB: predicated region body
PF: predicated region fallthrough
CT: control target
= control target key end

     0   :  { %s8506_s0 = inlined_call_operand.hbm [shape: f32[64,1024], index: 0, kind: input, shape index: {}]   ;;  %s8507_s1 = inlined_call_operand.hbm [shape: bf16[1024,512], index: 1, kind: input, shape index: {}]   ;;  %s8508_s2 = inlined_call_operand.hbm [shape: f32[1,512], index: 2, kind: input, shape index: {}]   ;;  %s8509_s3 = inlined_call_operand.hbm [shape: f32[1,512], index: 3, kind: input, shape index: {}]   ;;  %s8510_s4 = inlined_call_operand.hbm [shape: bf16[1536,256], index: 4, kind: input, shape index: {}]   ;;  %s8511_s5 = inlined_call_operand.vmem [shape: f32[1,256], index: 5, kind: input, shape index: {}]   ;;  %s8512_s6 = inlined_call_operand.vmem [shape: f32[1,256], index: 6, kind: input, shape index: {}]   ;;  %s8513_s7 = inlined_call_operand.hbm [shape: bf16[256,1024], index: 7, kind: input, shape index: {}]   ;;  %s8514_s8 = inlined_call_operand.vmem [shape: f32[1,1024], index: 8, kind: input, shape index: {}]   ;;  %s8515_s9 = inlined_call_operand.vmem [shape: f32[1,1024], index: 9, kind: input, shape index: {}]   ;;  %s8516_s10 = inlined_call_operand.hbm [shape: f32[64,1024], index: 10, kind: output, shape index: {}]  }
   0x1   :  { %8521 = sst [smem:[#allocation21_spill]] %s8515_s9 }
   0x2   :  { %8522 = sst [smem:[#allocation22_spill]] %s8516_s10 }
   0x3   :  { %15 = vsyncpa [#allocation5], 0 }
   0x4   :  { %17 = vsyncpa [#allocation5 + $0x1], 0 }
   0x5   :  { %18 = vsyncpa [#allocation8], 0 }
   0x6   :  { %19 = vsyncpa [#allocation11], 0 }
   0x7   :  { %20 = vsyncpa [#allocation14], 0 }
   0x8   :  { %21 = vsyncpa [#allocation6], 0 }
   0x9   :  { %23 = vsyncpa [#allocation6 + $0x1], 0  ;;  %s7700_s13 = smov 0   ;;  %s7702_s14 = smov 0  }
   0xa   :  { %s7704_s15 = smov 0   ;;  %s7706_s16 = smov 0  }
   0xb LB: > { %s7627_s17 = smov [#allocation7]   ;;  %s7721_s19 = sadd.s32 4294967295, %s7625_s16   ;;  %s7625_s16 = sphi %s7706_s16, %s8556_s16   ;;  %s7621_s15 = sphi %s7704_s15, %s8555_s15   ;;  %s7617_s14 = sphi %s7702_s14, %s8554_s14   ;;  %s7613_s13 = sphi %s7700_s13, %s8553_s13  }
   0xc   : > { %s287_s18 = sshll.u32 %s7627_s17, 4  ;;  %p5824_p0 = scmp.ge.s32.totalorder %s7625_s16, 1  ;;  %s7726_s18 = int_to_ptr.vmem [resolvable:$true] %s287_s18 }
   0xd   : > { %p8518_p1 = scmp.eq.s32.totalorder %s7721_s19, 0  ;;  %p275_p2 = scmp.lt.s32.totalorder %s7625_s16, 3 }
   0xe   : > { %s7628_s21 = smov [#allocation10]   ;;  %s7629_s24 = smov [#allocation9]  }
   0xf   : > { %p7728_p3 = pnand %p5824_p0, %p275_p2  ;;  %s312_s22 = sshll.u32 %s7628_s21, 4  ;;  %s7741_s22 = int_to_ptr.vmem [resolvable:$true] %s312_s22 }
  0x10   : > { %s301_s25 = sshll.u32 %s7629_s24, 4  ;;  %s7377_s28 = scalar_lea.hbm %s8507_s1, 32768  ;;  %s7743_s25 = int_to_ptr.vmem [resolvable:$true] %s301_s25 }
  0x11   : > { %s8523_s20 = scalar_select %p7728_p3, 1, 0 }
  0x12   : > { %p6589_p5 = pneg %p7728_p3  ;;  %p7378_p7 = scmp.ne.s32.totalorder %s8507_s1, %s7377_s28 }
  0x13   : > { %p7384_p11 = scmp.lt.u32.totalorder %s7377_s28, %s8507_s1 }
  0x14   : > { %p7737_p6 = pnand %p6589_p5, %p8518_p1 }
  0x16   : > { %p7753_p8 = pneg %p7737_p6 }
  0x18   : > { %p7380_p9 = pnand %p7753_p8, %p7378_p7 }
  0x1a   : > { %p7381_p10 = pneg %p7380_p9 }
  0x1c   : > { %p7386_p12 = pnand %p7384_p11, %p7381_p10 }
  0x1e   : > { %7389 = shalt.err (!%p7386_p12)
}
  0x1f   : > { %s7390_s21 = scalar_lea.vmem %s7726_s18, 32768  ;;  %p7398_p5 = scmp.lt.s32.totalorder %s7726_s18, %s7726_s18 }
  0x20   : > { %p7391_p13 = scmp.ne.s32.totalorder %s7726_s18, %s7390_s21  ;;  %p7399_p4 = scmp.lt.s32.totalorder %s7390_s21, %s7390_s21 }
  0x22   : > { %p7393_p0 = pnand %p7391_p13, %p7753_p8  ;;  %p7400_p7 = por %p7399_p4, %p7398_p5 }
  0x24   : > { %p7394_p2 = pneg %p7393_p0 }
  0x26   : > { %p7401_p9 = pnand %p7400_p7, %p7394_p2 }
  0x28   : > { %7404 = shalt.err (!%p7401_p9)
}
  0x29   : > { %s7630_s24 = smov 256   ;;  %s7631_s26 = smov 16  }
  0x2a   : > { %6592 = dma.hbm_to_vmem [thread:$0]  (!%p7737_p6), %s8507_s1, 32768, %s7726_s18, [#allocation8], %s7630_s24, %s7630_s24, %s7631_s26  }
  0x2b   : > { %s7405_s12 = scalar_lea.hbm %s8509_s3, 64 }
  0x2c   : > { %p7406_p4 = scmp.ne.s32.totalorder %s8509_s3, %s7405_s12  ;;  %p7412_p12 = scmp.lt.u32.totalorder %s7405_s12, %s8509_s3 }
  0x2e   : > { %p7408_p10 = pnand %p7406_p4, %p7753_p8 }
  0x30   : > { %p7409_p11 = pneg %p7408_p10 }
  0x32   : > { %p7414_p13 = pnand %p7412_p12, %p7409_p11 }
  0x34   : > { %7417 = shalt.err (!%p7414_p13)
}
  0x35   : > { %s7418_s18 = scalar_lea.vmem %s7741_s22, 64  ;;  %p7426_p7 = scmp.lt.s32.totalorder %s7741_s22, %s7741_s22 }
  0x36   : > { %p7419_p0 = scmp.ne.s32.totalorder %s7741_s22, %s7418_s18  ;;  %p7427_p9 = scmp.lt.s32.totalorder %s7418_s18, %s7418_s18 }
  0x38   : > { %p7421_p2 = pnand %p7419_p0, %p7753_p8  ;;  %p7428_p4 = por %p7427_p9, %p7426_p7 }
  0x3a   : > { %p7422_p5 = pneg %p7421_p2 }
  0x3c   : > { %p7429_p10 = pnand %p7428_p4, %p7422_p5 }
  0x3e   : > { %7432 = shalt.err (!%p7429_p10)
}
  0x3f   : > { %6598 = dma.hbm_to_vmem [thread:$0]  (!%p7737_p6), %s8509_s3, 64, %s7741_s22, [#allocation11]  }
  0x40   : > { %s7433_s27 = scalar_lea.hbm %s8508_s2, 64 }
  0x41   : > { %p7434_p11 = scmp.ne.s32.totalorder %s8508_s2, %s7433_s27  ;;  %p7440_p0 = scmp.lt.u32.totalorder %s7433_s27, %s8508_s2 }
  0x43   : > { %p7436_p12 = pnand %p7434_p11, %p7753_p8 }
  0x45   : > { %p7437_p13 = pneg %p7436_p12 }
  0x47   : > { %p7442_p2 = pnand %p7440_p0, %p7437_p13 }
  0x49   : > { %7445 = shalt.err (!%p7442_p2)
}
  0x4a   : > { %s7446_s22 = scalar_lea.vmem %s7743_s25, 64  ;;  %p7454_p4 = scmp.lt.s32.totalorder %s7743_s25, %s7743_s25 }
  0x4b   : > { %p7447_p5 = scmp.ne.s32.totalorder %s7743_s25, %s7446_s22  ;;  %p7455_p10 = scmp.lt.s32.totalorder %s7446_s22, %s7446_s22 }
  0x4d   : > { %p7449_p7 = pnand %p7447_p5, %p7753_p8  ;;  %p7456_p11 = por %p7455_p10, %p7454_p4 }
  0x4f   : > { %p7450_p9 = pneg %p7449_p7 }
  0x51   : > { %p7457_p12 = pnand %p7456_p11, %p7450_p9 }
  0x53   : > { %7460 = shalt.err (!%p7457_p12)
}
  0x54   : > { %6595 = dma.hbm_to_vmem [thread:$0]  (!%p7737_p6), %s8508_s2, 64, %s7743_s25, [#allocation8]  }
  0x55   : > { %s7632_s18 = smov [#allocation12]   ;;  %s7461_s26 = scalar_lea.hbm %s8510_s4, 24576 }
  0x56   : > { %s322_s9 = sshll.u32 %s7632_s18, 4  ;;  %p7462_p13 = scmp.ne.s32.totalorder %s8510_s4, %s7461_s26  ;;  %s323_s9 = int_to_ptr.vmem [resolvable:$true] %s322_s9 }
  0x57   : > { %p7468_p5 = scmp.lt.u32.totalorder %s7461_s26, %s8510_s4 }
  0x58   : > { %p7464_p0 = pnand %p7462_p13, %p7753_p8 }
  0x5a   : > { %p7465_p2 = pneg %p7464_p0 }
  0x5c   : > { %p7470_p7 = pnand %p7468_p5, %p7465_p2 }
  0x5e   : > { %7473 = shalt.err (!%p7470_p7)
}
  0x5f   : > { %s7474_s25 = scalar_lea.vmem %s323_s9, 24576  ;;  %p7482_p11 = scmp.lt.s32.totalorder %s323_s9, %s323_s9 }
  0x60   : > { %p7475_p9 = scmp.ne.s32.totalorder %s323_s9, %s7474_s25  ;;  %p7483_p12 = scmp.lt.s32.totalorder %s7474_s25, %s7474_s25 }
  0x62   : > { %p7477_p4 = pnand %p7475_p9, %p7753_p8  ;;  %p7484_p1 = por %p7483_p12, %p7482_p11 }
  0x64   : > { %p7478_p10 = pneg %p7477_p4 }
  0x66   : > { %p7485_p3 = pnand %p7484_p1, %p7478_p10 }
  0x68   : > { %7488 = shalt.err (!%p7485_p3)
}
  0x69   : > { %s7633_s12 = smov 128   ;;  %s7634_s22 = smov 8  }
  0x6a   : > { %6601 = dma.hbm_to_vmem [thread:$0]  (!%p7737_p6), %s8510_s4, 24576, %s323_s9, [#allocation11], %s7633_s12, %s7633_s12, %s7634_s22  }
  0x6b   : > { %s7635_s18 = smov [#allocation13]   ;;  %s7489_s27 = scalar_lea.hbm %s8513_s7, 16384 }
  0x6c   : > { %s341_s10 = sshll.u32 %s7635_s18, 4  ;;  %p7490_p1 = scmp.ne.s32.totalorder %s8513_s7, %s7489_s27  ;;  %s342_s10 = int_to_ptr.vmem [resolvable:$true] %s341_s10 }
  0x6d   : > { %p7496_p0 = scmp.lt.u32.totalorder %s7489_s27, %s8513_s7 }
  0x6e   : > { %p7492_p3 = pnand %p7490_p1, %p7753_p8 }
  0x70   : > { %p7493_p13 = pneg %p7492_p3 }
  0x72   : > { %p7498_p2 = pnand %p7496_p0, %p7493_p13 }
  0x74   : > { %7501 = shalt.err (!%p7498_p2)
}
  0x75   : > { %s7502_s9 = scalar_lea.vmem %s342_s10, 16384  ;;  %p7510_p4 = scmp.lt.s32.totalorder %s342_s10, %s342_s10 }
  0x76   : > { %p7503_p5 = scmp.ne.s32.totalorder %s342_s10, %s7502_s9  ;;  %p7511_p10 = scmp.lt.s32.totalorder %s7502_s9, %s7502_s9 }
  0x78   : > { %p7505_p7 = pnand %p7503_p5, %p7753_p8  ;;  %p7512_p11 = por %p7511_p10, %p7510_p4 }
  0x7a   : > { %p7506_p9 = pneg %p7505_p7 }
  0x7c   : > { %p7513_p12 = pnand %p7512_p11, %p7506_p9 }
  0x7e   : > { %7516 = shalt.err (!%p7513_p12)
}
  0x7f   : > { %s7636_s12 = smov 512   ;;  %s7637_s11 = smov 32  }
  0x80   : > { %6604 = dma.hbm_to_vmem [thread:$0]  (!%p7737_p6), %s8513_s7, 16384, %s342_s10, [#allocation14], %s7636_s12, %s7636_s12, %s7637_s11  }
  0x81   : > { %s5823_s21 = sadd.s32 4294967294, %s7625_s16   ;;  %s7858_s18 = sadd.s32 1, %s7625_s16  }
  0x82   : > { %s36_s24 = sadd.s32 1, %s7621_s15  ;;  %s33_s26 = ssub.s32 %s7625_s16, %s7858_s18 }
  0x83   : > { %p43_p8 = scmp.ne.s32.totalorder %s7621_s15, %s7617_s14  ;;  %p34_p1 = scmp.eq.s32.totalorder %s33_s26, 0 }
  0x84   : > { %p44_p3 = scmp.eq.s32.totalorder %s7625_s16, 0  ;;  %p49_p13 = scmp.ne.s32.totalorder %s7617_s14, %s7613_s13 }
  0x85   : > { %p262_p0 = scmp.eq.s32.totalorder %s7721_s19, 1  ;;  %p8526_p5 = scmp.eq.s32.totalorder %s7721_s19, 0 }
  0x86   : > { %s7870_s27 = scalar_select %p34_p1, %s7621_s15, %s36_s24  }
  0x87   : > { %p45_p2 = por %p44_p3, %p43_p8  ;;  %p7874_p7 = por %p8526_p5, %p49_p13 }
  0x88   : > { %p7878_p6 = por %p262_p0, %p43_p8  ;;  %p268_p9 = scmp.eq.s32.totalorder %s5823_s21, 1 }
  0x89   : > { %p6618_p4 = scmp.lt.s32.totalorder %s7625_s16, 2  ;;  %s361_s28 = sand.u32 1, %s7621_s15  }
  0x8a   : > { %s8528_s10 = scalar_select %p7878_p6, 1, 0 }
  0x8b   : > { %p7884_p10 = por %p268_p9, %p49_p13  ;;  %s5831_s30 = sshll.u32 %s361_s28, 8 }
  0x8c   : > { %s6426_s25 = sshll.u32 %s7625_s16, 12  ;;  %s365_s22 = scalar_lea.vmem [#allocation4], %s5831_s30 }
  0x8d   : > { %s8529_s29 = scalar_select %p7884_p10, 1, 0 }
  0x8e   : > { %s7892_s11 = scalar_lea.hbm %s8506_s0, %s6426_s25  ;;  %s373_s17 = sshll.u32 %s365_s22, 4  ;;  %s7898_s17 = int_to_ptr.vmem [resolvable:$true] %s373_s17 }
  0x8f   : > { %p7894_p11 = pnand %p6618_p4, %p45_p2  ;;  %s7900_s24 = scalar_lea.sflag [#allocation5], %s361_s28 }
  0x90   : > { %s7517_s26 = scalar_lea.hbm %s7892_s11, 4096  ;;  %s7522_s9 = scalar_lea.hbm %s8506_s0, 8192 }
  0x91   : > { %p7518_p12 = scmp.ne.s32.totalorder %s7892_s11, %s7517_s26  ;;  %p7519_p8 = pneg %p7894_p11 }
  0x92   : > { %p7523_p13 = scmp.lt.u32.totalorder %s7892_s11, %s8506_s0  ;;  %p7524_p0 = scmp.lt.u32.totalorder %s7522_s9, %s7517_s26 }
  0x93   : > { %p7520_p1 = pnand %p7519_p8, %p7518_p12  ;;  %p7526_p5 = scmp.lt.u32.totalorder %s7517_s26, %s7892_s11 }
  0x94   : > { %p7525_p2 = por %p7524_p0, %p7523_p13 }
  0x95   : > { %p7521_p3 = pneg %p7520_p1 }
  0x96   : > { %p7527_p9 = por %p7526_p5, %p7525_p2 }
  0x98   : > { %p7528_p4 = pnand %p7527_p9, %p7521_p3 }
  0x9a   : > { %7531 = shalt.err (!%p7528_p4)
}
  0x9b   : > { %s7532_s28 = scalar_lea.vmem %s7898_s17, 4096  ;;  %s7638_s30 = smov [#allocation4]  }
  0x9c   : > { %p7533_p12 = scmp.ne.s32.totalorder %s7898_s17, %s7532_s28  ;;  %s7537_s25 = sshll.u32 %s7638_s30, 4  ;;  %s7538_s25 = int_to_ptr.vmem [resolvable:$false] %s7537_s25 }
  0x9d   : > { %s7539_s12 = scalar_lea.vmem %s7538_s25, 8192  ;;  %p7540_p6 = scmp.lt.s32.totalorder %s7898_s17, %s7538_s25 }
  0x9e   : > { %p7535_p1 = pnand %p7533_p12, %p7519_p8  ;;  %p7541_p13 = scmp.lt.s32.totalorder %s7539_s12, %s7532_s28 }
  0xa0   : > { %p7536_p10 = pneg %p7535_p1  ;;  %p7542_p0 = por %p7541_p13, %p7540_p6 }
  0xa2   : > { %p7543_p2 = pnand %p7542_p0, %p7536_p10 }
  0xa4   : > { %7546 = shalt.err (!%p7543_p2)
}
  0xa5   : > { %s7639_s26 = smov 1024   ;;  %s7640_s9 = smov 64  }
  0xa6   : > { %6608 = dma.hbm_to_vmem [thread:$0]  (!%p7894_p11), %s7892_s11, 4096, %s7898_s17, %s7900_s24, %s7639_s26, %s7639_s26, %s7640_s9  }
  0xa7   : > { %p8531_p8 = scmp.ne.s32.totalorder %s8523_s20, 0 }
  0xa8   : > { %s7931_s22 = sand.u32 (!%p8531_p8), 1, %s7617_s14  }
  0xa9   : > { %385 = sbr.rel (%p8531_p8) target bundleno = 1653 (0x675), region = 60  ;;  %s5836_s28 = sshll.u32 (!%p8531_p8), %s7931_s22, 8 }
  0xaa   : > { %s388_s30 = scalar_lea.sflag (!%p8531_p8), [#allocation5], %s7931_s22  ;;  %s7937_s25 = scalar_lea.vmem (!%p8531_p8), [#allocation4], %s5836_s28 }
  0xb0   : > { %7592 = dma.done.wait (%p7874_p7), %s388_s30, 4096  }
  0xb1   : > { %7594 = vsyncadd (%p7874_p7), %s388_s30, 4294963200  ;;  %p8532_p6 = scmp.eq.s32.totalorder %s7721_s19, 0 }
  0xb3   : > { %7596 = dma.done.wait (%p8532_p6), [#allocation8], 32832   ;;  %p8533_p10 = pmov %p8532_p6 }
  0xb4   : > { %p8534_p11 = pmov %p8532_p6 }
  0xb5   : > { %7598 = vsyncadd (%p8533_p10), [#allocation8], 4294934464 }
  0xb6   : > { %7600 = dma.done.wait (%p8534_p11), [#allocation11], 24640   ;;  %p8535_p3 = pmov %p8532_p6 }
  0xb8   : > { %7602 = vsyncadd (%p8535_p3), [#allocation11], 4294942656  ;;  %p8536_p5 = pmov %p8535_p3 }
  0xb9   : > { %p8537_p9 = pmov %p8535_p3 }
  0xba   : > { %7604 = dma.done.wait (%p8536_p5), [#allocation14], 16384  }
  0xbb   : > { %7606 = vsyncadd (%p8537_p9), [#allocation14], 4294950912  ;;  %v6673_v0 = vld [vmem:[#allocation7 + $0x4] ss:$16 sps:$4 sm:$0xff]   ;;  %v6677_v2 = vld [vmem:[#allocation7] ss:$16 sps:$4 sm:$0xff]  }
  0xbc   : > { %v6675_v1 = vld [vmem:[#allocation7 + $0x204] ss:$16 sps:$4 sm:$0xff]   ;;  %2034 = vmatprep.subr.bf16.mxu1 %v6673_v0  ;;  %v6678_v3 = vld [vmem:[#allocation7 + $0x200] ss:$16 sps:$4 sm:$0xff]   ;;  %v451_v46 = vld [vmem:[%s7937_s25 + $0x8] sm:$0xff]  ;;  %vm2683_vm0 = vcmask 1040384  }
  0xbd   : > { %2087 = vmatprep.subr.bf16.mxu0 %v6675_v1  ;;  %v6679_v4 = vld [vmem:[#allocation7 + $0x24] ss:$16 sps:$4 sm:$0xff]   ;;  %2035 = vmatpush1.bf16.msra.mxu1 %v6677_v2  ;;  %v6683_v6 = vld [vmem:[#allocation7 + $0x20] ss:$16 sps:$4 sm:$0xff]   ;;  %v459_v49 = vld [vmem:[%s7937_s25 + $0x48] sm:$0xff]  ;;  %vm2832_vm7 = vcmask 1046528  }
  0xbe   : > { %2088 = vmatpush1.bf16.msra.mxu0 %v6678_v3  ;;  %v6681_v5 = vld [vmem:[#allocation7 + $0x224] ss:$16 sps:$4 sm:$0xff]   ;;  %2036 = vmatprep.subr.bf16.mxu1 %v6679_v4  ;;  %v6684_v7 = vld [vmem:[#allocation7 + $0x220] ss:$16 sps:$4 sm:$0xff]   ;;  %v7957_v50 = vpack.c.bf16 %v459_v49, %v451_v46  ;;  %v453_v51 = vld [vmem:[%s7937_s25 + $0x18] sm:$0xff]  ;;  %s8548_s9 = sld [smem:[#allocation21_spill]] }
  0xbf   : > { %2089 = vmatprep.subr.bf16.mxu0 %v6681_v5  ;;  %v6685_v8 = vld [vmem:[#allocation7 + $0x44] ss:$16 sps:$4 sm:$0xff]   ;;  %v6689_v10 = vld [vmem:[#allocation7 + $0x40] ss:$16 sps:$4 sm:$0xff]   ;;  %v461_v52 = vld [vmem:[%s7937_s25 + $0x58] sm:$0xff]  ;;  %s8373_s30 = scalar_lea.vmem [#allocation15], %s5836_s28 }
  0xc0   : > { %v6687_v9 = vld [vmem:[#allocation7 + $0x244] ss:$16 sps:$4 sm:$0xff]   ;;  %v6690_v11 = vld [vmem:[#allocation7 + $0x240] ss:$16 sps:$4 sm:$0xff]   ;;  %v7961_v55 = vpack.c.bf16 %v461_v52, %v453_v51  ;;  %2066 = vmatprep.mubr.bf16.mxu1 %v7957_v50  ;;  %s6428_s28 = sshll.u32 %s7721_s19, 12  ;;  %s5702_s20 = sshll.u32 %s8373_s30, 4  ;;  %s8459_s20 = int_to_ptr.vmem [resolvable:$true] %s5702_s20 }
  0xc1   : > { %2037 = vmatpush1.bf16.msra.mxu1 %v6683_v6  ;;  %v6691_v12 = vld [vmem:[#allocation7 + $0x64] ss:$16 sps:$4 sm:$0xff]   ;;  %v6695_v14 = vld [vmem:[#allocation7 + $0x60] ss:$16 sps:$4 sm:$0xff]   ;;  %s8549_s17 = sld [smem:[#allocation22_spill]]  ;;  %s5688_s19 = scalar_lea.sflag [#allocation6], %s7931_s22 }
  0xc2   : > { %2090 = vmatpush1.bf16.msra.mxu0 %v6684_v7  ;;  %2038 = vmatprep.subr.bf16.mxu1 %v6685_v8  ;;  %v6693_v13 = vld [vmem:[#allocation7 + $0x264] ss:$16 sps:$4 sm:$0xff]   ;;  %v6696_v15 = vld [vmem:[#allocation7 + $0x260] ss:$16 sps:$4 sm:$0xff]   ;;  %s7547_s24 = scalar_lea.vmem %s8459_s20, 4096  ;;  %p8550_p4 = scmp.ne.s32.totalorder %s8528_s10, 0 }
  0xc3   : > { %2091 = vmatprep.subr.bf16.mxu0 %v6687_v9  ;;  %v6697_v16 = vld [vmem:[#allocation7 + $0x84] ss:$16 sps:$4 sm:$0xff]   ;;  %v6701_v18 = vld [vmem:[#allocation7 + $0x80] ss:$16 sps:$4 sm:$0xff]   ;;  %2119 = vmatprep.mubr.bf16.mxu0 %v7961_v55  ;;  %p7548_p7 = scmp.ne.s32.totalorder %s8459_s20, %s7547_s24 }
  0xc4   : > { %v6699_v17 = vld [vmem:[#allocation7 + $0x284] ss:$16 sps:$4 sm:$0xff]   ;;  %v6702_v19 = vld [vmem:[#allocation7 + $0x280] ss:$16 sps:$4 sm:$0xff]  }
  0xc5   : > { %2039 = vmatpush1.bf16.msra.mxu1 %v6689_v10  ;;  %v6703_v20 = vld [vmem:[#allocation7 + $0xa4] ss:$16 sps:$4 sm:$0xff]   ;;  %v6707_v22 = vld [vmem:[#allocation7 + $0xa0] ss:$16 sps:$4 sm:$0xff]   ;;  %p7549_p12 = pnand %p7548_p7, %p8550_p4 }
  0xc6   : > { %2092 = vmatpush1.bf16.msra.mxu0 %v6690_v11  ;;  %2040 = vmatprep.subr.bf16.mxu1 %v6691_v12  ;;  %v6705_v21 = vld [vmem:[#allocation7 + $0x2a4] ss:$16 sps:$4 sm:$0xff]   ;;  %v6708_v23 = vld [vmem:[#allocation7 + $0x2a0] ss:$16 sps:$4 sm:$0xff]   ;;  %v6774_v11 = vld [vmem:[#allocation7 + $0xc] ss:$16 sps:$4 sm:$0xff]  }
  0xc7   : > { %2093 = vmatprep.subr.bf16.mxu0 %v6693_v13  ;;  %v6709_v24 = vld [vmem:[#allocation7 + $0xc4] ss:$16 sps:$4 sm:$0xff]   ;;  %v6713_v26 = vld [vmem:[#allocation7 + $0xc0] ss:$16 sps:$4 sm:$0xff]   ;;  %s8457_s21 = scalar_lea.hbm %s8549_s17, %s6428_s28  ;;  %p7550_p1 = pneg %p7549_p12 }
  0xc8   : > { %v6711_v25 = vld [vmem:[#allocation7 + $0x2c4] ss:$16 sps:$4 sm:$0xff]   ;;  %v6714_v27 = vld [vmem:[#allocation7 + $0x2c0] ss:$16 sps:$4 sm:$0xff]  }
  0xc9   : > { %2041 = vmatpush1.bf16.msra.mxu1 %v6695_v14  ;;  %v6715_v28 = vld [vmem:[#allocation7 + $0xe4] ss:$16 sps:$4 sm:$0xff]   ;;  %v6719_v30 = vld [vmem:[#allocation7 + $0xe0] ss:$16 sps:$4 sm:$0xff]   ;;  %v6772_v14 = vld [vmem:[#allocation7 + $0x8] ss:$16 sps:$4 sm:$0xff]  }
  0xca   : > { %2094 = vmatpush1.bf16.msra.mxu0 %v6696_v15  ;;  %2042 = vmatprep.subr.bf16.mxu1 %v6697_v16  ;;  %v6717_v29 = vld [vmem:[#allocation7 + $0x2e4] ss:$16 sps:$4 sm:$0xff]   ;;  %v6720_v31 = vld [vmem:[#allocation7 + $0x2e0] ss:$16 sps:$4 sm:$0xff]  }
  0xcb   : > { %2095 = vmatprep.subr.bf16.mxu0 %v6699_v17  ;;  %v6721_v32 = vld [vmem:[#allocation7 + $0x104] ss:$16 sps:$4 sm:$0xff]   ;;  %v6725_v34 = vld [vmem:[#allocation7 + $0x100] ss:$16 sps:$4 sm:$0xff]   ;;  %v6780_v17 = vld [vmem:[#allocation7 + $0x2c] ss:$16 sps:$4 sm:$0xff]  }
  0xcc   : > { %v6723_v33 = vld [vmem:[#allocation7 + $0x304] ss:$16 sps:$4 sm:$0xff]   ;;  %v6726_v35 = vld [vmem:[#allocation7 + $0x300] ss:$16 sps:$4 sm:$0xff]  }
  0xcd   : > { %2043 = vmatpush1.bf16.msra.mxu1 %v6701_v18  ;;  %v6727_v36 = vld [vmem:[#allocation7 + $0x124] ss:$16 sps:$4 sm:$0xff]   ;;  %v6731_v38 = vld [vmem:[#allocation7 + $0x120] ss:$16 sps:$4 sm:$0xff]  }
  0xce   : > { %2096 = vmatpush1.bf16.msra.mxu0 %v6702_v19  ;;  %2044 = vmatprep.subr.bf16.mxu1 %v6703_v20  ;;  %v6729_v37 = vld [vmem:[#allocation7 + $0x324] ss:$16 sps:$4 sm:$0xff]   ;;  %v6732_v39 = vld [vmem:[#allocation7 + $0x320] ss:$16 sps:$4 sm:$0xff]   ;;  %v6778_v19 = vld [vmem:[#allocation7 + $0x28] ss:$16 sps:$4 sm:$0xff]  }
  0xcf   : > { %2097 = vmatprep.subr.bf16.mxu0 %v6705_v21  ;;  %v6733_v40 = vld [vmem:[#allocation7 + $0x144] ss:$16 sps:$4 sm:$0xff]   ;;  %v6737_v42 = vld [vmem:[#allocation7 + $0x140] ss:$16 sps:$4 sm:$0xff]   ;;  %v6786_v21 = vld [vmem:[#allocation7 + $0x4c] ss:$16 sps:$4 sm:$0xff]  }
  0xd0   : > { %v6735_v41 = vld [vmem:[#allocation7 + $0x344] ss:$16 sps:$4 sm:$0xff]   ;;  %v6738_v43 = vld [vmem:[#allocation7 + $0x340] ss:$16 sps:$4 sm:$0xff]  }
  0xd1   : > { %2045 = vmatpush1.bf16.msra.mxu1 %v6707_v22  ;;  %v6739_v44 = vld [vmem:[#allocation7 + $0x164] ss:$16 sps:$4 sm:$0xff]   ;;  %v6743_v47 = vld [vmem:[#allocation7 + $0x160] ss:$16 sps:$4 sm:$0xff]  }
  0xd2   : > { %2098 = vmatpush1.bf16.msra.mxu0 %v6708_v23  ;;  %2046 = vmatprep.subr.bf16.mxu1 %v6709_v24  ;;  %v6741_v45 = vld [vmem:[#allocation7 + $0x364] ss:$16 sps:$4 sm:$0xff]   ;;  %v6744_v48 = vld [vmem:[#allocation7 + $0x360] ss:$16 sps:$4 sm:$0xff]   ;;  %v6784_v23 = vld [vmem:[#allocation7 + $0x48] ss:$16 sps:$4 sm:$0xff]  }
  0xd3   : > { %2099 = vmatprep.subr.bf16.mxu0 %v6711_v25  ;;  %v6745_v53 = vld [vmem:[#allocation7 + $0x184] ss:$16 sps:$4 sm:$0xff]   ;;  %v6749_v56 = vld [vmem:[#allocation7 + $0x180] ss:$16 sps:$4 sm:$0xff]   ;;  %v6792_v25 = vld [vmem:[#allocation7 + $0x6c] ss:$16 sps:$4 sm:$0xff]  }
  0xd4   : > { %v6747_v54 = vld [vmem:[#allocation7 + $0x384] ss:$16 sps:$4 sm:$0xff]   ;;  %v6750_v57 = vld [vmem:[#allocation7 + $0x380] ss:$16 sps:$4 sm:$0xff]  }
  0xd5   : > { %2047 = vmatpush1.bf16.msra.mxu1 %v6713_v26  ;;  %v6751_v58 = vld [vmem:[#allocation7 + $0x1a4] ss:$16 sps:$4 sm:$0xff]   ;;  %v6755_v60 = vld [vmem:[#allocation7 + $0x1a0] ss:$16 sps:$4 sm:$0xff]  }
  0xd6   : > { %2100 = vmatpush1.bf16.msra.mxu0 %v6714_v27  ;;  %2048 = vmatprep.subr.bf16.mxu1 %v6715_v28  ;;  %v6753_v59 = vld [vmem:[#allocation7 + $0x3a4] ss:$16 sps:$4 sm:$0xff]   ;;  %v6756_v61 = vld [vmem:[#allocation7 + $0x3a0] ss:$16 sps:$4 sm:$0xff]   ;;  %v6790_v27 = vld [vmem:[#allocation7 + $0x68] ss:$16 sps:$4 sm:$0xff]  }
  0xd7   : > { %2101 = vmatprep.subr.bf16.mxu0 %v6717_v29  ;;  %v6757_v62 = vld [vmem:[#allocation7 + $0x1c4] ss:$16 sps:$4 sm:$0xff]   ;;  %v6761_v0 = vld [vmem:[#allocation7 + $0x1c0] ss:$16 sps:$4 sm:$0xff]   ;;  %v6798_v29 = vld [vmem:[#allocation7 + $0x8c] ss:$16 sps:$4 sm:$0xff]  }
  0xd8   : > { %v6759_v63 = vld [vmem:[#allocation7 + $0x3c4] ss:$16 sps:$4 sm:$0xff]   ;;  %v6762_v1 = vld [vmem:[#allocation7 + $0x3c0] ss:$16 sps:$4 sm:$0xff]  }
  0xd9   : > { %2049 = vmatpush1.bf16.msra.mxu1 %v6719_v30  ;;  %v6763_v2 = vld [vmem:[#allocation7 + $0x1e4] ss:$16 sps:$4 sm:$0xff]   ;;  %v6767_v4 = vld [vmem:[#allocation7 + $0x1e0] ss:$16 sps:$4 sm:$0xff]  }
  0xda   : > { %2102 = vmatpush1.bf16.msra.mxu0 %v6720_v31  ;;  %2050 = vmatprep.subr.bf16.mxu1 %v6721_v32  ;;  %v6765_v3 = vld [vmem:[#allocation7 + $0x3e4] ss:$16 sps:$4 sm:$0xff]   ;;  %v6768_v5 = vld [vmem:[#allocation7 + $0x3e0] ss:$16 sps:$4 sm:$0xff]   ;;  %v6796_v31 = vld [vmem:[#allocation7 + $0x88] ss:$16 sps:$4 sm:$0xff]  }
  0xdb   : > { %2103 = vmatprep.subr.bf16.mxu0 %v6723_v33  ;;  %v450_v6 = vld [vmem:[%s7937_s25] sm:$0xff]  ;;  %v452_v9 = vld [vmem:[%s7937_s25 + $0x10] sm:$0xff]  ;;  %v6804_v33 = vld [vmem:[#allocation7 + $0xac] ss:$16 sps:$4 sm:$0xff]  }
  0xdc   : > { %v458_v7 = vld [vmem:[%s7937_s25 + $0x40] sm:$0xff]  ;;  %v460_v10 = vld [vmem:[%s7937_s25 + $0x50] sm:$0xff] }
  0xdd   : > { %2051 = vmatpush1.bf16.msra.mxu1 %v6725_v34  ;;  %v6771_v8 = vld [vmem:[#allocation7 + $0x404] ss:$16 sps:$4 sm:$0xff]   ;;  %v7969_v12 = vpack.c.bf16 %v458_v7, %v450_v6  ;;  %v6769_v13 = vld [vmem:[#allocation7 + $0x400] ss:$16 sps:$4 sm:$0xff]   ;;  %v7971_v15 = vpack.c.bf16 %v460_v10, %v452_v9  ;;  %v6832_v7 = vld [vmem:[#allocation7 + $0x148] ss:$16 sps:$4 sm:$0xff]  }
  0xde   : > { %2104 = vmatpush1.bf16.msra.mxu0 %v6726_v35  ;;  %2052 = vmatprep.subr.bf16.mxu1 %v6727_v36  ;;  %v6777_v16 = vld [vmem:[#allocation7 + $0x424] ss:$16 sps:$4 sm:$0xff]   ;;  %v6775_v18 = vld [vmem:[#allocation7 + $0x420] ss:$16 sps:$4 sm:$0xff]   ;;  %v6802_v35 = vld [vmem:[#allocation7 + $0xa8] ss:$16 sps:$4 sm:$0xff]  }
  0xdf   : > { %2105 = vmatprep.subr.bf16.mxu0 %v6729_v37  ;;  %v6783_v20 = vld [vmem:[#allocation7 + $0x444] ss:$16 sps:$4 sm:$0xff]   ;;  %v6781_v22 = vld [vmem:[#allocation7 + $0x440] ss:$16 sps:$4 sm:$0xff]   ;;  %v467_v36 = vld [vmem:[%s7937_s25 + $0x88] sm:$0xff] }
  0xe0   : > { %v6789_v24 = vld [vmem:[#allocation7 + $0x464] ss:$16 sps:$4 sm:$0xff]   ;;  %v6787_v26 = vld [vmem:[#allocation7 + $0x460] ss:$16 sps:$4 sm:$0xff]   ;;  %v475_v37 = vld [vmem:[%s7937_s25 + $0xc8] sm:$0xff] }
  0xe1   : > { %2053 = vmatpush1.bf16.msra.mxu1 %v6731_v38  ;;  %v6795_v28 = vld [vmem:[#allocation7 + $0x484] ss:$16 sps:$4 sm:$0xff]   ;;  %v6793_v30 = vld [vmem:[#allocation7 + $0x480] ss:$16 sps:$4 sm:$0xff]   ;;  %v6840_v9 = vld [vmem:[#allocation7 + $0x16c] ss:$16 sps:$4 sm:$0xff]  }
  0xe2   : > { %2106 = vmatpush1.bf16.msra.mxu0 %v6732_v39  ;;  %2054 = vmatprep.subr.bf16.mxu1 %v6733_v40  ;;  %v6801_v32 = vld [vmem:[#allocation7 + $0x4a4] ss:$16 sps:$4 sm:$0xff]   ;;  %v6799_v34 = vld [vmem:[#allocation7 + $0x4a0] ss:$16 sps:$4 sm:$0xff]   ;;  %v7979_v40 = vpack.c.bf16 %v475_v37, %v467_v36 }
  0xe3   : > { %2107 = vmatprep.subr.bf16.mxu0 %v6735_v41  ;;  %v466_v38 = vld [vmem:[%s7937_s25 + $0x80] sm:$0xff]  ;;  %v468_v49 = vld [vmem:[%s7937_s25 + $0x90] sm:$0xff] }
  0xe4   : > { %v474_v39 = vld [vmem:[%s7937_s25 + $0xc0] sm:$0xff]  ;;  %v476_v51 = vld [vmem:[%s7937_s25 + $0xd0] sm:$0xff] }
  0xe5   : > { %2055 = vmatpush1.bf16.msra.mxu1 %v6737_v42  ;;  %v7981_v41 = vpack.c.bf16 %v474_v39, %v466_v38  ;;  %v469_v42 = vld [vmem:[%s7937_s25 + $0x98] sm:$0xff]  ;;  %v6813_v52 = vld [vmem:[#allocation7 + $0x4e4] ss:$16 sps:$4 sm:$0xff]   ;;  %v6829_v6 = vld [vmem:[#allocation7 + $0x540] ss:$16 sps:$4 sm:$0xff]  }
  0xe6   : > { %2108 = vmatpush1.bf16.msra.mxu0 %v6738_v43  ;;  %2056 = vmatprep.subr.bf16.mxu1 %v6739_v44  ;;  %v477_v43 = vld [vmem:[%s7937_s25 + $0xd8] sm:$0xff]  ;;  %v6807_v44 = vld [vmem:[#allocation7 + $0x4c4] ss:$16 sps:$4 sm:$0xff]   ;;  %v6835_v10 = vld [vmem:[#allocation7 + $0x560] ss:$16 sps:$4 sm:$0xff]  }
  0xe7   : > { %2109 = vmatprep.subr.bf16.mxu0 %v6741_v45  ;;  %v6810_v45 = vld [vmem:[#allocation7 + $0xcc] ss:$16 sps:$4 sm:$0xff]   ;;  %v7985_v46 = vpack.c.bf16 %v477_v43, %v469_v42  ;;  %v6873_v37 = vld [vmem:[#allocation7 + $0x624] ss:$16 sps:$4 sm:$0xff]   ;;  %v6871_v43 = vld [vmem:[#allocation7 + $0x620] ss:$16 sps:$4 sm:$0xff]  }
  0xe8   : > { %v6876_v38 = vld [vmem:[#allocation7 + $0x22c] ss:$16 sps:$4 sm:$0xff]  }
  0xe9   : > { %2057 = vmatpush1.bf16.msra.mxu1 %v6743_v47  ;;  %v6805_v47 = vld [vmem:[#allocation7 + $0x4c0] ss:$16 sps:$4 sm:$0xff]   ;;  %v471_v39 = vld [vmem:[%s7937_s25 + $0xa8] sm:$0xff] }
  0xea   : > { %2110 = vmatpush1.bf16.msra.mxu0 %v6744_v48  ;;  %2058 = vmatprep.subr.bf16.mxu1 %v6745_v53  ;;  %v6808_v48 = vld [vmem:[#allocation7 + $0xc8] ss:$16 sps:$4 sm:$0xff]   ;;  %v7992_v53 = vpack.c.bf16 %v476_v51, %v468_v49  ;;  %v478_v49 = vld [vmem:[%s7937_s25 + $0xe0] sm:$0xff]  ;;  %v6882_v51 = vld [vmem:[#allocation7 + $0x24c] ss:$16 sps:$4 sm:$0xff]  }
  0xeb   : > { %2111 = vmatprep.subr.bf16.mxu0 %v6747_v54  ;;  %v6816_v54 = vld [vmem:[#allocation7 + $0xec] ss:$16 sps:$4 sm:$0xff]  }
  0xec   : > { %v479_v42 = vld [vmem:[%s7937_s25 + $0xe8] sm:$0xff] }
  0xed   : > { %2059 = vmatpush1.bf16.msra.mxu1 %v6749_v56  ;;  %v455_v56 = vld [vmem:[%s7937_s25 + $0x28] sm:$0xff] }
  0xee   : > { %2112 = vmatpush1.bf16.msra.mxu0 %v6750_v57  ;;  %2060 = vmatprep.subr.bf16.mxu1 %v6751_v58  ;;  %v463_v57 = vld [vmem:[%s7937_s25 + $0x68] sm:$0xff]  ;;  %v6811_v58 = vld [vmem:[#allocation7 + $0x4e0] ss:$16 sps:$4 sm:$0xff]  }
  0xef   : > { %2113 = vmatprep.subr.bf16.mxu0 %v6753_v59  ;;  %v6814_v59 = vld [vmem:[#allocation7 + $0xe8] ss:$16 sps:$4 sm:$0xff]  }
  0xf1   : > { %2061 = vmatpush1.bf16.msra.mxu1 %v6755_v60  ;;  %v7998_v60 = vpack.c.bf16 %v463_v57, %v455_v56  ;;  %v457_v57 = vld [vmem:[%s7937_s25 + $0x38] sm:$0xff] }
  0xf2   : > { %2114 = vmatpush1.bf16.msra.mxu0 %v6756_v61  ;;  %2062 = vmatprep.subr.bf16.mxu1 %v6757_v62  ;;  %v6819_v61 = vld [vmem:[#allocation7 + $0x504] ss:$16 sps:$4 sm:$0xff]   ;;  %v6822_v62 = vld [vmem:[#allocation7 + $0x10c] ss:$16 sps:$4 sm:$0xff]  }
  0xf3   : > { %2115 = vmatprep.subr.bf16.mxu0 %v6759_v63  ;;  %v6817_v63 = vld [vmem:[#allocation7 + $0x500] ss:$16 sps:$4 sm:$0xff]  }
  0xf5   : > { %2063 = vmatpush1.bf16.msra.mxu1 %v6761_v0  ;;  %v6820_v0 = vld [vmem:[#allocation7 + $0x108] ss:$16 sps:$4 sm:$0xff]  }
  0xf6   : > { %2116 = vmatpush1.bf16.msra.mxu0 %v6762_v1  ;;  %2064 = vmatprep.subr.bf16.mxu1 %v6763_v2  ;;  %v6825_v1 = vld [vmem:[#allocation7 + $0x524] ss:$16 sps:$4 sm:$0xff]   ;;  %v6823_v2 = vld [vmem:[#allocation7 + $0x520] ss:$16 sps:$4 sm:$0xff]  }
  0xf7   : > { %2117 = vmatprep.subr.bf16.mxu0 %v6765_v3  ;;  %v6826_v3 = vld [vmem:[#allocation7 + $0x128] ss:$16 sps:$4 sm:$0xff]  }
  0xf9   : > { %2065 = vmatpush1.bf16.msra.mxu1 %v6767_v4  ;;  %v6831_v4 = vld [vmem:[#allocation7 + $0x544] ss:$16 sps:$4 sm:$0xff]  }
  0xfa   : > { %2118 = vmatpush1.bf16.msra.mxu0 %v6768_v5  ;;  %2246 = vmatprep.subr.bf16.mxu1 %v6774_v11  ;;  %v6834_v5 = vld [vmem:[#allocation7 + $0x14c] ss:$16 sps:$4 sm:$0xff]   ;;  %v6838_v11 = vld [vmem:[#allocation7 + $0x168] ss:$16 sps:$4 sm:$0xff]  }
  0xfb   : > { %2140 = vmatprep.subr.bf16.mxu0 %v6771_v8  ;;  %v6837_v8 = vld [vmem:[#allocation7 + $0x564] ss:$16 sps:$4 sm:$0xff]  }
  0xfc   : > { %2067 = vmatmul.mubr.bf16.vlgmr.msra.gmra.mrb[0].mxu1 %v7969_v12 }
  0xfd   : > { %2120 = vmatmul.mubr.bf16.vlgmr.msra.gmra.mrb[0].mxu0 %v7971_v15  ;;  %2247 = vmatpush1.bf16.msra.mxu1 %v6772_v14  ;;  %v6846_v14 = vld [vmem:[#allocation7 + $0x18c] ss:$16 sps:$4 sm:$0xff]  }
  0xfe   : > { %2141 = vmatpush1.bf16.msra.mxu0 %v6769_v13  ;;  %2248 = vmatprep.subr.bf16.mxu1 %v6780_v17  ;;  %v6843_v13 = vld [vmem:[#allocation7 + $0x584] ss:$16 sps:$4 sm:$0xff]   ;;  %v6844_v17 = vld [vmem:[#allocation7 + $0x188] ss:$16 sps:$4 sm:$0xff]  }
  0xff   : > { %2142 = vmatprep.subr.bf16.mxu0 %v6777_v16  ;;  %2076 = vmatprep.mubr.bf16.mxu1 %v7979_v40  ;;  %v6841_v16 = vld [vmem:[#allocation7 + $0x580] ss:$16 sps:$4 sm:$0xff]  }
 0x100   : > { %2129 = vmatprep.mubr.bf16.mxu0 %v7985_v46 }
 0x101   : > { %2249 = vmatpush1.bf16.msra.mxu1 %v6778_v19  ;;  %v6852_v19 = vld [vmem:[#allocation7 + $0x1ac] ss:$16 sps:$4 sm:$0xff]  }
 0x102   : > { %2143 = vmatpush1.bf16.msra.mxu0 %v6775_v18  ;;  %2250 = vmatprep.subr.bf16.mxu1 %v6786_v21  ;;  %v6849_v18 = vld [vmem:[#allocation7 + $0x5a4] ss:$16 sps:$4 sm:$0xff]   ;;  %v6850_v21 = vld [vmem:[#allocation7 + $0x1a8] ss:$16 sps:$4 sm:$0xff]  }
 0x103   : > { %2144 = vmatprep.subr.bf16.mxu0 %v6783_v20  ;;  %v6847_v20 = vld [vmem:[#allocation7 + $0x5a0] ss:$16 sps:$4 sm:$0xff]  }
 0x104   : > { %2077 = vmatmul.mubr.bf16.gmra.mrb[4].mxu1 %v7981_v41 }
 0x105   : > { %2251 = vmatpush1.bf16.msra.mxu1 %v6784_v23  ;;  %2130 = vmatmul.mubr.bf16.gmra.mrb[4].mxu0 %v7992_v53  ;;  %v6858_v23 = vld [vmem:[#allocation7 + $0x1cc] ss:$16 sps:$4 sm:$0xff]  }
 0x106   : > { %2145 = vmatpush1.bf16.msra.mxu0 %v6781_v22  ;;  %2252 = vmatprep.subr.bf16.mxu1 %v6792_v25  ;;  %v6855_v22 = vld [vmem:[#allocation7 + $0x5c4] ss:$16 sps:$4 sm:$0xff]   ;;  %v6856_v25 = vld [vmem:[#allocation7 + $0x1c8] ss:$16 sps:$4 sm:$0xff]  }
 0x107   : > { %2146 = vmatprep.subr.bf16.mxu0 %v6789_v24  ;;  %2278 = vmatprep.mubr.bf16.mxu1 %v7957_v50  ;;  %v6828_v50 = vld [vmem:[#allocation7 + $0x12c] ss:$16 sps:$4 sm:$0xff]   ;;  %v6853_v24 = vld [vmem:[#allocation7 + $0x5c0] ss:$16 sps:$4 sm:$0xff]  }
 0x108   : > { %2172 = vmatprep.mubr.bf16.mxu0 %v7998_v60 }
 0x109   : > { %2253 = vmatpush1.bf16.msra.mxu1 %v6790_v27  ;;  %v6864_v27 = vld [vmem:[#allocation7 + $0x1ec] ss:$16 sps:$4 sm:$0xff]  }
 0x10a   : > { %2147 = vmatpush1.bf16.msra.mxu0 %v6787_v26  ;;  %2254 = vmatprep.subr.bf16.mxu1 %v6798_v29  ;;  %v6861_v26 = vld [vmem:[#allocation7 + $0x5e4] ss:$16 sps:$4 sm:$0xff]   ;;  %v6862_v29 = vld [vmem:[#allocation7 + $0x1e8] ss:$16 sps:$4 sm:$0xff]  }
 0x10b   : > { %2148 = vmatprep.subr.bf16.mxu0 %v6795_v28  ;;  %v6859_v28 = vld [vmem:[#allocation7 + $0x5e0] ss:$16 sps:$4 sm:$0xff]  }
 0x10d   : > { %2255 = vmatpush1.bf16.msra.mxu1 %v6796_v31  ;;  %v454_v31 = vld [vmem:[%s7937_s25 + $0x20] sm:$0xff] }
 0x10e   : > { %2149 = vmatpush1.bf16.msra.mxu0 %v6793_v30  ;;  %2256 = vmatprep.subr.bf16.mxu1 %v6804_v33  ;;  %v6867_v30 = vld [vmem:[#allocation7 + $0x604] ss:$16 sps:$4 sm:$0xff]   ;;  %v6870_v33 = vld [vmem:[#allocation7 + $0x20c] ss:$16 sps:$4 sm:$0xff]  }
 0x10f   : > { %2150 = vmatprep.subr.bf16.mxu0 %v6801_v32  ;;  %v462_v32 = vld [vmem:[%s7937_s25 + $0x60] sm:$0xff] }
 0x110   : > { %v8003_v36 = vpack.c.bf16 %v462_v32, %v454_v31  ;;  %v6942_v31 = vld [vmem:[#allocation7 + $0x38c] ss:$16 sps:$4 sm:$0xff]   ;;  %v6937_v32 = vld [vmem:[#allocation7 + $0x780] ss:$16 sps:$4 sm:$0xff]  }
 0x111   : > { %2257 = vmatpush1.bf16.msra.mxu1 %v6802_v35  ;;  %v6868_v35 = vld [vmem:[#allocation7 + $0x208] ss:$16 sps:$4 sm:$0xff]  }
 0x112   : > { %2151 = vmatpush1.bf16.msra.mxu0 %v6799_v34  ;;  %2258 = vmatprep.subr.bf16.mxu1 %v6810_v45  ;;  %v6865_v34 = vld [vmem:[#allocation7 + $0x600] ss:$16 sps:$4 sm:$0xff]   ;;  %v8007_v45 = vpack.c.bf16 %v479_v42, %v471_v39  ;;  %v6951_v39 = vld [vmem:[#allocation7 + $0x7c4] ss:$16 sps:$4 sm:$0xff]   ;;  %v6954_v42 = vld [vmem:[#allocation7 + $0x3cc] ss:$16 sps:$4 sm:$0xff]  }
 0x113   : > { %2152 = vmatprep.subr.bf16.mxu0 %v6807_v44  ;;  %v6874_v44 = vld [vmem:[#allocation7 + $0x228] ss:$16 sps:$4 sm:$0xff]  }
 0x115   : > { %2259 = vmatpush1.bf16.msra.mxu1 %v6808_v48  ;;  %v470_v48 = vld [vmem:[%s7937_s25 + $0xa0] sm:$0xff] }
 0x116   : > { %2153 = vmatpush1.bf16.msra.mxu0 %v6805_v47  ;;  %2260 = vmatprep.subr.bf16.mxu1 %v6816_v54  ;;  %v6879_v47 = vld [vmem:[#allocation7 + $0x644] ss:$16 sps:$4 sm:$0xff]   ;;  %v6880_v54 = vld [vmem:[#allocation7 + $0x248] ss:$16 sps:$4 sm:$0xff]   ;;  %v8015_v56 = vpack.c.bf16 %v478_v49, %v470_v48  ;;  %v6960_v48 = vld [vmem:[#allocation7 + $0x3ec] ss:$16 sps:$4 sm:$0xff]  }
 0x117   : > { %2154 = vmatprep.subr.bf16.mxu0 %v6813_v52  ;;  %v6877_v52 = vld [vmem:[#allocation7 + $0x640] ss:$16 sps:$4 sm:$0xff]  }
 0x118   : > { %v6955_v49 = vld [vmem:[#allocation7 + $0x7e0] ss:$16 sps:$4 sm:$0xff]  }
 0x119   : > { %2261 = vmatpush1.bf16.msra.mxu1 %v6814_v59  ;;  %v6888_v59 = vld [vmem:[#allocation7 + $0x26c] ss:$16 sps:$4 sm:$0xff]  }
 0x11a   : > { %2155 = vmatpush1.bf16.msra.mxu0 %v6811_v58  ;;  %2262 = vmatprep.subr.bf16.mxu1 %v6822_v62  ;;  %v465_v58 = vld [vmem:[%s7937_s25 + $0x78] sm:$0xff] }
 0x11b   : > { %2156 = vmatprep.subr.bf16.mxu0 %v6819_v61  ;;  %v8019_v61 = vpack.c.bf16 %v465_v58, %v457_v57  ;;  %v6886_v62 = vld [vmem:[#allocation7 + $0x268] ss:$16 sps:$4 sm:$0xff]  }
 0x11c   : > { %v473_v57 = vld [vmem:[%s7937_s25 + $0xb8] sm:$0xff] }
 0x11d   : > { %2263 = vmatpush1.bf16.msra.mxu1 %v6820_v0  ;;  %v6894_v0 = vld [vmem:[#allocation7 + $0x28c] ss:$16 sps:$4 sm:$0xff]  }
 0x11e   : > { %2157 = vmatpush1.bf16.msra.mxu0 %v6817_v63  ;;  %2264 = vmatprep.subr.bf16.mxu1 %v6828_v50  ;;  %v6891_v63 = vld [vmem:[#allocation7 + $0x684] ss:$16 sps:$4 sm:$0xff]   ;;  %v6892_v50 = vld [vmem:[#allocation7 + $0x288] ss:$16 sps:$4 sm:$0xff]  }
 0x11f   : > { %2158 = vmatprep.subr.bf16.mxu0 %v6825_v1  ;;  %v6889_v1 = vld [vmem:[#allocation7 + $0x680] ss:$16 sps:$4 sm:$0xff]   ;;  %v481_v58 = vld [vmem:[%s7937_s25 + $0xf8] sm:$0xff] }
 0x121   : > { %2265 = vmatpush1.bf16.msra.mxu1 %v6826_v3  ;;  %v6895_v3 = vld [vmem:[#allocation7 + $0x6a0] ss:$16 sps:$4 sm:$0xff]  }
 0x122   : > { %2159 = vmatpush1.bf16.msra.mxu0 %v6823_v2  ;;  %2266 = vmatprep.subr.bf16.mxu1 %v6834_v5  ;;  %v6897_v2 = vld [vmem:[#allocation7 + $0x6a4] ss:$16 sps:$4 sm:$0xff]  }
 0x123   : > { %2160 = vmatprep.subr.bf16.mxu0 %v6831_v4  ;;  %v6898_v4 = vld [vmem:[#allocation7 + $0x2a8] ss:$16 sps:$4 sm:$0xff]   ;;  %v6903_v5 = vld [vmem:[#allocation7 + $0x6c4] ss:$16 sps:$4 sm:$0xff]  }
 0x125   : > { %2267 = vmatpush1.bf16.msra.mxu1 %v6832_v7  ;;  %v6901_v7 = vld [vmem:[#allocation7 + $0x6c0] ss:$16 sps:$4 sm:$0xff]  }
 0x126   : > { %2161 = vmatpush1.bf16.msra.mxu0 %v6829_v6  ;;  %2268 = vmatprep.subr.bf16.mxu1 %v6840_v9  ;;  %v6906_v6 = vld [vmem:[#allocation7 + $0x2cc] ss:$16 sps:$4 sm:$0xff]  }
 0x127   : > { %2162 = vmatprep.subr.bf16.mxu0 %v6837_v8  ;;  %v6904_v8 = vld [vmem:[#allocation7 + $0x2c8] ss:$16 sps:$4 sm:$0xff]   ;;  %v6912_v9 = vld [vmem:[#allocation7 + $0x2ec] ss:$16 sps:$4 sm:$0xff]  }
 0x129   : > { %2269 = vmatpush1.bf16.msra.mxu1 %v6838_v11  ;;  %v6910_v11 = vld [vmem:[#allocation7 + $0x2e8] ss:$16 sps:$4 sm:$0xff]  }
 0x12a   : > { %2163 = vmatpush1.bf16.msra.mxu0 %v6835_v10  ;;  %2270 = vmatprep.subr.bf16.mxu1 %v6846_v14  ;;  %v6907_v10 = vld [vmem:[#allocation7 + $0x6e0] ss:$16 sps:$4 sm:$0xff]   ;;  %v6918_v14 = vld [vmem:[#allocation7 + $0x30c] ss:$16 sps:$4 sm:$0xff]  }
 0x12b   : > { %2164 = vmatprep.subr.bf16.mxu0 %v6843_v13  ;;  %v6915_v13 = vld [vmem:[#allocation7 + $0x704] ss:$16 sps:$4 sm:$0xff]  }
 0x12d   : > { %2271 = vmatpush1.bf16.msra.mxu1 %v6844_v17  ;;  %v6916_v17 = vld [vmem:[#allocation7 + $0x308] ss:$16 sps:$4 sm:$0xff]  }
 0x12e   : > { %2165 = vmatpush1.bf16.msra.mxu0 %v6841_v16  ;;  %2272 = vmatprep.subr.bf16.mxu1 %v6852_v19  ;;  %v6913_v16 = vld [vmem:[#allocation7 + $0x700] ss:$16 sps:$4 sm:$0xff]   ;;  %v6924_v19 = vld [vmem:[#allocation7 + $0x32c] ss:$16 sps:$4 sm:$0xff]  }
 0x12f   : > { %2166 = vmatprep.subr.bf16.mxu0 %v6849_v18  ;;  %v6921_v18 = vld [vmem:[#allocation7 + $0x724] ss:$16 sps:$4 sm:$0xff]  }
 0x131   : > { %2273 = vmatpush1.bf16.msra.mxu1 %v6850_v21  ;;  %v6922_v21 = vld [vmem:[#allocation7 + $0x328] ss:$16 sps:$4 sm:$0xff]  }
 0x132   : > { %2167 = vmatpush1.bf16.msra.mxu0 %v6847_v20  ;;  %2274 = vmatprep.subr.bf16.mxu1 %v6858_v23  ;;  %v6919_v20 = vld [vmem:[#allocation7 + $0x720] ss:$16 sps:$4 sm:$0xff]   ;;  %v6930_v23 = vld [vmem:[#allocation7 + $0x34c] ss:$16 sps:$4 sm:$0xff]  }
 0x133   : > { %2168 = vmatprep.subr.bf16.mxu0 %v6855_v22  ;;  %v6927_v22 = vld [vmem:[#allocation7 + $0x744] ss:$16 sps:$4 sm:$0xff]  }
 0x135   : > { %2275 = vmatpush1.bf16.msra.mxu1 %v6856_v25  ;;  %v6928_v25 = vld [vmem:[#allocation7 + $0x348] ss:$16 sps:$4 sm:$0xff]  }
 0x136   : > { %2169 = vmatpush1.bf16.msra.mxu0 %v6853_v24  ;;  %2276 = vmatprep.subr.bf16.mxu1 %v6864_v27  ;;  %v6925_v24 = vld [vmem:[#allocation7 + $0x740] ss:$16 sps:$4 sm:$0xff]   ;;  %v6936_v27 = vld [vmem:[#allocation7 + $0x36c] ss:$16 sps:$4 sm:$0xff]  }
 0x137   : > { %2170 = vmatprep.subr.bf16.mxu0 %v6861_v26  ;;  %v6933_v26 = vld [vmem:[#allocation7 + $0x764] ss:$16 sps:$4 sm:$0xff]  }
 0x139   : > { %2277 = vmatpush1.bf16.msra.mxu1 %v6862_v29  ;;  %v6934_v29 = vld [vmem:[#allocation7 + $0x368] ss:$16 sps:$4 sm:$0xff]  }
 0x13a   : > { %2171 = vmatpush1.bf16.msra.mxu0 %v6859_v28  ;;  %2299 = vmatprep.subr.bf16.mxu1 %v6870_v33  ;;  %v6931_v28 = vld [vmem:[#allocation7 + $0x760] ss:$16 sps:$4 sm:$0xff]   ;;  %v6940_v33 = vld [vmem:[#allocation7 + $0x388] ss:$16 sps:$4 sm:$0xff]  }
 0x13b   : > { %2193 = vmatprep.subr.bf16.mxu0 %v6867_v30  ;;  %v6939_v30 = vld [vmem:[#allocation7 + $0x784] ss:$16 sps:$4 sm:$0xff]  }
 0x13c   : > { %2279 = vmatmul.mubr.bf16.vlgmr.msra.gmra.mrb[8].mxu1 %v7969_v12  ;;  %v6885_v12 = vld [vmem:[#allocation7 + $0x664] ss:$16 sps:$4 sm:$0xff]  }
 0x13d   : > { %2173 = vmatmul.mubr.bf16.vlgmr.msra.gmra.mrb[0].mxu0 %v8003_v36  ;;  %2300 = vmatpush1.bf16.msra.mxu1 %v6868_v35  ;;  %v6948_v35 = vld [vmem:[#allocation7 + $0x3ac] ss:$16 sps:$4 sm:$0xff]  }
 0x13e   : > { %2194 = vmatpush1.bf16.msra.mxu0 %v6865_v34  ;;  %2301 = vmatprep.subr.bf16.mxu1 %v6876_v38  ;;  %v6945_v34 = vld [vmem:[#allocation7 + $0x7a4] ss:$16 sps:$4 sm:$0xff]   ;;  %v6946_v38 = vld [vmem:[#allocation7 + $0x3a8] ss:$16 sps:$4 sm:$0xff]  }
 0x13f   : > { %2195 = vmatprep.subr.bf16.mxu0 %v6873_v37  ;;  %2182 = vmatprep.mubr.bf16.mxu0 %v8007_v45  ;;  %v6943_v37 = vld [vmem:[#allocation7 + $0x7a0] ss:$16 sps:$4 sm:$0xff]  }
 0x140   : > { %2288 = vmatprep.mubr.bf16.mxu1 %v7979_v40  ;;  %v6883_v40 = vld [vmem:[#allocation7 + $0x660] ss:$16 sps:$4 sm:$0xff]  }
 0x141   : > { %2302 = vmatpush1.bf16.msra.mxu1 %v6874_v44  ;;  %v6952_v44 = vld [vmem:[#allocation7 + $0x3c8] ss:$16 sps:$4 sm:$0xff]  }
 0x142   : > { %2196 = vmatpush1.bf16.msra.mxu0 %v6871_v43  ;;  %2303 = vmatprep.subr.bf16.mxu1 %v6882_v51  ;;  %v6949_v43 = vld [vmem:[#allocation7 + $0x7c0] ss:$16 sps:$4 sm:$0xff]   ;;  %v6958_v51 = vld [vmem:[#allocation7 + $0x3e8] ss:$16 sps:$4 sm:$0xff]  }
 0x143   : > { %2197 = vmatprep.subr.bf16.mxu0 %v6879_v47  ;;  %v6957_v47 = vld [vmem:[#allocation7 + $0x7e4] ss:$16 sps:$4 sm:$0xff]  }
 0x144   : > { %2289 = vmatmul.mubr.bf16.gmra.mrb[12].mxu1 %v7981_v41  ;;  %v6900_v41 = vld [vmem:[#allocation7 + $0x2ac] ss:$16 sps:$4 sm:$0xff]  }
 0x145   : > { %2183 = vmatmul.mubr.bf16.gmra.mrb[4].mxu0 %v8015_v56  ;;  %2304 = vmatpush1.bf16.msra.mxu1 %v6880_v54  ;;  %v464_v54 = vld [vmem:[%s7937_s25 + $0x70] sm:$0xff] }
 0x146   : > { %2198 = vmatpush1.bf16.msra.mxu0 %v6877_v52  ;;  %2305 = vmatprep.subr.bf16.mxu1 %v6888_v59  ;;  %v456_v52 = vld [vmem:[%s7937_s25 + $0x30] sm:$0xff]  ;;  %v6961_v59 = vld [vmem:[#allocation7 + $0x408] ss:$16 sps:$4 sm:$0xff]  }
 0x147   : > { %2199 = vmatprep.subr.bf16.mxu0 %v6885_v12  ;;  %2225 = vmatprep.mubr.bf16.mxu0 %v8019_v61  ;;  %v6963_v12 = vld [vmem:[#allocation7 + $0x40c] ss:$16 sps:$4 sm:$0xff]  }
 0x148   : > { %2331 = vmatprep.mubr.bf16.mxu1 %v7961_v55  ;;  %v6909_v55 = vld [vmem:[#allocation7 + $0x6e4] ss:$16 sps:$4 sm:$0xff]  }
 0x149   : > { %2306 = vmatpush1.bf16.msra.mxu1 %v6886_v62  ;;  %v6966_v62 = vld [vmem:[#allocation7 + $0x42c] ss:$16 sps:$4 sm:$0xff]  }
 0x14a   : > { %2200 = vmatpush1.bf16.msra.mxu0 %v6883_v40  ;;  %2307 = vmatprep.subr.bf16.mxu1 %v6894_v0  ;;  %v8029_v40 = vpack.c.bf16 %v464_v54, %v456_v52  ;;  %v6964_v0 = vld [vmem:[#allocation7 + $0x428] ss:$16 sps:$4 sm:$0xff]   ;;  %v7011_v54 = vld [vmem:[#allocation7 + $0x60c] ss:$16 sps:$4 sm:$0xff]  }
 0x14b   : > { %2201 = vmatprep.subr.bf16.mxu0 %v6891_v63  ;;  %v8031_v63 = vpack.c.bf16 %v481_v58, %v473_v57  ;;  %v7006_v52 = vld [vmem:[#allocation7 + $0x5e8] ss:$16 sps:$4 sm:$0xff]   ;;  %v7014_v57 = vld [vmem:[#allocation7 + $0x62c] ss:$16 sps:$4 sm:$0xff]  }
 0x14c   : > { %v7012_v58 = vld [vmem:[#allocation7 + $0x628] ss:$16 sps:$4 sm:$0xff]  }
 0x14d   : > { %2308 = vmatpush1.bf16.msra.mxu1 %v6892_v50  ;;  %v480_v50 = vld [vmem:[%s7937_s25 + $0xf0] sm:$0xff] }
 0x14e   : > { %2202 = vmatpush1.bf16.msra.mxu0 %v6889_v1  ;;  %2309 = vmatprep.subr.bf16.mxu1 %v6900_v41  ;;  %v472_v1 = vld [vmem:[%s7937_s25 + $0xb0] sm:$0xff]  ;;  %v6967_v41 = vld [vmem:[#allocation7 + $0x448] ss:$16 sps:$4 sm:$0xff]  }
 0x14f   : > { %2203 = vmatprep.subr.bf16.mxu0 %v6897_v2  ;;  %v6969_v2 = vld [vmem:[#allocation7 + $0x44c] ss:$16 sps:$4 sm:$0xff]  }
 0x151   : > { %2310 = vmatpush1.bf16.msra.mxu1 %v6898_v4  ;;  %v6972_v4 = vld [vmem:[#allocation7 + $0x46c] ss:$16 sps:$4 sm:$0xff]  }
 0x152   : > { %2204 = vmatpush1.bf16.msra.mxu0 %v6895_v3  ;;  %2311 = vmatprep.subr.bf16.mxu1 %v6906_v6  ;;  %v8039_v3 = vpack.c.bf16 %v480_v50, %v472_v1  ;;  %v7059_v6 = vld [vmem:[#allocation12 + $0x4] ss:$8 sps:$4 sm:$0xff]   ;;  %v7018_v1 = vld [vmem:[#allocation7 + $0x668] ss:$16 sps:$4 sm:$0xff]  }
 0x153   : > { %2205 = vmatprep.subr.bf16.mxu0 %v6903_v5  ;;  %v7057_v5 = vld [vmem:[#allocation12] ss:$8 sps:$4 sm:$0xff]   ;;  %v7023_v50 = vld [vmem:[#allocation7 + $0x68c] ss:$16 sps:$4 sm:$0xff]  }
 0x155   : > { %2312 = vmatpush1.bf16.msra.mxu1 %v6904_v8  ;;  %v6975_v8 = vld [vmem:[#allocation7 + $0x48c] ss:$16 sps:$4 sm:$0xff]  }
 0x156   : > { %2206 = vmatpush1.bf16.msra.mxu0 %v6901_v7  ;;  %2313 = vmatprep.subr.bf16.mxu1 %v6912_v9  ;;  %v7062_v7 = vld [vmem:[#allocation12 + $0x14] ss:$8 sps:$4 sm:$0xff]   ;;  %v6973_v9 = vld [vmem:[#allocation7 + $0x488] ss:$16 sps:$4 sm:$0xff]  }
 0x157   : > { %2207 = vmatprep.subr.bf16.mxu0 %v6909_v55  ;;  %v7065_v55 = vld [vmem:[#allocation12 + $0x24] ss:$8 sps:$4 sm:$0xff]  }
 0x159   : > { %2314 = vmatpush1.bf16.msra.mxu1 %v6910_v11  ;;  %v7063_v11 = vld [vmem:[#allocation12 + $0x20] ss:$8 sps:$4 sm:$0xff]  }
 0x15a   : > { %2208 = vmatpush1.bf16.msra.mxu0 %v6907_v10  ;;  %2315 = vmatprep.subr.bf16.mxu1 %v6918_v14  ;;  %v6978_v10 = vld [vmem:[#allocation7 + $0x4ac] ss:$16 sps:$4 sm:$0xff]  }
 0x15b   : > { %2209 = vmatprep.subr.bf16.mxu0 %v6915_v13  ;;  %v6976_v13 = vld [vmem:[#allocation7 + $0x4a8] ss:$16 sps:$4 sm:$0xff]   ;;  %v6981_v14 = vld [vmem:[#allocation7 + $0x4cc] ss:$16 sps:$4 sm:$0xff]  }
 0x15d   : > { %2316 = vmatpush1.bf16.msra.mxu1 %v6916_v17  ;;  %v6979_v17 = vld [vmem:[#allocation7 + $0x4c8] ss:$16 sps:$4 sm:$0xff]  }
 0x15e   : > { %2210 = vmatpush1.bf16.msra.mxu0 %v6913_v16  ;;  %2317 = vmatprep.subr.bf16.mxu1 %v6924_v19  ;;  %v7071_v16 = vld [vmem:[#allocation12 + $0x44] ss:$8 sps:$4 sm:$0xff]   ;;  %v7069_v19 = vld [vmem:[#allocation12 + $0x40] ss:$8 sps:$4 sm:$0xff]  }
 0x15f   : > { %2211 = vmatprep.subr.bf16.mxu0 %v6921_v18  ;;  %v6984_v18 = vld [vmem:[#allocation7 + $0x4ec] ss:$16 sps:$4 sm:$0xff]  }
 0x161   : > { %2318 = vmatpush1.bf16.msra.mxu1 %v6922_v21  ;;  %v6982_v21 = vld [vmem:[#allocation7 + $0x4e8] ss:$16 sps:$4 sm:$0xff]  }
 0x162   : > { %2212 = vmatpush1.bf16.msra.mxu0 %v6919_v20  ;;  %2319 = vmatprep.subr.bf16.mxu1 %v6930_v23  ;;  %v7074_v20 = vld [vmem:[#allocation12 + $0x54] ss:$8 sps:$4 sm:$0xff]   ;;  %v7072_v23 = vld [vmem:[#allocation12 + $0x50] ss:$8 sps:$4 sm:$0xff]  }
 0x163   : > { %2213 = vmatprep.subr.bf16.mxu0 %v6927_v22  ;;  %v6987_v22 = vld [vmem:[#allocation7 + $0x50c] ss:$16 sps:$4 sm:$0xff]  }
 0x165   : > { %2320 = vmatpush1.bf16.msra.mxu1 %v6928_v25  ;;  %v6985_v25 = vld [vmem:[#allocation7 + $0x508] ss:$16 sps:$4 sm:$0xff]  }
 0x166   : > { %2214 = vmatpush1.bf16.msra.mxu0 %v6925_v24  ;;  %2321 = vmatprep.subr.bf16.mxu1 %v6936_v27  ;;  %v7077_v24 = vld [vmem:[#allocation12 + $0x64] ss:$8 sps:$4 sm:$0xff]   ;;  %v7075_v27 = vld [vmem:[#allocation12 + $0x60] ss:$8 sps:$4 sm:$0xff]  }
 0x167   : > { %2215 = vmatprep.subr.bf16.mxu0 %v6933_v26  ;;  %v6990_v26 = vld [vmem:[#allocation7 + $0x52c] ss:$16 sps:$4 sm:$0xff]  }
 0x169   : > { %2322 = vmatpush1.bf16.msra.mxu1 %v6934_v29  ;;  %v6988_v29 = vld [vmem:[#allocation7 + $0x528] ss:$16 sps:$4 sm:$0xff]  }
 0x16a   : > { %2216 = vmatpush1.bf16.msra.mxu0 %v6931_v28  ;;  %2323 = vmatprep.subr.bf16.mxu1 %v6942_v31  ;;  %v7080_v28 = vld [vmem:[#allocation12 + $0x74] ss:$8 sps:$4 sm:$0xff]   ;;  %v7078_v31 = vld [vmem:[#allocation12 + $0x70] ss:$8 sps:$4 sm:$0xff]  }
 0x16b   : > { %2217 = vmatprep.subr.bf16.mxu0 %v6939_v30  ;;  %v6993_v30 = vld [vmem:[#allocation7 + $0x54c] ss:$16 sps:$4 sm:$0xff]  }
 0x16d   : > { %2324 = vmatpush1.bf16.msra.mxu1 %v6940_v33  ;;  %v6991_v33 = vld [vmem:[#allocation7 + $0x548] ss:$16 sps:$4 sm:$0xff]  }
 0x16e   : > { %2218 = vmatpush1.bf16.msra.mxu0 %v6937_v32  ;;  %2325 = vmatprep.subr.bf16.mxu1 %v6948_v35  ;;  %v7083_v32 = vld [vmem:[#allocation12 + $0x84] ss:$8 sps:$4 sm:$0xff]   ;;  %v7081_v35 = vld [vmem:[#allocation12 + $0x80] ss:$8 sps:$4 sm:$0xff]  }
 0x16f   : > { %2219 = vmatprep.subr.bf16.mxu0 %v6945_v34  ;;  %v6996_v34 = vld [vmem:[#allocation7 + $0x56c] ss:$16 sps:$4 sm:$0xff]  }
 0x171   : > { %2326 = vmatpush1.bf16.msra.mxu1 %v6946_v38  ;;  %v6994_v38 = vld [vmem:[#allocation7 + $0x568] ss:$16 sps:$4 sm:$0xff]  }
 0x172   : > { %2220 = vmatpush1.bf16.msra.mxu0 %v6943_v37  ;;  %2327 = vmatprep.subr.bf16.mxu1 %v6954_v42  ;;  %v7086_v37 = vld [vmem:[#allocation12 + $0x94] ss:$8 sps:$4 sm:$0xff]   ;;  %v7084_v42 = vld [vmem:[#allocation12 + $0x90] ss:$8 sps:$4 sm:$0xff]  }
 0x173   : > { %2221 = vmatprep.subr.bf16.mxu0 %v6951_v39  ;;  %v6999_v39 = vld [vmem:[#allocation7 + $0x58c] ss:$16 sps:$4 sm:$0xff]  }
 0x175   : > { %2328 = vmatpush1.bf16.msra.mxu1 %v6952_v44  ;;  %v7002_v44 = vld [vmem:[#allocation7 + $0x5ac] ss:$16 sps:$4 sm:$0xff]  }
 0x176   : > { %2222 = vmatpush1.bf16.msra.mxu0 %v6949_v43  ;;  %2329 = vmatprep.subr.bf16.mxu1 %v6960_v48  ;;  %v6997_v43 = vld [vmem:[#allocation7 + $0x588] ss:$16 sps:$4 sm:$0xff]   ;;  %v7005_v48 = vld [vmem:[#allocation7 + $0x5cc] ss:$16 sps:$4 sm:$0xff]  }
 0x177   : > { %2223 = vmatprep.subr.bf16.mxu0 %v6957_v47  ;;  %v7000_v47 = vld [vmem:[#allocation7 + $0x5a8] ss:$16 sps:$4 sm:$0xff]  }
 0x179   : > { %2330 = vmatpush1.bf16.msra.mxu1 %v6958_v51  ;;  %v7008_v51 = vld [vmem:[#allocation7 + $0x5ec] ss:$16 sps:$4 sm:$0xff]  }
 0x17a   : > { %2224 = vmatpush1.bf16.msra.mxu0 %v6955_v49  ;;  %2352 = vmatprep.subr.bf16.mxu1 %v6963_v12  ;;  %v7003_v49 = vld [vmem:[#allocation7 + $0x5c8] ss:$16 sps:$4 sm:$0xff]  }
 0x17b   : > { %4093 = vmatprep.subr.bf16.mxu0 %v7059_v6  ;;  %v7009_v12 = vld [vmem:[#allocation7 + $0x608] ss:$16 sps:$4 sm:$0xff]  }
 0x17c   : > { %2332 = vmatmul.mubr.bf16.vlgmr.msra.gmra.mrb[8].mxu1 %v7971_v15  ;;  %v6970_v15 = vld [vmem:[#allocation7 + $0x468] ss:$16 sps:$4 sm:$0xff]  }
 0x17d   : > { %2226 = vmatmul.mubr.bf16.vlgmr.msra.gmra.mrb[0].mxu0 %v8029_v40  ;;  %2353 = vmatpush1.bf16.msra.mxu1 %v6961_v59  ;;  %v7017_v59 = vld [vmem:[#allocation7 + $0x64c] ss:$16 sps:$4 sm:$0xff]   ;;  %v7024_v6 = vld [vmem:[#allocation7 + $0x6a8] ss:$16 sps:$4 sm:$0xff]  }
 0x17e   : > { %2235 = vmatprep.mubr.bf16.mxu0 %v8031_v63  ;;  %2354 = vmatprep.subr.bf16.mxu1 %v6966_v62  ;;  %v7015_v62 = vld [vmem:[#allocation7 + $0x648] ss:$16 sps:$4 sm:$0xff]  }
 0x17f   : > { %2341 = vmatprep.mubr.bf16.mxu1 %v7985_v46  ;;  %4094 = vmatpush1.bf16.msra.mxu0 %v7057_v5  ;;  %v7060_v46 = vld [vmem:[#allocation12 + $0x10] ss:$8 sps:$4 sm:$0xff]  }
 0x180   : > { %4095 = vmatprep.subr.bf16.mxu0 %v7062_v7  ;;  %v7090_v5 = vld [vmem:[#allocation12 + $0xb0] ss:$8 sps:$4 sm:$0xff]  }
 0x181   : > { %2355 = vmatpush1.bf16.msra.mxu1 %v6964_v0  ;;  %v7020_v0 = vld [vmem:[#allocation7 + $0x66c] ss:$16 sps:$4 sm:$0xff]  }
 0x182   : > { %2356 = vmatprep.subr.bf16.mxu1 %v6969_v2  ;;  %v7089_v2 = vld [vmem:[#allocation12 + $0xa4] ss:$8 sps:$4 sm:$0xff]  }
 0x183   : > { %4096 = vmatpush1.bf16.msra.mxu0 %v7060_v46 }
 0x184   : > { %2342 = vmatmul.mubr.bf16.gmra.mrb[12].mxu1 %v7992_v53  ;;  %v7068_v53 = vld [vmem:[#allocation12 + $0x34] ss:$8 sps:$4 sm:$0xff]   ;;  %4097 = vmatprep.subr.bf16.mxu0 %v7065_v55  ;;  %v7027_v55 = vld [vmem:[#allocation7 + $0x6c8] ss:$16 sps:$4 sm:$0xff]  }
 0x185   : > { %2236 = vmatmul.mubr.bf16.gmra.mrb[4].mxu0 %v8039_v3  ;;  %2357 = vmatpush1.bf16.msra.mxu1 %v6967_v41  ;;  %v7021_v41 = vld [vmem:[#allocation7 + $0x688] ss:$16 sps:$4 sm:$0xff]  }
 0x186   : > { %2384 = vmatprep.mubr.bf16.mxu1 %v7998_v60  ;;  %2358 = vmatprep.subr.bf16.mxu1 %v6972_v4  ;;  %v7066_v60 = vld [vmem:[#allocation12 + $0x30] ss:$8 sps:$4 sm:$0xff]   ;;  %v7092_v4 = vld [vmem:[#allocation12 + $0xb4] ss:$8 sps:$4 sm:$0xff]  }
 0x187   : > { %4098 = vmatpush1.bf16.msra.mxu0 %v7063_v11  ;;  %v7032_v11 = vld [vmem:[#allocation7 + $0x6ec] ss:$16 sps:$4 sm:$0xff]  }
 0x188   : > { %4099 = vmatprep.subr.bf16.mxu0 %v7068_v53  ;;  %v7098_v53 = vld [vmem:[#allocation12 + $0xd4] ss:$8 sps:$4 sm:$0xff]  }
 0x189   : > { %2359 = vmatpush1.bf16.msra.mxu1 %v6970_v15 }
 0x18a   : > { %2360 = vmatprep.subr.bf16.mxu1 %v6975_v8  ;;  %v7093_v8 = vld [vmem:[#allocation12 + $0xc0] ss:$8 sps:$4 sm:$0xff]  }
 0x18b   : > { %4100 = vmatpush1.bf16.msra.mxu0 %v7066_v60  ;;  %v7035_v60 = vld [vmem:[#allocation7 + $0x70c] ss:$16 sps:$4 sm:$0xff]  }
 0x18c   : > { %4101 = vmatprep.subr.bf16.mxu0 %v7071_v16  ;;  %v7101_v16 = vld [vmem:[#allocation12 + $0xe4] ss:$8 sps:$4 sm:$0xff]  }
 0x18d   : > { %2361 = vmatpush1.bf16.msra.mxu1 %v6973_v9  ;;  %v7641_v9 = vmov 0.0  }
 0x18e   : > { %2362 = vmatprep.subr.bf16.mxu1 %v6978_v10  ;;  %2551 = vst [vmem:[#allocation2 + $0x8] sm:$0xff] %v7641_v9  ;;  %2550 = vst [vmem:[#allocation2] sm:$0xff] %v7641_v9 }
 0x18f   : > { %4102 = vmatpush1.bf16.msra.mxu0 %v7069_v19  ;;  %2552 = vst [vmem:[#allocation2 + $0x10] sm:$0xff] %v7641_v9  ;;  %2553 = vst [vmem:[#allocation2 + $0x18] sm:$0xff] %v7641_v9  ;;  %v7038_v19 = vld [vmem:[#allocation7 + $0x72c] ss:$16 sps:$4 sm:$0xff]  }
 0x190   : > { %4103 = vmatprep.subr.bf16.mxu0 %v7074_v20  ;;  %2554 = vst [vmem:[#allocation2 + $0xa0] sm:$0xff] %v7641_v9  ;;  %2555 = vst [vmem:[#allocation2 + $0xa8] sm:$0xff] %v7641_v9  ;;  %v7104_v20 = vld [vmem:[#allocation12 + $0xf4] ss:$8 sps:$4 sm:$0xff]  }
 0x191   : > { %2363 = vmatpush1.bf16.msra.mxu1 %v6976_v13  ;;  %2556 = vst [vmem:[#allocation2 + $0xb0] sm:$0xff] %v7641_v9  ;;  %2557 = vst [vmem:[#allocation2 + $0xb8] sm:$0xff] %v7641_v9  ;;  %v7096_v13 = vld [vmem:[#allocation12 + $0xd0] ss:$8 sps:$4 sm:$0xff]  }
 0x192   : > { %2364 = vmatprep.subr.bf16.mxu1 %v6981_v14  ;;  %v7030_v14 = vld [vmem:[#allocation7 + $0x6e8] ss:$16 sps:$4 sm:$0xff]  }
 0x193   : > { %4104 = vmatpush1.bf16.msra.mxu0 %v7072_v23  ;;  %v7041_v23 = vld [vmem:[#allocation7 + $0x74c] ss:$16 sps:$4 sm:$0xff]  }
 0x194   : > { %4105 = vmatprep.subr.bf16.mxu0 %v7077_v24  ;;  %v7039_v24 = vld [vmem:[#allocation7 + $0x748] ss:$16 sps:$4 sm:$0xff]  }
 0x195   : > { %2365 = vmatpush1.bf16.msra.mxu1 %v6979_v17  ;;  %v7099_v17 = vld [vmem:[#allocation12 + $0xe0] ss:$8 sps:$4 sm:$0xff]  }
 0x196   : > { %2366 = vmatprep.subr.bf16.mxu1 %v6984_v18  ;;  %v7033_v18 = vld [vmem:[#allocation7 + $0x708] ss:$16 sps:$4 sm:$0xff]  }
 0x197   : > { %4106 = vmatpush1.bf16.msra.mxu0 %v7075_v27 }
 0x198   : > { %4107 = vmatprep.subr.bf16.mxu0 %v7080_v28  ;;  %v7042_v28 = vld [vmem:[#allocation7 + $0x768] ss:$16 sps:$4 sm:$0xff]  }
 0x199   : > { %2367 = vmatpush1.bf16.msra.mxu1 %v6982_v21  ;;  %v7102_v21 = vld [vmem:[#allocation12 + $0xf0] ss:$8 sps:$4 sm:$0xff]  }
 0x19a   : > { %2368 = vmatprep.subr.bf16.mxu1 %v6987_v22  ;;  %v7036_v22 = vld [vmem:[#allocation7 + $0x728] ss:$16 sps:$4 sm:$0xff]  }
 0x19b   : > { %4108 = vmatpush1.bf16.msra.mxu0 %v7078_v31 }
 0x19c   : > { %4109 = vmatprep.subr.bf16.mxu0 %v7083_v32  ;;  %v7045_v32 = vld [vmem:[#allocation7 + $0x788] ss:$16 sps:$4 sm:$0xff]  }
 0x19d   : > { %2369 = vmatpush1.bf16.msra.mxu1 %v6985_v25  ;;  %v7044_v25 = vld [vmem:[#allocation7 + $0x76c] ss:$16 sps:$4 sm:$0xff]  }
 0x19e   : > { %2370 = vmatprep.subr.bf16.mxu1 %v6990_v26 }
 0x19f   : > { %4110 = vmatpush1.bf16.msra.mxu0 %v7081_v35  ;;  %v7053_v35 = vld [vmem:[#allocation7 + $0x7cc] ss:$16 sps:$4 sm:$0xff]  }
 0x1a0   : > { %4111 = vmatprep.subr.bf16.mxu0 %v7086_v37  ;;  %v7051_v37 = vld [vmem:[#allocation7 + $0x7c8] ss:$16 sps:$4 sm:$0xff]  }
 0x1a1   : > { %2371 = vmatpush1.bf16.msra.mxu1 %v6988_v29 }
 0x1a2   : > { %2372 = vmatprep.subr.bf16.mxu1 %v6993_v30  ;;  %v7047_v30 = vld [vmem:[#allocation7 + $0x78c] ss:$16 sps:$4 sm:$0xff]  }
 0x1a3   : > { %4112 = vmatpush1.bf16.msra.mxu0 %v7084_v42  ;;  %v7054_v42 = vld [vmem:[#allocation7 + $0x7e8] ss:$16 sps:$4 sm:$0xff]  }
 0x1a4   : > { %4113 = vmatprep.subr.bf16.mxu0 %v7089_v2 }
 0x1a5   : > { %2373 = vmatpush1.bf16.msra.mxu1 %v6991_v33  ;;  %v7050_v33 = vld [vmem:[#allocation7 + $0x7ac] ss:$16 sps:$4 sm:$0xff]  }
 0x1a6   : > { %2374 = vmatprep.subr.bf16.mxu1 %v6996_v34  ;;  %v7048_v34 = vld [vmem:[#allocation7 + $0x7a8] ss:$16 sps:$4 sm:$0xff]  }
 0x1a9   : > { %2375 = vmatpush1.bf16.msra.mxu1 %v6994_v38  ;;  %v7107_v38 = vld [vmem:[#allocation12 + $0x104] ss:$8 sps:$4 sm:$0xff]  }
 0x1aa   : > { %2376 = vmatprep.subr.bf16.mxu1 %v6999_v39  ;;  %v7056_v39 = vld [vmem:[#allocation7 + $0x7ec] ss:$16 sps:$4 sm:$0xff]  }
 0x1ad   : > { %2377 = vmatpush1.bf16.msra.mxu1 %v6997_v43  ;;  %v2460_v43 = vlaneseq }
 0x1ae   : > { %2378 = vmatprep.subr.bf16.mxu1 %v7002_v44 }
 0x1af   : > { %v8067_v44 = vshrl.u32 %v2460_v43, 7 }
 0x1b1   : > { %2379 = vmatpush1.bf16.msra.mxu1 %v7000_v47  ;;  %v8070_v47 = vsub.s32 0, %v8067_v44 }
 0x1b2   : > { %2380 = vmatprep.subr.bf16.mxu1 %v7005_v48  ;;  %v8072_v48 = vld [vmem:[#allocation9] sm:$0xf] }
 0x1b5   : > { %2381 = vmatpush1.bf16.msra.mxu1 %v7003_v49  ;;  %v8075_v49 = vsub.s32 1, %v8067_v44 }
 0x1b6   : > { %2382 = vmatprep.subr.bf16.mxu1 %v7008_v51  ;;  %v8077_v51 = vld [vmem:[#allocation10] sm:$0xf] }
 0x1b9   : > { %2383 = vmatpush1.bf16.msra.mxu1 %v7006_v52 }
 0x1ba   : > { %2405 = vmatprep.subr.bf16.mxu1 %v7011_v54  ;;  %v2501_v54 = vrot.slane %v8077_v51, %v8070_v47 }
 0x1bc   : > { %2385 = vmatmul.mubr.bf16.vlgmr.msra.gmra.mrb[8].mxu1 %v8003_v36  ;;  %v7087_v36 = vld [vmem:[#allocation12 + $0xa0] ss:$8 sps:$4 sm:$0xff]  }
 0x1bd   : > { %2406 = vmatpush1.bf16.msra.mxu1 %v7009_v12  ;;  %2394 = vmatprep.mubr.bf16.mxu1 %v8007_v45  ;;  %v7026_v45 = vld [vmem:[#allocation7 + $0x6ac] ss:$16 sps:$4 sm:$0xff]  }
 0x1be   : > { %2407 = vmatprep.subr.bf16.mxu1 %v7014_v57  ;;  %4114 = vmatpush1.bf16.msra.mxu0 %v7087_v36 }
 0x1bf   : > { %4115 = vmatprep.subr.bf16.mxu0 %v7092_v4  ;;  %v2635_v4 = vld [vmem:[#allocation2] sm:$0x80] }
 0x1c1   : > { %2408 = vmatpush1.bf16.msra.mxu1 %v7012_v58  ;;  %v2505_v58 = vrot.slane %v8077_v51, %v8075_v49 }
 0x1c2   : > { %2409 = vmatprep.subr.bf16.mxu1 %v7017_v59  ;;  %4116 = vmatpush1.bf16.msra.mxu0 %v7090_v5 }
 0x1c4   : > { %2395 = vmatmul.mubr.bf16.gmra.mrb[12].mxu1 %v8015_v56  ;;  %v7029_v56 = vld [vmem:[#allocation7 + $0x6cc] ss:$16 sps:$4 sm:$0xff]  }
 0x1c5   : > { %2410 = vmatpush1.bf16.msra.mxu1 %v7015_v62  ;;  %2437 = vmatprep.mubr.bf16.mxu1 %v8019_v61  ;;  %v7095_v61 = vld [vmem:[#allocation12 + $0xc4] ss:$8 sps:$4 sm:$0xff]  }
 0x1c6   : > { %2411 = vmatprep.subr.bf16.mxu1 %v7020_v0  ;;  %4117 = vmatprep.subr.bf16.mxu0 %v7095_v61 }
 0x1c7   : > { %4118 = vmatpush1.bf16.msra.mxu0 %v7093_v8 }
 0x1c8   : > { %4119 = vmatprep.subr.bf16.mxu0 %v7098_v53 }
 0x1c9   : > { %2412 = vmatpush1.bf16.msra.mxu1 %v7018_v1 }
 0x1ca   : > { %2413 = vmatprep.subr.bf16.mxu1 %v7023_v50  ;;  %v8091_v50 = vadd.s32 8, %v8067_v44 }
 0x1cb   : > { %4120 = vmatpush1.bf16.msra.mxu0 %v7096_v13 }
 0x1cc   : > { %4121 = vmatprep.subr.bf16.mxu0 %v7101_v16  ;;  %v2590_v8 = vand.u32 7, %v8091_v50  ;;  %v4467_v50 = vld [vmem:[#allocation13 + $0x20] sm:$0xff] }
 0x1cd   : > { %2414 = vmatpush1.bf16.msra.mxu1 %v7021_v41 }
 0x1ce   : > { %2415 = vmatprep.subr.bf16.mxu1 %v7026_v45  ;;  %vm2628_vm2 = vcmp.ne.s32.totalorder %v2590_v8, 0  ;;  %vm2632_vm9 = vcmp.ne.s32.totalorder %v2590_v8, 7  ;;  %v4471_v8 = vld [vmem:[#allocation13 + $0x40] sm:$0xff] }
 0x1cf   : > { %v8048_v15 = vpop.f32.mrb[0].mxu1  ;;  %4122 = vmatpush1.bf16.msra.mxu0 %v7099_v17 }
 0x1d0   : > { %v8050_v7 = vpop.f32.mrb[1].mxu1  ;;  %4123 = vmatprep.subr.bf16.mxu0 %v7104_v20 }
 0x1d1   : > { %v8052_v46 = vpop.f32.mrb[2].mxu1  ;;  %2416 = vmatpush1.bf16.msra.mxu1 %v7024_v6 }
 0x1d2   : > { %v8054_v10 = vpop.f32.mrb[3].mxu1  ;;  %2417 = vmatprep.subr.bf16.mxu1 %v7029_v56  ;;  %v2583_v56 = vand.u32 7, %v8067_v44 }
 0x1d3   : > { %4124 = vmatpush1.bf16.msra.mxu0 %v7102_v21 }
 0x1d4   : > { %4146 = vmatprep.subr.bf16.mxu0 %v7107_v38  ;;  %vm8111_vm1 = vcmp.ne.s32.totalorder %v2583_v56, 0  ;;  %vm2631_vm8 = vcmp.ne.s32.totalorder %v2583_v56, 7  ;;  %v4463_v56 = vld [vmem:[#allocation13] sm:$0xff] }
 0x1d5   : > { %2418 = vmatpush1.bf16.msra.mxu1 %v7027_v55  ;;  %vm8133_vm3 = vmpackc.low %vm2628_vm2, %vm8111_vm1 }
 0x1d6   : > { %2419 = vmatprep.subr.bf16.mxu1 %v7032_v11  ;;  %v2684_v11 = vrot.slane %v2635_v4, 7  ;;  %v7113_v4 = vld [vmem:[#allocation12 + $0x124] ss:$8 sps:$4 sm:$0xff]   ;;  %vm8267_vm10 = vmpackc.low %vm2632_vm9, %vm2631_vm8 }
 0x1d7   : > { %v8056_v26 = vpop.f32.mrb[4].mxu1 }
 0x1d8   : > { %v8058_v27 = vpop.f32.mrb[5].mxu1 }
 0x1d9   : > { %2420 = vmatpush1.bf16.msra.mxu1 %v7030_v14  ;;  %v8060_v29 = vpop.f32.mrb[6].mxu1 }
 0x1da   : > { %2421 = vmatprep.subr.bf16.mxu1 %v7035_v60  ;;  %v8062_v31 = vpop.f32.mrb[7].mxu1 }
 0x1dd   : > { %2422 = vmatpush1.bf16.msra.mxu1 %v7033_v18 }
 0x1de   : > { %2423 = vmatprep.subr.bf16.mxu1 %v7038_v19  ;;  %v7182_v19 = vld [vmem:[#allocation12 + $0x294] ss:$8 sps:$4 sm:$0xff]  }
 0x1e1   : > { %2424 = vmatpush1.bf16.msra.mxu1 %v7036_v22 }
 0x1e2   : > { %2425 = vmatprep.subr.bf16.mxu1 %v7041_v23 }
 0x1e5   : > { %2426 = vmatpush1.bf16.msra.mxu1 %v7039_v24 }
 0x1e6   : > { %2427 = vmatprep.subr.bf16.mxu1 %v7044_v25 }
 0x1e9   : > { %2428 = vmatpush1.bf16.msra.mxu1 %v7042_v28 }
 0x1ea   : > { %2429 = vmatprep.subr.bf16.mxu1 %v7047_v30 }
 0x1ed   : > { %2430 = vmatpush1.bf16.msra.mxu1 %v7045_v32 }
 0x1ee   : > { %2431 = vmatprep.subr.bf16.mxu1 %v7050_v33 }
 0x1f1   : > { %2432 = vmatpush1.bf16.msra.mxu1 %v7048_v34 }
 0x1f2   : > { %2433 = vmatprep.subr.bf16.mxu1 %v7053_v35 }
 0x1f5   : > { %2434 = vmatpush1.bf16.msra.mxu1 %v7051_v37 }
 0x1f6   : > { %2435 = vmatprep.subr.bf16.mxu1 %v7056_v39 }
 0x1f9   : > { %2436 = vmatpush1.bf16.msra.mxu1 %v7054_v42 }
 0x1fc   : > { %2438 = vmatmul.mubr.bf16.vlgmr.msra.gmra.mrb[8].mxu1 %v8029_v40  ;;  %v2463_v40 = vrot.slane %v8072_v48, %v8070_v47 }
 0x1fd   : > { %2447 = vmatprep.mubr.bf16.mxu1 %v8031_v63  ;;  %v2467_v63 = vrot.slane %v8072_v48, %v8075_v49 }
 0x204   : > { %2448 = vmatmul.mubr.bf16.gmra.mrb[12].mxu1 %v8039_v3 }
 0x250   : > { %v2227_v52 = vpop.f32.mrb[0].mxu0 }
 0x251   : > { %v6477_v3 = vadd.f32 %v2227_v52, %v8048_v15  ;;  %v2229_v12 = vpop.f32.mrb[1].mxu0  ;;  %v2636_v15 = vld [vmem:[#allocation2 + $0x8] sm:$0x80]  ;;  %v7105_v52 = vld [vmem:[#allocation12 + $0x100] ss:$8 sps:$4 sm:$0xff]  }
 0x252   : > { %v6478_v57 = vadd.f32 %v2229_v12, %v8050_v7  ;;  %v2231_v59 = vpop.f32.mrb[2].mxu0  ;;  %v2687_v14 = vrot.slane %v2636_v15, 7 }
 0x253   : > { %v2480_v62 = vmul.f32 %v6477_v3, %v2463_v40  ;;  %v6479_v0 = vadd.f32 %v2231_v59, %v8052_v46  ;;  %v2233_v1 = vpop.f32.mrb[3].mxu0 }
 0x254   : > { %v2481_v2 = vmul.f32 %v6478_v57, %v2467_v63  ;;  %v6480_v36 = vadd.f32 %v2233_v1, %v8054_v10  ;;  %v7110_v57 = vld [vmem:[#allocation12 + $0x114] ss:$8 sps:$4 sm:$0xff]  }
 0x255   : > { %v2518_v41 = vadd.f32 %v2501_v54, %v2480_v62  ;;  %v2484_v45 = vmul.f32 %v6479_v0, %v2463_v40 }
 0x256   : > { %v2519_v5 = vadd.f32 %v2505_v58, %v2481_v2  ;;  %v2485_v6 = vmul.f32 %v6480_v36, %v2467_v63  ;;  %v7108_v36 = vld [vmem:[#allocation12 + $0x110] ss:$8 sps:$4 sm:$0xff]  }
 0x257   : > { %v8095_v61 = vmax.f32 %v2518_v41, 0.0  ;;  %v2522_v7 = vadd.f32 %v2501_v54, %v2484_v45 }
 0x258   : > { %v8098_v46 = vmax.f32 %v2519_v5, 0.0  ;;  %v2523_v55 = vadd.f32 %v2505_v58, %v2485_v6  ;;  %v2237_v9 = vpop.f32.mrb[4].mxu0 }
 0x259   : > { %2558 = vst [vmem:[#allocation2 + $0x20] sm:$0xff] %v8095_v61  ;;  %v8101_v10 = vmax.f32 %v2522_v7, 0.0  ;;  %v6481_v53 = vadd.f32 %v2237_v9, %v8056_v26  ;;  %v2239_v13 = vpop.f32.mrb[5].mxu0  ;;  %v2685_v60 = vrot.slane %v8095_v61, 7  ;;  %v7111_v7 = vld [vmem:[#allocation12 + $0x120] ss:$8 sps:$4 sm:$0xff]  }
 0x25a   : > { %2559 = vst [vmem:[#allocation2 + $0x28] sm:$0xff] %v8098_v46  ;;  %v8106_v16 = vmax.f32 %v2523_v55, 0.0  ;;  %v6482_v17 = vadd.f32 %v2239_v13, %v8058_v27  ;;  %v2241_v18 = vpop.f32.mrb[6].mxu0  ;;  %v2688_v20 = vrot.slane %v8098_v46, 7  ;;  %v7116_v55 = vld [vmem:[#allocation12 + $0x134] ss:$8 sps:$4 sm:$0xff]  }
 0x25b   : > { %2562 = vst [vmem:[#allocation2 + $0x40] sm:$0xff] %v8101_v10  ;;  %v2768_v21 = vpack.c.bf16 %v8101_v10, %v8095_v61  ;;  %v2488_v22 = vmul.f32 %v6481_v53, %v2463_v40  ;;  %v6483_v23 = vadd.f32 %v2241_v18, %v8060_v29  ;;  %v2243_v24 = vpop.f32.mrb[7].mxu0  ;;  %v2686_v28 = vsel %vm2683_vm0, %v2684_v11, %v2685_v60  ;;  %v7114_v13 = vld [vmem:[#allocation12 + $0x130] ss:$8 sps:$4 sm:$0xff]   ;;  %v7215_v61 = vld [vmem:[#allocation12 + $0x344] ss:$8 sps:$4 sm:$0xff]  }
 0x25c   : > { %2563 = vst [vmem:[#allocation2 + $0x48] sm:$0xff] %v8106_v16  ;;  %v2489_v25 = vmul.f32 %v6482_v17, %v2467_v63  ;;  %v6484_v26 = vadd.f32 %v2243_v24, %v8062_v31  ;;  %v2698_v27 = vrot.slane %v8106_v16, 7  ;;  %v2696_v33 = vrot.slane %v8101_v10, 7  ;;  %v7122_v24 = vld [vmem:[#allocation12 + $0x154] ss:$8 sps:$4 sm:$0xff]  }
 0x25d   : > { %v2526_v30 = vadd.f32 %v2501_v54, %v2488_v22  ;;  %v2492_v32 = vmul.f32 %v6483_v23, %v2463_v40  ;;  %v2769_v29 = vpack.c.bf16 %v8106_v16, %v8098_v46  ;;  %v2689_v37 = vsel %vm2683_vm0, %v2687_v14, %v2688_v20  ;;  %v7117_v23 = vld [vmem:[#allocation12 + $0x140] ss:$8 sps:$4 sm:$0xff]   ;;  %v7185_v46 = vld [vmem:[#allocation12 + $0x2a4] ss:$8 sps:$4 sm:$0xff]  }
 0x25e   : > { %v2527_v34 = vadd.f32 %v2505_v58, %v2489_v25  ;;  %v2493_v35 = vmul.f32 %v6484_v26, %v2467_v63  ;;  %v2699_v38 = vsel %vm2683_vm0, %v2688_v20, %v2698_v27  ;;  %v2697_v40 = vsel %vm2683_vm0, %v2685_v60, %v2696_v33  ;;  %v7119_v60 = vld [vmem:[#allocation12 + $0x144] ss:$8 sps:$4 sm:$0xff]   ;;  %v7120_v25 = vld [vmem:[#allocation12 + $0x150] ss:$8 sps:$4 sm:$0xff]   ;;  %v7183_v16 = vld [vmem:[#allocation12 + $0x2a0] ss:$8 sps:$4 sm:$0xff]  }
 0x25f   : > { %v2542_v39 = vmax.f32 %v2526_v30, 0.0  ;;  %v2530_v42 = vadd.f32 %v2501_v54, %v2492_v32  ;;  %v6430_v43 = vpack.c.bf16 %v2699_v38, %v2689_v37  ;;  %v6433_v63 = vpack.c.bf16 %v2697_v40, %v2686_v28  ;;  %v7125_v26 = vld [vmem:[#allocation12 + $0x164] ss:$8 sps:$4 sm:$0xff]   ;;  %v7128_v28 = vld [vmem:[#allocation12 + $0x174] ss:$8 sps:$4 sm:$0xff]  }
 0x260   : > { %v8138_v3 = vmax.f32 %v2527_v34, 0.0  ;;  %v2531_v12 = vadd.f32 %v2505_v58, %v2493_v35  ;;  %v8145_v54 = vadd.s32 16, %v8067_v44  ;;  %v8149_v58 = vadd.s32 24, %v8067_v44  ;;  %v7126_v30 = vld [vmem:[#allocation12 + $0x170] ss:$8 sps:$4 sm:$0xff]  }
 0x261   : > { %2566 = vst [vmem:[#allocation2 + $0x60] sm:$0xff] %v2542_v39  ;;  %v2546_v59 = vmax.f32 %v2530_v42, 0.0  ;;  %6431 = vmatprep.mubr.msk.bf16.mxu0 %vm8133_vm3, %v6430_v43  ;;  %v2704_v62 = vrot.slane %v2542_v39, 7  ;;  %v7131_v32 = vld [vmem:[#allocation12 + $0x184] ss:$8 sps:$4 sm:$0xff]  }
 0x262   : > { %v2547_v0 = vmax.f32 %v2531_v12, 0.0  ;;  %6434 = vmatmul.mubr.msk.bf16.vlgmr.msra.gmra.mrb[8].mxu0 %vm8133_vm3, %v6433_v63  ;;  %v2706_v1 = vrot.slane %v8138_v3, 7  ;;  %v2597_v6 = vand.u32 7, %v8145_v54  ;;  %v2604_v15 = vand.u32 7, %v8149_v58  ;;  %v7134_v34 = vld [vmem:[#allocation12 + $0x194] ss:$8 sps:$4 sm:$0xff]  }
 0x263   : > { %2570 = vst [vmem:[#allocation2 + $0x80] sm:$0xff] %v2546_v59  ;;  %v2705_v2 = vsel %vm2683_vm0, %v2696_v33, %v2704_v62  ;;  %4147 = vmatpush1.bf16.msra.mxu0 %v7105_v52  ;;  %v8152_v41 = vpack.c.bf16 %v2546_v59, %v2542_v39  ;;  %v7129_v33 = vld [vmem:[#allocation12 + $0x180] ss:$8 sps:$4 sm:$0xff]   ;;  %v7132_v35 = vld [vmem:[#allocation12 + $0x190] ss:$8 sps:$4 sm:$0xff]  }
 0x264   : > { %2571 = vst [vmem:[#allocation2 + $0x88] sm:$0xff] %v2547_v0  ;;  %v2707_v45 = vsel %vm2683_vm0, %v2698_v27, %v2706_v1  ;;  %4148 = vmatprep.subr.bf16.mxu0 %v7110_v57  ;;  %v8156_v5 = vpack.c.bf16 %v2547_v0, %v8138_v3  ;;  %vm2629_vm4 = vcmp.ne.s32.totalorder %v2597_v6, 0  ;;  %vm2630_vm5 = vcmp.ne.s32.totalorder %v2604_v15, 0  ;;  %v7123_v27 = vld [vmem:[#allocation12 + $0x160] ss:$8 sps:$4 sm:$0xff]  }
 0x265   : > { %vm8166_vm6 = vmpackc.low %vm2630_vm5, %vm2629_vm4  ;;  %v7137_v37 = vld [vmem:[#allocation12 + $0x1a4] ss:$8 sps:$4 sm:$0xff]   ;;  %v7135_v38 = vld [vmem:[#allocation12 + $0x1a0] ss:$8 sps:$4 sm:$0xff]   ;;  %vm2633_vm11 = vcmp.ne.s32.totalorder %v2597_v6, 7  ;;  %vm2634_vm12 = vcmp.ne.s32.totalorder %v2604_v15, 7 }
 0x266   : > { %v7140_v39 = vld [vmem:[#allocation12 + $0x1b4] ss:$8 sps:$4 sm:$0xff]   ;;  %v7138_v42 = vld [vmem:[#allocation12 + $0x1b0] ss:$8 sps:$4 sm:$0xff]   ;;  %v7143_v43 = vld [vmem:[#allocation12 + $0x1c4] ss:$8 sps:$4 sm:$0xff]  }
 0x267   : > { %4149 = vmatpush1.bf16.msra.mxu0 %v7108_v36  ;;  %v7141_v40 = vld [vmem:[#allocation12 + $0x1c0] ss:$8 sps:$4 sm:$0xff]   ;;  %v7146_v52 = vld [vmem:[#allocation12 + $0x1d4] ss:$8 sps:$4 sm:$0xff]   ;;  %v7144_v12 = vld [vmem:[#allocation12 + $0x1d0] ss:$8 sps:$4 sm:$0xff]  }
 0x268   : > { %4150 = vmatprep.subr.bf16.mxu0 %v7113_v4  ;;  %v7149_v63 = vld [vmem:[#allocation12 + $0x1e4] ss:$8 sps:$4 sm:$0xff]   ;;  %v7147_v57 = vld [vmem:[#allocation12 + $0x1e0] ss:$8 sps:$4 sm:$0xff]   ;;  %v7152_v59 = vld [vmem:[#allocation12 + $0x1f4] ss:$8 sps:$4 sm:$0xff]  }
 0x269   : > { %v7155_v0 = vld [vmem:[#allocation12 + $0x204] ss:$8 sps:$4 sm:$0xff]   ;;  %v7213_v10 = vld [vmem:[#allocation12 + $0x340] ss:$8 sps:$4 sm:$0xff]   ;;  %vm8284_vm13 = vmpackc.low %vm2634_vm12, %vm2633_vm11 }
 0x26a   : > { %v2651_v9 = vld [vmem:[#allocation2 + $0x80] sm:$0x7f]  ;;  %v4464_v54 = vld [vmem:[#allocation13 + $0x8] sm:$0xff] }
 0x26b   : > { %v2652_v11 = vld [vmem:[#allocation2 + $0x88] sm:$0x7f]  ;;  %v2712_v53 = vrot.slane %v2651_v9, 7  ;;  %4151 = vmatpush1.bf16.msra.mxu0 %v7111_v7  ;;  %v7302_v58 = vld [vmem:[#allocation12 + $0x514] ss:$8 sps:$4 sm:$0xff]  }
 0x26c   : > { %v2714_v14 = vrot.slane %v2652_v11, 7  ;;  %4152 = vmatprep.subr.bf16.mxu0 %v7116_v55 }
 0x26d   : > { %v2713_v17 = vsel %vm2683_vm0, %v2704_v62, %v2712_v53  ;;  %v7150_v62 = vld [vmem:[#allocation12 + $0x1f0] ss:$8 sps:$4 sm:$0xff]  }
 0x26e   : > { %v2715_v18 = vsel %vm2683_vm0, %v2706_v1, %v2714_v14  ;;  %v6439_v20 = vpack.c.bf16 %v2713_v17, %v2705_v2  ;;  %v8175_v1 = vsub.s32 2, %v8067_v44  ;;  %v8178_v2 = vsub.s32 3, %v8067_v44 }
 0x26f   : > { %v6436_v22 = vpack.c.bf16 %v2715_v18, %v2707_v45  ;;  %4153 = vmatpush1.bf16.msra.mxu0 %v7114_v13  ;;  %v2637_v18 = vld [vmem:[#allocation2 + $0x10] sm:$0x80] }
 0x270   : > { %4154 = vmatprep.subr.bf16.mxu0 %v7119_v60  ;;  %v2471_v36 = vrot.slane %v8072_v48, %v8175_v1  ;;  %v2475_v45 = vrot.slane %v8072_v48, %v8178_v2  ;;  %v2509_v4 = vrot.slane %v8077_v51, %v8175_v1  ;;  %v2513_v55 = vrot.slane %v8077_v51, %v8178_v2 }
 0x271   : > { %6437 = vmatprep.mubr.msk.bf16.mxu0 %vm8166_vm6, %v6436_v22 }
 0x272   : > { %6440 = vmatmul.mubr.msk.bf16.gmra.mrb[12].mxu0 %vm8166_vm6, %v6439_v20 }
 0x273   : > { %4155 = vmatpush1.bf16.msra.mxu0 %v7117_v23  ;;  %v2638_v23 = vld [vmem:[#allocation2 + $0x18] sm:$0x80] }
 0x274   : > { %4156 = vmatprep.subr.bf16.mxu0 %v7122_v24 }
 0x277   : > { %4157 = vmatpush1.bf16.msra.mxu0 %v7120_v25 }
 0x278   : > { %4158 = vmatprep.subr.bf16.mxu0 %v7125_v26 }
 0x27b   : > { %4159 = vmatpush1.bf16.msra.mxu0 %v7123_v27  ;;  %v2690_v27 = vrot.slane %v2637_v18, 7 }
 0x27c   : > { %4160 = vmatprep.subr.bf16.mxu0 %v7128_v28  ;;  %v2693_v28 = vrot.slane %v2638_v23, 7 }
 0x27f   : > { %4161 = vmatpush1.bf16.msra.mxu0 %v7126_v30 }
 0x280   : > { %4162 = vmatprep.subr.bf16.mxu0 %v7131_v32 }
 0x283   : > { %4163 = vmatpush1.bf16.msra.mxu0 %v7129_v33 }
 0x284   : > { %4164 = vmatprep.subr.bf16.mxu0 %v7134_v34 }
 0x287   : > { %4165 = vmatpush1.bf16.msra.mxu0 %v7132_v35 }
 0x288   : > { %4166 = vmatprep.subr.bf16.mxu0 %v7137_v37 }
 0x28b   : > { %4167 = vmatpush1.bf16.msra.mxu0 %v7135_v38 }
 0x28c   : > { %4168 = vmatprep.subr.bf16.mxu0 %v7140_v39 }
 0x28f   : > { %4169 = vmatpush1.bf16.msra.mxu0 %v7138_v42 }
 0x290   : > { %4170 = vmatprep.subr.bf16.mxu0 %v7143_v43 }
 0x293   : > { %4171 = vmatpush1.bf16.msra.mxu0 %v7141_v40 }
 0x294   : > { %4172 = vmatprep.subr.bf16.mxu0 %v7146_v52 }
 0x297   : > { %4173 = vmatpush1.bf16.msra.mxu0 %v7144_v12 }
 0x298   : > { %4174 = vmatprep.subr.bf16.mxu0 %v7149_v63 }
 0x29b   : > { %4175 = vmatpush1.bf16.msra.mxu0 %v7147_v57 }
 0x29c   : > { %4176 = vmatprep.subr.bf16.mxu0 %v7152_v59 }
 0x29f   : > { %4177 = vmatpush1.bf16.msra.mxu0 %v7150_v62 }
 0x2a0   : > { %4199 = vmatprep.subr.bf16.mxu0 %v7155_v0 }
 0x2cf   : > { %v2439_v7 = vpop.f32.mrb[8].mxu1 }
 0x2d0   : > { %v2482_v9 = vmul.f32 %v2471_v36, %v2439_v7  ;;  %v2441_v11 = vpop.f32.mrb[9].mxu1 }
 0x2d1   : > { %v2483_v53 = vmul.f32 %v2475_v45, %v2441_v11  ;;  %v2443_v13 = vpop.f32.mrb[10].mxu1 }
 0x2d2   : > { %v2520_v14 = vadd.f32 %v2509_v4, %v2482_v9  ;;  %v2486_v60 = vmul.f32 %v2471_v36, %v2443_v13  ;;  %v2445_v17 = vpop.f32.mrb[11].mxu1 }
 0x2d3   : > { %v2521_v20 = vadd.f32 %v2513_v55, %v2483_v53  ;;  %v2487_v22 = vmul.f32 %v2475_v45, %v2445_v17  ;;  %v7153_v17 = vld [vmem:[#allocation12 + $0x200] ss:$8 sps:$4 sm:$0xff]  }
 0x2d4   : > { %v8188_v24 = vmax.f32 %v2520_v14, 0.0  ;;  %v2524_v48 = vadd.f32 %v2509_v4, %v2486_v60 }
 0x2d5   : > { %v8190_v25 = vmax.f32 %v2521_v20, 0.0  ;;  %v2525_v26 = vadd.f32 %v2513_v55, %v2487_v22  ;;  %v7158_v22 = vld [vmem:[#allocation12 + $0x214] ss:$8 sps:$4 sm:$0xff]  }
 0x2d6   : > { %2560 = vst [vmem:[#allocation2 + $0x30] sm:$0xff] %v8188_v24  ;;  %v8193_v51 = vmax.f32 %v2524_v48, 0.0  ;;  %v2691_v30 = vrot.slane %v8188_v24, 7 }
 0x2d7   : > { %2561 = vst [vmem:[#allocation2 + $0x38] sm:$0xff] %v8190_v25  ;;  %v8197_v32 = vmax.f32 %v2525_v26, 0.0  ;;  %v2449_v33 = vpop.f32.mrb[12].mxu1  ;;  %v2694_v34 = vrot.slane %v8190_v25, 7 }
 0x2d8   : > { %2564 = vst [vmem:[#allocation2 + $0x50] sm:$0xff] %v8193_v51  ;;  %v2770_v35 = vpack.c.bf16 %v8193_v51, %v8188_v24  ;;  %v2490_v37 = vmul.f32 %v2471_v36, %v2449_v33  ;;  %v2451_v38 = vpop.f32.mrb[13].mxu1  ;;  %v2700_v39 = vrot.slane %v8193_v51, 7  ;;  %v2692_v52 = vsel %vm2683_vm0, %v2690_v27, %v2691_v30  ;;  %v7255_v51 = vld [vmem:[#allocation12 + $0x420] ss:$8 sps:$4 sm:$0xff]  }
 0x2d9   : > { %v2491_v42 = vmul.f32 %v2475_v45, %v2451_v38  ;;  %v2453_v43 = vpop.f32.mrb[14].mxu1  ;;  %v2702_v40 = vrot.slane %v8197_v32, 7  ;;  %v2771_v12 = vpack.c.bf16 %v8197_v32, %v8190_v25  ;;  %v2695_v62 = vsel %vm2683_vm0, %v2693_v28, %v2694_v34  ;;  %v7227_v25 = vld [vmem:[#allocation12 + $0x384] ss:$8 sps:$4 sm:$0xff]  }
 0x2da   : > { %v2528_v63 = vadd.f32 %v2509_v4, %v2490_v37  ;;  %v2494_v57 = vmul.f32 %v2471_v36, %v2453_v43  ;;  %v2455_v59 = vpop.f32.mrb[15].mxu1  ;;  %v2701_v0 = vsel %vm2683_vm0, %v2691_v30, %v2700_v39  ;;  %v7161_v37 = vld [vmem:[#allocation12 + $0x224] ss:$8 sps:$4 sm:$0xff]   ;;  %v7159_v43 = vld [vmem:[#allocation12 + $0x220] ss:$8 sps:$4 sm:$0xff]  }
 0x2db   : > { %v2529_v7 = vadd.f32 %v2513_v55, %v2491_v42  ;;  %v2495_v9 = vmul.f32 %v2475_v45, %v2455_v59  ;;  %v2703_v11 = vsel %vm2683_vm0, %v2694_v34, %v2702_v40  ;;  %v6445_v53 = vpack.c.bf16 %v2701_v0, %v2692_v52  ;;  %v7164_v52 = vld [vmem:[#allocation12 + $0x234] ss:$8 sps:$4 sm:$0xff]   ;;  %v7162_v59 = vld [vmem:[#allocation12 + $0x230] ss:$8 sps:$4 sm:$0xff]   ;;  %v7167_v0 = vld [vmem:[#allocation12 + $0x244] ss:$8 sps:$4 sm:$0xff]  }
 0x2dc   : > { %v2544_v13 = vmax.f32 %v2528_v63, 0.0  ;;  %v2532_v14 = vadd.f32 %v2509_v4, %v2494_v57  ;;  %v6442_v60 = vpack.c.bf16 %v2703_v11, %v2695_v62  ;;  %v2843_v45 = vrot.slane %v8197_v32, 1  ;;  %v7225_v32 = vld [vmem:[#allocation12 + $0x380] ss:$8 sps:$4 sm:$0xff]  }
 0x2dd   : > { %v8211_v18 = vmax.f32 %v2529_v7, 0.0  ;;  %v2533_v20 = vadd.f32 %v2513_v55, %v2495_v9  ;;  %v7156_v55 = vld [vmem:[#allocation12 + $0x210] ss:$8 sps:$4 sm:$0xff]  }
 0x2de   : > { %2568 = vst [vmem:[#allocation2 + $0x70] sm:$0xff] %v2544_v13  ;;  %v2548_v36 = vmax.f32 %v2532_v14, 0.0  ;;  %6443 = vmatprep.mubr.msk.bf16.mxu0 %vm8133_vm3, %v6442_v60  ;;  %v2708_v23 = vrot.slane %v2544_v13, 7  ;;  %v2787_v48 = vld [vmem:[#allocation2 + $0x38] sm:$0xfe] }
 0x2df   : > { %v2549_v26 = vmax.f32 %v2533_v20, 0.0  ;;  %6446 = vmatmul.mubr.msk.bf16.vlgmr.msra.gmra.mrb[8].mxu0 %vm8133_vm3, %v6445_v53  ;;  %v2710_v4 = vrot.slane %v8211_v18, 7  ;;  %v2842_v27 = vrot.slane %v2787_v48, 1  ;;  %v2851_v28 = vrot.slane %v8211_v18, 1  ;;  %v7170_v14 = vld [vmem:[#allocation12 + $0x254] ss:$8 sps:$4 sm:$0xff]  }
 0x2e0   : > { %2572 = vst [vmem:[#allocation2 + $0x90] sm:$0xff] %v2548_v36  ;;  %4200 = vmatpush1.bf16.msra.mxu0 %v7153_v17  ;;  %v2709_v30 = vsel %vm2683_vm0, %v2700_v39, %v2708_v23  ;;  %v8221_v33 = vpack.c.bf16 %v2548_v36, %v2544_v13  ;;  %v7165_v13 = vld [vmem:[#allocation12 + $0x240] ss:$8 sps:$4 sm:$0xff]   ;;  %v7168_v60 = vld [vmem:[#allocation12 + $0x250] ss:$8 sps:$4 sm:$0xff]  }
 0x2e1   : > { %2573 = vst [vmem:[#allocation2 + $0x98] sm:$0xff] %v2549_v26  ;;  %4201 = vmatprep.subr.bf16.mxu0 %v7158_v22  ;;  %v2711_v34 = vsel %vm2683_vm0, %v2702_v40, %v2710_v4  ;;  %v8225_v31 = vpack.c.bf16 %v2549_v26, %v8211_v18  ;;  %v8228_v38 = vsel %vm2832_vm7, %v2842_v27, %v2843_v45  ;;  %v7173_v17 = vld [vmem:[#allocation12 + $0x264] ss:$8 sps:$4 sm:$0xff]   ;;  %v7171_v20 = vld [vmem:[#allocation12 + $0x260] ss:$8 sps:$4 sm:$0xff]  }
 0x2e2   : > { %v8233_v42 = vsel %vm2832_vm7, %v2843_v45, %v2851_v28  ;;  %v7176_v22 = vld [vmem:[#allocation12 + $0x274] ss:$8 sps:$4 sm:$0xff]   ;;  %v7174_v36 = vld [vmem:[#allocation12 + $0x270] ss:$8 sps:$4 sm:$0xff]   ;;  %v7177_v48 = vld [vmem:[#allocation12 + $0x280] ss:$8 sps:$4 sm:$0xff]  }
 0x2e3   : > { %v6466_v39 = vpack.c.bf16 %v8233_v42, %v8228_v38  ;;  %v7180_v45 = vld [vmem:[#allocation12 + $0x290] ss:$8 sps:$4 sm:$0xff]   ;;  %v7189_v27 = vld [vmem:[#allocation12 + $0x2c0] ss:$8 sps:$4 sm:$0xff]   ;;  %v7323_v42 = vld [vmem:[#allocation12 + $0x584] ss:$8 sps:$4 sm:$0xff]  }
 0x2e4   : > { %4202 = vmatpush1.bf16.msra.mxu0 %v7156_v55  ;;  %v7186_v26 = vld [vmem:[#allocation12 + $0x2b0] ss:$8 sps:$4 sm:$0xff]   ;;  %v7194_v55 = vld [vmem:[#allocation12 + $0x2d4] ss:$8 sps:$4 sm:$0xff]  }
 0x2e5   : > { %4203 = vmatprep.subr.bf16.mxu0 %v7161_v37  ;;  %v7195_v37 = vld [vmem:[#allocation12 + $0x2e0] ss:$8 sps:$4 sm:$0xff]   ;;  %v7318_v38 = vld [vmem:[#allocation12 + $0x570] ss:$8 sps:$4 sm:$0xff]  }
 0x2e7   : > { %v2653_v40 = vld [vmem:[#allocation2 + $0x90] sm:$0x7f] }
 0x2e8   : > { %v2654_v63 = vld [vmem:[#allocation2 + $0x98] sm:$0x7f]  ;;  %v2716_v57 = vrot.slane %v2653_v40, 7  ;;  %4204 = vmatpush1.bf16.msra.mxu0 %v7159_v43  ;;  %v7203_v40 = vld [vmem:[#allocation12 + $0x304] ss:$8 sps:$4 sm:$0xff]  }
 0x2e9   : > { %v2718_v62 = vrot.slane %v2654_v63, 7  ;;  %4205 = vmatprep.subr.bf16.mxu0 %v7164_v52  ;;  %v7200_v43 = vld [vmem:[#allocation12 + $0x2f4] ss:$8 sps:$4 sm:$0xff]   ;;  %v7198_v52 = vld [vmem:[#allocation12 + $0x2f0] ss:$8 sps:$4 sm:$0xff]  }
 0x2ea   : > { %v2717_v7 = vsel %vm2683_vm0, %v2708_v23, %v2716_v57  ;;  %v7179_v23 = vld [vmem:[#allocation12 + $0x284] ss:$8 sps:$4 sm:$0xff]   ;;  %v7201_v63 = vld [vmem:[#allocation12 + $0x300] ss:$8 sps:$4 sm:$0xff]   ;;  %v7206_v57 = vld [vmem:[#allocation12 + $0x314] ss:$8 sps:$4 sm:$0xff]  }
 0x2eb   : > { %v2719_v9 = vsel %vm2683_vm0, %v2710_v4, %v2718_v62  ;;  %v6451_v11 = vpack.c.bf16 %v2717_v7, %v2709_v30  ;;  %v7191_v4 = vld [vmem:[#allocation12 + $0x2c4] ss:$8 sps:$4 sm:$0xff]   ;;  %v7192_v30 = vld [vmem:[#allocation12 + $0x2d0] ss:$8 sps:$4 sm:$0xff]   ;;  %v7212_v7 = vld [vmem:[#allocation12 + $0x334] ss:$8 sps:$4 sm:$0xff]  }
 0x2ec   : > { %v6448_v53 = vpack.c.bf16 %v2719_v9, %v2711_v34  ;;  %4206 = vmatpush1.bf16.msra.mxu0 %v7162_v59  ;;  %v7197_v34 = vld [vmem:[#allocation12 + $0x2e4] ss:$8 sps:$4 sm:$0xff]   ;;  %v7204_v59 = vld [vmem:[#allocation12 + $0x310] ss:$8 sps:$4 sm:$0xff]  }
 0x2ed   : > { %4207 = vmatprep.subr.bf16.mxu0 %v7167_v0  ;;  %v7209_v62 = vld [vmem:[#allocation12 + $0x324] ss:$8 sps:$4 sm:$0xff]   ;;  %v7207_v0 = vld [vmem:[#allocation12 + $0x320] ss:$8 sps:$4 sm:$0xff]   ;;  %v7210_v9 = vld [vmem:[#allocation12 + $0x330] ss:$8 sps:$4 sm:$0xff]  }
 0x2ee   : > { %6449 = vmatprep.mubr.msk.bf16.mxu0 %vm8166_vm6, %v6448_v53  ;;  %v7219_v53 = vld [vmem:[#allocation12 + $0x360] ss:$8 sps:$4 sm:$0xff]  }
 0x2ef   : > { %6452 = vmatmul.mubr.msk.bf16.gmra.mrb[12].mxu0 %vm8166_vm6, %v6451_v11  ;;  %v7221_v11 = vld [vmem:[#allocation12 + $0x364] ss:$8 sps:$4 sm:$0xff]  }
 0x2f0   : > { %4231 = vmatprep.mubr.bf16.mxu0 %v2769_v29  ;;  %4208 = vmatpush1.bf16.msra.mxu0 %v7165_v13  ;;  %v7188_v29 = vld [vmem:[#allocation12 + $0x2b4] ss:$8 sps:$4 sm:$0xff]   ;;  %v7222_v13 = vld [vmem:[#allocation12 + $0x370] ss:$8 sps:$4 sm:$0xff]  }
 0x2f1   : > { %4209 = vmatprep.subr.bf16.mxu0 %v7170_v14  ;;  %v7228_v14 = vld [vmem:[#allocation12 + $0x390] ss:$8 sps:$4 sm:$0xff]  }
 0x2f4   : > { %4210 = vmatpush1.bf16.msra.mxu0 %v7168_v60  ;;  %v7233_v60 = vld [vmem:[#allocation12 + $0x3a4] ss:$8 sps:$4 sm:$0xff]  }
 0x2f5   : > { %4211 = vmatprep.subr.bf16.mxu0 %v7173_v17  ;;  %v7231_v17 = vld [vmem:[#allocation12 + $0x3a0] ss:$8 sps:$4 sm:$0xff]  }
 0x2f8   : > { %4212 = vmatpush1.bf16.msra.mxu0 %v7171_v20  ;;  %v7236_v20 = vld [vmem:[#allocation12 + $0x3b4] ss:$8 sps:$4 sm:$0xff]  }
 0x2f9   : > { %4213 = vmatprep.subr.bf16.mxu0 %v7176_v22  ;;  %v7234_v22 = vld [vmem:[#allocation12 + $0x3b0] ss:$8 sps:$4 sm:$0xff]  }
 0x2fc   : > { %4214 = vmatpush1.bf16.msra.mxu0 %v7174_v36  ;;  %v7239_v36 = vld [vmem:[#allocation12 + $0x3c4] ss:$8 sps:$4 sm:$0xff]  }
 0x2fd   : > { %4215 = vmatprep.subr.bf16.mxu0 %v7179_v23  ;;  %v7237_v23 = vld [vmem:[#allocation12 + $0x3c0] ss:$8 sps:$4 sm:$0xff]  }
 0x300   : > { %4216 = vmatpush1.bf16.msra.mxu0 %v7177_v48  ;;  %v7242_v48 = vld [vmem:[#allocation12 + $0x3d4] ss:$8 sps:$4 sm:$0xff]  }
 0x301   : > { %4217 = vmatprep.subr.bf16.mxu0 %v7182_v19  ;;  %v7240_v19 = vld [vmem:[#allocation12 + $0x3d0] ss:$8 sps:$4 sm:$0xff]  }
 0x304   : > { %4218 = vmatpush1.bf16.msra.mxu0 %v7180_v45  ;;  %v7245_v45 = vld [vmem:[#allocation12 + $0x3e4] ss:$8 sps:$4 sm:$0xff]  }
 0x305   : > { %4219 = vmatprep.subr.bf16.mxu0 %v7185_v46  ;;  %v7243_v46 = vld [vmem:[#allocation12 + $0x3e0] ss:$8 sps:$4 sm:$0xff]  }
 0x308   : > { %4220 = vmatpush1.bf16.msra.mxu0 %v7183_v16  ;;  %v7248_v16 = vld [vmem:[#allocation12 + $0x3f4] ss:$8 sps:$4 sm:$0xff]  }
 0x309   : > { %4221 = vmatprep.subr.bf16.mxu0 %v7188_v29  ;;  %v7246_v29 = vld [vmem:[#allocation12 + $0x3f0] ss:$8 sps:$4 sm:$0xff]  }
 0x30c   : > { %4222 = vmatpush1.bf16.msra.mxu0 %v7186_v26  ;;  %v7251_v26 = vld [vmem:[#allocation12 + $0x404] ss:$8 sps:$4 sm:$0xff]  }
 0x30d   : > { %4223 = vmatprep.subr.bf16.mxu0 %v7191_v4  ;;  %v7249_v4 = vld [vmem:[#allocation12 + $0x400] ss:$8 sps:$4 sm:$0xff]  }
 0x310   : > { %4224 = vmatpush1.bf16.msra.mxu0 %v7189_v27  ;;  %v2789_v27 = vld [vmem:[#allocation2 + $0x48] sm:$0xff] }
 0x311   : > { %4225 = vmatprep.subr.bf16.mxu0 %v7194_v55  ;;  %v7254_v55 = vld [vmem:[#allocation12 + $0x414] ss:$8 sps:$4 sm:$0xff]  }
 0x314   : > { %4226 = vmatpush1.bf16.msra.mxu0 %v7192_v30  ;;  %v2785_v30 = vld [vmem:[#allocation2 + $0x28] sm:$0xfe] }
 0x315   : > { %4227 = vmatprep.subr.bf16.mxu0 %v7197_v34  ;;  %v2837_v34 = vrot.slane %v2789_v27, 1 }
 0x318   : > { %4228 = vmatpush1.bf16.msra.mxu0 %v7195_v37  ;;  %v7252_v37 = vld [vmem:[#allocation12 + $0x410] ss:$8 sps:$4 sm:$0xff]  }
 0x319   : > { %4229 = vmatprep.subr.bf16.mxu0 %v7200_v43  ;;  %v7257_v43 = vld [vmem:[#allocation12 + $0x424] ss:$8 sps:$4 sm:$0xff]  }
 0x31c   : > { %4230 = vmatpush1.bf16.msra.mxu0 %v7198_v52  ;;  %v2836_v52 = vrot.slane %v2785_v30, 1 }
 0x31d   : > { %4252 = vmatprep.subr.bf16.mxu0 %v7203_v40  ;;  %v2847_v40 = vrot.slane %v8138_v3, 1 }
 0x31f   : > { %4232 = vmatmul.mubr.bf16.vlgmr.msra.gmra.mrb[8].mxu0 %v2768_v21  ;;  %v7218_v21 = vld [vmem:[#allocation12 + $0x354] ss:$8 sps:$4 sm:$0xff]   ;;  %v2848_v24 = vsel %vm2832_vm7, %v2837_v34, %v2847_v40 }
 0x320   : > { %4241 = vmatprep.mubr.bf16.mxu0 %v8156_v5  ;;  %4253 = vmatpush1.bf16.msra.mxu0 %v7201_v63  ;;  %v7216_v5 = vld [vmem:[#allocation12 + $0x350] ss:$8 sps:$4 sm:$0xff]   ;;  %v2838_v63 = vsel %vm2832_vm7, %v2836_v52, %v2837_v34  ;;  %v7278_v34 = vld [vmem:[#allocation12 + $0x494] ss:$8 sps:$4 sm:$0xff]  }
 0x321   : > { %4254 = vmatprep.subr.bf16.mxu0 %v7206_v57  ;;  %v6454_v57 = vpack.c.bf16 %v2848_v24, %v2838_v63  ;;  %v7276_v63 = vld [vmem:[#allocation12 + $0x490] ss:$8 sps:$4 sm:$0xff]  }
 0x324   : > { %4255 = vmatpush1.bf16.msra.mxu0 %v7204_v59  ;;  %v7258_v59 = vld [vmem:[#allocation12 + $0x430] ss:$8 sps:$4 sm:$0xff]  }
 0x325   : > { %4256 = vmatprep.subr.bf16.mxu0 %v7209_v62  ;;  %v6291_v62 = vcombine.low %v4463_v56, %v4467_v50 }
 0x327   : > { %4242 = vmatmul.mubr.bf16.gmra.mrb[12].mxu0 %v8152_v41  ;;  %v7224_v41 = vld [vmem:[#allocation12 + $0x374] ss:$8 sps:$4 sm:$0xff]  }
 0x328   : > { %4257 = vmatpush1.bf16.msra.mxu0 %v7207_v0  ;;  %4284 = vmatprep.mubr.bf16.mxu0 %v2771_v12  ;;  %v7230_v12 = vld [vmem:[#allocation12 + $0x394] ss:$8 sps:$4 sm:$0xff]   ;;  %v6292_v0 = vcombine.high %v4463_v56, %v4467_v50  ;;  %v7279_v50 = vld [vmem:[#allocation12 + $0x4a0] ss:$8 sps:$4 sm:$0xff]  }
 0x329   : > { %4258 = vmatprep.subr.bf16.mxu0 %v7212_v7  ;;  %v4475_v7 = vld [vmem:[#allocation13 + $0x60] sm:$0xff] }
 0x32a   : > { %5231 = vmatprep.subr.bf16.mxu1 %v6292_v0  ;;  %v4539_v0 = vld [vmem:[#allocation13 + $0x260] sm:$0xff] }
 0x32b   : > { %5232 = vmatpush1.bf16.msra.mxu1 %v6291_v62  ;;  %v4535_v62 = vld [vmem:[#allocation13 + $0x240] sm:$0xff] }
 0x32c   : > { %4259 = vmatpush1.bf16.msra.mxu0 %v7210_v9  ;;  %v7263_v9 = vld [vmem:[#allocation12 + $0x444] ss:$8 sps:$4 sm:$0xff]  }
 0x32d   : > { %4260 = vmatprep.subr.bf16.mxu0 %v7215_v61  ;;  %v6300_v61 = vcombine.high %v4471_v8, %v4475_v7 }
 0x32f   : > { %5233 = vmatprep.subr.bf16.mxu1 %v6300_v61  ;;  %v6364_v61 = vcombine.high %v4535_v62, %v4539_v0 }
 0x330   : > { %4261 = vmatpush1.bf16.msra.mxu0 %v7213_v10  ;;  %v4479_v10 = vld [vmem:[#allocation13 + $0x80] sm:$0xff] }
 0x331   : > { %4262 = vmatprep.subr.bf16.mxu0 %v7218_v21  ;;  %v4483_v21 = vld [vmem:[#allocation13 + $0xa0] sm:$0xff] }
 0x334   : > { %4263 = vmatpush1.bf16.msra.mxu0 %v7216_v5  ;;  %v6299_v5 = vcombine.low %v4471_v8, %v4475_v7 }
 0x335   : > { %4264 = vmatprep.subr.bf16.mxu0 %v7221_v11  ;;  %v6308_v11 = vcombine.high %v4479_v10, %v4483_v21 }
 0x336   : > { %5234 = vmatpush1.bf16.msra.mxu1 %v6299_v5  ;;  %v4547_v5 = vld [vmem:[#allocation13 + $0x2a0] sm:$0xff] }
 0x337   : > { %5235 = vmatprep.subr.bf16.mxu1 %v6308_v11  ;;  %v7285_v11 = vld [vmem:[#allocation12 + $0x4c0] ss:$8 sps:$4 sm:$0xff]  }
 0x338   : > { %4265 = vmatpush1.bf16.msra.mxu0 %v7219_v53  ;;  %v7266_v53 = vld [vmem:[#allocation12 + $0x454] ss:$8 sps:$4 sm:$0xff]  }
 0x339   : > { %4266 = vmatprep.subr.bf16.mxu0 %v7224_v41  ;;  %v4487_v41 = vld [vmem:[#allocation13 + $0xc0] sm:$0xff] }
 0x33c   : > { %4267 = vmatpush1.bf16.msra.mxu0 %v7222_v13  ;;  %v4491_v13 = vld [vmem:[#allocation13 + $0xe0] sm:$0xff] }
 0x33d   : > { %4268 = vmatprep.subr.bf16.mxu0 %v7227_v25  ;;  %v6307_v25 = vcombine.low %v4479_v10, %v4483_v21  ;;  %v7287_v10 = vld [vmem:[#allocation12 + $0x4c4] ss:$8 sps:$4 sm:$0xff]  }
 0x33e   : > { %v4543_v21 = vld [vmem:[#allocation13 + $0x280] sm:$0xff] }
 0x33f   : > { %5236 = vmatpush1.bf16.msra.mxu1 %v6307_v25  ;;  %v4555_v25 = vld [vmem:[#allocation13 + $0x2e0] sm:$0xff] }
 0x340   : > { %4269 = vmatpush1.bf16.msra.mxu0 %v7225_v32  ;;  %v7264_v32 = vld [vmem:[#allocation12 + $0x450] ss:$8 sps:$4 sm:$0xff]  }
 0x341   : > { %4270 = vmatprep.subr.bf16.mxu0 %v7230_v12  ;;  %v6316_v12 = vcombine.high %v4487_v41, %v4491_v13 }
 0x343   : > { %5237 = vmatprep.subr.bf16.mxu1 %v6316_v12  ;;  %v7288_v12 = vld [vmem:[#allocation12 + $0x4d0] ss:$8 sps:$4 sm:$0xff]  }
 0x344   : > { %4271 = vmatpush1.bf16.msra.mxu0 %v7228_v14  ;;  %v7269_v14 = vld [vmem:[#allocation12 + $0x464] ss:$8 sps:$4 sm:$0xff]  }
 0x345   : > { %4272 = vmatprep.subr.bf16.mxu0 %v7233_v60  ;;  %v4495_v60 = vld [vmem:[#allocation13 + $0x100] sm:$0xff] }
 0x348   : > { %4273 = vmatpush1.bf16.msra.mxu0 %v7231_v17  ;;  %v4499_v17 = vld [vmem:[#allocation13 + $0x120] sm:$0xff] }
 0x349   : > { %4274 = vmatprep.subr.bf16.mxu0 %v7236_v20  ;;  %v6315_v20 = vcombine.low %v4487_v41, %v4491_v13  ;;  %v7290_v41 = vld [vmem:[#allocation12 + $0x4d4] ss:$8 sps:$4 sm:$0xff]   ;;  %v4551_v13 = vld [vmem:[#allocation13 + $0x2c0] sm:$0xff] }
 0x34b   : > { %5238 = vmatpush1.bf16.msra.mxu1 %v6315_v20  ;;  %v4563_v20 = vld [vmem:[#allocation13 + $0x320] sm:$0xff] }
 0x34c   : > { %4275 = vmatpush1.bf16.msra.mxu0 %v7234_v22  ;;  %v7267_v22 = vld [vmem:[#allocation12 + $0x460] ss:$8 sps:$4 sm:$0xff]  }
 0x34d   : > { %4276 = vmatprep.subr.bf16.mxu0 %v7239_v36  ;;  %v6324_v36 = vcombine.high %v4495_v60, %v4499_v17 }
 0x34f   : > { %5239 = vmatprep.subr.bf16.mxu1 %v6324_v36  ;;  %v6379_v36 = vcombine.low %v4551_v13, %v4555_v25 }
 0x350   : > { %4277 = vmatpush1.bf16.msra.mxu0 %v7237_v23  ;;  %v7272_v23 = vld [vmem:[#allocation12 + $0x474] ss:$8 sps:$4 sm:$0xff]  }
 0x351   : > { %4278 = vmatprep.subr.bf16.mxu0 %v7242_v48  ;;  %v4503_v48 = vld [vmem:[#allocation13 + $0x140] sm:$0xff] }
 0x354   : > { %4279 = vmatpush1.bf16.msra.mxu0 %v7240_v19  ;;  %v4507_v19 = vld [vmem:[#allocation13 + $0x160] sm:$0xff] }
 0x355   : > { %4280 = vmatprep.subr.bf16.mxu0 %v7245_v45  ;;  %v6323_v45 = vcombine.low %v4495_v60, %v4499_v17  ;;  %v6331_v27 = vcombine.low %v4503_v48, %v4507_v19  ;;  %v7293_v60 = vld [vmem:[#allocation12 + $0x4e4] ss:$8 sps:$4 sm:$0xff]  }
 0x356   : > { %v4559_v17 = vld [vmem:[#allocation13 + $0x300] sm:$0xff] }
 0x357   : > { %5240 = vmatpush1.bf16.msra.mxu1 %v6323_v45  ;;  %v6388_v45 = vcombine.high %v4559_v17, %v4563_v20 }
 0x358   : > { %4281 = vmatpush1.bf16.msra.mxu0 %v7243_v46  ;;  %v7270_v46 = vld [vmem:[#allocation12 + $0x470] ss:$8 sps:$4 sm:$0xff]  }
 0x359   : > { %4282 = vmatprep.subr.bf16.mxu0 %v7248_v16  ;;  %v6332_v16 = vcombine.high %v4503_v48, %v4507_v19  ;;  %v2797_v48 = vld [vmem:[#allocation2 + $0x88] sm:$0xff] }
 0x35a   : > { %v2801_v19 = vld [vmem:[#allocation2 + $0xa8] sm:$0x1] }
 0x35b   : > { %5241 = vmatprep.subr.bf16.mxu1 %v6332_v16  ;;  %v2788_v16 = vld [vmem:[#allocation2 + $0x40] sm:$0xff] }
 0x35c   : > { %4283 = vmatpush1.bf16.msra.mxu0 %v7246_v29  ;;  %v7275_v29 = vld [vmem:[#allocation12 + $0x484] ss:$8 sps:$4 sm:$0xff]   ;;  %5242 = vmatpush1.bf16.msra.mxu1 %v6331_v27  ;;  %v2863_v27 = vrot.slane %v2801_v19, 1  ;;  %v7339_v19 = vld [vmem:[#allocation12 + $0x5e0] ss:$8 sps:$4 sm:$0xff]  }
 0x35d   : > { %4305 = vmatprep.subr.bf16.mxu0 %v7251_v26  ;;  %v4511_v26 = vld [vmem:[#allocation13 + $0x180] sm:$0xff] }
 0x35f   : > { %4285 = vmatmul.mubr.bf16.vlgmr.msra.gmra.mrb[8].mxu0 %v2770_v35  ;;  %v4579_v35 = vld [vmem:[#allocation13 + $0x3a0] sm:$0xff] }
 0x360   : > { %4294 = vmatprep.mubr.bf16.mxu0 %v8225_v31  ;;  %4306 = vmatpush1.bf16.msra.mxu0 %v7249_v4  ;;  %v7260_v31 = vld [vmem:[#allocation12 + $0x434] ss:$8 sps:$4 sm:$0xff]   ;;  %v4515_v4 = vld [vmem:[#allocation13 + $0x1a0] sm:$0xff] }
 0x361   : > { %4307 = vmatprep.subr.bf16.mxu0 %v7254_v55  ;;  %v7273_v55 = vld [vmem:[#allocation12 + $0x480] ss:$8 sps:$4 sm:$0xff]   ;;  %v6340_v30 = vcombine.high %v4511_v26, %v4515_v4  ;;  %v6339_v52 = vcombine.low %v4511_v26, %v4515_v4  ;;  %v2784_v26 = vld [vmem:[#allocation2 + $0x20] sm:$0xfe]  ;;  %v2855_v4 = vrot.slane %v2797_v48, 1 }
 0x362   : > { %v2794_v48 = vld [vmem:[#allocation2 + $0x70] sm:$0xff] }
 0x363   : > { %5243 = vmatprep.subr.bf16.mxu1 %v6340_v30  ;;  %v7294_v30 = vld [vmem:[#allocation12 + $0x4f0] ss:$8 sps:$4 sm:$0xff]  }
 0x364   : > { %4308 = vmatpush1.bf16.msra.mxu0 %v7252_v37  ;;  %v4519_v37 = vld [vmem:[#allocation13 + $0x1c0] sm:$0xff]  ;;  %5244 = vmatpush1.bf16.msra.mxu1 %v6339_v52 }
 0x365   : > { %4309 = vmatprep.subr.bf16.mxu0 %v7257_v43  ;;  %v4523_v43 = vld [vmem:[#allocation13 + $0x1e0] sm:$0xff] }
 0x366   : > { %v6348_v24 = vcombine.high %v4519_v37, %v4523_v43  ;;  %v6347_v56 = vcombine.low %v4519_v37, %v4523_v43  ;;  %v7299_v37 = vld [vmem:[#allocation12 + $0x504] ss:$8 sps:$4 sm:$0xff]   ;;  %v2833_v43 = vrot.slane %v2784_v26, 1  ;;  %v2849_v26 = vrot.slane %v2794_v48, 1 }
 0x367   : > { %4295 = vmatmul.mubr.bf16.gmra.mrb[12].mxu0 %v8221_v33  ;;  %v7261_v33 = vld [vmem:[#allocation12 + $0x440] ss:$8 sps:$4 sm:$0xff]  }
 0x368   : > { %4310 = vmatpush1.bf16.msra.mxu0 %v7255_v51  ;;  %6455 = vmatprep.mubr.msk.bf16.mxu0 %vm8267_vm10, %v6454_v57  ;;  %v7281_v51 = vld [vmem:[#allocation12 + $0x4a4] ss:$8 sps:$4 sm:$0xff]  }
 0x369   : > { %4311 = vmatprep.subr.bf16.mxu0 %v7260_v31  ;;  %v4527_v31 = vld [vmem:[#allocation13 + $0x200] sm:$0xff]  ;;  %5245 = vmatprep.subr.bf16.mxu1 %v6348_v24  ;;  %v2864_v24 = vsel %vm2832_vm7, %v2855_v4, %v2863_v27 }
 0x36a   : > { %v4531_v57 = vld [vmem:[#allocation13 + $0x220] sm:$0xff]  ;;  %5246 = vmatpush1.bf16.msra.mxu1 %v6347_v56 }
 0x36b   : > { %v6356_v8 = vcombine.high %v4527_v31, %v4531_v57  ;;  %v6355_v7 = vcombine.low %v4527_v31, %v4531_v57  ;;  %v2800_v31 = vld [vmem:[#allocation2 + $0xa0] sm:$0x1]  ;;  %v7297_v56 = vld [vmem:[#allocation12 + $0x500] ss:$8 sps:$4 sm:$0xff]  }
 0x36c   : > { %4312 = vmatpush1.bf16.msra.mxu0 %v7258_v59  ;;  %v7284_v59 = vld [vmem:[#allocation12 + $0x4b4] ss:$8 sps:$4 sm:$0xff]   ;;  %v2861_v15 = vrot.slane %v2800_v31, 1 }
 0x36d   : > { %4313 = vmatprep.subr.bf16.mxu0 %v7263_v9  ;;  %v7282_v9 = vld [vmem:[#allocation12 + $0x4b0] ss:$8 sps:$4 sm:$0xff]   ;;  %5247 = vmatprep.subr.bf16.mxu1 %v6356_v8  ;;  %v7305_v8 = vld [vmem:[#allocation12 + $0x524] ss:$8 sps:$4 sm:$0xff]  }
 0x36e   : > { %5248 = vmatpush1.bf16.msra.mxu1 %v6355_v7 }
 0x36f   : > { %5249 = vmatprep.subr.bf16.mxu1 %v6364_v61  ;;  %v7306_v61 = vld [vmem:[#allocation12 + $0x530] ss:$8 sps:$4 sm:$0xff]  }
 0x370   : > { %4314 = vmatpush1.bf16.msra.mxu0 %v7261_v33  ;;  %v6363_v33 = vcombine.low %v4535_v62, %v4539_v0  ;;  %v7303_v0 = vld [vmem:[#allocation12 + $0x520] ss:$8 sps:$4 sm:$0xff]  }
 0x371   : > { %4315 = vmatprep.subr.bf16.mxu0 %v7266_v53  ;;  %v6372_v53 = vcombine.high %v4543_v21, %v4547_v5 }
 0x372   : > { %5250 = vmatpush1.bf16.msra.mxu1 %v6363_v33  ;;  %v7312_v33 = vld [vmem:[#allocation12 + $0x550] ss:$8 sps:$4 sm:$0xff]  }
 0x373   : > { %5251 = vmatprep.subr.bf16.mxu1 %v6372_v53  ;;  %v7315_v53 = vld [vmem:[#allocation12 + $0x560] ss:$8 sps:$4 sm:$0xff]  }
 0x374   : > { %4316 = vmatpush1.bf16.msra.mxu0 %v7264_v32  ;;  %v6371_v32 = vcombine.low %v4543_v21, %v4547_v5  ;;  %v7309_v21 = vld [vmem:[#allocation12 + $0x540] ss:$8 sps:$4 sm:$0xff]   ;;  %v7314_v5 = vld [vmem:[#allocation12 + $0x554] ss:$8 sps:$4 sm:$0xff]  }
 0x375   : > { %4317 = vmatprep.subr.bf16.mxu0 %v7269_v14  ;;  %v6380_v14 = vcombine.high %v4551_v13, %v4555_v25  ;;  %v7326_v13 = vld [vmem:[#allocation12 + $0x594] ss:$8 sps:$4 sm:$0xff]   ;;  %v7324_v25 = vld [vmem:[#allocation12 + $0x590] ss:$8 sps:$4 sm:$0xff]  }
 0x376   : > { %5252 = vmatpush1.bf16.msra.mxu1 %v6371_v32  ;;  %v7329_v32 = vld [vmem:[#allocation12 + $0x5a4] ss:$8 sps:$4 sm:$0xff]  }
 0x377   : > { %5253 = vmatprep.subr.bf16.mxu1 %v6380_v14  ;;  %v7332_v14 = vld [vmem:[#allocation12 + $0x5b4] ss:$8 sps:$4 sm:$0xff]  }
 0x378   : > { %4318 = vmatpush1.bf16.msra.mxu0 %v7267_v22  ;;  %v2792_v22 = vld [vmem:[#allocation2 + $0x60] sm:$0xff] }
 0x379   : > { %4319 = vmatprep.subr.bf16.mxu0 %v7272_v23  ;;  %v7291_v23 = vld [vmem:[#allocation12 + $0x4e0] ss:$8 sps:$4 sm:$0xff]  }
 0x37a   : > { %5254 = vmatpush1.bf16.msra.mxu1 %v6379_v36  ;;  %v7336_v36 = vld [vmem:[#allocation12 + $0x5d0] ss:$8 sps:$4 sm:$0xff]  }
 0x37b   : > { %5255 = vmatprep.subr.bf16.mxu1 %v6388_v45  ;;  %v2799_v45 = vld [vmem:[#allocation2 + $0x98] sm:$0xff] }
 0x37c   : > { %4320 = vmatpush1.bf16.msra.mxu0 %v7270_v46  ;;  %v7296_v46 = vld [vmem:[#allocation12 + $0x4f4] ss:$8 sps:$4 sm:$0xff]   ;;  %v2859_v27 = vrot.slane %v2799_v45, 1 }
 0x37d   : > { %4321 = vmatprep.subr.bf16.mxu0 %v7275_v29  ;;  %v2845_v29 = vrot.slane %v2792_v22, 1  ;;  %v7338_v22 = vld [vmem:[#allocation12 + $0x5d4] ss:$8 sps:$4 sm:$0xff]  }
 0x380   : > { %4322 = vmatpush1.bf16.msra.mxu0 %v7273_v55  ;;  %v6387_v55 = vcombine.low %v4559_v17, %v4563_v20  ;;  %v7335_v17 = vld [vmem:[#allocation12 + $0x5c4] ss:$8 sps:$4 sm:$0xff]   ;;  %v7333_v20 = vld [vmem:[#allocation12 + $0x5c0] ss:$8 sps:$4 sm:$0xff]  }
 0x381   : > { %4323 = vmatprep.subr.bf16.mxu0 %v7278_v34  ;;  %v2834_v34 = vrot.slane %v2788_v16, 1  ;;  %v7344_v16 = vld [vmem:[#allocation12 + $0x5f4] ss:$8 sps:$4 sm:$0xff]  }
 0x382   : > { %5256 = vmatpush1.bf16.msra.mxu1 %v6387_v55 }
 0x383   : > { %v2846_v52 = vsel %vm2832_vm7, %v2834_v34, %v2845_v29  ;;  %v2835_v57 = vsel %vm2832_vm7, %v2833_v43, %v2834_v34 }
 0x384   : > { %4324 = vmatpush1.bf16.msra.mxu0 %v7276_v63  ;;  %v2856_v63 = vsel %vm2832_vm7, %v2847_v40, %v2855_v4  ;;  %v7300_v40 = vld [vmem:[#allocation12 + $0x510] ss:$8 sps:$4 sm:$0xff]   ;;  %v2786_v4 = vld [vmem:[#allocation2 + $0x30] sm:$0xfe] }
 0x385   : > { %4325 = vmatprep.subr.bf16.mxu0 %v7281_v51  ;;  %v2796_v51 = vld [vmem:[#allocation2 + $0x80] sm:$0xff]  ;;  %v6460_v6 = vpack.c.bf16 %v2864_v24, %v2856_v63  ;;  %v2798_v24 = vld [vmem:[#allocation2 + $0x90] sm:$0xff] }
 0x386   : > { %v2853_v3 = vrot.slane %v2796_v51, 1  ;;  %v2802_v51 = vld [vmem:[#allocation2 + $0xb0] sm:$0x1] }
 0x388   : > { %4326 = vmatpush1.bf16.msra.mxu0 %v7279_v50  ;;  %v6457_v50 = vpack.c.bf16 %v2846_v52, %v2835_v57  ;;  %v2862_v62 = vsel %vm2832_vm7, %v2853_v3, %v2861_v15  ;;  %v2860_v52 = vsel %vm2832_vm7, %v2851_v28, %v2859_v27  ;;  %v4571_v15 = vld [vmem:[#allocation13 + $0x360] sm:$0xff] }
 0x389   : > { %4327 = vmatprep.subr.bf16.mxu0 %v7284_v59  ;;  %v2854_v59 = vsel %vm2832_vm7, %v2845_v29, %v2853_v3  ;;  %v2790_v29 = vld [vmem:[#allocation2 + $0x50] sm:$0xff]  ;;  %v4567_v3 = vld [vmem:[#allocation13 + $0x340] sm:$0xff] }
 0x38a   : > { %v6463_v7 = vpack.c.bf16 %v2862_v62, %v2854_v59  ;;  %v2840_v34 = vrot.slane %v2790_v29, 1  ;;  %v4575_v59 = vld [vmem:[#allocation13 + $0x380] sm:$0xff] }
 0x38b   : > { %v6404_v62 = vcombine.high %v4575_v59, %v4579_v35 }
 0x38c   : > { %4328 = vmatpush1.bf16.msra.mxu0 %v7282_v9  ;;  %v7308_v9 = vld [vmem:[#allocation12 + $0x534] ss:$8 sps:$4 sm:$0xff]   ;;  %v2850_v43 = vsel %vm2832_vm7, %v2840_v34, %v2849_v26 }
 0x38d   : > { %4329 = vmatprep.subr.bf16.mxu0 %v7287_v10  ;;  %v7311_v10 = vld [vmem:[#allocation12 + $0x544] ss:$8 sps:$4 sm:$0xff]  }
 0x390   : > { %4330 = vmatpush1.bf16.msra.mxu0 %v7285_v11  ;;  %v7317_v11 = vld [vmem:[#allocation12 + $0x564] ss:$8 sps:$4 sm:$0xff]  }
 0x391   : > { %4331 = vmatprep.subr.bf16.mxu0 %v7290_v41  ;;  %v7320_v41 = vld [vmem:[#allocation12 + $0x574] ss:$8 sps:$4 sm:$0xff]  }
 0x394   : > { %4332 = vmatpush1.bf16.msra.mxu0 %v7288_v12  ;;  %v7327_v12 = vld [vmem:[#allocation12 + $0x5a0] ss:$8 sps:$4 sm:$0xff]  }
 0x395   : > { %4333 = vmatprep.subr.bf16.mxu0 %v7293_v60  ;;  %v7330_v60 = vld [vmem:[#allocation12 + $0x5b0] ss:$8 sps:$4 sm:$0xff]  }
 0x398   : > { %4334 = vmatpush1.bf16.msra.mxu0 %v7291_v23  ;;  %v7341_v23 = vld [vmem:[#allocation12 + $0x5e4] ss:$8 sps:$4 sm:$0xff]  }
 0x399   : > { %4335 = vmatprep.subr.bf16.mxu0 %v7296_v46  ;;  %v2803_v46 = vld [vmem:[#allocation2 + $0xb8] sm:$0x1] }
 0x39a   : > { %v2867_v55 = vrot.slane %v2803_v46, 1 }
 0x39c   : > { %4336 = vmatpush1.bf16.msra.mxu0 %v7294_v30  ;;  %v7342_v30 = vld [vmem:[#allocation12 + $0x5f0] ss:$8 sps:$4 sm:$0xff]   ;;  %v2868_v63 = vsel %vm2832_vm7, %v2859_v27, %v2867_v55 }
 0x39d   : > { %4358 = vmatprep.subr.bf16.mxu0 %v7299_v37  ;;  %v2839_v37 = vrot.slane %v2786_v4, 1  ;;  %v4476_v4 = vld [vmem:[#allocation13 + $0x68] sm:$0xff] }
 0x39f   : > { %6458 = vmatmul.mubr.msk.bf16.vlgmr.msra.gmra.mrb[8].mxu0 %vm8267_vm10, %v6457_v50  ;;  %v2841_v31 = vsel %vm2832_vm7, %v2839_v37, %v2840_v34  ;;  %v2857_v50 = vrot.slane %v2798_v24, 1 }
 0x3a0   : > { %6461 = vmatprep.mubr.msk.bf16.mxu0 %vm8284_vm13, %v6460_v6  ;;  %4359 = vmatpush1.bf16.msra.mxu0 %v7297_v56  ;;  %v6469_v57 = vpack.c.bf16 %v2850_v43, %v2841_v31  ;;  %v6472_v56 = vpack.c.bf16 %v2868_v63, %v2860_v52 }
 0x3a1   : > { %4360 = vmatprep.subr.bf16.mxu0 %v7302_v58  ;;  %v2865_v58 = vrot.slane %v2802_v51, 1  ;;  %v2858_v18 = vsel %vm2832_vm7, %v2849_v26, %v2857_v50  ;;  %v4472_v26 = vld [vmem:[#allocation13 + $0x48] sm:$0xff] }
 0x3a2   : > { %v6302_v51 = vcombine.high %v4472_v26, %v4476_v4 }
 0x3a3   : > { %v2866_v28 = vsel %vm2832_vm7, %v2857_v50, %v2865_v58  ;;  %v4484_v50 = vld [vmem:[#allocation13 + $0xa8] sm:$0xff] }
 0x3a4   : > { %4361 = vmatpush1.bf16.msra.mxu0 %v7300_v40  ;;  %v6475_v6 = vpack.c.bf16 %v2866_v28, %v2858_v18  ;;  %v6396_v40 = vcombine.high %v4567_v3, %v4571_v15  ;;  %v6301_v28 = vcombine.low %v4472_v26, %v4476_v4  ;;  %v4556_v26 = vld [vmem:[#allocation13 + $0x2e8] sm:$0xff] }
 0x3a5   : > { %4362 = vmatprep.subr.bf16.mxu0 %v7305_v8  ;;  %v6395_v8 = vcombine.low %v4567_v3, %v4571_v15 }
 0x3a6   : > { %5257 = vmatprep.subr.bf16.mxu1 %v6396_v40 }
 0x3a7   : > { %6464 = vmatmul.mubr.msk.bf16.gmra.mrb[12].mxu0 %vm8284_vm13, %v6463_v7  ;;  %5258 = vmatpush1.bf16.msra.mxu1 %v6395_v8  ;;  %v4583_v7 = vld [vmem:[#allocation13 + $0x3c0] sm:$0xff] }
 0x3a8   : > { %4363 = vmatpush1.bf16.msra.mxu0 %v7303_v0  ;;  %6467 = vmatprep.mubr.msk.bf16.mxu0 %vm8267_vm10, %v6466_v39  ;;  %v7321_v39 = vld [vmem:[#allocation12 + $0x580] ss:$8 sps:$4 sm:$0xff]   ;;  %v6403_v0 = vcombine.low %v4575_v59, %v4579_v35 }
 0x3a9   : > { %4364 = vmatprep.subr.bf16.mxu0 %v7308_v9  ;;  %5259 = vmatprep.subr.bf16.mxu1 %v6404_v62  ;;  %v4587_v9 = vld [vmem:[#allocation13 + $0x3e0] sm:$0xff]  ;;  %v4488_v59 = vld [vmem:[#allocation13 + $0xc8] sm:$0xff] }
 0x3aa   : > { %v4492_v35 = vld [vmem:[#allocation13 + $0xe8] sm:$0xff] }
 0x3ab   : > { %5260 = vmatpush1.bf16.msra.mxu1 %v6403_v0 }
 0x3ac   : > { %4365 = vmatpush1.bf16.msra.mxu0 %v7306_v61  ;;  %v6412_v61 = vcombine.high %v4583_v7, %v4587_v9 }
 0x3ad   : > { %4366 = vmatprep.subr.bf16.mxu0 %v7311_v10  ;;  %v6411_v10 = vcombine.low %v4583_v7, %v4587_v9  ;;  %v6318_v9 = vcombine.high %v4488_v59, %v4492_v35 }
 0x3ae   : > { %5261 = vmatprep.subr.bf16.mxu1 %v6412_v61  ;;  %v4496_v61 = vld [vmem:[#allocation13 + $0x108] sm:$0xff] }
 0x3af   : > { %5262 = vmatpush1.bf16.msra.mxu1 %v6411_v10  ;;  %v4500_v10 = vld [vmem:[#allocation13 + $0x128] sm:$0xff] }
 0x3b0   : > { %4367 = vmatpush1.bf16.msra.mxu0 %v7309_v21  ;;  %v4468_v21 = vld [vmem:[#allocation13 + $0x28] sm:$0xff] }
 0x3b1   : > { %4368 = vmatprep.subr.bf16.mxu0 %v7314_v5  ;;  %v6294_v5 = vcombine.high %v4464_v54, %v4468_v21 }
 0x3b3   : > { %5284 = vmatprep.subr.bf16.mxu1 %v6294_v5  ;;  %v4504_v5 = vld [vmem:[#allocation13 + $0x148] sm:$0xff] }
 0x3b4   : > { %4369 = vmatpush1.bf16.msra.mxu0 %v7312_v33  ;;  %v6293_v33 = vcombine.low %v4464_v54, %v4468_v21  ;;  %v6317_v54 = vcombine.low %v4488_v59, %v4492_v35  ;;  %v6326_v21 = vcombine.high %v4496_v61, %v4500_v10  ;;  %v4473_v35 = vld [vmem:[#allocation13 + $0x50] sm:$0xff] }
 0x3b5   : > { %4370 = vmatprep.subr.bf16.mxu0 %v7317_v11  ;;  %v4411_v11 = vld [vmem:[%s8511_s5] sm:$0x3] }
 0x3b8   : > { %4371 = vmatpush1.bf16.msra.mxu0 %v7315_v53  ;;  %v4431_v53 = vld [vmem:[%s8512_s6] sm:$0x3] }
 0x3b9   : > { %4372 = vmatprep.subr.bf16.mxu0 %v7320_v41  ;;  %v4416_v41 = vrot.slane %v4411_v11, %v8070_v47 }
 0x3bc   : > { %4373 = vmatpush1.bf16.msra.mxu0 %v7318_v38  ;;  %v4420_v38 = vrot.slane %v4411_v11, %v8075_v49  ;;  %v6325_v11 = vcombine.low %v4496_v61, %v4500_v10  ;;  %v4481_v10 = vld [vmem:[#allocation13 + $0x90] sm:$0xff] }
 0x3bd   : > { %4374 = vmatprep.subr.bf16.mxu0 %v7323_v42  ;;  %v4436_v42 = vrot.slane %v4431_v53, %v8070_v47 }
 0x3c0   : > { %4375 = vmatpush1.bf16.msra.mxu0 %v7321_v39 }
 0x3c1   : > { %4376 = vmatprep.subr.bf16.mxu0 %v7326_v13  ;;  %v4440_v13 = vrot.slane %v4431_v53, %v8075_v49 }
 0x3c4   : > { %4377 = vmatpush1.bf16.msra.mxu0 %v7324_v25 }
 0x3c5   : > { %4378 = vmatprep.subr.bf16.mxu0 %v7329_v32 }
 0x3c8   : > { %4379 = vmatpush1.bf16.msra.mxu0 %v7327_v12 }
 0x3c9   : > { %4380 = vmatprep.subr.bf16.mxu0 %v7332_v14 }
 0x3cc   : > { %4381 = vmatpush1.bf16.msra.mxu0 %v7330_v60 }
 0x3cd   : > { %4382 = vmatprep.subr.bf16.mxu0 %v7335_v17 }
 0x3d0   : > { %4383 = vmatpush1.bf16.msra.mxu0 %v7333_v20 }
 0x3d1   : > { %4384 = vmatprep.subr.bf16.mxu0 %v7338_v22 }
 0x3d4   : > { %4385 = vmatpush1.bf16.msra.mxu0 %v7336_v36 }
 0x3d5   : > { %4386 = vmatprep.subr.bf16.mxu0 %v7341_v23 }
 0x3d8   : > { %4387 = vmatpush1.bf16.msra.mxu0 %v7339_v19 }
 0x3d9   : > { %4388 = vmatprep.subr.bf16.mxu0 %v7344_v16 }
 0x3dc   : > { %4389 = vmatpush1.bf16.msra.mxu0 %v7342_v30 }
 0x3df   : > { %6470 = vmatmul.mubr.msk.bf16.vlgmr.msra.gmra.mrb[8].mxu0 %vm8267_vm10, %v6469_v57 }
 0x3e0   : > { %6473 = vmatprep.mubr.msk.bf16.mxu0 %vm8284_vm13, %v6472_v56  ;;  %v4480_v56 = vld [vmem:[#allocation13 + $0x88] sm:$0xff] }
 0x3e1   : > { %v6310_v15 = vcombine.high %v4480_v56, %v4484_v50  ;;  %v6309_v7 = vcombine.low %v4480_v56, %v4484_v50  ;;  %v4580_v56 = vld [vmem:[#allocation13 + $0x3a8] sm:$0xff] }
 0x3e7   : > { %6476 = vmatmul.mubr.msk.bf16.gmra.mrb[12].mxu0 %vm8284_vm13, %v6475_v6 }
 0x4b2   : > { %v4392_v39 = vpop.f32.mrb[8].mxu0 }
 0x4b3   : > { %v4423_v25 = vmul.f32 %v4416_v41, %v4392_v39  ;;  %v4394_v32 = vpop.f32.mrb[9].mxu0 }
 0x4b4   : > { %v4424_v12 = vmul.f32 %v4420_v38, %v4394_v32  ;;  %v4396_v14 = vpop.f32.mrb[10].mxu0 }
 0x4b5   : > { %v4443_v60 = vadd.f32 %v4436_v42, %v4423_v25  ;;  %v4425_v17 = vmul.f32 %v4416_v41, %v4396_v14  ;;  %v4398_v20 = vpop.f32.mrb[11].mxu0  ;;  %v4524_v25 = vld [vmem:[#allocation13 + $0x1e8] sm:$0xff] }
 0x4b6   : > { %v4444_v22 = vadd.f32 %v4440_v13, %v4424_v12  ;;  %v4426_v36 = vmul.f32 %v4420_v38, %v4398_v20  ;;  %v4528_v14 = vld [vmem:[#allocation13 + $0x208] sm:$0xff] }
 0x4b7   : > { %v4445_v23 = vadd.f32 %v4436_v42, %v4425_v17  ;;  %v4451_v19 = vmax.f32 %v4443_v60, 0.0  ;;  %v4532_v60 = vld [vmem:[#allocation13 + $0x228] sm:$0xff] }
 0x4b8   : > { %v4446_v48 = vadd.f32 %v4440_v13, %v4426_v36  ;;  %v4452_v46 = vmax.f32 %v4444_v22, 0.0  ;;  %v6358_v20 = vcombine.high %v4528_v14, %v4532_v60  ;;  %v4536_v22 = vld [vmem:[#allocation13 + $0x248] sm:$0xff] }
 0x4b9   : > { %v4453_v45 = vmax.f32 %v4445_v23, 0.0  ;;  %v4540_v36 = vld [vmem:[#allocation13 + $0x268] sm:$0xff]  ;;  %v6357_v23 = vcombine.low %v4528_v14, %v4532_v60  ;;  %v4513_v60 = vld [vmem:[#allocation13 + $0x190] sm:$0xff] }
 0x4ba   : > { %v4454_v16 = vmax.f32 %v4446_v48, 0.0  ;;  %v4402_v29 = vpop.f32.mrb[12].mxu0  ;;  %v6366_v48 = vcombine.high %v4536_v22, %v4540_v36 }
 0x4bb   : > { %v8325_v27 = vpack.c.bf16 %v4453_v45, %v4451_v19  ;;  %v4427_v55 = vmul.f32 %v4416_v41, %v4402_v29  ;;  %v4404_v30 = vpop.f32.mrb[13].mxu0  ;;  %v4544_v19 = vld [vmem:[#allocation13 + $0x288] sm:$0xff] }
 0x4bc   : > { %v8327_v34 = vpack.c.bf16 %v4454_v16, %v4452_v46  ;;  %v4428_v37 = vmul.f32 %v4420_v38, %v4404_v30  ;;  %v4406_v43 = vpop.f32.mrb[14].mxu0  ;;  %v4548_v45 = vld [vmem:[#allocation13 + $0x2a8] sm:$0xff]  ;;  %v6365_v46 = vcombine.low %v4536_v22, %v4540_v36  ;;  %v4521_v36 = vld [vmem:[#allocation13 + $0x1d0] sm:$0xff] }
 0x4bd   : > { %v4447_v52 = vadd.f32 %v4436_v42, %v4427_v55  ;;  %v4429_v63 = vmul.f32 %v4416_v41, %v4406_v43  ;;  %v4408_v24 = vpop.f32.mrb[15].mxu0  ;;  %v4512_v41 = vld [vmem:[#allocation13 + $0x188] sm:$0xff]  ;;  %v6374_v16 = vcombine.high %v4544_v19, %v4548_v45  ;;  %v6373_v4 = vcombine.low %v4544_v19, %v4548_v45  ;;  %v4529_v45 = vld [vmem:[#allocation13 + $0x210] sm:$0xff] }
 0x4be   : > { %v4448_v31 = vadd.f32 %v4440_v13, %v4428_v37  ;;  %v4430_v57 = vmul.f32 %v4420_v38, %v4408_v24  ;;  %5263 = vmatprep.mubr.bf16.mxu1 %v8327_v34  ;;  %v4516_v38 = vld [vmem:[#allocation13 + $0x1a8] sm:$0xff] }
 0x4bf   : > { %v4449_v58 = vadd.f32 %v4436_v42, %v4429_v63  ;;  %5264 = vmatmul.mubr.bf16.vlgmr.msra.gmra.mrb[16].mxu1 %v8325_v27  ;;  %v4455_v6 = vmax.f32 %v4447_v52, 0.0  ;;  %v6342_v39 = vcombine.high %v4512_v41, %v4516_v38  ;;  %v6341_v32 = vcombine.low %v4512_v41, %v4516_v38  ;;  %v4552_v29 = vld [vmem:[#allocation13 + $0x2c8] sm:$0xff]  ;;  %v4497_v38 = vld [vmem:[#allocation13 + $0x110] sm:$0xff] }
 0x4c0   : > { %v4450_v18 = vadd.f32 %v4440_v13, %v4430_v57  ;;  %5285 = vmatpush1.bf16.msra.mxu1 %v6293_v33  ;;  %v4456_v40 = vmax.f32 %v4448_v31, 0.0  ;;  %v4508_v33 = vld [vmem:[#allocation13 + $0x168] sm:$0xff]  ;;  %v6382_v55 = vcombine.high %v4552_v29, %v4556_v26  ;;  %v6381_v43 = vcombine.low %v4552_v29, %v4556_v26  ;;  %v4537_v26 = vld [vmem:[#allocation13 + $0x250] sm:$0xff] }
 0x4c1   : > { %v4457_v3 = vmax.f32 %v4449_v58, 0.0  ;;  %5286 = vmatprep.subr.bf16.mxu1 %v6302_v51  ;;  %v6334_v53 = vcombine.high %v4504_v5, %v4508_v33  ;;  %v6333_v42 = vcombine.low %v4504_v5, %v4508_v33  ;;  %v4520_v13 = vld [vmem:[#allocation13 + $0x1c8] sm:$0xff]  ;;  %v4489_v33 = vld [vmem:[#allocation13 + $0xd0] sm:$0xff] }
 0x4c2   : > { %v4458_v8 = vmax.f32 %v4450_v18, 0.0  ;;  %v6350_v12 = vcombine.high %v4520_v13, %v4524_v25  ;;  %v6349_v17 = vcombine.low %v4520_v13, %v4524_v25  ;;  %v4560_v30 = vld [vmem:[#allocation13 + $0x308] sm:$0xff]  ;;  %v4505_v25 = vld [vmem:[#allocation13 + $0x150] sm:$0xff] }
 0x4c3   : > { %v8331_v62 = vpack.c.bf16 %v4457_v3, %v4455_v6  ;;  %v4564_v37 = vld [vmem:[#allocation13 + $0x328] sm:$0xff] }
 0x4c4   : > { %v8333_v0 = vpack.c.bf16 %v4458_v8, %v4456_v40  ;;  %5287 = vmatpush1.bf16.msra.mxu1 %v6301_v28  ;;  %v6390_v52 = vcombine.high %v4560_v30, %v4564_v37  ;;  %v4568_v63 = vld [vmem:[#allocation13 + $0x348] sm:$0xff]  ;;  %v6389_v51 = vcombine.low %v4560_v30, %v4564_v37  ;;  %v4469_v40 = vld [vmem:[#allocation13 + $0x30] sm:$0xff] }
 0x4c5   : > { %5288 = vmatprep.subr.bf16.mxu1 %v6310_v15  ;;  %v4572_v24 = vld [vmem:[#allocation13 + $0x368] sm:$0xff]  ;;  %v4465_v15 = vld [vmem:[#allocation13 + $0x10] sm:$0xff] }
 0x4c6   : > { %5273 = vmatprep.mubr.bf16.mxu1 %v8333_v0  ;;  %v6398_v31 = vcombine.high %v4568_v63, %v4572_v24  ;;  %v4576_v57 = vld [vmem:[#allocation13 + $0x388] sm:$0xff]  ;;  %v6397_v50 = vcombine.low %v4568_v63, %v4572_v24  ;;  %v6296_v59 = vcombine.high %v4465_v15, %v4469_v40  ;;  %v4545_v37 = vld [vmem:[#allocation13 + $0x290] sm:$0xff] }
 0x4c7   : > { %5274 = vmatmul.mubr.bf16.gmra.mrb[20].mxu1 %v8331_v62  ;;  %v6406_v58 = vcombine.high %v4576_v57, %v4580_v56  ;;  %v4584_v18 = vld [vmem:[#allocation13 + $0x3c8] sm:$0xff]  ;;  %v6405_v6 = vcombine.low %v4576_v57, %v4580_v56  ;;  %v4553_v24 = vld [vmem:[#allocation13 + $0x2d0] sm:$0xff] }
 0x4c8   : > { %5289 = vmatpush1.bf16.msra.mxu1 %v6309_v7  ;;  %5316 = vmatprep.mubr.bf16.mxu1 %v8327_v34  ;;  %v4588_v28 = vld [vmem:[#allocation13 + $0x3e8] sm:$0xff]  ;;  %v4477_v7 = vld [vmem:[#allocation13 + $0x70] sm:$0xff] }
 0x4c9   : > { %5290 = vmatprep.subr.bf16.mxu1 %v6318_v9  ;;  %v6414_v3 = vcombine.high %v4584_v18, %v4588_v28  ;;  %v6413_v8 = vcombine.low %v4584_v18, %v4588_v28  ;;  %v6295_v9 = vcombine.low %v4465_v15, %v4469_v40  ;;  %v6304_v61 = vcombine.high %v4473_v35, %v4477_v7  ;;  %v4561_v56 = vld [vmem:[#allocation13 + $0x310] sm:$0xff] }
 0x4ca   : > { %v4569_v28 = vld [vmem:[#allocation13 + $0x350] sm:$0xff] }
 0x4cb   : > { %v4577_v40 = vld [vmem:[#allocation13 + $0x390] sm:$0xff] }
 0x4cc   : > { %5291 = vmatpush1.bf16.msra.mxu1 %v6317_v54  ;;  %v4485_v54 = vld [vmem:[#allocation13 + $0xb0] sm:$0xff] }
 0x4cd   : > { %5292 = vmatprep.subr.bf16.mxu1 %v6326_v21  ;;  %v6303_v21 = vcombine.low %v4473_v35, %v4477_v7  ;;  %v6312_v5 = vcombine.high %v4481_v10, %v4485_v54  ;;  %v4585_v7 = vld [vmem:[#allocation13 + $0x3d0] sm:$0xff] }
 0x4d0   : > { %5293 = vmatpush1.bf16.msra.mxu1 %v6325_v11  ;;  %v4493_v11 = vld [vmem:[#allocation13 + $0xf0] sm:$0xff] }
 0x4d1   : > { %5294 = vmatprep.subr.bf16.mxu1 %v6334_v53  ;;  %v6311_v53 = vcombine.low %v4481_v10, %v4485_v54  ;;  %v6320_v41 = vcombine.high %v4489_v33, %v4493_v11  ;;  %v4466_v54 = vld [vmem:[#allocation13 + $0x18] sm:$0xff] }
 0x4d4   : > { %5295 = vmatpush1.bf16.msra.mxu1 %v6333_v42  ;;  %v4501_v42 = vld [vmem:[#allocation13 + $0x130] sm:$0xff] }
 0x4d5   : > { %5296 = vmatprep.subr.bf16.mxu1 %v6342_v39  ;;  %v6319_v39 = vcombine.low %v4489_v33, %v4493_v11  ;;  %v6328_v13 = vcombine.high %v4497_v38, %v4501_v42  ;;  %v4474_v11 = vld [vmem:[#allocation13 + $0x58] sm:$0xff] }
 0x4d8   : > { %5297 = vmatpush1.bf16.msra.mxu1 %v6341_v32  ;;  %v4509_v32 = vld [vmem:[#allocation13 + $0x170] sm:$0xff] }
 0x4d9   : > { %5298 = vmatprep.subr.bf16.mxu1 %v6350_v12  ;;  %v6327_v12 = vcombine.low %v4497_v38, %v4501_v42  ;;  %v6336_v14 = vcombine.high %v4505_v25, %v4509_v32  ;;  %v4482_v42 = vld [vmem:[#allocation13 + $0x98] sm:$0xff] }
 0x4dc   : > { %5299 = vmatpush1.bf16.msra.mxu1 %v6349_v17  ;;  %v4517_v17 = vld [vmem:[#allocation13 + $0x1b0] sm:$0xff] }
 0x4dd   : > { %5300 = vmatprep.subr.bf16.mxu1 %v6358_v20  ;;  %v6335_v20 = vcombine.low %v4505_v25, %v4509_v32  ;;  %v6344_v22 = vcombine.high %v4513_v60, %v4517_v17  ;;  %v4490_v32 = vld [vmem:[#allocation13 + $0xd8] sm:$0xff] }
 0x4e0   : > { %5301 = vmatpush1.bf16.msra.mxu1 %v6357_v23  ;;  %v4525_v23 = vld [vmem:[#allocation13 + $0x1f0] sm:$0xff] }
 0x4e1   : > { %5302 = vmatprep.subr.bf16.mxu1 %v6366_v48  ;;  %v6343_v48 = vcombine.low %v4513_v60, %v4517_v17  ;;  %v6352_v19 = vcombine.high %v4521_v36, %v4525_v23  ;;  %v4498_v17 = vld [vmem:[#allocation13 + $0x118] sm:$0xff] }
 0x4e4   : > { %5303 = vmatpush1.bf16.msra.mxu1 %v6365_v46  ;;  %v4533_v46 = vld [vmem:[#allocation13 + $0x230] sm:$0xff] }
 0x4e5   : > { %5304 = vmatprep.subr.bf16.mxu1 %v6374_v16  ;;  %v6351_v16 = vcombine.low %v4521_v36, %v4525_v23  ;;  %v6360_v29 = vcombine.high %v4529_v45, %v4533_v46  ;;  %v4506_v23 = vld [vmem:[#allocation13 + $0x158] sm:$0xff] }
 0x4e8   : > { %5305 = vmatpush1.bf16.msra.mxu1 %v6373_v4  ;;  %v4541_v4 = vld [vmem:[#allocation13 + $0x270] sm:$0xff] }
 0x4e9   : > { %5306 = vmatprep.subr.bf16.mxu1 %v6382_v55  ;;  %v6359_v55 = vcombine.low %v4529_v45, %v4533_v46  ;;  %v6368_v30 = vcombine.high %v4537_v26, %v4541_v4  ;;  %v4514_v46 = vld [vmem:[#allocation13 + $0x198] sm:$0xff] }
 0x4ec   : > { %5307 = vmatpush1.bf16.msra.mxu1 %v6381_v43  ;;  %v4549_v43 = vld [vmem:[#allocation13 + $0x2b0] sm:$0xff] }
 0x4ed   : > { %5308 = vmatprep.subr.bf16.mxu1 %v6390_v52  ;;  %v6367_v52 = vcombine.low %v4537_v26, %v4541_v4  ;;  %v6376_v63 = vcombine.high %v4545_v37, %v4549_v43  ;;  %v4522_v4 = vld [vmem:[#allocation13 + $0x1d8] sm:$0xff] }
 0x4f0   : > { %5309 = vmatpush1.bf16.msra.mxu1 %v6389_v51  ;;  %v4557_v51 = vld [vmem:[#allocation13 + $0x2f0] sm:$0xff] }
 0x4f1   : > { %5310 = vmatprep.subr.bf16.mxu1 %v6398_v31  ;;  %v6375_v31 = vcombine.low %v4545_v37, %v4549_v43  ;;  %v6384_v57 = vcombine.high %v4553_v24, %v4557_v51  ;;  %v4530_v37 = vld [vmem:[#allocation13 + $0x218] sm:$0xff] }
 0x4f2   : > { %v4534_v43 = vld [vmem:[#allocation13 + $0x238] sm:$0xff] }
 0x4f4   : > { %5311 = vmatpush1.bf16.msra.mxu1 %v6397_v50  ;;  %v4565_v50 = vld [vmem:[#allocation13 + $0x330] sm:$0xff] }
 0x4f5   : > { %5312 = vmatprep.subr.bf16.mxu1 %v6406_v58  ;;  %v6383_v58 = vcombine.low %v4553_v24, %v4557_v51  ;;  %v6392_v18 = vcombine.high %v4561_v56, %v4565_v50  ;;  %v4538_v24 = vld [vmem:[#allocation13 + $0x258] sm:$0xff] }
 0x4f6   : > { %v4542_v51 = vld [vmem:[#allocation13 + $0x278] sm:$0xff] }
 0x4f8   : > { %5313 = vmatpush1.bf16.msra.mxu1 %v6405_v6  ;;  %v4573_v6 = vld [vmem:[#allocation13 + $0x370] sm:$0xff] }
 0x4f9   : > { %5314 = vmatprep.subr.bf16.mxu1 %v6414_v3  ;;  %v6391_v3 = vcombine.low %v4561_v56, %v4565_v50  ;;  %v6400_v15 = vcombine.high %v4569_v28, %v4573_v6  ;;  %v4546_v56 = vld [vmem:[#allocation13 + $0x298] sm:$0xff] }
 0x4fa   : > { %v4550_v50 = vld [vmem:[#allocation13 + $0x2b8] sm:$0xff] }
 0x4fc   : > { %5315 = vmatpush1.bf16.msra.mxu1 %v6413_v8  ;;  %v4581_v8 = vld [vmem:[#allocation13 + $0x3b0] sm:$0xff] }
 0x4fd   : > { %5337 = vmatprep.subr.bf16.mxu1 %v6296_v59  ;;  %v6399_v59 = vcombine.low %v4569_v28, %v4573_v6  ;;  %v6408_v35 = vcombine.high %v4577_v40, %v4581_v8  ;;  %v4554_v28 = vld [vmem:[#allocation13 + $0x2d8] sm:$0xff] }
 0x4fe   : > { %v4558_v6 = vld [vmem:[#allocation13 + $0x2f8] sm:$0xff] }
 0x4ff   : > { %5317 = vmatmul.mubr.bf16.vlgmr.msra.gmra.mrb[24].mxu1 %v8325_v27 }
 0x500   : > { %5326 = vmatprep.mubr.bf16.mxu1 %v8333_v0  ;;  %5338 = vmatpush1.bf16.msra.mxu1 %v6295_v9  ;;  %v4589_v9 = vld [vmem:[#allocation13 + $0x3f0] sm:$0xff] }
 0x501   : > { %5339 = vmatprep.subr.bf16.mxu1 %v6304_v61  ;;  %v6407_v61 = vcombine.low %v4577_v40, %v4581_v8  ;;  %v6416_v10 = vcombine.high %v4585_v7, %v4589_v9  ;;  %v4562_v40 = vld [vmem:[#allocation13 + $0x318] sm:$0xff] }
 0x502   : > { %v4566_v8 = vld [vmem:[#allocation13 + $0x338] sm:$0xff] }
 0x504   : > { %5340 = vmatpush1.bf16.msra.mxu1 %v6303_v21  ;;  %v4470_v21 = vld [vmem:[#allocation13 + $0x38] sm:$0xff] }
 0x505   : > { %5341 = vmatprep.subr.bf16.mxu1 %v6312_v5  ;;  %v6415_v5 = vcombine.low %v4585_v7, %v4589_v9  ;;  %v6298_v33 = vcombine.high %v4466_v54, %v4470_v21  ;;  %v4570_v7 = vld [vmem:[#allocation13 + $0x358] sm:$0xff] }
 0x506   : > { %v4574_v9 = vld [vmem:[#allocation13 + $0x378] sm:$0xff] }
 0x507   : > { %5327 = vmatmul.mubr.bf16.gmra.mrb[28].mxu1 %v8331_v62 }
 0x508   : > { %5342 = vmatpush1.bf16.msra.mxu1 %v6311_v53  ;;  %5369 = vmatprep.mubr.bf16.mxu1 %v8327_v34  ;;  %v4478_v53 = vld [vmem:[#allocation13 + $0x78] sm:$0xff] }
 0x509   : > { %5343 = vmatprep.subr.bf16.mxu1 %v6320_v41  ;;  %v6297_v41 = vcombine.low %v4466_v54, %v4470_v21  ;;  %v6306_v38 = vcombine.high %v4474_v11, %v4478_v53  ;;  %v4578_v54 = vld [vmem:[#allocation13 + $0x398] sm:$0xff] }
 0x50a   : > { %v4582_v21 = vld [vmem:[#allocation13 + $0x3b8] sm:$0xff] }
 0x50c   : > { %5344 = vmatpush1.bf16.msra.mxu1 %v6319_v39  ;;  %v4486_v39 = vld [vmem:[#allocation13 + $0xb8] sm:$0xff] }
 0x50d   : > { %5345 = vmatprep.subr.bf16.mxu1 %v6328_v13  ;;  %v6305_v13 = vcombine.low %v4474_v11, %v4478_v53  ;;  %v6314_v25 = vcombine.high %v4482_v42, %v4486_v39  ;;  %v4586_v11 = vld [vmem:[#allocation13 + $0x3d8] sm:$0xff] }
 0x50e   : > { %v4590_v53 = vld [vmem:[#allocation13 + $0x3f8] sm:$0xff] }
 0x510   : > { %5346 = vmatpush1.bf16.msra.mxu1 %v6327_v12  ;;  %v4494_v12 = vld [vmem:[#allocation13 + $0xf8] sm:$0xff] }
 0x511   : > { %5347 = vmatprep.subr.bf16.mxu1 %v6336_v14  ;;  %v6313_v14 = vcombine.low %v4482_v42, %v4486_v39  ;;  %v6322_v60 = vcombine.high %v4490_v32, %v4494_v12  ;;  %v6417_v42 = vcombine.low %v4586_v11, %v4590_v53  ;;  %v8352_v39 = vld [vmem:[%s8514_s8] sm:$0xff] }
 0x514   : > { %5348 = vmatpush1.bf16.msra.mxu1 %v6335_v20  ;;  %v4502_v20 = vld [vmem:[#allocation13 + $0x138] sm:$0xff] }
 0x515   : > { %5349 = vmatprep.subr.bf16.mxu1 %v6344_v22  ;;  %v6321_v22 = vcombine.low %v4490_v32, %v4494_v12  ;;  %v6330_v36 = vcombine.high %v4498_v17, %v4502_v20 }
 0x518   : > { %5350 = vmatpush1.bf16.msra.mxu1 %v6343_v48  ;;  %v4510_v48 = vld [vmem:[#allocation13 + $0x178] sm:$0xff] }
 0x519   : > { %5351 = vmatprep.subr.bf16.mxu1 %v6352_v19  ;;  %v6329_v19 = vcombine.low %v4498_v17, %v4502_v20  ;;  %v6338_v45 = vcombine.high %v4506_v23, %v4510_v48 }
 0x51c   : > { %5352 = vmatpush1.bf16.msra.mxu1 %v6351_v16  ;;  %v4518_v16 = vld [vmem:[#allocation13 + $0x1b8] sm:$0xff] }
 0x51d   : > { %5353 = vmatprep.subr.bf16.mxu1 %v6360_v29  ;;  %v6337_v29 = vcombine.low %v4506_v23, %v4510_v48  ;;  %v6346_v26 = vcombine.high %v4514_v46, %v4518_v16 }
 0x520   : > { %5354 = vmatpush1.bf16.msra.mxu1 %v6359_v55  ;;  %v4526_v55 = vld [vmem:[#allocation13 + $0x1f8] sm:$0xff] }
 0x521   : > { %5355 = vmatprep.subr.bf16.mxu1 %v6368_v30  ;;  %v6345_v30 = vcombine.low %v4514_v46, %v4518_v16 }
 0x524   : > { %5356 = vmatpush1.bf16.msra.mxu1 %v6367_v52  ;;  %v6353_v52 = vcombine.low %v4522_v4, %v4526_v55 }
 0x525   : > { %5357 = vmatprep.subr.bf16.mxu1 %v6376_v63  ;;  %v6362_v63 = vcombine.high %v4530_v37, %v4534_v43 }
 0x528   : > { %5358 = vmatpush1.bf16.msra.mxu1 %v6375_v31  ;;  %v6361_v31 = vcombine.low %v4530_v37, %v4534_v43 }
 0x529   : > { %5359 = vmatprep.subr.bf16.mxu1 %v6384_v57  ;;  %v6370_v57 = vcombine.high %v4538_v24, %v4542_v51 }
 0x52c   : > { %5360 = vmatpush1.bf16.msra.mxu1 %v6383_v58  ;;  %v6369_v58 = vcombine.low %v4538_v24, %v4542_v51 }
 0x52d   : > { %5361 = vmatprep.subr.bf16.mxu1 %v6392_v18  ;;  %v6378_v18 = vcombine.high %v4546_v56, %v4550_v50 }
 0x530   : > { %5362 = vmatpush1.bf16.msra.mxu1 %v6391_v3  ;;  %v6377_v3 = vcombine.low %v4546_v56, %v4550_v50 }
 0x531   : > { %5363 = vmatprep.subr.bf16.mxu1 %v6400_v15  ;;  %v6386_v15 = vcombine.high %v4554_v28, %v4558_v6 }
 0x534   : > { %5364 = vmatpush1.bf16.msra.mxu1 %v6399_v59  ;;  %v6385_v59 = vcombine.low %v4554_v28, %v4558_v6  ;;  %v7349_v28 = vld [vmem:[%s7937_s25 + $0x80] sm:$0xff] }
 0x535   : > { %5365 = vmatprep.subr.bf16.mxu1 %v6408_v35  ;;  %v6394_v35 = vcombine.high %v4562_v40, %v4566_v8 }
 0x538   : > { %5366 = vmatpush1.bf16.msra.mxu1 %v6407_v61  ;;  %v6393_v61 = vcombine.low %v4562_v40, %v4566_v8 }
 0x539   : > { %5367 = vmatprep.subr.bf16.mxu1 %v6416_v10  ;;  %v6402_v10 = vcombine.high %v4570_v7, %v4574_v9 }
 0x53c   : > { %5368 = vmatpush1.bf16.msra.mxu1 %v6415_v5  ;;  %v6401_v5 = vcombine.low %v4570_v7, %v4574_v9 }
 0x53d   : > { %5390 = vmatprep.subr.bf16.mxu1 %v6298_v33  ;;  %v6410_v33 = vcombine.high %v4578_v54, %v4582_v21 }
 0x53f   : > { %5370 = vmatmul.mubr.bf16.vlgmr.msra.gmra.mrb[32].mxu1 %v8325_v27 }
 0x540   : > { %5379 = vmatprep.mubr.bf16.mxu1 %v8333_v0  ;;  %5391 = vmatpush1.bf16.msra.mxu1 %v6297_v41  ;;  %v6409_v41 = vcombine.low %v4578_v54, %v4582_v21 }
 0x541   : > { %5392 = vmatprep.subr.bf16.mxu1 %v6306_v38  ;;  %v6418_v38 = vcombine.high %v4586_v11, %v4590_v53 }
 0x544   : > { %5393 = vmatpush1.bf16.msra.mxu1 %v6305_v13  ;;  %v8357_v13 = vld [vmem:[%s8548_s9] sm:$0xff] }
 0x545   : > { %5394 = vmatprep.subr.bf16.mxu1 %v6314_v25  ;;  %v5448_v25 = vrot.slane %v8352_v39, %v8070_v47  ;;  %v5526_v32 = vrot.slane %v8357_v13, %v8075_v49  ;;  %v5530_v11 = vrot.slane %v8357_v13, %v8175_v1 }
 0x547   : > { %5380 = vmatmul.mubr.bf16.gmra.mrb[36].mxu1 %v8331_v62 }
 0x548   : > { %5395 = vmatpush1.bf16.msra.mxu1 %v6313_v14  ;;  %5422 = vmatprep.mubr.bf16.mxu1 %v8327_v34  ;;  %v6354_v34 = vcombine.high %v4522_v4, %v4526_v55 }
 0x549   : > { %5396 = vmatprep.subr.bf16.mxu1 %v6322_v60 }
 0x54c   : > { %5397 = vmatpush1.bf16.msra.mxu1 %v6321_v22 }
 0x54d   : > { %5398 = vmatprep.subr.bf16.mxu1 %v6330_v36 }
 0x550   : > { %5399 = vmatpush1.bf16.msra.mxu1 %v6329_v19  ;;  %v7345_v19 = vld [vmem:[%s7937_s25] sm:$0xff] }
 0x551   : > { %5400 = vmatprep.subr.bf16.mxu1 %v6338_v45 }
 0x554   : > { %5401 = vmatpush1.bf16.msra.mxu1 %v6337_v29 }
 0x555   : > { %5402 = vmatprep.subr.bf16.mxu1 %v6346_v26 }
 0x558   : > { %5403 = vmatpush1.bf16.msra.mxu1 %v6345_v30  ;;  %v7348_v30 = vld [vmem:[%s7937_s25 + $0x48] sm:$0xff] }
 0x559   : > { %5404 = vmatprep.subr.bf16.mxu1 %v6354_v34 }
 0x55c   : > { %5405 = vmatpush1.bf16.msra.mxu1 %v6353_v52 }
 0x55d   : > { %5406 = vmatprep.subr.bf16.mxu1 %v6362_v63 }
 0x560   : > { %5407 = vmatpush1.bf16.msra.mxu1 %v6361_v31 }
 0x561   : > { %5408 = vmatprep.subr.bf16.mxu1 %v6370_v57 }
 0x564   : > { %5409 = vmatpush1.bf16.msra.mxu1 %v6369_v58 }
 0x565   : > { %5410 = vmatprep.subr.bf16.mxu1 %v6378_v18 }
 0x568   : > { %5411 = vmatpush1.bf16.msra.mxu1 %v6377_v3 }
 0x569   : > { %5412 = vmatprep.subr.bf16.mxu1 %v6386_v15  ;;  %v7350_v15 = vld [vmem:[%s7937_s25 + $0x88] sm:$0xff] }
 0x56c   : > { %5413 = vmatpush1.bf16.msra.mxu1 %v6385_v59 }
 0x56d   : > { %5414 = vmatprep.subr.bf16.mxu1 %v6394_v35  ;;  %v7351_v35 = vld [vmem:[%s7937_s25 + $0xc0] sm:$0xff] }
 0x570   : > { %5415 = vmatpush1.bf16.msra.mxu1 %v6393_v61  ;;  %v7352_v61 = vld [vmem:[%s7937_s25 + $0xc8] sm:$0xff] }
 0x571   : > { %5416 = vmatprep.subr.bf16.mxu1 %v6402_v10 }
 0x574   : > { %5417 = vmatpush1.bf16.msra.mxu1 %v6401_v5  ;;  %v5456_v5 = vrot.slane %v8352_v39, %v8175_v1 }
 0x575   : > { %5418 = vmatprep.subr.bf16.mxu1 %v6410_v33  ;;  %v5460_v33 = vrot.slane %v8352_v39, %v8178_v2 }
 0x578   : > { %5419 = vmatpush1.bf16.msra.mxu1 %v6409_v41  ;;  %v5534_v41 = vrot.slane %v8357_v13, %v8178_v2 }
 0x579   : > { %5420 = vmatprep.subr.bf16.mxu1 %v6418_v38 }
 0x57c   : > { %5421 = vmatpush1.bf16.msra.mxu1 %v6417_v42 }
 0x57f   : > { %5423 = vmatmul.mubr.bf16.vlgmr.msra.gmra.mrb[40].mxu1 %v8325_v27  ;;  %v5452_v27 = vrot.slane %v8352_v39, %v8075_v49  ;;  %v7347_v49 = vld [vmem:[%s7937_s25 + $0x40] sm:$0xff] }
 0x580   : > { %5432 = vmatprep.mubr.bf16.mxu1 %v8333_v0 }
 0x587   : > { %5433 = vmatmul.mubr.bf16.gmra.mrb[44].mxu1 %v8331_v62  ;;  %v5522_v62 = vrot.slane %v8357_v13, %v8070_v47  ;;  %v7346_v47 = vld [vmem:[%s7937_s25 + $0x8] sm:$0xff] }
 0x592   : > { %v5265_v0 = vpop.f32.mrb[16].mxu1 }
 0x593   : > { %v5485_v12 = vmul.f32 %v5448_v25, %v5265_v0  ;;  %v5267_v14 = vpop.f32.mrb[17].mxu1 }
 0x594   : > { %v5486_v60 = vmul.f32 %v5452_v27, %v5267_v14  ;;  %v5269_v17 = vpop.f32.mrb[18].mxu1 }
 0x595   : > { %v5559_v20 = vadd.f32 %v5522_v62, %v5485_v12  ;;  %v5493_v22 = vmul.f32 %v5448_v25, %v5269_v17  ;;  %v5271_v36 = vpop.f32.mrb[19].mxu1 }
 0x596   : > { %v5560_v23 = vadd.f32 %v5526_v32, %v5486_v60  ;;  %v5494_v48 = vmul.f32 %v5452_v27, %v5271_v36  ;;  %v7353_v60 = vld [vmem:[%s7937_s25 + $0x10] sm:$0xff] }
 0x597   : > { %v5591_v45 = vadd.f32 %v7345_v19, %v5559_v20  ;;  %v5567_v46 = vadd.f32 %v5522_v62, %v5493_v22  ;;  %v7354_v20 = vld [vmem:[%s7937_s25 + $0x18] sm:$0xff] }
 0x598   : > { %v5592_v16 = vadd.f32 %v7346_v47, %v5560_v23  ;;  %v5568_v29 = vadd.f32 %v5526_v32, %v5494_v48  ;;  %v7355_v23 = vld [vmem:[%s7937_s25 + $0x50] sm:$0xff] }
 0x599   : > { %v5623_v26 = vmax.f32 %v5591_v45, 0.0  ;;  %v5599_v4 = vadd.f32 %v7347_v49, %v5567_v46  ;;  %v7356_v45 = vld [vmem:[%s7937_s25 + $0x58] sm:$0xff] }
 0x59a   : > { %v5624_v55 = vmax.f32 %v5592_v16, 0.0  ;;  %v5600_v34 = vadd.f32 %v7348_v30, %v5568_v29  ;;  %v5275_v37 = vpop.f32.mrb[20].mxu1 }
 0x59b   : > { %5655 = vst [vmem:[%s8373_s30] sm:$0xff] %v5623_v26  ;;  %v5631_v43 = vmax.f32 %v5599_v4, 0.0  ;;  %v5501_v52 = vmul.f32 %v5448_v25, %v5275_v37  ;;  %v5277_v63 = vpop.f32.mrb[21].mxu1 }
 0x59c   : > { %5656 = vst [vmem:[%s8373_s30 + $0x8] sm:$0xff] %v5624_v55  ;;  %v5632_v24 = vmax.f32 %v5600_v34, 0.0  ;;  %v5502_v51 = vmul.f32 %v5452_v27, %v5277_v63  ;;  %v5279_v31 = vpop.f32.mrb[22].mxu1  ;;  %v7357_v63 = vld [vmem:[%s7937_s25 + $0x90] sm:$0xff] }
 0x59d   : > { %5663 = vst [vmem:[%s8373_s30 + $0x40] sm:$0xff] %v5631_v43  ;;  %v5575_v57 = vadd.f32 %v5522_v62, %v5501_v52  ;;  %v5509_v56 = vmul.f32 %v5448_v25, %v5279_v31  ;;  %v5281_v50 = vpop.f32.mrb[23].mxu1  ;;  %v7358_v31 = vld [vmem:[%s7937_s25 + $0x98] sm:$0xff] }
 0x59e   : > { %5664 = vst [vmem:[%s8373_s30 + $0x48] sm:$0xff] %v5632_v24  ;;  %v5576_v58 = vadd.f32 %v5526_v32, %v5502_v51  ;;  %v5510_v18 = vmul.f32 %v5452_v27, %v5281_v50 }
 0x59f   : > { %v5607_v6 = vadd.f32 %v7349_v28, %v5575_v57  ;;  %v5583_v3 = vadd.f32 %v5522_v62, %v5509_v56 }
 0x5a0   : > { %v5608_v40 = vadd.f32 %v7350_v15, %v5576_v58  ;;  %v5584_v8 = vadd.f32 %v5526_v32, %v5510_v18  ;;  %v7359_v58 = vld [vmem:[%s7937_s25 + $0xd0] sm:$0xff] }
 0x5a1   : > { %v5639_v59 = vmax.f32 %v5607_v6, 0.0  ;;  %v5615_v7 = vadd.f32 %v7351_v35, %v5583_v3  ;;  %v7360_v6 = vld [vmem:[%s7937_s25 + $0xd8] sm:$0xff] }
 0x5a2   : > { %v5640_v9 = vmax.f32 %v5608_v40, 0.0  ;;  %v5616_v10 = vadd.f32 %v7352_v61, %v5584_v8  ;;  %v5463_v8 = vsub.s32 4, %v8067_v44 }
 0x5a3   : > { %5671 = vst [vmem:[%s8373_s30 + $0x80] sm:$0xff] %v5639_v59  ;;  %v5647_v54 = vmax.f32 %v5615_v7, 0.0  ;;  %v5467_v59 = vsub.s32 5, %v8067_v44 }
 0x5a4   : > { %5672 = vst [vmem:[%s8373_s30 + $0x88] sm:$0xff] %v5640_v9  ;;  %v5648_v21 = vmax.f32 %v5616_v10, 0.0  ;;  %v5464_v35 = vrot.slane %v8352_v39, %v5463_v8  ;;  %v5538_v9 = vrot.slane %v8357_v13, %v5463_v8 }
 0x5a5   : > { %5679 = vst [vmem:[%s8373_s30 + $0xc0] sm:$0xff] %v5647_v54  ;;  %v5468_v7 = vrot.slane %v8352_v39, %v5467_v59  ;;  %v5542_v10 = vrot.slane %v8357_v13, %v5467_v59 }
 0x5a6   : > { %5680 = vst [vmem:[%s8373_s30 + $0xc8] sm:$0xff] %v5648_v21 }
 0x5d2   : > { %v5318_v53 = vpop.f32.mrb[24].mxu1 }
 0x5d3   : > { %v5487_v38 = vmul.f32 %v5456_v5, %v5318_v53  ;;  %v5320_v42 = vpop.f32.mrb[25].mxu1 }
 0x5d4   : > { %v5488_v25 = vmul.f32 %v5460_v33, %v5320_v42  ;;  %v5322_v27 = vpop.f32.mrb[26].mxu1 }
 0x5d5   : > { %v5561_v62 = vadd.f32 %v5530_v11, %v5487_v38  ;;  %v5495_v0 = vmul.f32 %v5456_v5, %v5322_v27  ;;  %v5324_v32 = vpop.f32.mrb[27].mxu1 }
 0x5d6   : > { %v5562_v12 = vadd.f32 %v5534_v41, %v5488_v25  ;;  %v5496_v14 = vmul.f32 %v5460_v33, %v5324_v32  ;;  %v7361_v25 = vld [vmem:[%s7937_s25 + $0x20] sm:$0xff] }
 0x5d7   : > { %v5593_v17 = vadd.f32 %v7353_v60, %v5561_v62  ;;  %v5569_v1 = vadd.f32 %v5530_v11, %v5495_v0  ;;  %v7362_v0 = vld [vmem:[%s7937_s25 + $0x28] sm:$0xff]  ;;  %v7363_v60 = vld [vmem:[%s7937_s25 + $0x60] sm:$0xff] }
 0x5d8   : > { %v5594_v22 = vadd.f32 %v7354_v20, %v5562_v12  ;;  %v5570_v36 = vadd.f32 %v5534_v41, %v5496_v14  ;;  %v7364_v20 = vld [vmem:[%s7937_s25 + $0x68] sm:$0xff] }
 0x5d9   : > { %v5625_v2 = vmax.f32 %v5593_v17, 0.0  ;;  %v5601_v48 = vadd.f32 %v7355_v23, %v5569_v1 }
 0x5da   : > { %v5626_v19 = vmax.f32 %v5594_v22, 0.0  ;;  %v5602_v46 = vadd.f32 %v7356_v45, %v5570_v36  ;;  %v5328_v47 = vpop.f32.mrb[28].mxu1 }
 0x5db   : > { %5657 = vst [vmem:[%s8373_s30 + $0x10] sm:$0xff] %v5625_v2  ;;  %v5633_v16 = vmax.f32 %v5601_v48, 0.0  ;;  %v5503_v29 = vmul.f32 %v5456_v5, %v5328_v47  ;;  %v5330_v26 = vpop.f32.mrb[29].mxu1 }
 0x5dc   : > { %5658 = vst [vmem:[%s8373_s30 + $0x18] sm:$0xff] %v5626_v19  ;;  %v5634_v49 = vmax.f32 %v5602_v46, 0.0  ;;  %v5504_v4 = vmul.f32 %v5460_v33, %v5330_v26  ;;  %v5332_v55 = vpop.f32.mrb[30].mxu1 }
 0x5dd   : > { %5665 = vst [vmem:[%s8373_s30 + $0x50] sm:$0xff] %v5633_v16  ;;  %v5577_v30 = vadd.f32 %v5530_v11, %v5503_v29  ;;  %v5511_v34 = vmul.f32 %v5456_v5, %v5332_v55  ;;  %v5334_v37 = vpop.f32.mrb[31].mxu1 }
 0x5de   : > { %5666 = vst [vmem:[%s8373_s30 + $0x58] sm:$0xff] %v5634_v49  ;;  %v5578_v43 = vadd.f32 %v5534_v41, %v5504_v4  ;;  %v5512_v52 = vmul.f32 %v5460_v33, %v5334_v37  ;;  %v7365_v4 = vld [vmem:[%s7937_s25 + $0xa0] sm:$0xff] }
 0x5df   : > { %v5609_v24 = vadd.f32 %v7357_v63, %v5577_v30  ;;  %v5585_v51 = vadd.f32 %v5530_v11, %v5511_v34  ;;  %v7366_v34 = vld [vmem:[%s7937_s25 + $0xa8] sm:$0xff]  ;;  %v7367_v63 = vld [vmem:[%s7937_s25 + $0xe0] sm:$0xff] }
 0x5e0   : > { %v5610_v57 = vadd.f32 %v7358_v31, %v5578_v43  ;;  %v5586_v56 = vadd.f32 %v5534_v41, %v5512_v52  ;;  %v7368_v31 = vld [vmem:[%s7937_s25 + $0xe8] sm:$0xff] }
 0x5e1   : > { %v5641_v50 = vmax.f32 %v5609_v24, 0.0  ;;  %v5617_v18 = vadd.f32 %v7359_v58, %v5585_v51  ;;  %v5471_v58 = vsub.s32 6, %v8067_v44 }
 0x5e2   : > { %v5642_v28 = vmax.f32 %v5610_v57, 0.0  ;;  %v5618_v3 = vadd.f32 %v7360_v6, %v5586_v56 }
 0x5e3   : > { %5673 = vst [vmem:[%s8373_s30 + $0x90] sm:$0xff] %v5641_v50  ;;  %v5649_v15 = vmax.f32 %v5617_v18, 0.0  ;;  %v5475_v18 = vsub.s32 7, %v8067_v44 }
 0x5e4   : > { %5674 = vst [vmem:[%s8373_s30 + $0x98] sm:$0xff] %v5642_v28  ;;  %v5650_v40 = vmax.f32 %v5618_v3, 0.0  ;;  %v5472_v28 = vrot.slane %v8352_v39, %v5471_v58  ;;  %v5546_v3 = vrot.slane %v8357_v13, %v5471_v58 }
 0x5e5   : > { %5681 = vst [vmem:[%s8373_s30 + $0xd0] sm:$0xff] %v5649_v15  ;;  %v5476_v6 = vrot.slane %v8352_v39, %v5475_v18 }
 0x5e6   : > { %5682 = vst [vmem:[%s8373_s30 + $0xd8] sm:$0xff] %v5650_v40  ;;  %v5550_v40 = vrot.slane %v8357_v13, %v5475_v18 }
 0x612   : > { %v5371_v61 = vpop.f32.mrb[32].mxu1 }
 0x613   : > { %v5489_v54 = vmul.f32 %v5464_v35, %v5371_v61  ;;  %v5373_v21 = vpop.f32.mrb[33].mxu1 }
 0x614   : > { %v5490_v5 = vmul.f32 %v5468_v7, %v5373_v21  ;;  %v5375_v33 = vpop.f32.mrb[34].mxu1  ;;  %v7369_v21 = vld [vmem:[%s7937_s25 + $0x30] sm:$0xff] }
 0x615   : > { %v5563_v11 = vadd.f32 %v5538_v9, %v5489_v54  ;;  %v5497_v53 = vmul.f32 %v5464_v35, %v5375_v33  ;;  %v5377_v41 = vpop.f32.mrb[35].mxu1  ;;  %v7370_v33 = vld [vmem:[%s7937_s25 + $0x38] sm:$0xff] }
 0x616   : > { %v5564_v38 = vadd.f32 %v5542_v10, %v5490_v5  ;;  %v5498_v42 = vmul.f32 %v5468_v7, %v5377_v41  ;;  %v7371_v41 = vld [vmem:[%s7937_s25 + $0x70] sm:$0xff] }
 0x617   : > { %v5595_v27 = vadd.f32 %v7361_v25, %v5563_v11  ;;  %v5571_v62 = vadd.f32 %v5538_v9, %v5497_v53  ;;  %v7372_v25 = vld [vmem:[%s7937_s25 + $0x78] sm:$0xff] }
 0x618   : > { %v5596_v32 = vadd.f32 %v7362_v0, %v5564_v38  ;;  %v5572_v12 = vadd.f32 %v5542_v10, %v5498_v42 }
 0x619   : > { %v5627_v14 = vmax.f32 %v5595_v27, 0.0  ;;  %v5603_v17 = vadd.f32 %v7363_v60, %v5571_v62 }
 0x61a   : > { %v5628_v1 = vmax.f32 %v5596_v32, 0.0  ;;  %v5604_v22 = vadd.f32 %v7364_v20, %v5572_v12  ;;  %v5381_v36 = vpop.f32.mrb[36].mxu1 }
 0x61b   : > { %5659 = vst [vmem:[%s8373_s30 + $0x20] sm:$0xff] %v5627_v14  ;;  %v5635_v2 = vmax.f32 %v5603_v17, 0.0  ;;  %v5505_v23 = vmul.f32 %v5464_v35, %v5381_v36  ;;  %v5383_v48 = vpop.f32.mrb[37].mxu1 }
 0x61c   : > { %5660 = vst [vmem:[%s8373_s30 + $0x28] sm:$0xff] %v5628_v1  ;;  %v5636_v19 = vmax.f32 %v5604_v22, 0.0  ;;  %v5506_v45 = vmul.f32 %v5468_v7, %v5383_v48  ;;  %v5385_v46 = vpop.f32.mrb[38].mxu1 }
 0x61d   : > { %5667 = vst [vmem:[%s8373_s30 + $0x60] sm:$0xff] %v5635_v2  ;;  %v5579_v47 = vadd.f32 %v5538_v9, %v5505_v23  ;;  %v5513_v16 = vmul.f32 %v5464_v35, %v5385_v46  ;;  %v5387_v29 = vpop.f32.mrb[39].mxu1  ;;  %v7373_v23 = vld [vmem:[%s7937_s25 + $0xb0] sm:$0xff] }
 0x61e   : > { %5668 = vst [vmem:[%s8373_s30 + $0x68] sm:$0xff] %v5636_v19  ;;  %v5580_v26 = vadd.f32 %v5542_v10, %v5506_v45  ;;  %v5514_v49 = vmul.f32 %v5468_v7, %v5387_v29  ;;  %v7374_v45 = vld [vmem:[%s7937_s25 + $0xb8] sm:$0xff]  ;;  %v7375_v29 = vld [vmem:[%s7937_s25 + $0xf0] sm:$0xff] }
 0x61f   : > { %v5611_v55 = vadd.f32 %v7365_v4, %v5579_v47  ;;  %v5587_v30 = vadd.f32 %v5538_v9, %v5513_v16  ;;  %v7376_v4 = vld [vmem:[%s7937_s25 + $0xf8] sm:$0xff]  ;;  %s7642_s25 = smov [#allocation15]  }
 0x620   : > { %v5612_v37 = vadd.f32 %v7366_v34, %v5580_v26  ;;  %v5588_v43 = vadd.f32 %v5542_v10, %v5514_v49  ;;  %s7551_s12 = sshll.u32 %s7642_s25, 4  ;;  %s7552_s12 = int_to_ptr.vmem [resolvable:$false] %s7551_s12 }
 0x621   : > { %v5643_v52 = vmax.f32 %v5611_v55, 0.0  ;;  %v5619_v24 = vadd.f32 %v7367_v63, %v5587_v30  ;;  %s7553_s26 = scalar_lea.vmem %s7552_s12, 8192  ;;  %p7554_p13 = scmp.lt.s32.totalorder %s8459_s20, %s7552_s12 }
 0x622   : > { %v5644_v51 = vmax.f32 %v5612_v37, 0.0  ;;  %v5620_v57 = vadd.f32 %v7368_v31, %v5588_v43  ;;  %p7555_p0 = scmp.lt.s32.totalorder %s7553_s26, %s7547_s24 }
 0x623   : > { %5675 = vst [vmem:[%s8373_s30 + $0xa0] sm:$0xff] %v5643_v52  ;;  %v5651_v56 = vmax.f32 %v5619_v24, 0.0 }
 0x624   : > { %5676 = vst [vmem:[%s8373_s30 + $0xa8] sm:$0xff] %v5644_v51  ;;  %v5652_v50 = vmax.f32 %v5620_v57, 0.0  ;;  %p7556_p2 = por %p7555_p0, %p7554_p13 }
 0x625   : > { %5683 = vst [vmem:[%s8373_s30 + $0xe0] sm:$0xff] %v5651_v56 }
 0x626   : > { %5684 = vst [vmem:[%s8373_s30 + $0xe8] sm:$0xff] %v5652_v50  ;;  %p7557_p8 = pnand %p7556_p2, %p7550_p1 }
 0x652   : > { %v5424_v15 = vpop.f32.mrb[40].mxu1 }
 0x653   : > { %v5491_v8 = vmul.f32 %v5472_v28, %v5424_v15  ;;  %v5426_v59 = vpop.f32.mrb[41].mxu1 }
 0x654   : > { %v5492_v35 = vmul.f32 %v5476_v6, %v5426_v59  ;;  %v5428_v7 = vpop.f32.mrb[42].mxu1 }
 0x655   : > { %v5565_v9 = vadd.f32 %v5546_v3, %v5491_v8  ;;  %v5499_v61 = vmul.f32 %v5472_v28, %v5428_v7  ;;  %v5430_v10 = vpop.f32.mrb[43].mxu1 }
 0x656   : > { %v5566_v44 = vadd.f32 %v5550_v40, %v5492_v35  ;;  %v5500_v54 = vmul.f32 %v5476_v6, %v5430_v10 }
 0x657   : > { %v5597_v39 = vadd.f32 %v7369_v21, %v5565_v9  ;;  %v5573_v5 = vadd.f32 %v5546_v3, %v5499_v61 }
 0x658   : > { %v5598_v11 = vadd.f32 %v7370_v33, %v5566_v44  ;;  %v5574_v53 = vadd.f32 %v5550_v40, %v5500_v54 }
 0x659   : > { %v5629_v13 = vmax.f32 %v5597_v39, 0.0  ;;  %v5605_v38 = vadd.f32 %v7371_v41, %v5573_v5 }
 0x65a   : > { %v5630_v42 = vmax.f32 %v5598_v11, 0.0  ;;  %v5606_v27 = vadd.f32 %v7372_v25, %v5574_v53  ;;  %v5434_v62 = vpop.f32.mrb[44].mxu1 }
 0x65b   : > { %5661 = vst [vmem:[%s8373_s30 + $0x30] sm:$0xff] %v5629_v13  ;;  %v5637_v0 = vmax.f32 %v5605_v38, 0.0  ;;  %v5507_v32 = vmul.f32 %v5472_v28, %v5434_v62  ;;  %v5436_v12 = vpop.f32.mrb[45].mxu1 }
 0x65c   : > { %5662 = vst [vmem:[%s8373_s30 + $0x38] sm:$0xff] %v5630_v42  ;;  %v5638_v14 = vmax.f32 %v5606_v27, 0.0  ;;  %v5508_v60 = vmul.f32 %v5476_v6, %v5436_v12  ;;  %v5438_v17 = vpop.f32.mrb[46].mxu1 }
 0x65d   : > { %5669 = vst [vmem:[%s8373_s30 + $0x70] sm:$0xff] %v5637_v0  ;;  %v5581_v1 = vadd.f32 %v5546_v3, %v5507_v32  ;;  %v5515_v20 = vmul.f32 %v5472_v28, %v5438_v17  ;;  %v5440_v22 = vpop.f32.mrb[47].mxu1 }
 0x65e   : > { %5670 = vst [vmem:[%s8373_s30 + $0x78] sm:$0xff] %v5638_v14  ;;  %v5582_v36 = vadd.f32 %v5550_v40, %v5508_v60  ;;  %v5516_v2 = vmul.f32 %v5476_v6, %v5440_v22 }
 0x65f   : > { %v5613_v48 = vadd.f32 %v7373_v23, %v5581_v1  ;;  %v5589_v19 = vadd.f32 %v5546_v3, %v5515_v20 }
 0x660   : > { %v5614_v46 = vadd.f32 %v7374_v45, %v5582_v36  ;;  %v5590_v47 = vadd.f32 %v5550_v40, %v5516_v2 }
 0x661   : > { %v5645_v16 = vmax.f32 %v5613_v48, 0.0  ;;  %v5621_v26 = vadd.f32 %v7375_v29, %v5589_v19 }
 0x662   : > { %v5646_v49 = vmax.f32 %v5614_v46, 0.0  ;;  %v5622_v55 = vadd.f32 %v7376_v4, %v5590_v47 }
 0x663   : > { %5677 = vst [vmem:[%s8373_s30 + $0xb0] sm:$0xff] %v5645_v16  ;;  %v5653_v30 = vmax.f32 %v5621_v26, 0.0 }
 0x664   : > { %5678 = vst [vmem:[%s8373_s30 + $0xb8] sm:$0xff] %v5646_v49  ;;  %v5654_v34 = vmax.f32 %v5622_v55, 0.0 }
 0x665   : > { %5685 = vst [vmem:[%s8373_s30 + $0xf0] sm:$0xff] %v5653_v30 }
 0x666   : > { %5686 = vst [vmem:[%s8373_s30 + $0xf8] sm:$0xff] %v5654_v34 }
 0x667   : > { %7560 = shalt.err (!%p7557_p8)
}
 0x668   : > { %s7561_s9 = scalar_lea.hbm %s8457_s21, 4096  ;;  %s7565_s23 = scalar_lea.hbm %s8549_s17, 8192 }
 0x669   : > { %p7562_p6 = scmp.ne.s32.totalorder %s8457_s21, %s7561_s9  ;;  %p7566_p3 = scmp.lt.u32.totalorder %s8457_s21, %s8549_s17 }
 0x66a   : > { %p7567_p5 = scmp.lt.u32.totalorder %s7565_s23, %s7561_s9  ;;  %p7569_p7 = scmp.lt.u32.totalorder %s7561_s9, %s8457_s21 }
 0x66b   : > { %p7563_p10 = pnand %p7562_p6, %p8550_p4 }
 0x66c   : > { %p7568_p9 = por %p7567_p5, %p7566_p3 }
 0x66d   : > { %p7564_p11 = pneg %p7563_p10 }
 0x66e   : > { %p7570_p12 = por %p7569_p7, %p7568_p9 }
 0x670   : > { %p7571_p1 = pnand %p7570_p12, %p7564_p11 }
 0x672   : > { %7574 = shalt.err (!%p7571_p1)
}
 0x673   : > { %s7643_s24 = smov 1024   ;;  %s7644_s12 = smov 64  }
 0x674   : > { %6587 = dma.vmem_to_hbm [thread:$0]  (%p8550_p4), %s8459_s20, 4096, %s8457_s21, %s5688_s19, %s7643_s24, %s7643_s24, %s7644_s12  }
 0x675 PF: > { %s5717_s26 = sand.u32 1, %s7613_s13   ;;  %p8551_p13 = scmp.ne.s32.totalorder %s8529_s29, 0 }
 0x676   : > { %p8552_p0 = scmp.ge.s32.totalorder %s7625_s16, 2  ;;  %s5718_s9 = scalar_lea.sflag [#allocation6], %s5717_s26 }
 0x678   : > { %p6610_p2 = pnand %p8552_p0, %p8551_p13 }
 0x67a   : > { %7608 = dma.done.wait (!%p6610_p2), %s5718_s9, 4096  }
 0x67b   : > { %7610 = vsyncadd (!%p6610_p2), %s5718_s9, 4294963200  ;;  %p26_p8 = scmp.ge.s32.totalorder %s7858_s18, 4   ;;  %s8553_s13 = smov %s7617_s14 }
 0x67c   : > { %s8554_s14 = smov %s7621_s15  ;;  %s8555_s15 = smov %s7870_s27 }
 0x67d   : > { %s8556_s16 = smov %s7858_s18  ;;  %28 = sbr.rel (!%p26_p8) target bundleno = 11 (0xb), region = 125 }
 0x684   :  { %5723 = vsyncpa [#allocation5], 1 }
 0x685   :  { %5725 = vsyncpa [#allocation5 + $0x1], 1 }
 0x686   :  { %5726 = vsyncpa [#allocation8], 1 }
 0x687   :  { %5727 = vsyncpa [#allocation11], 1 }
 0x688   :  { %5728 = vsyncpa [#allocation14], 1 }
 0x689   :  { %5729 = vsyncpa [#allocation6], 1 }
 0x68a   :  { %5731 = vsyncpa [#allocation6 + $0x1], 1 }

</bundles_post_ra>
